<compile_context>
chip_gen: v7x
topology: tpu7x:2x2x1
jax: 0.10.0
libtpu: 0.0.40
codegen_flags: <defaults>
</compile_context>

<pallas_src>
import functools

import jax
import jax.numpy as jnp
from jax.experimental import pallas as pl
from jax.experimental.pallas import tpu as pltpu


# ----------------------------------------------------------------------------
# Fused whole-network kernel (one grid step = BLOCK_B batch elements)
# ----------------------------------------------------------------------------
def _net_kernel(bt, x_ref, m1_ref, b1_ref, m2_ref, b2_ref,
                w3_ref, b3_ref, w4_ref, b4_ref, w5_ref, b5_ref, o_ref):
    f32 = jnp.float32
    bf16 = jnp.bfloat16

    # -------- conv1 (5x5, 1->32) + bias + ReLU + 2x2 maxpool --------
    # x_ref: [1, 8, 6*bt, 28]; x_ref[0, base, t*bt + b, :] == input row (4*t + base)
    # of example b.  Group (pi, e): accumulator row t*bt+b == conv row 4*t + 2*e + pi.
    def conv1_acc(pi, e):
        acc = None
        for dy in range(5):
            base = 2 * e + pi + dy                       # 0..7
            lhs = x_ref[0, base, :, :]                   # [6*bt, 28] bf16, no reshape
            d = jnp.dot(lhs, m1_ref[dy], preferred_element_type=f32)
            acc = d if acc is None else acc + d
        return acc                                       # [6*bt, 768] f32

    b1 = b1_ref[...]                                     # [1, 768] f32

    def conv1_group(e):
        y0 = jnp.maximum(conv1_acc(0, e) + b1, 0.0)      # conv rows 4t+2e
        y1 = jnp.maximum(conv1_acc(1, e) + b1, 0.0)      # conv rows 4t+2e+1
        p = jnp.maximum(y0, y1)                          # max over pool-row parity
        return jnp.maximum(p[:, :384], p[:, 384:])       # max over pool-col parity

    a1_e = conv1_group(0)    # [6*bt, 384] f32: row t*bt+b = pooled1 row 2t   ; cols jj*32+ci
    a1_o = conv1_group(1)    # [6*bt, 384] f32: row t*bt+b = pooled1 row 2t+1

    # -------- conv2 (5x5, 32->64) + bias + ReLU + 2x2 maxpool --------
    b2 = b2_ref[...]                                     # [1, 512] f32

    def conv2_acc(pi):
        acc = None
        for dy in range(5):
            base = pi + dy                               # 0..5
            src = a1_e if base % 2 == 0 else a1_o
            m = base // 2
            lhs = src[m * bt:(m + 4) * bt, :].astype(bf16)   # [4*bt, 384]
            d = jnp.dot(lhs, m2_ref[dy], preferred_element_type=f32)
            acc = d if acc is None else acc + d
        return acc                                       # [4*bt, 512] f32

    z0 = jnp.maximum(conv2_acc(0) + b2, 0.0)
    z1 = jnp.maximum(conv2_acc(1) + b2, 0.0)
    p2 = jnp.maximum(z0, z1)                             # max over pool-row parity
    a2 = jnp.maximum(p2[:, :256], p2[:, 256:])           # [4*bt, 256]; row t2*bt+b, col jj*64+co

    # -------- flatten + fc1 + ReLU --------
    # torch.flatten's (C,H,W) ordering is folded into w3's row permutation, so
    # fc1 is a sum over the 4 pooled rows of a2 (no in-kernel reshape).
    hacc = None
    for t in range(4):
        lhs = a2[t * bt:(t + 1) * bt, :].astype(bf16)    # [bt, 256]
        d = jnp.dot(lhs, w3_ref[t * 256:(t + 1) * 256, :],
                    preferred_element_type=f32)
        hacc = d if hacc is None else hacc + d
    h = jnp.maximum(hacc + b3_ref[...], 0.0).astype(bf16)        # [bt, 1024]

    # -------- fc2 + ReLU --------
    h2 = jnp.maximum(jnp.dot(h, w4_ref[...], preferred_element_type=f32)
                     + b4_ref[...], 0.0).astype(bf16)            # [bt, 256]

    # TODO(synk): nn.Dropout(p=1) uses eval-mode (identity) semantics here;
    # training-mode PyTorch would zero all activations before the output layer.

    # -------- output layer (N padded to 128 lanes, sliced to 10 outside) ----
    logits = jnp.dot(h2, w5_ref[...], preferred_element_type=f32) + b5_ref[...]
    o_ref[...] = logits.astype(o_ref.dtype)              # [bt, 128] full-lane store


# ----------------------------------------------------------------------------
# One-time parameter pre-transformation (banded conv mats, [K,N] fc, bf16)
# ----------------------------------------------------------------------------
def prepare_params(p):
    """Torch-layout params -> kernel layouts (bf16 matmul operands, f32 biases)."""
    f32, bf16 = jnp.float32, jnp.bfloat16

    # conv1 banded matrix: m1[dy][q, pj*384 + jj*32 + co] = w1[co,0,dy,q-(2jj+pj)]
    w1 = p["conv1_w"].astype(f32)                        # [32, 1, 5, 5]
    wk1 = jnp.transpose(w1[:, 0], (1, 2, 0))             # [dy, dx, co]
    m1 = jnp.zeros((5, 28, 2, 12, 32), f32)
    for pj in range(2):
        for jj in range(12):
            j = 2 * jj + pj
            m1 = m1.at[:, j:j + 5, pj, jj, :].set(wk1)
    m1 = m1.reshape(5, 28, 768).astype(bf16)
    b1 = jnp.tile(p["conv1_b"].astype(f32), 24).reshape(1, 768)

    # conv2 banded matrix: m2[dy][wi*32+ci, pj*256 + jj*64 + co]
    w2 = p["conv2_w"].astype(f32)                        # [64, 32, 5, 5]
    wk2 = jnp.transpose(w2, (2, 3, 1, 0))                # [dy, dx, ci, co]
    m2 = jnp.zeros((5, 12, 32, 2, 4, 64), f32)
    for pj in range(2):
        for jj in range(4):
            j = 2 * jj + pj
            m2 = m2.at[:, j:j + 5, :, pj, jj, :].set(wk2)
    m2 = m2.reshape(5, 384, 512).astype(bf16)
    b2 = jnp.tile(p["conv2_b"].astype(f32), 8).reshape(1, 512)

    # fc1: stored [in, out]; rows permuted from torch (C,H,W) flatten order to
    # the kernel's (H, W, C) activation order.
    w3 = p["fc1_w"].astype(f32).T.reshape(64, 4, 4, 1024)        # [c, h, w, out]
    w3 = jnp.transpose(w3, (1, 2, 0, 3)).reshape(1024, 1024).astype(bf16)
    b3 = p["fc1_b"].astype(f32).reshape(1, 1024)

    w4 = p["fc2_w"].astype(f32).T.astype(bf16)           # [1024, 256]
    b4 = p["fc2_b"].astype(f32).reshape(1, 256)

    # output layer padded 10 -> 128 lanes (lane-dense final matmul + store)
    w5 = jnp.pad(p["out_w"].astype(f32).T, ((0, 0), (0, 118))).astype(bf16)  # [256,128]
    b5 = jnp.pad(p["out_b"].astype(f32), (0, 118)).reshape(1, 128)

    return dict(m1=m1, b1=b1, m2=m2, b2=b2,
                fc1_w=w3, fc1_b=b3, fc2_w=w4, fc2_b=b4, out_w=w5, out_b=b5)


# ----------------------------------------------------------------------------
# Forward pass: one pallas_call for the whole network, batch-tiled grid
# ----------------------------------------------------------------------------
def _const_spec(arr):
    n = arr.ndim
    return pl.BlockSpec(arr.shape, lambda g: (0,) * n)


def net_forward(prepped, x_nchw, block_b=64):
    B = x_nchw.shape[0]
    assert x_nchw.shape[1:] == (1, 28, 28), x_nchw.shape
    assert block_b % 8 == 0 and block_b >= 8, "block_b must be a multiple of 8"

    bt = block_b
    g = pl.cdiv(B, bt)                         # number of grid steps
    b_pad = g * bt

    x = x_nchw.astype(jnp.float32).reshape(B, 28, 28)
    if b_pad != B:
        x = jnp.pad(x, ((0, b_pad - B), (0, 0), (0, 0)))

    # Pre-stack the shifted conv1 row-slices, batch-minor:
    #   xs[blk, base, t*bt + b, :] == input row (4*t + base) of example blk*bt + b
    rows = 4 * jnp.arange(6)[None, :] + jnp.arange(8)[:, None]      # [8, 6]
    xs = x[:, rows, :]                                              # [b_pad, 8, 6, 28]
    xs = xs.reshape(g, bt, 8, 6, 28).transpose(0, 2, 3, 1, 4)       # [g, 8, 6, bt, 28]
    xs = xs.reshape(g, 8, 6 * bt, 28).astype(jnp.bfloat16)

    m1, b1 = prepped["m1"], prepped["b1"]
    m2, b2 = prepped["m2"], prepped["b2"]
    w3, b3 = prepped["fc1_w"], prepped["fc1_b"]
    w4, b4 = prepped["fc2_w"], prepped["fc2_b"]
    w5, b5 = prepped["out_w"], prepped["out_b"]

    out = pl.pallas_call(
        functools.partial(_net_kernel, bt),
        out_shape=jax.ShapeDtypeStruct((b_pad, 128), jnp.float32),
        grid=(g,),
        in_specs=[
            pl.BlockSpec((1, 8, 6 * bt, 28), lambda i: (i, 0, 0, 0)),
            _const_spec(m1), _const_spec(b1),
            _const_spec(m2), _const_spec(b2),
            _const_spec(w3), _const_spec(b3),
            _const_spec(w4), _const_spec(b4),
            _const_spec(w5), _const_spec(b5),
        ],
        out_specs=pl.BlockSpec((bt, 128), lambda i: (i, 0)),
        compiler_params=pltpu.CompilerParams(
            dimension_semantics=("parallel",),
            vmem_limit_bytes=40 * 1024 * 1024,   # bf16 weights (~4.8MB x2) + tiles
        ),
    )(xs, m1, b1, m2, b2, w3, b3, w4, b4, w5, b5)
    return out[:B, :10]


# ----------------------------------------------------------------------------
# Parameters (deterministic synthetic init matching the module's shapes)
# ----------------------------------------------------------------------------
def init_params(key):
    ks = jax.random.split(key, 10)

    def torch_default(k, shape, fan_in):
        bound = 1.0 / jnp.sqrt(jnp.float32(fan_in))
        return jax.random.uniform(k, shape, jnp.float32, -bound, bound)

    # conv1: xavier_uniform_ on the weight (as in the module's __init__)
    fan_in1, fan_out1 = 1 * 5 * 5, 32 * 5 * 5
    g1 = jnp.sqrt(6.0 / (fan_in1 + fan_out1))
    return {
        "conv1_w": jax.random.uniform(ks[0], (32, 1, 5, 5), jnp.float32, -g1, g1),
        "conv1_b": torch_default(ks[1], (32,), fan_in1),
        "conv2_w": torch_default(ks[2], (64, 32, 5, 5), 32 * 5 * 5),
        "conv2_b": torch_default(ks[3], (64,), 32 * 5 * 5),
        "fc1_w": torch_default(ks[4], (1024, 64 * 4 * 4), 64 * 4 * 4),  # [out, in]
        "fc1_b": torch_default(ks[5], (1024,), 64 * 4 * 4),
        "fc2_w": torch_default(ks[6], (256, 1024), 1024),
        "fc2_b": torch_default(ks[7], (256,), 1024),
        "out_w": torch_default(ks[8], (10, 256), 256),
        "out_b": torch_default(ks[9], (10,), 256),
    }


# ----------------------------------------------------------------------------
# Plain-JAX reference of Net.forward (eval mode) for validation
# ----------------------------------------------------------------------------
def net_reference(p, x_nchw):
    hi = jax.lax.Precision.HIGHEST

    def conv(x, w, b):
        y = jax.lax.conv_general_dilated(
            x, w, window_strides=(1, 1), padding="VALID",
            dimension_numbers=("NCHW", "OIHW", "NCHW"), precision=hi)
        return jax.nn.relu(y + b[None, :, None, None])

    def pool(x):
        B, C, H, W = x.shape
        return x.reshape(B, C, H // 2, 2, W // 2, 2).max(axis=(3, 5))

    x = x_nchw.astype(jnp.float32)
    x = pool(conv(x, p["conv1_w"], p["conv1_b"]))
    x = pool(conv(x, p["conv2_w"], p["conv2_b"]))
    x = x.reshape(x.shape[0], -1)
    x = jax.nn.relu(jnp.dot(x, p["fc1_w"].T, precision=hi) + p["fc1_b"])
    x = jax.nn.relu(jnp.dot(x, p["fc2_w"].T, precision=hi) + p["fc2_b"])
    return jnp.dot(x, p["out_w"].T, precision=hi) + p["out_b"]


if __name__ == "__main__":
    key = jax.random.PRNGKey(0)
    pkey, xkey = jax.random.split(key)
    raw = init_params(pkey)
    prepped = prepare_params(raw)        # one-time weight pre-transformation

    # Small test: 16 Fashion-MNIST-sized examples, batch tile 8 -> grid of 2
    # (exercises multi-step pipeline + "parallel" batch axis).
    x = jax.random.normal(xkey, (16, 1, 28, 28), dtype=jnp.float32)

    fwd = jax.jit(net_forward, static_argnames=("block_b",))
    out = jax.block_until_ready(fwd(prepped, x, block_b=8))

    assert out.shape == (16, 10), out.shape
    assert jnp.all(jnp.isfinite(out)), "non-finite output"

    ref = jax.block_until_ready(net_reference(raw, x))
    max_err = float(jnp.max(jnp.abs(out - ref)))
    assert jnp.allclose(out, ref, rtol=5e-2, atol=2e-2), f"max abs err = {max_err}"

    print("KERNEL_OK")
</pallas_src>

<mosaic_0001>
module attributes {stable_mosaic.version = 11 : i64} {
  func.func @_net_kernel(%arg0: i32, %arg1: memref<1x8x48x28xbf16, #tpu.memory_space<vmem>>, %arg2: memref<5x28x768xbf16, #tpu.memory_space<vmem>>, %arg3: memref<1x768xf32, #tpu.memory_space<vmem>>, %arg4: memref<5x384x512xbf16, #tpu.memory_space<vmem>>, %arg5: memref<1x512xf32, #tpu.memory_space<vmem>>, %arg6: memref<1024x1024xbf16, #tpu.memory_space<vmem>>, %arg7: memref<1x1024xf32, #tpu.memory_space<vmem>>, %arg8: memref<1024x256xbf16, #tpu.memory_space<vmem>>, %arg9: memref<1x256xf32, #tpu.memory_space<vmem>>, %arg10: memref<256x128xbf16, #tpu.memory_space<vmem>>, %arg11: memref<1x128xf32, #tpu.memory_space<vmem>>, %arg12: memref<8x128xf32, #tpu.memory_space<vmem>>) attributes {dimension_semantics = [#tpu.dimension_semantics<parallel>], iteration_bounds = array<i64: 2>, scalar_prefetch = 0 : i64, scratch_operands = 0 : i64, tpu.core_type = #tpu.core_type<tc>, window_params = [{transform_indices = @transform_0, window_bounds = array<i64: 1, 8, 48, 28>}, {pipeline_mode = #tpu.pipeline_mode<synchronous>, transform_indices = @transform_1, window_bounds = array<i64: 5, 28, 768>}, {pipeline_mode = #tpu.pipeline_mode<synchronous>, transform_indices = @transform_2, window_bounds = array<i64: 1, 768>}, {pipeline_mode = #tpu.pipeline_mode<synchronous>, transform_indices = @transform_3, window_bounds = array<i64: 5, 384, 512>}, {pipeline_mode = #tpu.pipeline_mode<synchronous>, transform_indices = @transform_4, window_bounds = array<i64: 1, 512>}, {pipeline_mode = #tpu.pipeline_mode<synchronous>, transform_indices = @transform_5, window_bounds = array<i64: 1024, 1024>}, {pipeline_mode = #tpu.pipeline_mode<synchronous>, transform_indices = @transform_6, window_bounds = array<i64: 1, 1024>}, {pipeline_mode = #tpu.pipeline_mode<synchronous>, transform_indices = @transform_7, window_bounds = array<i64: 1024, 256>}, {pipeline_mode = #tpu.pipeline_mode<synchronous>, transform_indices = @transform_8, window_bounds = array<i64: 1, 256>}, {pipeline_mode = #tpu.pipeline_mode<synchronous>, transform_indices = @transform_9, window_bounds = array<i64: 256, 128>}, {pipeline_mode = #tpu.pipeline_mode<synchronous>, transform_indices = @transform_10, window_bounds = array<i64: 1, 128>}, {transform_indices = @transform_11, window_bounds = array<i64: 8, 128>}]} {
    %c0 = arith.constant 0 : index
    %c0_0 = arith.constant 0 : index
    %0 = vector.load %arg3[%c0, %c0_0] : memref<1x768xf32, #tpu.memory_space<vmem>>, vector<1x768xf32>
    %c0_1 = arith.constant 0 : index
    %c0_2 = arith.constant 0 : index
    %c0_3 = arith.constant 0 : index
    %c0_4 = arith.constant 0 : index
    %1 = vector.load %arg1[%c0_1, %c0_2, %c0_3, %c0_4] : memref<1x8x48x28xbf16, #tpu.memory_space<vmem>>, vector<1x1x48x28xbf16>
    %2 = vector.shape_cast %1 : vector<1x1x48x28xbf16> to vector<48x28xbf16>
    %c0_5 = arith.constant 0 : index
    %c0_6 = arith.constant 0 : index
    %c0_7 = arith.constant 0 : index
    %3 = vector.load %arg2[%c0_5, %c0_6, %c0_7] : memref<5x28x768xbf16, #tpu.memory_space<vmem>>, vector<1x28x768xbf16>
    %4 = vector.shape_cast %3 : vector<1x28x768xbf16> to vector<28x768xbf16>
    %cst = arith.constant dense<0.000000e+00> : vector<48x768xf32>
    %5 = tpu.matmul %2, %4, %cst {dimension_numbers = #tpu.dot_dimension_numbers<[1], [0], [0], [1], [0, 0, 1, 1], [], []>} : vector<48x28xbf16>, vector<28x768xbf16>, vector<48x768xf32> -> vector<48x768xf32>
    %c0_8 = arith.constant 0 : index
    %c1 = arith.constant 1 : index
    %c0_9 = arith.constant 0 : index
    %c0_10 = arith.constant 0 : index
    %6 = vector.load %arg1[%c0_8, %c1, %c0_9, %c0_10] : memref<1x8x48x28xbf16, #tpu.memory_space<vmem>>, vector<1x1x48x28xbf16>
    %7 = vector.shape_cast %6 : vector<1x1x48x28xbf16> to vector<48x28xbf16>
    %c1_11 = arith.constant 1 : index
    %c0_12 = arith.constant 0 : index
    %c0_13 = arith.constant 0 : index
    %8 = vector.load %arg2[%c1_11, %c0_12, %c0_13] : memref<5x28x768xbf16, #tpu.memory_space<vmem>>, vector<1x28x768xbf16>
    %9 = vector.shape_cast %8 : vector<1x28x768xbf16> to vector<28x768xbf16>
    %cst_14 = arith.constant dense<0.000000e+00> : vector<48x768xf32>
    %10 = tpu.matmul %7, %9, %cst_14 {dimension_numbers = #tpu.dot_dimension_numbers<[1], [0], [0], [1], [0, 0, 1, 1], [], []>} : vector<48x28xbf16>, vector<28x768xbf16>, vector<48x768xf32> -> vector<48x768xf32>
    %11 = arith.addf %5, %10 : vector<48x768xf32>
    %c0_15 = arith.constant 0 : index
    %c2 = arith.constant 2 : index
    %c0_16 = arith.constant 0 : index
    %c0_17 = arith.constant 0 : index
    %12 = vector.load %arg1[%c0_15, %c2, %c0_16, %c0_17] : memref<1x8x48x28xbf16, #tpu.memory_space<vmem>>, vector<1x1x48x28xbf16>
    %13 = vector.shape_cast %12 : vector<1x1x48x28xbf16> to vector<48x28xbf16>
    %c2_18 = arith.constant 2 : index
    %c0_19 = arith.constant 0 : index
    %c0_20 = arith.constant 0 : index
    %14 = vector.load %arg2[%c2_18, %c0_19, %c0_20] : memref<5x28x768xbf16, #tpu.memory_space<vmem>>, vector<1x28x768xbf16>
    %15 = vector.shape_cast %14 : vector<1x28x768xbf16> to vector<28x768xbf16>
    %cst_21 = arith.constant dense<0.000000e+00> : vector<48x768xf32>
    %16 = tpu.matmul %13, %15, %cst_21 {dimension_numbers = #tpu.dot_dimension_numbers<[1], [0], [0], [1], [0, 0, 1, 1], [], []>} : vector<48x28xbf16>, vector<28x768xbf16>, vector<48x768xf32> -> vector<48x768xf32>
    %17 = arith.addf %11, %16 : vector<48x768xf32>
    %c0_22 = arith.constant 0 : index
    %c3 = arith.constant 3 : index
    %c0_23 = arith.constant 0 : index
    %c0_24 = arith.constant 0 : index
    %18 = vector.load %arg1[%c0_22, %c3, %c0_23, %c0_24] : memref<1x8x48x28xbf16, #tpu.memory_space<vmem>>, vector<1x1x48x28xbf16>
    %19 = vector.shape_cast %18 : vector<1x1x48x28xbf16> to vector<48x28xbf16>
    %c3_25 = arith.constant 3 : index
    %c0_26 = arith.constant 0 : index
    %c0_27 = arith.constant 0 : index
    %20 = vector.load %arg2[%c3_25, %c0_26, %c0_27] : memref<5x28x768xbf16, #tpu.memory_space<vmem>>, vector<1x28x768xbf16>
    %21 = vector.shape_cast %20 : vector<1x28x768xbf16> to vector<28x768xbf16>
    %cst_28 = arith.constant dense<0.000000e+00> : vector<48x768xf32>
    %22 = tpu.matmul %19, %21, %cst_28 {dimension_numbers = #tpu.dot_dimension_numbers<[1], [0], [0], [1], [0, 0, 1, 1], [], []>} : vector<48x28xbf16>, vector<28x768xbf16>, vector<48x768xf32> -> vector<48x768xf32>
    %23 = arith.addf %17, %22 : vector<48x768xf32>
    %c0_29 = arith.constant 0 : index
    %c4 = arith.constant 4 : index
    %c0_30 = arith.constant 0 : index
    %c0_31 = arith.constant 0 : index
    %24 = vector.load %arg1[%c0_29, %c4, %c0_30, %c0_31] : memref<1x8x48x28xbf16, #tpu.memory_space<vmem>>, vector<1x1x48x28xbf16>
    %25 = vector.shape_cast %24 : vector<1x1x48x28xbf16> to vector<48x28xbf16>
    %c4_32 = arith.constant 4 : index
    %c0_33 = arith.constant 0 : index
    %c0_34 = arith.constant 0 : index
    %26 = vector.load %arg2[%c4_32, %c0_33, %c0_34] : memref<5x28x768xbf16, #tpu.memory_space<vmem>>, vector<1x28x768xbf16>
    %27 = vector.shape_cast %26 : vector<1x28x768xbf16> to vector<28x768xbf16>
    %cst_35 = arith.constant dense<0.000000e+00> : vector<48x768xf32>
    %28 = tpu.matmul %25, %27, %cst_35 {dimension_numbers = #tpu.dot_dimension_numbers<[1], [0], [0], [1], [0, 0, 1, 1], [], []>} : vector<48x28xbf16>, vector<28x768xbf16>, vector<48x768xf32> -> vector<48x768xf32>
    %29 = arith.addf %23, %28 : vector<48x768xf32>
    %30 = vector.broadcast %0 : vector<1x768xf32> to vector<48x768xf32>
    %31 = arith.addf %29, %30 : vector<48x768xf32>
    %cst_36 = arith.constant 0.000000e+00 : f32
    %32 = vector.broadcast %cst_36 : f32 to vector<48x768xf32>
    %33 = arith.maximumf %31, %32 : vector<48x768xf32>
    %c0_37 = arith.constant 0 : index
    %c1_38 = arith.constant 1 : index
    %c0_39 = arith.constant 0 : index
    %c0_40 = arith.constant 0 : index
    %34 = vector.load %arg1[%c0_37, %c1_38, %c0_39, %c0_40] : memref<1x8x48x28xbf16, #tpu.memory_space<vmem>>, vector<1x1x48x28xbf16>
    %35 = vector.shape_cast %34 : vector<1x1x48x28xbf16> to vector<48x28xbf16>
    %c0_41 = arith.constant 0 : index
    %c0_42 = arith.constant 0 : index
    %c0_43 = arith.constant 0 : index
    %36 = vector.load %arg2[%c0_41, %c0_42, %c0_43] : memref<5x28x768xbf16, #tpu.memory_space<vmem>>, vector<1x28x768xbf16>
    %37 = vector.shape_cast %36 : vector<1x28x768xbf16> to vector<28x768xbf16>
    %cst_44 = arith.constant dense<0.000000e+00> : vector<48x768xf32>
    %38 = tpu.matmul %35, %37, %cst_44 {dimension_numbers = #tpu.dot_dimension_numbers<[1], [0], [0], [1], [0, 0, 1, 1], [], []>} : vector<48x28xbf16>, vector<28x768xbf16>, vector<48x768xf32> -> vector<48x768xf32>
    %c0_45 = arith.constant 0 : index
    %c2_46 = arith.constant 2 : index
    %c0_47 = arith.constant 0 : index
    %c0_48 = arith.constant 0 : index
    %39 = vector.load %arg1[%c0_45, %c2_46, %c0_47, %c0_48] : memref<1x8x48x28xbf16, #tpu.memory_space<vmem>>, vector<1x1x48x28xbf16>
    %40 = vector.shape_cast %39 : vector<1x1x48x28xbf16> to vector<48x28xbf16>
    %c1_49 = arith.constant 1 : index
    %c0_50 = arith.constant 0 : index
    %c0_51 = arith.constant 0 : index
    %41 = vector.load %arg2[%c1_49, %c0_50, %c0_51] : memref<5x28x768xbf16, #tpu.memory_space<vmem>>, vector<1x28x768xbf16>
    %42 = vector.shape_cast %41 : vector<1x28x768xbf16> to vector<28x768xbf16>
    %cst_52 = arith.constant dense<0.000000e+00> : vector<48x768xf32>
    %43 = tpu.matmul %40, %42, %cst_52 {dimension_numbers = #tpu.dot_dimension_numbers<[1], [0], [0], [1], [0, 0, 1, 1], [], []>} : vector<48x28xbf16>, vector<28x768xbf16>, vector<48x768xf32> -> vector<48x768xf32>
    %44 = arith.addf %38, %43 : vector<48x768xf32>
    %c0_53 = arith.constant 0 : index
    %c3_54 = arith.constant 3 : index
    %c0_55 = arith.constant 0 : index
    %c0_56 = arith.constant 0 : index
    %45 = vector.load %arg1[%c0_53, %c3_54, %c0_55, %c0_56] : memref<1x8x48x28xbf16, #tpu.memory_space<vmem>>, vector<1x1x48x28xbf16>
    %46 = vector.shape_cast %45 : vector<1x1x48x28xbf16> to vector<48x28xbf16>
    %c2_57 = arith.constant 2 : index
    %c0_58 = arith.constant 0 : index
    %c0_59 = arith.constant 0 : index
    %47 = vector.load %arg2[%c2_57, %c0_58, %c0_59] : memref<5x28x768xbf16, #tpu.memory_space<vmem>>, vector<1x28x768xbf16>
    %48 = vector.shape_cast %47 : vector<1x28x768xbf16> to vector<28x768xbf16>
    %cst_60 = arith.constant dense<0.000000e+00> : vector<48x768xf32>
    %49 = tpu.matmul %46, %48, %cst_60 {dimension_numbers = #tpu.dot_dimension_numbers<[1], [0], [0], [1], [0, 0, 1, 1], [], []>} : vector<48x28xbf16>, vector<28x768xbf16>, vector<48x768xf32> -> vector<48x768xf32>
    %50 = arith.addf %44, %49 : vector<48x768xf32>
    %c0_61 = arith.constant 0 : index
    %c4_62 = arith.constant 4 : index
    %c0_63 = arith.constant 0 : index
    %c0_64 = arith.constant 0 : index
    %51 = vector.load %arg1[%c0_61, %c4_62, %c0_63, %c0_64] : memref<1x8x48x28xbf16, #tpu.memory_space<vmem>>, vector<1x1x48x28xbf16>
    %52 = vector.shape_cast %51 : vector<1x1x48x28xbf16> to vector<48x28xbf16>
    %c3_65 = arith.constant 3 : index
    %c0_66 = arith.constant 0 : index
    %c0_67 = arith.constant 0 : index
    %53 = vector.load %arg2[%c3_65, %c0_66, %c0_67] : memref<5x28x768xbf16, #tpu.memory_space<vmem>>, vector<1x28x768xbf16>
    %54 = vector.shape_cast %53 : vector<1x28x768xbf16> to vector<28x768xbf16>
    %cst_68 = arith.constant dense<0.000000e+00> : vector<48x768xf32>
    %55 = tpu.matmul %52, %54, %cst_68 {dimension_numbers = #tpu.dot_dimension_numbers<[1], [0], [0], [1], [0, 0, 1, 1], [], []>} : vector<48x28xbf16>, vector<28x768xbf16>, vector<48x768xf32> -> vector<48x768xf32>
    %56 = arith.addf %50, %55 : vector<48x768xf32>
    %c0_69 = arith.constant 0 : index
    %c5 = arith.constant 5 : index
    %c0_70 = arith.constant 0 : index
    %c0_71 = arith.constant 0 : index
    %57 = vector.load %arg1[%c0_69, %c5, %c0_70, %c0_71] : memref<1x8x48x28xbf16, #tpu.memory_space<vmem>>, vector<1x1x48x28xbf16>
    %58 = vector.shape_cast %57 : vector<1x1x48x28xbf16> to vector<48x28xbf16>
    %c4_72 = arith.constant 4 : index
    %c0_73 = arith.constant 0 : index
    %c0_74 = arith.constant 0 : index
    %59 = vector.load %arg2[%c4_72, %c0_73, %c0_74] : memref<5x28x768xbf16, #tpu.memory_space<vmem>>, vector<1x28x768xbf16>
    %60 = vector.shape_cast %59 : vector<1x28x768xbf16> to vector<28x768xbf16>
    %cst_75 = arith.constant dense<0.000000e+00> : vector<48x768xf32>
    %61 = tpu.matmul %58, %60, %cst_75 {dimension_numbers = #tpu.dot_dimension_numbers<[1], [0], [0], [1], [0, 0, 1, 1], [], []>} : vector<48x28xbf16>, vector<28x768xbf16>, vector<48x768xf32> -> vector<48x768xf32>
    %62 = arith.addf %56, %61 : vector<48x768xf32>
    %63 = vector.broadcast %0 : vector<1x768xf32> to vector<48x768xf32>
    %64 = arith.addf %62, %63 : vector<48x768xf32>
    %cst_76 = arith.constant 0.000000e+00 : f32
    %65 = vector.broadcast %cst_76 : f32 to vector<48x768xf32>
    %66 = arith.maximumf %64, %65 : vector<48x768xf32>
    %67 = arith.maximumf %33, %66 : vector<48x768xf32>
    %68 = vector.extract_strided_slice %67 {offsets = [0, 0], sizes = [48, 384], strides = [1, 1]} : vector<48x768xf32> to vector<48x384xf32>
    %69 = vector.extract_strided_slice %67 {offsets = [0, 384], sizes = [48, 384], strides = [1, 1]} : vector<48x768xf32> to vector<48x384xf32>
    %70 = arith.maximumf %68, %69 : vector<48x384xf32>
    %c0_77 = arith.constant 0 : index
    %c2_78 = arith.constant 2 : index
    %c0_79 = arith.constant 0 : index
    %c0_80 = arith.constant 0 : index
    %71 = vector.load %arg1[%c0_77, %c2_78, %c0_79, %c0_80] : memref<1x8x48x28xbf16, #tpu.memory_space<vmem>>, vector<1x1x48x28xbf16>
    %72 = vector.shape_cast %71 : vector<1x1x48x28xbf16> to vector<48x28xbf16>
    %c0_81 = arith.constant 0 : index
    %c0_82 = arith.constant 0 : index
    %c0_83 = arith.constant 0 : index
    %73 = vector.load %arg2[%c0_81, %c0_82, %c0_83] : memref<5x28x768xbf16, #tpu.memory_space<vmem>>, vector<1x28x768xbf16>
    %74 = vector.shape_cast %73 : vector<1x28x768xbf16> to vector<28x768xbf16>
    %cst_84 = arith.constant dense<0.000000e+00> : vector<48x768xf32>
    %75 = tpu.matmul %72, %74, %cst_84 {dimension_numbers = #tpu.dot_dimension_numbers<[1], [0], [0], [1], [0, 0, 1, 1], [], []>} : vector<48x28xbf16>, vector<28x768xbf16>, vector<48x768xf32> -> vector<48x768xf32>
    %c0_85 = arith.constant 0 : index
    %c3_86 = arith.constant 3 : index
    %c0_87 = arith.constant 0 : index
    %c0_88 = arith.constant 0 : index
    %76 = vector.load %arg1[%c0_85, %c3_86, %c0_87, %c0_88] : memref<1x8x48x28xbf16, #tpu.memory_space<vmem>>, vector<1x1x48x28xbf16>
    %77 = vector.shape_cast %76 : vector<1x1x48x28xbf16> to vector<48x28xbf16>
    %c1_89 = arith.constant 1 : index
    %c0_90 = arith.constant 0 : index
    %c0_91 = arith.constant 0 : index
    %78 = vector.load %arg2[%c1_89, %c0_90, %c0_91] : memref<5x28x768xbf16, #tpu.memory_space<vmem>>, vector<1x28x768xbf16>
    %79 = vector.shape_cast %78 : vector<1x28x768xbf16> to vector<28x768xbf16>
    %cst_92 = arith.constant dense<0.000000e+00> : vector<48x768xf32>
    %80 = tpu.matmul %77, %79, %cst_92 {dimension_numbers = #tpu.dot_dimension_numbers<[1], [0], [0], [1], [0, 0, 1, 1], [], []>} : vector<48x28xbf16>, vector<28x768xbf16>, vector<48x768xf32> -> vector<48x768xf32>
    %81 = arith.addf %75, %80 : vector<48x768xf32>
    %c0_93 = arith.constant 0 : index
    %c4_94 = arith.constant 4 : index
    %c0_95 = arith.constant 0 : index
    %c0_96 = arith.constant 0 : index
    %82 = vector.load %arg1[%c0_93, %c4_94, %c0_95, %c0_96] : memref<1x8x48x28xbf16, #tpu.memory_space<vmem>>, vector<1x1x48x28xbf16>
    %83 = vector.shape_cast %82 : vector<1x1x48x28xbf16> to vector<48x28xbf16>
    %c2_97 = arith.constant 2 : index
    %c0_98 = arith.constant 0 : index
    %c0_99 = arith.constant 0 : index
    %84 = vector.load %arg2[%c2_97, %c0_98, %c0_99] : memref<5x28x768xbf16, #tpu.memory_space<vmem>>, vector<1x28x768xbf16>
    %85 = vector.shape_cast %84 : vector<1x28x768xbf16> to vector<28x768xbf16>
    %cst_100 = arith.constant dense<0.000000e+00> : vector<48x768xf32>
    %86 = tpu.matmul %83, %85, %cst_100 {dimension_numbers = #tpu.dot_dimension_numbers<[1], [0], [0], [1], [0, 0, 1, 1], [], []>} : vector<48x28xbf16>, vector<28x768xbf16>, vector<48x768xf32> -> vector<48x768xf32>
    %87 = arith.addf %81, %86 : vector<48x768xf32>
    %c0_101 = arith.constant 0 : index
    %c5_102 = arith.constant 5 : index
    %c0_103 = arith.constant 0 : index
    %c0_104 = arith.constant 0 : index
    %88 = vector.load %arg1[%c0_101, %c5_102, %c0_103, %c0_104] : memref<1x8x48x28xbf16, #tpu.memory_space<vmem>>, vector<1x1x48x28xbf16>
    %89 = vector.shape_cast %88 : vector<1x1x48x28xbf16> to vector<48x28xbf16>
    %c3_105 = arith.constant 3 : index
    %c0_106 = arith.constant 0 : index
    %c0_107 = arith.constant 0 : index
    %90 = vector.load %arg2[%c3_105, %c0_106, %c0_107] : memref<5x28x768xbf16, #tpu.memory_space<vmem>>, vector<1x28x768xbf16>
    %91 = vector.shape_cast %90 : vector<1x28x768xbf16> to vector<28x768xbf16>
    %cst_108 = arith.constant dense<0.000000e+00> : vector<48x768xf32>
    %92 = tpu.matmul %89, %91, %cst_108 {dimension_numbers = #tpu.dot_dimension_numbers<[1], [0], [0], [1], [0, 0, 1, 1], [], []>} : vector<48x28xbf16>, vector<28x768xbf16>, vector<48x768xf32> -> vector<48x768xf32>
    %93 = arith.addf %87, %92 : vector<48x768xf32>
    %c0_109 = arith.constant 0 : index
    %c6 = arith.constant 6 : index
    %c0_110 = arith.constant 0 : index
    %c0_111 = arith.constant 0 : index
    %94 = vector.load %arg1[%c0_109, %c6, %c0_110, %c0_111] : memref<1x8x48x28xbf16, #tpu.memory_space<vmem>>, vector<1x1x48x28xbf16>
    %95 = vector.shape_cast %94 : vector<1x1x48x28xbf16> to vector<48x28xbf16>
    %c4_112 = arith.constant 4 : index
    %c0_113 = arith.constant 0 : index
    %c0_114 = arith.constant 0 : index
    %96 = vector.load %arg2[%c4_112, %c0_113, %c0_114] : memref<5x28x768xbf16, #tpu.memory_space<vmem>>, vector<1x28x768xbf16>
    %97 = vector.shape_cast %96 : vector<1x28x768xbf16> to vector<28x768xbf16>
    %cst_115 = arith.constant dense<0.000000e+00> : vector<48x768xf32>
    %98 = tpu.matmul %95, %97, %cst_115 {dimension_numbers = #tpu.dot_dimension_numbers<[1], [0], [0], [1], [0, 0, 1, 1], [], []>} : vector<48x28xbf16>, vector<28x768xbf16>, vector<48x768xf32> -> vector<48x768xf32>
    %99 = arith.addf %93, %98 : vector<48x768xf32>
    %100 = vector.broadcast %0 : vector<1x768xf32> to vector<48x768xf32>
    %101 = arith.addf %99, %100 : vector<48x768xf32>
    %cst_116 = arith.constant 0.000000e+00 : f32
    %102 = vector.broadcast %cst_116 : f32 to vector<48x768xf32>
    %103 = arith.maximumf %101, %102 : vector<48x768xf32>
    %c0_117 = arith.constant 0 : index
    %c3_118 = arith.constant 3 : index
    %c0_119 = arith.constant 0 : index
    %c0_120 = arith.constant 0 : index
    %104 = vector.load %arg1[%c0_117, %c3_118, %c0_119, %c0_120] : memref<1x8x48x28xbf16, #tpu.memory_space<vmem>>, vector<1x1x48x28xbf16>
    %105 = vector.shape_cast %104 : vector<1x1x48x28xbf16> to vector<48x28xbf16>
    %c0_121 = arith.constant 0 : index
    %c0_122 = arith.constant 0 : index
    %c0_123 = arith.constant 0 : index
    %106 = vector.load %arg2[%c0_121, %c0_122, %c0_123] : memref<5x28x768xbf16, #tpu.memory_space<vmem>>, vector<1x28x768xbf16>
    %107 = vector.shape_cast %106 : vector<1x28x768xbf16> to vector<28x768xbf16>
    %cst_124 = arith.constant dense<0.000000e+00> : vector<48x768xf32>
    %108 = tpu.matmul %105, %107, %cst_124 {dimension_numbers = #tpu.dot_dimension_numbers<[1], [0], [0], [1], [0, 0, 1, 1], [], []>} : vector<48x28xbf16>, vector<28x768xbf16>, vector<48x768xf32> -> vector<48x768xf32>
    %c0_125 = arith.constant 0 : index
    %c4_126 = arith.constant 4 : index
    %c0_127 = arith.constant 0 : index
    %c0_128 = arith.constant 0 : index
    %109 = vector.load %arg1[%c0_125, %c4_126, %c0_127, %c0_128] : memref<1x8x48x28xbf16, #tpu.memory_space<vmem>>, vector<1x1x48x28xbf16>
    %110 = vector.shape_cast %109 : vector<1x1x48x28xbf16> to vector<48x28xbf16>
    %c1_129 = arith.constant 1 : index
    %c0_130 = arith.constant 0 : index
    %c0_131 = arith.constant 0 : index
    %111 = vector.load %arg2[%c1_129, %c0_130, %c0_131] : memref<5x28x768xbf16, #tpu.memory_space<vmem>>, vector<1x28x768xbf16>
    %112 = vector.shape_cast %111 : vector<1x28x768xbf16> to vector<28x768xbf16>
    %cst_132 = arith.constant dense<0.000000e+00> : vector<48x768xf32>
    %113 = tpu.matmul %110, %112, %cst_132 {dimension_numbers = #tpu.dot_dimension_numbers<[1], [0], [0], [1], [0, 0, 1, 1], [], []>} : vector<48x28xbf16>, vector<28x768xbf16>, vector<48x768xf32> -> vector<48x768xf32>
    %114 = arith.addf %108, %113 : vector<48x768xf32>
    %c0_133 = arith.constant 0 : index
    %c5_134 = arith.constant 5 : index
    %c0_135 = arith.constant 0 : index
    %c0_136 = arith.constant 0 : index
    %115 = vector.load %arg1[%c0_133, %c5_134, %c0_135, %c0_136] : memref<1x8x48x28xbf16, #tpu.memory_space<vmem>>, vector<1x1x48x28xbf16>
    %116 = vector.shape_cast %115 : vector<1x1x48x28xbf16> to vector<48x28xbf16>
    %c2_137 = arith.constant 2 : index
    %c0_138 = arith.constant 0 : index
    %c0_139 = arith.constant 0 : index
    %117 = vector.load %arg2[%c2_137, %c0_138, %c0_139] : memref<5x28x768xbf16, #tpu.memory_space<vmem>>, vector<1x28x768xbf16>
    %118 = vector.shape_cast %117 : vector<1x28x768xbf16> to vector<28x768xbf16>
    %cst_140 = arith.constant dense<0.000000e+00> : vector<48x768xf32>
    %119 = tpu.matmul %116, %118, %cst_140 {dimension_numbers = #tpu.dot_dimension_numbers<[1], [0], [0], [1], [0, 0, 1, 1], [], []>} : vector<48x28xbf16>, vector<28x768xbf16>, vector<48x768xf32> -> vector<48x768xf32>
    %120 = arith.addf %114, %119 : vector<48x768xf32>
    %c0_141 = arith.constant 0 : index
    %c6_142 = arith.constant 6 : index
    %c0_143 = arith.constant 0 : index
    %c0_144 = arith.constant 0 : index
    %121 = vector.load %arg1[%c0_141, %c6_142, %c0_143, %c0_144] : memref<1x8x48x28xbf16, #tpu.memory_space<vmem>>, vector<1x1x48x28xbf16>
    %122 = vector.shape_cast %121 : vector<1x1x48x28xbf16> to vector<48x28xbf16>
    %c3_145 = arith.constant 3 : index
    %c0_146 = arith.constant 0 : index
    %c0_147 = arith.constant 0 : index
    %123 = vector.load %arg2[%c3_145, %c0_146, %c0_147] : memref<5x28x768xbf16, #tpu.memory_space<vmem>>, vector<1x28x768xbf16>
    %124 = vector.shape_cast %123 : vector<1x28x768xbf16> to vector<28x768xbf16>
    %cst_148 = arith.constant dense<0.000000e+00> : vector<48x768xf32>
    %125 = tpu.matmul %122, %124, %cst_148 {dimension_numbers = #tpu.dot_dimension_numbers<[1], [0], [0], [1], [0, 0, 1, 1], [], []>} : vector<48x28xbf16>, vector<28x768xbf16>, vector<48x768xf32> -> vector<48x768xf32>
    %126 = arith.addf %120, %125 : vector<48x768xf32>
    %c0_149 = arith.constant 0 : index
    %c7 = arith.constant 7 : index
    %c0_150 = arith.constant 0 : index
    %c0_151 = arith.constant 0 : index
    %127 = vector.load %arg1[%c0_149, %c7, %c0_150, %c0_151] : memref<1x8x48x28xbf16, #tpu.memory_space<vmem>>, vector<1x1x48x28xbf16>
    %128 = vector.shape_cast %127 : vector<1x1x48x28xbf16> to vector<48x28xbf16>
    %c4_152 = arith.constant 4 : index
    %c0_153 = arith.constant 0 : index
    %c0_154 = arith.constant 0 : index
    %129 = vector.load %arg2[%c4_152, %c0_153, %c0_154] : memref<5x28x768xbf16, #tpu.memory_space<vmem>>, vector<1x28x768xbf16>
    %130 = vector.shape_cast %129 : vector<1x28x768xbf16> to vector<28x768xbf16>
    %cst_155 = arith.constant dense<0.000000e+00> : vector<48x768xf32>
    %131 = tpu.matmul %128, %130, %cst_155 {dimension_numbers = #tpu.dot_dimension_numbers<[1], [0], [0], [1], [0, 0, 1, 1], [], []>} : vector<48x28xbf16>, vector<28x768xbf16>, vector<48x768xf32> -> vector<48x768xf32>
    %132 = arith.addf %126, %131 : vector<48x768xf32>
    %133 = vector.broadcast %0 : vector<1x768xf32> to vector<48x768xf32>
    %134 = arith.addf %132, %133 : vector<48x768xf32>
    %cst_156 = arith.constant 0.000000e+00 : f32
    %135 = vector.broadcast %cst_156 : f32 to vector<48x768xf32>
    %136 = arith.maximumf %134, %135 : vector<48x768xf32>
    %137 = arith.maximumf %103, %136 : vector<48x768xf32>
    %138 = vector.extract_strided_slice %137 {offsets = [0, 0], sizes = [48, 384], strides = [1, 1]} : vector<48x768xf32> to vector<48x384xf32>
    %139 = vector.extract_strided_slice %137 {offsets = [0, 384], sizes = [48, 384], strides = [1, 1]} : vector<48x768xf32> to vector<48x384xf32>
    %140 = arith.maximumf %138, %139 : vector<48x384xf32>
    %c0_157 = arith.constant 0 : index
    %c0_158 = arith.constant 0 : index
    %141 = vector.load %arg5[%c0_157, %c0_158] : memref<1x512xf32, #tpu.memory_space<vmem>>, vector<1x512xf32>
    %142 = vector.extract_strided_slice %70 {offsets = [0, 0], sizes = [32, 384], strides = [1, 1]} : vector<48x384xf32> to vector<32x384xf32>
    %143 = arith.truncf %142 : vector<32x384xf32> to vector<32x384xbf16>
    %c0_159 = arith.constant 0 : index
    %c0_160 = arith.constant 0 : index
    %c0_161 = arith.constant 0 : index
    %144 = vector.load %arg4[%c0_159, %c0_160, %c0_161] : memref<5x384x512xbf16, #tpu.memory_space<vmem>>, vector<1x384x512xbf16>
    %145 = vector.shape_cast %144 : vector<1x384x512xbf16> to vector<384x512xbf16>
    %cst_162 = arith.constant dense<0.000000e+00> : vector<32x512xf32>
    %146 = tpu.matmul %143, %145, %cst_162 {dimension_numbers = #tpu.dot_dimension_numbers<[1], [0], [0], [1], [0, 0, 1, 1], [], []>} : vector<32x384xbf16>, vector<384x512xbf16>, vector<32x512xf32> -> vector<32x512xf32>
    %147 = vector.extract_strided_slice %140 {offsets = [0, 0], sizes = [32, 384], strides = [1, 1]} : vector<48x384xf32> to vector<32x384xf32>
    %148 = arith.truncf %147 : vector<32x384xf32> to vector<32x384xbf16>
    %c1_163 = arith.constant 1 : index
    %c0_164 = arith.constant 0 : index
    %c0_165 = arith.constant 0 : index
    %149 = vector.load %arg4[%c1_163, %c0_164, %c0_165] : memref<5x384x512xbf16, #tpu.memory_space<vmem>>, vector<1x384x512xbf16>
    %150 = vector.shape_cast %149 : vector<1x384x512xbf16> to vector<384x512xbf16>
    %cst_166 = arith.constant dense<0.000000e+00> : vector<32x512xf32>
    %151 = tpu.matmul %148, %150, %cst_166 {dimension_numbers = #tpu.dot_dimension_numbers<[1], [0], [0], [1], [0, 0, 1, 1], [], []>} : vector<32x384xbf16>, vector<384x512xbf16>, vector<32x512xf32> -> vector<32x512xf32>
    %152 = arith.addf %146, %151 : vector<32x512xf32>
    %153 = vector.extract_strided_slice %70 {offsets = [8, 0], sizes = [32, 384], strides = [1, 1]} : vector<48x384xf32> to vector<32x384xf32>
    %154 = arith.truncf %153 : vector<32x384xf32> to vector<32x384xbf16>
    %c2_167 = arith.constant 2 : index
    %c0_168 = arith.constant 0 : index
    %c0_169 = arith.constant 0 : index
    %155 = vector.load %arg4[%c2_167, %c0_168, %c0_169] : memref<5x384x512xbf16, #tpu.memory_space<vmem>>, vector<1x384x512xbf16>
    %156 = vector.shape_cast %155 : vector<1x384x512xbf16> to vector<384x512xbf16>
    %cst_170 = arith.constant dense<0.000000e+00> : vector<32x512xf32>
    %157 = tpu.matmul %154, %156, %cst_170 {dimension_numbers = #tpu.dot_dimension_numbers<[1], [0], [0], [1], [0, 0, 1, 1], [], []>} : vector<32x384xbf16>, vector<384x512xbf16>, vector<32x512xf32> -> vector<32x512xf32>
    %158 = arith.addf %152, %157 : vector<32x512xf32>
    %159 = vector.extract_strided_slice %140 {offsets = [8, 0], sizes = [32, 384], strides = [1, 1]} : vector<48x384xf32> to vector<32x384xf32>
    %160 = arith.truncf %159 : vector<32x384xf32> to vector<32x384xbf16>
    %c3_171 = arith.constant 3 : index
    %c0_172 = arith.constant 0 : index
    %c0_173 = arith.constant 0 : index
    %161 = vector.load %arg4[%c3_171, %c0_172, %c0_173] : memref<5x384x512xbf16, #tpu.memory_space<vmem>>, vector<1x384x512xbf16>
    %162 = vector.shape_cast %161 : vector<1x384x512xbf16> to vector<384x512xbf16>
    %cst_174 = arith.constant dense<0.000000e+00> : vector<32x512xf32>
    %163 = tpu.matmul %160, %162, %cst_174 {dimension_numbers = #tpu.dot_dimension_numbers<[1], [0], [0], [1], [0, 0, 1, 1], [], []>} : vector<32x384xbf16>, vector<384x512xbf16>, vector<32x512xf32> -> vector<32x512xf32>
    %164 = arith.addf %158, %163 : vector<32x512xf32>
    %165 = vector.extract_strided_slice %70 {offsets = [16, 0], sizes = [32, 384], strides = [1, 1]} : vector<48x384xf32> to vector<32x384xf32>
    %166 = arith.truncf %165 : vector<32x384xf32> to vector<32x384xbf16>
    %c4_175 = arith.constant 4 : index
    %c0_176 = arith.constant 0 : index
    %c0_177 = arith.constant 0 : index
    %167 = vector.load %arg4[%c4_175, %c0_176, %c0_177] : memref<5x384x512xbf16, #tpu.memory_space<vmem>>, vector<1x384x512xbf16>
    %168 = vector.shape_cast %167 : vector<1x384x512xbf16> to vector<384x512xbf16>
    %cst_178 = arith.constant dense<0.000000e+00> : vector<32x512xf32>
    %169 = tpu.matmul %166, %168, %cst_178 {dimension_numbers = #tpu.dot_dimension_numbers<[1], [0], [0], [1], [0, 0, 1, 1], [], []>} : vector<32x384xbf16>, vector<384x512xbf16>, vector<32x512xf32> -> vector<32x512xf32>
    %170 = arith.addf %164, %169 : vector<32x512xf32>
    %171 = vector.broadcast %141 : vector<1x512xf32> to vector<32x512xf32>
    %172 = arith.addf %170, %171 : vector<32x512xf32>
    %cst_179 = arith.constant 0.000000e+00 : f32
    %173 = vector.broadcast %cst_179 : f32 to vector<32x512xf32>
    %174 = arith.maximumf %172, %173 : vector<32x512xf32>
    %175 = vector.extract_strided_slice %140 {offsets = [0, 0], sizes = [32, 384], strides = [1, 1]} : vector<48x384xf32> to vector<32x384xf32>
    %176 = arith.truncf %175 : vector<32x384xf32> to vector<32x384xbf16>
    %c0_180 = arith.constant 0 : index
    %c0_181 = arith.constant 0 : index
    %c0_182 = arith.constant 0 : index
    %177 = vector.load %arg4[%c0_180, %c0_181, %c0_182] : memref<5x384x512xbf16, #tpu.memory_space<vmem>>, vector<1x384x512xbf16>
    %178 = vector.shape_cast %177 : vector<1x384x512xbf16> to vector<384x512xbf16>
    %cst_183 = arith.constant dense<0.000000e+00> : vector<32x512xf32>
    %179 = tpu.matmul %176, %178, %cst_183 {dimension_numbers = #tpu.dot_dimension_numbers<[1], [0], [0], [1], [0, 0, 1, 1], [], []>} : vector<32x384xbf16>, vector<384x512xbf16>, vector<32x512xf32> -> vector<32x512xf32>
    %180 = vector.extract_strided_slice %70 {offsets = [8, 0], sizes = [32, 384], strides = [1, 1]} : vector<48x384xf32> to vector<32x384xf32>
    %181 = arith.truncf %180 : vector<32x384xf32> to vector<32x384xbf16>
    %c1_184 = arith.constant 1 : index
    %c0_185 = arith.constant 0 : index
    %c0_186 = arith.constant 0 : index
    %182 = vector.load %arg4[%c1_184, %c0_185, %c0_186] : memref<5x384x512xbf16, #tpu.memory_space<vmem>>, vector<1x384x512xbf16>
    %183 = vector.shape_cast %182 : vector<1x384x512xbf16> to vector<384x512xbf16>
    %cst_187 = arith.constant dense<0.000000e+00> : vector<32x512xf32>
    %184 = tpu.matmul %181, %183, %cst_187 {dimension_numbers = #tpu.dot_dimension_numbers<[1], [0], [0], [1], [0, 0, 1, 1], [], []>} : vector<32x384xbf16>, vector<384x512xbf16>, vector<32x512xf32> -> vector<32x512xf32>
    %185 = arith.addf %179, %184 : vector<32x512xf32>
    %186 = vector.extract_strided_slice %140 {offsets = [8, 0], sizes = [32, 384], strides = [1, 1]} : vector<48x384xf32> to vector<32x384xf32>
    %187 = arith.truncf %186 : vector<32x384xf32> to vector<32x384xbf16>
    %c2_188 = arith.constant 2 : index
    %c0_189 = arith.constant 0 : index
    %c0_190 = arith.constant 0 : index
    %188 = vector.load %arg4[%c2_188, %c0_189, %c0_190] : memref<5x384x512xbf16, #tpu.memory_space<vmem>>, vector<1x384x512xbf16>
    %189 = vector.shape_cast %188 : vector<1x384x512xbf16> to vector<384x512xbf16>
    %cst_191 = arith.constant dense<0.000000e+00> : vector<32x512xf32>
    %190 = tpu.matmul %187, %189, %cst_191 {dimension_numbers = #tpu.dot_dimension_numbers<[1], [0], [0], [1], [0, 0, 1, 1], [], []>} : vector<32x384xbf16>, vector<384x512xbf16>, vector<32x512xf32> -> vector<32x512xf32>
    %191 = arith.addf %185, %190 : vector<32x512xf32>
    %192 = vector.extract_strided_slice %70 {offsets = [16, 0], sizes = [32, 384], strides = [1, 1]} : vector<48x384xf32> to vector<32x384xf32>
    %193 = arith.truncf %192 : vector<32x384xf32> to vector<32x384xbf16>
    %c3_192 = arith.constant 3 : index
    %c0_193 = arith.constant 0 : index
    %c0_194 = arith.constant 0 : index
    %194 = vector.load %arg4[%c3_192, %c0_193, %c0_194] : memref<5x384x512xbf16, #tpu.memory_space<vmem>>, vector<1x384x512xbf16>
    %195 = vector.shape_cast %194 : vector<1x384x512xbf16> to vector<384x512xbf16>
    %cst_195 = arith.constant dense<0.000000e+00> : vector<32x512xf32>
    %196 = tpu.matmul %193, %195, %cst_195 {dimension_numbers = #tpu.dot_dimension_numbers<[1], [0], [0], [1], [0, 0, 1, 1], [], []>} : vector<32x384xbf16>, vector<384x512xbf16>, vector<32x512xf32> -> vector<32x512xf32>
    %197 = arith.addf %191, %196 : vector<32x512xf32>
    %198 = vector.extract_strided_slice %140 {offsets = [16, 0], sizes = [32, 384], strides = [1, 1]} : vector<48x384xf32> to vector<32x384xf32>
    %199 = arith.truncf %198 : vector<32x384xf32> to vector<32x384xbf16>
    %c4_196 = arith.constant 4 : index
    %c0_197 = arith.constant 0 : index
    %c0_198 = arith.constant 0 : index
    %200 = vector.load %arg4[%c4_196, %c0_197, %c0_198] : memref<5x384x512xbf16, #tpu.memory_space<vmem>>, vector<1x384x512xbf16>
    %201 = vector.shape_cast %200 : vector<1x384x512xbf16> to vector<384x512xbf16>
    %cst_199 = arith.constant dense<0.000000e+00> : vector<32x512xf32>
    %202 = tpu.matmul %199, %201, %cst_199 {dimension_numbers = #tpu.dot_dimension_numbers<[1], [0], [0], [1], [0, 0, 1, 1], [], []>} : vector<32x384xbf16>, vector<384x512xbf16>, vector<32x512xf32> -> vector<32x512xf32>
    %203 = arith.addf %197, %202 : vector<32x512xf32>
    %204 = vector.broadcast %141 : vector<1x512xf32> to vector<32x512xf32>
    %205 = arith.addf %203, %204 : vector<32x512xf32>
    %cst_200 = arith.constant 0.000000e+00 : f32
    %206 = vector.broadcast %cst_200 : f32 to vector<32x512xf32>
    %207 = arith.maximumf %205, %206 : vector<32x512xf32>
    %208 = arith.maximumf %174, %207 : vector<32x512xf32>
    %209 = vector.extract_strided_slice %208 {offsets = [0, 0], sizes = [32, 256], strides = [1, 1]} : vector<32x512xf32> to vector<32x256xf32>
    %210 = vector.extract_strided_slice %208 {offsets = [0, 256], sizes = [32, 256], strides = [1, 1]} : vector<32x512xf32> to vector<32x256xf32>
    %211 = arith.maximumf %209, %210 : vector<32x256xf32>
    %212 = vector.extract_strided_slice %211 {offsets = [0, 0], sizes = [8, 256], strides = [1, 1]} : vector<32x256xf32> to vector<8x256xf32>
    %213 = arith.truncf %212 : vector<8x256xf32> to vector<8x256xbf16>
    %c0_201 = arith.constant 0 : index
    %c0_202 = arith.constant 0 : index
    %214 = vector.load %arg6[%c0_201, %c0_202] : memref<1024x1024xbf16, #tpu.memory_space<vmem>>, vector<256x1024xbf16>
    %cst_203 = arith.constant dense<0.000000e+00> : vector<8x1024xf32>
    %215 = tpu.matmul %213, %214, %cst_203 {dimension_numbers = #tpu.dot_dimension_numbers<[1], [0], [0], [1], [0, 0, 1, 1], [], []>} : vector<8x256xbf16>, vector<256x1024xbf16>, vector<8x1024xf32> -> vector<8x1024xf32>
    %216 = vector.extract_strided_slice %211 {offsets = [8, 0], sizes = [8, 256], strides = [1, 1]} : vector<32x256xf32> to vector<8x256xf32>
    %217 = arith.truncf %216 : vector<8x256xf32> to vector<8x256xbf16>
    %c256 = arith.constant 256 : index
    %c0_204 = arith.constant 0 : index
    %218 = vector.load %arg6[%c256, %c0_204] : memref<1024x1024xbf16, #tpu.memory_space<vmem>>, vector<256x1024xbf16>
    %cst_205 = arith.constant dense<0.000000e+00> : vector<8x1024xf32>
    %219 = tpu.matmul %217, %218, %cst_205 {dimension_numbers = #tpu.dot_dimension_numbers<[1], [0], [0], [1], [0, 0, 1, 1], [], []>} : vector<8x256xbf16>, vector<256x1024xbf16>, vector<8x1024xf32> -> vector<8x1024xf32>
    %220 = arith.addf %215, %219 : vector<8x1024xf32>
    %221 = vector.extract_strided_slice %211 {offsets = [16, 0], sizes = [8, 256], strides = [1, 1]} : vector<32x256xf32> to vector<8x256xf32>
    %222 = arith.truncf %221 : vector<8x256xf32> to vector<8x256xbf16>
    %c512 = arith.constant 512 : index
    %c0_206 = arith.constant 0 : index
    %223 = vector.load %arg6[%c512, %c0_206] : memref<1024x1024xbf16, #tpu.memory_space<vmem>>, vector<256x1024xbf16>
    %cst_207 = arith.constant dense<0.000000e+00> : vector<8x1024xf32>
    %224 = tpu.matmul %222, %223, %cst_207 {dimension_numbers = #tpu.dot_dimension_numbers<[1], [0], [0], [1], [0, 0, 1, 1], [], []>} : vector<8x256xbf16>, vector<256x1024xbf16>, vector<8x1024xf32> -> vector<8x1024xf32>
    %225 = arith.addf %220, %224 : vector<8x1024xf32>
    %226 = vector.extract_strided_slice %211 {offsets = [24, 0], sizes = [8, 256], strides = [1, 1]} : vector<32x256xf32> to vector<8x256xf32>
    %227 = arith.truncf %226 : vector<8x256xf32> to vector<8x256xbf16>
    %c768 = arith.constant 768 : index
    %c0_208 = arith.constant 0 : index
    %228 = vector.load %arg6[%c768, %c0_208] : memref<1024x1024xbf16, #tpu.memory_space<vmem>>, vector<256x1024xbf16>
    %cst_209 = arith.constant dense<0.000000e+00> : vector<8x1024xf32>
    %229 = tpu.matmul %227, %228, %cst_209 {dimension_numbers = #tpu.dot_dimension_numbers<[1], [0], [0], [1], [0, 0, 1, 1], [], []>} : vector<8x256xbf16>, vector<256x1024xbf16>, vector<8x1024xf32> -> vector<8x1024xf32>
    %230 = arith.addf %225, %229 : vector<8x1024xf32>
    %c0_210 = arith.constant 0 : index
    %c0_211 = arith.constant 0 : index
    %231 = vector.load %arg7[%c0_210, %c0_211] : memref<1x1024xf32, #tpu.memory_space<vmem>>, vector<1x1024xf32>
    %232 = vector.broadcast %231 : vector<1x1024xf32> to vector<8x1024xf32>
    %233 = arith.addf %230, %232 : vector<8x1024xf32>
    %cst_212 = arith.constant 0.000000e+00 : f32
    %234 = vector.broadcast %cst_212 : f32 to vector<8x1024xf32>
    %235 = arith.maximumf %233, %234 : vector<8x1024xf32>
    %236 = arith.truncf %235 : vector<8x1024xf32> to vector<8x1024xbf16>
    %c0_213 = arith.constant 0 : index
    %c0_214 = arith.constant 0 : index
    %237 = vector.load %arg8[%c0_213, %c0_214] : memref<1024x256xbf16, #tpu.memory_space<vmem>>, vector<1024x256xbf16>
    %cst_215 = arith.constant dense<0.000000e+00> : vector<8x256xf32>
    %238 = tpu.matmul %236, %237, %cst_215 {dimension_numbers = #tpu.dot_dimension_numbers<[1], [0], [0], [1], [0, 0, 1, 1], [], []>} : vector<8x1024xbf16>, vector<1024x256xbf16>, vector<8x256xf32> -> vector<8x256xf32>
    %c0_216 = arith.constant 0 : index
    %c0_217 = arith.constant 0 : index
    %239 = vector.load %arg9[%c0_216, %c0_217] : memref<1x256xf32, #tpu.memory_space<vmem>>, vector<1x256xf32>
    %240 = vector.broadcast %239 : vector<1x256xf32> to vector<8x256xf32>
    %241 = arith.addf %238, %240 : vector<8x256xf32>
    %cst_218 = arith.constant 0.000000e+00 : f32
    %242 = vector.broadcast %cst_218 : f32 to vector<8x256xf32>
    %243 = arith.maximumf %241, %242 : vector<8x256xf32>
    %244 = arith.truncf %243 : vector<8x256xf32> to vector<8x256xbf16>
    %c0_219 = arith.constant 0 : index
    %c0_220 = arith.constant 0 : index
    %245 = vector.load %arg10[%c0_219, %c0_220] : memref<256x128xbf16, #tpu.memory_space<vmem>>, vector<256x128xbf16>
    %cst_221 = arith.constant dense<0.000000e+00> : vector<8x128xf32>
    %246 = tpu.matmul %244, %245, %cst_221 {dimension_numbers = #tpu.dot_dimension_numbers<[1], [0], [0], [1], [0, 0, 1, 1], [], []>} : vector<8x256xbf16>, vector<256x128xbf16>, vector<8x128xf32> -> vector<8x128xf32>
    %c0_222 = arith.constant 0 : index
    %c0_223 = arith.constant 0 : index
    %247 = vector.load %arg11[%c0_222, %c0_223] : memref<1x128xf32, #tpu.memory_space<vmem>>, vector<1x128xf32>
    %248 = vector.broadcast %247 : vector<1x128xf32> to vector<8x128xf32>
    %249 = arith.addf %246, %248 : vector<8x128xf32>
    %c0_224 = arith.constant 0 : index
    %c0_225 = arith.constant 0 : index
    %250 = vector.load %arg12[%c0_224, %c0_225] : memref<8x128xf32, #tpu.memory_space<vmem>>, vector<8x128xf32>
    tpu.vector_store %arg12[%c0_224, %c0_225], %249 {strides = array<i32>} : memref<8x128xf32, #tpu.memory_space<vmem>>, vector<8x128xf32>,
    return
  }
  func.func @transform_0(%arg0: i32) -> (i32, i32, i32, i32) {
    %c0_i32 = arith.constant 0 : i32
    %c0_i32_0 = arith.constant 0 : i32
    %c0_i32_1 = arith.constant 0 : i32
    %c0_i32_2 = arith.constant 0 : i32
    return %arg0, %c0_i32, %c0_i32_0, %c0_i32_1 : i32, i32, i32, i32
  }
  func.func @transform_1(%arg0: i32) -> (i32, i32, i32) {
    %c0_i32 = arith.constant 0 : i32
    %c0_i32_0 = arith.constant 0 : i32
    %c0_i32_1 = arith.constant 0 : i32
    %c0_i32_2 = arith.constant 0 : i32
    return %c0_i32, %c0_i32_0, %c0_i32_1 : i32, i32, i32
  }
  func.func @transform_2(%arg0: i32) -> (i32, i32) {
    %c0_i32 = arith.constant 0 : i32
    %c0_i32_0 = arith.constant 0 : i32
    %c0_i32_1 = arith.constant 0 : i32
    return %c0_i32, %c0_i32_0 : i32, i32
  }
  func.func @transform_3(%arg0: i32) -> (i32, i32, i32) {
    %c0_i32 = arith.constant 0 : i32
    %c0_i32_0 = arith.constant 0 : i32
    %c0_i32_1 = arith.constant 0 : i32
    %c0_i32_2 = arith.constant 0 : i32
    return %c0_i32, %c0_i32_0, %c0_i32_1 : i32, i32, i32
  }
  func.func @transform_4(%arg0: i32) -> (i32, i32) {
    %c0_i32 = arith.constant 0 : i32
    %c0_i32_0 = arith.constant 0 : i32
    %c0_i32_1 = arith.constant 0 : i32
    return %c0_i32, %c0_i32_0 : i32, i32
  }
  func.func @transform_5(%arg0: i32) -> (i32, i32) {
    %c0_i32 = arith.constant 0 : i32
    %c0_i32_0 = arith.constant 0 : i32
    %c0_i32_1 = arith.constant 0 : i32
    return %c0_i32, %c0_i32_0 : i32, i32
  }
  func.func @transform_6(%arg0: i32) -> (i32, i32) {
    %c0_i32 = arith.constant 0 : i32
    %c0_i32_0 = arith.constant 0 : i32
    %c0_i32_1 = arith.constant 0 : i32
    return %c0_i32, %c0_i32_0 : i32, i32
  }
  func.func @transform_7(%arg0: i32) -> (i32, i32) {
    %c0_i32 = arith.constant 0 : i32
    %c0_i32_0 = arith.constant 0 : i32
    %c0_i32_1 = arith.constant 0 : i32
    return %c0_i32, %c0_i32_0 : i32, i32
  }
  func.func @transform_8(%arg0: i32) -> (i32, i32) {
    %c0_i32 = arith.constant 0 : i32
    %c0_i32_0 = arith.constant 0 : i32
    %c0_i32_1 = arith.constant 0 : i32
    return %c0_i32, %c0_i32_0 : i32, i32
  }
  func.func @transform_9(%arg0: i32) -> (i32, i32) {
    %c0_i32 = arith.constant 0 : i32
    %c0_i32_0 = arith.constant 0 : i32
    %c0_i32_1 = arith.constant 0 : i32
    return %c0_i32, %c0_i32_0 : i32, i32
  }
  func.func @transform_10(%arg0: i32) -> (i32, i32) {
    %c0_i32 = arith.constant 0 : i32
    %c0_i32_0 = arith.constant 0 : i32
    %c0_i32_1 = arith.constant 0 : i32
    return %c0_i32, %c0_i32_0 : i32, i32
  }
  func.func @transform_11(%arg0: i32) -> (i32, i32) {
    %c0_i32 = arith.constant 0 : i32
    %c0_i32_0 = arith.constant 0 : i32
    return %arg0, %c0_i32 : i32, i32
  }
}

</mosaic_0001>

<bundles_post_ra>
// kernel: net_forward.1
= control target key start
LH: loop header
LB: loop body
LE: loop exit
PB: predicated region body
PF: predicated region fallthrough
CT: control target
= control target key end

     0   :  { %s24269_s0 = inlined_call_operand.vmem [shape: bf16[2,8,48,28], index: 0, kind: input, shape index: {}]   ;;  %s24270_s1 = inlined_call_operand.hbm [shape: bf16[5,28,768], index: 1, kind: input, shape index: {}]   ;;  %s24271_s2 = inlined_call_operand.hbm [shape: f32[1,768], index: 2, kind: input, shape index: {}]   ;;  %s24272_s3 = inlined_call_operand.hbm [shape: bf16[5,384,512], index: 3, kind: input, shape index: {}]   ;;  %s24273_s4 = inlined_call_operand.hbm [shape: f32[1,512], index: 4, kind: input, shape index: {}]   ;;  %s24274_s5 = inlined_call_operand.hbm [shape: bf16[1024,1024], index: 5, kind: input, shape index: {}]   ;;  %s24275_s6 = inlined_call_operand.hbm [shape: f32[1,1024], index: 6, kind: input, shape index: {}]   ;;  %s24276_s7 = inlined_call_operand.hbm [shape: bf16[1024,256], index: 7, kind: input, shape index: {}]   ;;  %s24277_s8 = inlined_call_operand.hbm [shape: f32[1,256], index: 8, kind: input, shape index: {}]   ;;  %s24278_s9 = inlined_call_operand.hbm [shape: bf16[256,128], index: 9, kind: input, shape index: {}]   ;;  %s24279_s10 = inlined_call_operand.hbm [shape: f32[1,128], index: 10, kind: input, shape index: {}]   ;;  %s24280_s11 = inlined_call_operand.hbm [shape: f32[16,128], index: 11, kind: output, shape index: {}]  }
   0x1   :  { %24524 = sst [smem:[#allocation114_spill]] %s24271_s2 }
   0x2   :  { %24525 = sst [smem:[#allocation115_spill]] %s24273_s4 }
   0x3   :  { %16 = vsyncpa [#allocation3], 0 }
   0x4   :  { %17 = vsyncpa [#allocation6], 0 }
   0x5   :  { %18 = vsyncpa [#allocation9], 0 }
   0x6   :  { %19 = vsyncpa [#allocation12], 0 }
   0x7   :  { %20 = vsyncpa [#allocation15], 0 }
   0x8   :  { %21 = vsyncpa [#allocation18], 0 }
   0x9   :  { %22 = vsyncpa [#allocation4], 0 }
   0xa   :  { %24 = vsyncpa [#allocation4 + $0x1], 0  ;;  %s20472_s17 = smov 0   ;;  %s20474_s18 = smov 0  }
   0xb   :  { %s20476_s19 = smov 0   ;;  %s20478_s20 = smov 0  }
   0xc LB: > { %24526 = sst [smem:[#allocation27_spill]] %s20376_s17  ;;  %s20493_s21 = sadd.s32 4294967295, %s20388_s20   ;;  %s20388_s20 = sphi %s20478_s20, %s25001_s20   ;;  %s20384_s19 = sphi %s20476_s19, %s25003_s19   ;;  %s20380_s18 = sphi %s20474_s18, %s25005_s18   ;;  %s20376_s17 = sphi %s20472_s17, %s25004_s17  }
   0xd   : > { %24527 = sst [smem:[#allocation28_spill]] %s20384_s19  ;;  %s16188_s22 = sadd.s32 4294967294, %s20388_s20  }
   0xe   : > { %s20497_s23 = sadd.s32 1, %s20388_s20   ;;  %s273_s24 = sadd.s32 1, %s20384_s19 }
   0xf   : > { %24528 = sst [smem:[#allocation29_spill]] %s20497_s23  ;;  %s270_s25 = ssub.s32 %s20388_s20, %s20497_s23 }
  0x10   : > { %p283_p0 = scmp.ne.s32.totalorder %s20384_s19, %s20380_s18  ;;  %p271_p1 = scmp.eq.s32.totalorder %s270_s25, 0 }
  0x11   : > { %p284_p2 = scmp.eq.s32.totalorder %s20493_s21, 1  ;;  %p289_p3 = scmp.ne.s32.totalorder %s20380_s18, %s20376_s17 }
  0x12   : > { %p290_p4 = scmp.eq.s32.totalorder %s16188_s22, 1  ;;  %p16189_p7 = scmp.ge.s32.totalorder %s20388_s20, 1 }
  0x13   : > { %s20508_s26 = scalar_select %p271_p1, %s20384_s19, %s273_s24  }
  0x14   : > { %p20510_p5 = por %p284_p2, %p283_p0  ;;  %p20514_p6 = por %p290_p4, %p289_p3 }
  0x15   : > { %24529 = sst [smem:[#allocation30_spill]] %s20508_s26  ;;  %p297_p8 = scmp.lt.s32.totalorder %s20388_s20, 3 }
  0x16   : > { %s24530_s27 = scalar_select %p20510_p5, 1, 0 }
  0x17   : > { %s24531_s28 = scalar_select %p20514_p6, 1, 0 }
  0x18   : > { %p24284_p9 = scmp.eq.s32.totalorder %s20493_s21, 0  ;;  %p20521_p10 = pnand %p16189_p7, %p297_p8 }
  0x19   : > { %24532 = sst [smem:[#allocation31_spill]] %s24531_s28  ;;  %s20390_s30 = smov [#allocation5]  }
  0x1a   : > { %s24533_s29 = scalar_select %p20521_p10, 1, 0 }
  0x1b   : > { %s323_s12 = sshll.u32 %s20390_s30, 4  ;;  %p18668_p11 = pneg %p20521_p10  ;;  %s324_s12 = int_to_ptr.vmem [resolvable:$true] %s323_s12 }
  0x1c   : > { %s20391_s13 = smov [#allocation8]   ;;  %s20392_s16 = smov [#allocation11]  }
  0x1d   : > { %s347_s14 = sshll.u32 %s20391_s13, 4  ;;  %p20529_p12 = pnand %p24284_p9, %p18668_p11  ;;  %s20533_s14 = int_to_ptr.vmem [resolvable:$true] %s347_s14 }
  0x1e   : > { %s371_s22 = sshll.u32 %s20392_s16, 4  ;;  %s24535_s2 = sld [smem:[#allocation114_spill]]  ;;  %s20535_s22 = int_to_ptr.vmem [resolvable:$true] %s371_s22 }
  0x1f   : > { %p20545_p0 = pneg %p20529_p12 }
  0x24   : > { %s20022_s30 = scalar_lea.hbm %s24535_s2, 96 }
  0x25   : > { %p20023_p13 = scmp.ne.s32.totalorder %s24535_s2, %s20022_s30  ;;  %p20029_p3 = scmp.lt.u32.totalorder %s20022_s30, %s24535_s2 }
  0x27   : > { %p20025_p1 = pnand %p20545_p0, %p20023_p13 }
  0x29   : > { %p20026_p2 = pneg %p20025_p1 }
  0x2b   : > { %p20031_p4 = pnand %p20029_p3, %p20026_p2 }
  0x2d   : > { %20034 = shalt.err (!%p20031_p4)
}
  0x2e   : > { %s20035_s24 = scalar_lea.vmem %s324_s12, 96  ;;  %p20043_p9 = scmp.lt.s32.totalorder %s324_s12, %s324_s12 }
  0x2f   : > { %p20036_p7 = scmp.ne.s32.totalorder %s324_s12, %s20035_s24  ;;  %p20044_p6 = scmp.lt.s32.totalorder %s20035_s24, %s20035_s24 }
  0x31   : > { %p20038_p8 = pnand %p20036_p7, %p20545_p0  ;;  %p20045_p5 = por %p20044_p6, %p20043_p9 }
  0x33   : > { %p20039_p11 = pneg %p20038_p8 }
  0x35   : > { %p20046_p10 = pnand %p20045_p5, %p20039_p11 }
  0x37   : > { %20049 = shalt.err (!%p20046_p10)
}
  0x38   : > { %18674 = dma.hbm_to_vmem [thread:$0]  (!%p20529_p12), %s24535_s2, 96, %s324_s12, [#allocation6]  }
  0x39   : > { %s24537_s4 = sld [smem:[#allocation115_spill]] }
  0x3f   : > { %s20050_s30 = scalar_lea.hbm %s24537_s4, 64 }
  0x40   : > { %p20051_p13 = scmp.ne.s32.totalorder %s24537_s4, %s20050_s30  ;;  %p20057_p5 = scmp.lt.u32.totalorder %s20050_s30, %s24537_s4 }
  0x42   : > { %p20053_p1 = pnand %p20051_p13, %p20545_p0 }
  0x44   : > { %p20054_p6 = pneg %p20053_p1 }
  0x46   : > { %p20059_p9 = pnand %p20057_p5, %p20054_p6 }
  0x48   : > { %20062 = shalt.err (!%p20059_p9)
}
  0x49   : > { %s20063_s12 = scalar_lea.vmem %s20533_s14, 64  ;;  %p20071_p4 = scmp.lt.s32.totalorder %s20533_s14, %s20533_s14 }
  0x4a   : > { %p20064_p10 = scmp.ne.s32.totalorder %s20533_s14, %s20063_s12  ;;  %p20072_p7 = scmp.lt.s32.totalorder %s20063_s12, %s20063_s12 }
  0x4c   : > { %p20066_p2 = pnand %p20064_p10, %p20545_p0  ;;  %p20073_p8 = por %p20072_p7, %p20071_p4 }
  0x4e   : > { %p20067_p3 = pneg %p20066_p2 }
  0x50   : > { %p20074_p11 = pnand %p20073_p8, %p20067_p3 }
  0x52   : > { %20077 = shalt.err (!%p20074_p11)
}
  0x53   : > { %18680 = dma.hbm_to_vmem [thread:$0]  (!%p20529_p12), %s24537_s4, 64, %s20533_s14, [#allocation9]  }
  0x54   : > { %s20078_s23 = scalar_lea.hbm %s24275_s6, 128 }
  0x55   : > { %p20079_p13 = scmp.ne.s32.totalorder %s24275_s6, %s20078_s23  ;;  %p20085_p5 = scmp.lt.u32.totalorder %s20078_s23, %s24275_s6 }
  0x57   : > { %p20081_p1 = pnand %p20079_p13, %p20545_p0 }
  0x59   : > { %p20082_p6 = pneg %p20081_p1 }
  0x5b   : > { %p20087_p9 = pnand %p20085_p5, %p20082_p6 }
  0x5d   : > { %20090 = shalt.err (!%p20087_p9)
}
  0x5e   : > { %s20091_s14 = scalar_lea.vmem %s20535_s22, 128  ;;  %p20099_p4 = scmp.lt.s32.totalorder %s20535_s22, %s20535_s22 }
  0x5f   : > { %p20092_p10 = scmp.ne.s32.totalorder %s20535_s22, %s20091_s14  ;;  %p20100_p7 = scmp.lt.s32.totalorder %s20091_s14, %s20091_s14 }
  0x61   : > { %p20094_p2 = pnand %p20092_p10, %p20545_p0  ;;  %p20101_p8 = por %p20100_p7, %p20099_p4 }
  0x63   : > { %p20095_p3 = pneg %p20094_p2 }
  0x65   : > { %p20102_p11 = pnand %p20101_p8, %p20095_p3 }
  0x67   : > { %20105 = shalt.err (!%p20102_p11)
}
  0x68   : > { %18686 = dma.hbm_to_vmem [thread:$0]  (!%p20529_p12), %s24275_s6, 128, %s20535_s22, [#allocation12]  }
  0x69   : > { %s20393_s28 = smov [#allocation14]   ;;  %s20394_s26 = smov [#allocation2]  }
  0x6a   : > { %s395_s19 = sshll.u32 %s20393_s28, 4  ;;  %s309_s23 = sshll.u32 %s20394_s26, 4  ;;  %s396_s19 = int_to_ptr.vmem [resolvable:$true] %s395_s19  ;;  %s310_s23 = int_to_ptr.vmem [resolvable:$true] %s309_s23 }
  0x6b   : > { %s20106_s16 = scalar_lea.hbm %s24277_s8, 32 }
  0x6c   : > { %p20107_p13 = scmp.ne.s32.totalorder %s24277_s8, %s20106_s16  ;;  %p20113_p5 = scmp.lt.u32.totalorder %s20106_s16, %s24277_s8 }
  0x6e   : > { %p20109_p1 = pnand %p20107_p13, %p20545_p0 }
  0x70   : > { %p20110_p6 = pneg %p20109_p1 }
  0x72   : > { %p20115_p9 = pnand %p20113_p5, %p20110_p6 }
  0x74   : > { %20118 = shalt.err (!%p20115_p9)
}
  0x75   : > { %s20119_s22 = scalar_lea.vmem %s396_s19, 32  ;;  %p20127_p4 = scmp.lt.s32.totalorder %s396_s19, %s396_s19 }
  0x76   : > { %p20120_p10 = scmp.ne.s32.totalorder %s396_s19, %s20119_s22  ;;  %p20128_p7 = scmp.lt.s32.totalorder %s20119_s22, %s20119_s22 }
  0x78   : > { %p20122_p2 = pnand %p20120_p10, %p20545_p0  ;;  %p20129_p8 = por %p20128_p7, %p20127_p4 }
  0x7a   : > { %p20123_p3 = pneg %p20122_p2 }
  0x7c   : > { %p20130_p11 = pnand %p20129_p8, %p20123_p3 }
  0x7e   : > { %20133 = shalt.err (!%p20130_p11)
}
  0x7f   : > { %18692 = dma.hbm_to_vmem [thread:$0]  (!%p20529_p12), %s24277_s8, 32, %s396_s19, [#allocation15]  }
  0x80   : > { %s20134_s25 = scalar_lea.hbm %s24270_s1, 7680 }
  0x81   : > { %p20135_p13 = scmp.ne.s32.totalorder %s24270_s1, %s20134_s25  ;;  %p20141_p5 = scmp.lt.u32.totalorder %s20134_s25, %s24270_s1 }
  0x83   : > { %p20137_p1 = pnand %p20135_p13, %p20545_p0 }
  0x85   : > { %p20138_p6 = pneg %p20137_p1 }
  0x87   : > { %p20143_p9 = pnand %p20141_p5, %p20138_p6 }
  0x89   : > { %20146 = shalt.err (!%p20143_p9)
}
  0x8a   : > { %s20147_s12 = scalar_lea.vmem %s310_s23, 7680  ;;  %p20155_p4 = scmp.lt.s32.totalorder %s310_s23, %s310_s23 }
  0x8b   : > { %p20148_p10 = scmp.ne.s32.totalorder %s310_s23, %s20147_s12  ;;  %p20156_p7 = scmp.lt.s32.totalorder %s20147_s12, %s20147_s12 }
  0x8d   : > { %p20150_p2 = pnand %p20148_p10, %p20545_p0  ;;  %p20157_p8 = por %p20156_p7, %p20155_p4 }
  0x8f   : > { %p20151_p3 = pneg %p20150_p2 }
  0x91   : > { %p20158_p11 = pnand %p20157_p8, %p20151_p3 }
  0x93   : > { %20161 = shalt.err (!%p20158_p11)
}
  0x94   : > { %s20395_s19 = smov 384   ;;  %s20396_s22 = smov 24  }
  0x95   : > { %18671 = dma.hbm_to_vmem [thread:$0]  (!%p20529_p12), %s24270_s1, 7680, %s310_s23, [#allocation3], %s20395_s19, %s20395_s19, %s20396_s22  }
  0x96   : > { %s20397_s2 = smov [#allocation7]   ;;  %s20162_s16 = scalar_lea.hbm %s24272_s3, 61440 }
  0x97   : > { %s333_s26 = sshll.u32 %s20397_s2, 4  ;;  %p20163_p13 = scmp.ne.s32.totalorder %s24272_s3, %s20162_s16  ;;  %s334_s26 = int_to_ptr.vmem [resolvable:$true] %s333_s26 }
  0x98   : > { %p20169_p5 = scmp.lt.u32.totalorder %s20162_s16, %s24272_s3 }
  0x99   : > { %p20165_p1 = pnand %p20163_p13, %p20545_p0 }
  0x9b   : > { %p20166_p6 = pneg %p20165_p1 }
  0x9d   : > { %p20171_p9 = pnand %p20169_p5, %p20166_p6 }
  0x9f   : > { %20174 = shalt.err (!%p20171_p9)
}
  0xa0   : > { %s20175_s23 = scalar_lea.vmem %s334_s26, 61440  ;;  %p20183_p4 = scmp.lt.s32.totalorder %s334_s26, %s334_s26 }
  0xa1   : > { %p20176_p10 = scmp.ne.s32.totalorder %s334_s26, %s20175_s23  ;;  %p20184_p7 = scmp.lt.s32.totalorder %s20175_s23, %s20175_s23 }
  0xa3   : > { %p20178_p2 = pnand %p20176_p10, %p20545_p0  ;;  %p20185_p8 = por %p20184_p7, %p20183_p4 }
  0xa5   : > { %p20179_p3 = pneg %p20178_p2 }
  0xa7   : > { %p20186_p11 = pnand %p20185_p8, %p20179_p3 }
  0xa9   : > { %20189 = shalt.err (!%p20186_p11)
}
  0xaa   : > { %s20398_s19 = smov 256   ;;  %s20399_s22 = smov 16  }
  0xab   : > { %18677 = dma.hbm_to_vmem [thread:$0]  (!%p20529_p12), %s24272_s3, 61440, %s334_s26, [#allocation6], %s20398_s19, %s20398_s19, %s20399_s22  }
  0xac   : > { %s20400_s28 = smov [#allocation10]   ;;  %s20190_s16 = scalar_lea.hbm %s24274_s5, 65536 }
  0xad   : > { %s357_s2 = sshll.u32 %s20400_s28, 4  ;;  %p20191_p13 = scmp.ne.s32.totalorder %s24274_s5, %s20190_s16  ;;  %s358_s2 = int_to_ptr.vmem [resolvable:$true] %s357_s2 }
  0xae   : > { %p20197_p5 = scmp.lt.u32.totalorder %s20190_s16, %s24274_s5 }
  0xaf   : > { %p20193_p1 = pnand %p20191_p13, %p20545_p0 }
  0xb1   : > { %p20194_p6 = pneg %p20193_p1 }
  0xb3   : > { %p20199_p9 = pnand %p20197_p5, %p20194_p6 }
  0xb5   : > { %20202 = shalt.err (!%p20199_p9)
}
  0xb6   : > { %s20203_s26 = scalar_lea.vmem %s358_s2, 65536  ;;  %p20211_p4 = scmp.lt.s32.totalorder %s358_s2, %s358_s2 }
  0xb7   : > { %p20204_p10 = scmp.ne.s32.totalorder %s358_s2, %s20203_s26  ;;  %p20212_p7 = scmp.lt.s32.totalorder %s20203_s26, %s20203_s26 }
  0xb9   : > { %p20206_p2 = pnand %p20204_p10, %p20545_p0  ;;  %p20213_p8 = por %p20212_p7, %p20211_p4 }
  0xbb   : > { %p20207_p3 = pneg %p20206_p2 }
  0xbd   : > { %p20214_p11 = pnand %p20213_p8, %p20207_p3 }
  0xbf   : > { %20217 = shalt.err (!%p20214_p11)
}
  0xc0   : > { %s20401_s19 = smov 512   ;;  %s20402_s22 = smov 32  }
  0xc1   : > { %18683 = dma.hbm_to_vmem [thread:$0]  (!%p20529_p12), %s24274_s5, 65536, %s358_s2, [#allocation9], %s20401_s19, %s20401_s19, %s20402_s22  }
  0xc2   : > { %s20403_s28 = smov [#allocation13]   ;;  %s20218_s24 = scalar_lea.hbm %s24276_s7, 16384 }
  0xc3   : > { %s381_s25 = sshll.u32 %s20403_s28, 4  ;;  %p20219_p13 = scmp.ne.s32.totalorder %s24276_s7, %s20218_s24  ;;  %s382_s25 = int_to_ptr.vmem [resolvable:$true] %s381_s25 }
  0xc4   : > { %p20225_p5 = scmp.lt.u32.totalorder %s20218_s24, %s24276_s7 }
  0xc5   : > { %p20221_p1 = pnand %p20219_p13, %p20545_p0 }
  0xc7   : > { %p20222_p6 = pneg %p20221_p1 }
  0xc9   : > { %p20227_p9 = pnand %p20225_p5, %p20222_p6 }
  0xcb   : > { %20230 = shalt.err (!%p20227_p9)
}
  0xcc   : > { %s20231_s2 = scalar_lea.vmem %s382_s25, 16384  ;;  %p20239_p4 = scmp.lt.s32.totalorder %s382_s25, %s382_s25 }
  0xcd   : > { %p20232_p10 = scmp.ne.s32.totalorder %s382_s25, %s20231_s2  ;;  %p20240_p7 = scmp.lt.s32.totalorder %s20231_s2, %s20231_s2 }
  0xcf   : > { %p20234_p2 = pnand %p20232_p10, %p20545_p0  ;;  %p20241_p8 = por %p20240_p7, %p20239_p4 }
  0xd1   : > { %p20235_p3 = pneg %p20234_p2 }
  0xd3   : > { %p20242_p11 = pnand %p20241_p8, %p20235_p3 }
  0xd5   : > { %20245 = shalt.err (!%p20242_p11)
}
  0xd6   : > { %s20404_s19 = smov 128   ;;  %s20405_s22 = smov 8  }
  0xd7   : > { %18689 = dma.hbm_to_vmem [thread:$0]  (!%p20529_p12), %s24276_s7, 16384, %s382_s25, [#allocation12], %s20404_s19, %s20404_s19, %s20405_s22  }
  0xd8   : > { %s20406_s28 = smov [#allocation16]   ;;  %s20246_s14 = scalar_lea.hbm %s24278_s9, 2048 }
  0xd9   : > { %s405_s30 = sshll.u32 %s20406_s28, 4  ;;  %p20247_p13 = scmp.ne.s32.totalorder %s24278_s9, %s20246_s14  ;;  %s406_s30 = int_to_ptr.vmem [resolvable:$true] %s405_s30 }
  0xda   : > { %p20253_p5 = scmp.lt.u32.totalorder %s20246_s14, %s24278_s9 }
  0xdb   : > { %p20249_p1 = pnand %p20247_p13, %p20545_p0 }
  0xdd   : > { %p20250_p6 = pneg %p20249_p1 }
  0xdf   : > { %p20255_p9 = pnand %p20253_p5, %p20250_p6 }
  0xe1   : > { %20258 = shalt.err (!%p20255_p9)
}
  0xe2   : > { %s20259_s25 = scalar_lea.vmem %s406_s30, 2048  ;;  %p20267_p4 = scmp.lt.s32.totalorder %s406_s30, %s406_s30 }
  0xe3   : > { %p20260_p10 = scmp.ne.s32.totalorder %s406_s30, %s20259_s25  ;;  %p20268_p7 = scmp.lt.s32.totalorder %s20259_s25, %s20259_s25 }
  0xe5   : > { %p20262_p2 = pnand %p20260_p10, %p20545_p0  ;;  %p20269_p8 = por %p20268_p7, %p20267_p4 }
  0xe7   : > { %p20263_p3 = pneg %p20262_p2 }
  0xe9   : > { %p20270_p11 = pnand %p20269_p8, %p20263_p3 }
  0xeb   : > { %20273 = shalt.err (!%p20270_p11)
}
  0xec   : > { %s20407_s19 = smov 64   ;;  %s20408_s22 = smov 4  }
  0xed   : > { %18695 = dma.hbm_to_vmem [thread:$0]  (!%p20529_p12), %s24278_s9, 2048, %s406_s30, [#allocation15], %s20407_s19, %s20407_s19, %s20408_s22  }
  0xee   : > { %s20409_s28 = smov [#allocation17]   ;;  %s20274_s12 = scalar_lea.hbm %s24279_s10, 16 }
  0xef   : > { %s419_s16 = sshll.u32 %s20409_s28, 4  ;;  %p20275_p13 = scmp.ne.s32.totalorder %s24279_s10, %s20274_s12  ;;  %s420_s16 = int_to_ptr.vmem [resolvable:$true] %s419_s16 }
  0xf0   : > { %p20281_p5 = scmp.lt.u32.totalorder %s20274_s12, %s24279_s10 }
  0xf1   : > { %p20277_p1 = pnand %p20275_p13, %p20545_p0 }
  0xf3   : > { %p20278_p6 = pneg %p20277_p1 }
  0xf5   : > { %p20283_p9 = pnand %p20281_p5, %p20278_p6 }
  0xf7   : > { %20286 = shalt.err (!%p20283_p9)
}
  0xf8   : > { %s20287_s30 = scalar_lea.vmem %s420_s16, 16  ;;  %s20294_s19 = scalar_lea.vmem %s420_s16, 32 }
  0xf9   : > { %p20288_p10 = scmp.ne.s32.totalorder %s420_s16, %s20287_s30  ;;  %p20295_p4 = scmp.lt.s32.totalorder %s420_s16, %s420_s16 }
  0xfa   : > { %p20296_p7 = scmp.lt.s32.totalorder %s20294_s19, %s20287_s30 }
  0xfb   : > { %p20290_p2 = pnand %p20288_p10, %p20545_p0 }
  0xfc   : > { %p20297_p8 = por %p20296_p7, %p20295_p4 }
  0xfd   : > { %p20291_p3 = pneg %p20290_p2 }
  0xff   : > { %p20298_p11 = pnand %p20297_p8, %p20291_p3 }
 0x101   : > { %20301 = shalt.err (!%p20298_p11)
}
 0x102   : > { %18698 = dma.hbm_to_vmem [thread:$0]  (!%p20529_p12), %s24279_s10, 16, %s420_s16, [#allocation18]  }
 0x103   : > { %p24538_p13 = scmp.ne.s32.totalorder %s24533_s29, 0 }
 0x105   : > { %440 = sbr.rel (%p24538_p13) target bundleno = 3870 (0xf1e), region = 64 }
 0x10c   : > { %p24539_p1 = scmp.eq.s32.totalorder %s20493_s21, 0 }
 0x10e   : > { %20347 = dma.done.wait (%p24539_p1), [#allocation3], 7680   ;;  %p24540_p0 = pmov %p24539_p1 }
 0x110   : > { %20349 = vsyncadd (%p24540_p0), [#allocation3], 4294959616  ;;  %p24541_p6 = pmov %p24540_p0 }
 0x111   : > { %p24542_p5 = pmov %p24540_p0 }
 0x112   : > { %20351 = dma.done.wait (%p24541_p6), [#allocation6], 61536  }
 0x113   : > { %20353 = vsyncadd (%p24542_p5), [#allocation6], 4294905760  ;;  %p24543_p9 = pmov %p24540_p0 }
 0x114   : > { %p24544_p12 = pmov %p24540_p0 }
 0x115   : > { %20355 = dma.done.wait (%p24543_p9), [#allocation9], 65600  }
 0x116   : > { %20357 = vsyncadd (%p24544_p12), [#allocation9], 4294901696  ;;  %p24545_p10 = pmov %p24540_p0 }
 0x117   : > { %p24546_p2 = pmov %p24540_p0 }
 0x118   : > { %20359 = dma.done.wait (%p24545_p10), [#allocation12], 16512  }
 0x119   : > { %20361 = vsyncadd (%p24546_p2), [#allocation12], 4294950784  ;;  %p24547_p3 = pmov %p24540_p0 }
 0x11a   : > { %p24548_p4 = pmov %p24540_p0 }
 0x11b   : > { %20363 = dma.done.wait (%p24547_p3), [#allocation15], 2080  }
 0x11c   : > { %20365 = vsyncadd (%p24548_p4), [#allocation15], 4294965216  ;;  %p24549_p7 = pmov %p24540_p0 }
 0x11d   : > { %p24550_p8 = pmov %p24540_p0 }
 0x11e   : > { %20367 = dma.done.wait (%p24549_p7), [#allocation18], 16  }
 0x11f   : > { %20369 = vsyncadd (%p24550_p8), [#allocation18], 4294967280  ;;  %p516_p11 = scmp.lt.s32.totalorder %s20493_s21, 1  ;;  %v24298_v0 = vmov 0   ;;  %v20763_v1 = vld [vmem:[#allocation2 + $0x64] ss:$24 sps:$4 sm:$0xff]  }
 0x120   : > { %691 = vmatprep.mubr.bf16.mxu0 %v24298_v0  ;;  %764 = vmatprep.mubr.bf16.mxu1 %v24298_v0  ;;  %v20765_v2 = vld [vmem:[#allocation2 + $0x6c] ss:$24 sps:$4 sm:$0xff]   ;;  %v20768_v3 = vld [vmem:[#allocation2 + $0x60] ss:$24 sps:$4 sm:$0xff]   ;;  %vm640_vm0 = vcmask 1045504   ;;  %vm630_vm1 = vcmask 228352  }
 0x121   : > { %s517_s29 = scalar_select %p516_p11, %s20493_s21, 1  ;;  %659 = vmatprep.subr.bf16.mxu0 %v20763_v1  ;;  %v20770_v4 = vld [vmem:[#allocation2 + $0x68] ss:$24 sps:$4 sm:$0xff]   ;;  %17743 = vmatprep.subr.bf16.mxu1 %v20765_v2  ;;  %v20778_v5 = vld [vmem:[#allocation2 + $0x94] ss:$24 sps:$4 sm:$0x3f]  }
 0x122   : > { %660 = vmatpush1.bf16.msra.mxu0 %v20768_v3  ;;  %17745 = vmatpush1.bf16.msra.mxu1 %v20770_v4  ;;  %v20782_v6 = vld [vmem:[#allocation2 + $0x9c] ss:$24 sps:$4 sm:$0x3f]   ;;  %v18787_v7 = vld [vmem:[#allocation2 + $0x90] ss:$24 sps:$4 sm:$0x3f]  }
 0x123   : > { %s18625_s15 = smul.u32 192, %s517_s29  ;;  %16235 = vmatprep.subr.msk.bf16.mxu0 %vm640_vm0, %v20778_v5  ;;  %v18788_v8 = vld [vmem:[#allocation2 + $0x98] ss:$24 sps:$4 sm:$0x3f]   ;;  %17744 = vmatprep.subr.msk.bf16.mxu1 %vm640_vm0, %v20782_v6  ;;  %v20792_v10 = vsel %vm640_vm0, %v18787_v7, 0  ;;  %s513_s16 = sand.u32 1, %s20380_s18  }
 0x124   : > { %v20795_v11 = vsel %vm640_vm0, %v18788_v8, 0  ;;  %v18791_v13 = vld [vmem:[#allocation2 + $0xc] ss:$24 sps:$4 sm:$0xff]   ;;  %v18793_v14 = vld [vmem:[#allocation2 + $0x8] ss:$24 sps:$4 sm:$0xff]   ;;  %s16212_s24 = sshll.u32 %s513_s16, 3 }
 0x125   : > { %s20775_s28 = scalar_lea.vmem %s24269_s0, %s18625_s15  ;;  %v18795_v15 = vld [vmem:[#allocation2 + $0x3c] ss:$24 sps:$4 sm:$0x3f]   ;;  %v18797_v16 = vld [vmem:[#allocation2 + $0x38] ss:$24 sps:$4 sm:$0x3f]  }
 0x126   : > { %v20787_v9 = vld [vmem:[%s20775_s28 + $0x18] sm:$0xff]   ;;  %v20798_v12 = vld [vmem:[%s20775_s28 + $0x20] sm:$0xff]   ;;  %662 = vmatpush1.bf16.msra.mxu0 %v20792_v10  ;;  %17746 = vmatpush1.bf16.msra.mxu1 %v20795_v11  ;;  %v20811_v17 = vsel %vm640_vm0, %v18797_v16, 0  ;;  %v20815_v19 = vld [vmem:[%s20775_s28 + $0x28] sm:$0xff]   ;;  %s17718_s14 = sshll.u32 %s20493_s21, 7  ;;  %s515_s12 = scalar_lea.vmem [#allocation19], %s16212_s24 }
 0x127   : > { %722 = vmatprep.subr.bf16.mxu0 %v20765_v2  ;;  %1007 = vmatprep.subr.bf16.mxu1 %v18791_v13  ;;  %v18799_v18 = vld [vmem:[#allocation2 + $0xcc] ss:$24 sps:$4 sm:$0xff]   ;;  %v18801_v22 = vld [vmem:[#allocation2 + $0xc8] ss:$24 sps:$4 sm:$0xff]   ;;  %v20866_v33 = vld [vmem:[%s20775_s28 + $0x10] sm:$0xff]   ;;  %s16031_s23 = sshll.u32 %s515_s12, 4  ;;  %s24227_s25 = scalar_lea.hbm %s24280_s11, %s17718_s14  ;;  %s24229_s23 = int_to_ptr.vmem [resolvable:$true] %s16031_s23 }
 0x128   : > { %v20820_v20 = vld [vmem:[#allocation2 + $0x74] ss:$24 sps:$4 sm:$0xff]   ;;  %v20831_v21 = vld [vmem:[%s20775_s28] sm:$0xff]   ;;  %v18811_v23 = vld [vmem:[#allocation2 + $0xf8] ss:$24 sps:$4 sm:$0x3f]  }
 0x129   : > { %16236 = vmatmul.mubr.msk.bf16.vlgmr.msra.gmra.mrb[0].mxu0 %vm630_vm1, %v20787_v9  ;;  %16241 = vmatmul.mubr.msk.bf16.vlgmr.msra.gmra.mrb[0].mxu1 %vm630_vm1, %v20798_v12  ;;  %v18808_v24 = vld [vmem:[#allocation2 + $0xfc] ss:$24 sps:$4 sm:$0x3f]   ;;  %v20839_v25 = vsel %vm640_vm0, %v18811_v23, 0  ;;  %v18814_v26 = vld [vmem:[#allocation2 + $0x12c] ss:$24 sps:$4 sm:$0xff]  }
 0x12a   : > { %1008 = vmatpush1.bf16.msra.mxu1 %v18793_v14  ;;  %701 = vmatprep.mubr.bf16.mxu0 %v24298_v0  ;;  %v20844_v27 = vld [vmem:[%s20775_s28 + $0x8] sm:$0xff]   ;;  %v18810_v29 = vld [vmem:[#allocation2 + $0xa0] ss:$24 sps:$4 sm:$0x3f]   ;;  %v20863_v32 = vld [vmem:[#allocation2 + $0x4] ss:$24 sps:$4 sm:$0xff]  }
 0x12b   : > { %774 = vmatprep.mubr.bf16.mxu1 %v24298_v0  ;;  %16266 = vmatprep.subr.msk.bf16.mxu1 %vm640_vm0, %v18795_v15  ;;  %v20846_v28 = vld [vmem:[#allocation2 + $0x70] ss:$24 sps:$4 sm:$0xff]   ;;  %v20849_v30 = vld [vmem:[#allocation2 + $0xa4] ss:$24 sps:$4 sm:$0x3f]   ;;  %v20857_v31 = vsel %vm640_vm0, %v18810_v29, 0 }
 0x12c   : > { %723 = vmatpush1.bf16.msra.mxu0 %v20770_v4  ;;  %24551 = vst [vmem:[#allocation32_spill] sm:$0xff] %v20857_v31  ;;  %v18820_v34 = vld [vmem:[#allocation2] ss:$24 sps:$4 sm:$0xff]   ;;  %v18821_v35 = vld [vmem:[#allocation2 + $0x34] ss:$24 sps:$4 sm:$0x3f]  }
 0x12d   : > { %16239 = vmatprep.subr.msk.bf16.mxu0 %vm640_vm0, %v20782_v6  ;;  %v18825_v36 = vld [vmem:[#allocation2 + $0x30] ss:$24 sps:$4 sm:$0x3f]   ;;  %v18832_v38 = vld [vmem:[#allocation2 + $0x14] ss:$24 sps:$4 sm:$0xff]   ;;  %v20891_v44 = vld [vmem:[%s20775_s28 + $0x38] sm:$0xff]  }
 0x12e   : > { %1010 = vmatpush1.bf16.msra.mxu1 %v20811_v17  ;;  %v20878_v37 = vsel %vm640_vm0, %v18825_v36, 0  ;;  %v20881_v39 = vld [vmem:[%s20775_s28 + $0x30] sm:$0xff]   ;;  %v18816_v40 = vld [vmem:[#allocation2 + $0x128] ss:$24 sps:$4 sm:$0xff]   ;;  %v18829_v43 = vld [vmem:[#allocation2 + $0x18c] ss:$24 sps:$4 sm:$0xff]  }
 0x12f   : > { %1312 = vmatprep.subr.bf16.mxu1 %v18799_v18  ;;  %v18823_v41 = vld [vmem:[#allocation2 + $0x15c] ss:$24 sps:$4 sm:$0x3f]   ;;  %v18826_v42 = vld [vmem:[#allocation2 + $0x158] ss:$24 sps:$4 sm:$0x3f]  }
 0x130   : > { %725 = vmatpush1.bf16.msra.mxu0 %v20795_v11  ;;  %v20895_v45 = vsel %vm640_vm0, %v18826_v42, 0  ;;  %v20905_v46 = vld [vmem:[%s20775_s28 + $0x40] sm:$0xff]   ;;  %v18835_v47 = vld [vmem:[#allocation2 + $0x10] ss:$24 sps:$4 sm:$0xff]   ;;  %v20943_v58 = vld [vmem:[%s20775_s28 + $0x58] sm:$0xff]   ;;  %s16018_s30 = scalar_lea.sflag [#allocation4], %s513_s16 }
 0x131   : > { %16237 = vmatmul.mubr.msk.bf16.gmra.mrb[4].mxu0 %vm630_vm1, %v20798_v12  ;;  %16242 = vmatmul.mubr.msk.bf16.gmra.mrb[4].mxu1 %vm630_vm1, %v20815_v19  ;;  %v18836_v48 = vld [vmem:[#allocation2 + $0x44] ss:$24 sps:$4 sm:$0x3f]   ;;  %v18840_v49 = vld [vmem:[#allocation2 + $0x40] ss:$24 sps:$4 sm:$0x3f]  }
 0x132   : > { %711 = vmatprep.mubr.bf16.mxu0 %v24298_v0  ;;  %1039 = vmatprep.mubr.bf16.mxu1 %v24298_v0  ;;  %v18844_v50 = vld [vmem:[#allocation2 + $0xc4] ss:$24 sps:$4 sm:$0xff]   ;;  %v20914_v51 = vld [vmem:[%s20775_s28 + $0x48] sm:$0xff]   ;;  %v20918_v53 = vsel %vm640_vm0, %v18840_v49, 0  ;;  %v20928_v56 = vld [vmem:[%s20775_s28 + $0x50] sm:$0xff]   ;;  %s20302_s19 = scalar_lea.vmem %s24229_s23, 128 }
 0x133   : > { %785 = vmatprep.subr.bf16.mxu0 %v20820_v20  ;;  %v18831_v52 = vld [vmem:[#allocation2 + $0x188] ss:$24 sps:$4 sm:$0xff]   ;;  %v18838_v54 = vld [vmem:[#allocation2 + $0x1bc] ss:$24 sps:$4 sm:$0x3f]   ;;  %p20303_p13 = scmp.ne.s32.totalorder %s24229_s23, %s20302_s19  ;;  %p24997_p1 = scmp.ne.s32.totalorder %s24530_s27, 0 }
 0x134   : > { %v18841_v55 = vld [vmem:[#allocation2 + $0x1b8] ss:$24 sps:$4 sm:$0x3f]   ;;  %v18848_v60 = vld [vmem:[#allocation2 + $0xf4] ss:$24 sps:$4 sm:$0x3f]  }
 0x135   : > { %v20932_v57 = vsel %vm640_vm0, %v18841_v55, 0  ;;  %v18847_v59 = vld [vmem:[#allocation2 + $0xc0] ss:$24 sps:$4 sm:$0xff]   ;;  %v18850_v61 = vld [vmem:[#allocation2 + $0xf0] ss:$24 sps:$4 sm:$0x3f]   ;;  %p20304_p0 = pnand %p20303_p13, %p24997_p1 }
 0x136   : > { %v18852_v62 = vld [vmem:[#allocation2 + $0xd4] ss:$24 sps:$4 sm:$0xff]   ;;  %v20952_v63 = vld [vmem:[%s20775_s28 + $0x60] sm:$0xff]   ;;  %v18854_v8 = vld [vmem:[#allocation2 + $0xd0] ss:$24 sps:$4 sm:$0xff]   ;;  %s20411_s21 = smov [#allocation19]  }
 0x137   : > { %v20967_v7 = vld [vmem:[%s20775_s28 + $0x68] sm:$0xff]   ;;  %v18867_v18 = vld [vmem:[#allocation2 + $0x164] ss:$24 sps:$4 sm:$0x3f]   ;;  %v21168_v49 = vld [vmem:[#allocation2 + $0x60] ss:$24 sps:$4 sm:$0xff]   ;;  %p20305_p6 = pneg %p20304_p0 }
 0x138   : > { %v18861_v13 = vld [vmem:[#allocation2 + $0x154] ss:$24 sps:$4 sm:$0x3f]   ;;  %v18863_v14 = vld [vmem:[#allocation2 + $0x150] ss:$24 sps:$4 sm:$0x3f]  }
 0x139   : > { %16238 = vmatmul.mubr.msk.bf16.gmra.mrb[8].mxu0 %vm630_vm1, %v20815_v19  ;;  %16267 = vmatmul.mubr.msk.bf16.vlgmr.msra.gmra.mrb[8].mxu1 %vm630_vm1, %v20831_v21  ;;  %v21018_v15 = vsel %vm640_vm0, %v18863_v14, 0  ;;  %v18866_v16 = vld [vmem:[#allocation2 + $0x130] ss:$24 sps:$4 sm:$0xff]   ;;  %v21058_v23 = vld [vmem:[#allocation2 + $0x34] ss:$24 sps:$4 sm:$0x3f]  }
 0x13a   : > { %1313 = vmatpush1.bf16.msra.mxu1 %v18801_v22  ;;  %754 = vmatprep.mubr.bf16.mxu0 %v24298_v0  ;;  %24553 = vst [vmem:[#allocation34_spill] sm:$0xff] %v21018_v15  ;;  %v21053_v22 = vld [vmem:[#allocation2] ss:$24 sps:$4 sm:$0xff]   ;;  %v21082_v29 = vld [vmem:[#allocation2 + $0x194] ss:$24 sps:$4 sm:$0xff]   ;;  %s20306_s22 = sshll.u32 %s20411_s21, 4  ;;  %s20307_s22 = int_to_ptr.vmem [resolvable:$false] %s20306_s22 }
 0x13b   : > { %1049 = vmatprep.mubr.bf16.mxu1 %v24298_v0  ;;  %16299 = vmatprep.subr.msk.bf16.mxu1 %vm640_vm0, %v18808_v24  ;;  %v21063_v24 = vld [vmem:[#allocation2 + $0xc] ss:$24 sps:$4 sm:$0xff]   ;;  %v21269_v14 = vld [vmem:[#allocation2 + $0x70] ss:$24 sps:$4 sm:$0xff]   ;;  %s20308_s4 = scalar_lea.vmem %s20307_s22, 256  ;;  %p20309_p5 = scmp.lt.s32.totalorder %s24229_s23, %s20307_s22 }
 0x13c   : > { %v21112_v36 = vld [vmem:[%s20775_s28 + $0x20] sm:$0xff]   ;;  %v21190_v55 = vld [vmem:[#allocation2 + $0xf4] ss:$24 sps:$4 sm:$0x3f]   ;;  %p20310_p9 = scmp.lt.s32.totalorder %s20308_s4, %s20302_s19 }
 0x13e   : > { %1315 = vmatpush1.bf16.msra.mxu1 %v20839_v25  ;;  %p20311_p12 = por %p20310_p9, %p20309_p5 }
 0x13f   : > { %1653 = vmatprep.subr.bf16.mxu1 %v18814_v26  ;;  %v21072_v26 = vld [vmem:[#allocation2 + $0x180] ss:$24 sps:$4 sm:$0xff]  }
 0x140   : > { %p20312_p10 = pnand %p20311_p12, %p20305_p6 }
 0x141   : > { %16240 = vmatmul.mubr.msk.bf16.vlgmr.msra.gmra.mrb[12].mxu0 %vm630_vm1, %v20787_v9  ;;  %16268 = vmatmul.mubr.msk.bf16.gmra.mrb[0].mxu1 %vm630_vm1, %v20844_v27 }
 0x142   : > { %786 = vmatpush1.bf16.msra.mxu0 %v20846_v28  ;;  %817 = vmatprep.mubr.bf16.mxu0 %v24298_v0 }
 0x143   : > { %16243 = vmatprep.subr.msk.bf16.mxu0 %vm640_vm0, %v20849_v30  ;;  %1059 = vmatprep.mubr.bf16.mxu1 %v24298_v0 }
 0x146   : > { %788 = vmatpush1.bf16.msra.mxu0 %v20857_v31 }
 0x147   : > { %944 = vmatprep.subr.bf16.mxu0 %v20863_v32 }
 0x149   : > { %16244 = vmatmul.mubr.msk.bf16.vlgmr.msra.gmra.mrb[16].mxu0 %vm630_vm1, %v20787_v9  ;;  %16269 = vmatmul.mubr.msk.bf16.gmra.mrb[4].mxu1 %vm630_vm1, %v20866_v33  ;;  %v18855_v9 = vld [vmem:[#allocation2 + $0x104] ss:$24 sps:$4 sm:$0x3f]  }
 0x14a   : > { %827 = vmatprep.mubr.bf16.mxu0 %v24298_v0  ;;  %1344 = vmatprep.mubr.bf16.mxu1 %v24298_v0 }
 0x14b   : > { %945 = vmatpush1.bf16.msra.mxu0 %v18820_v34  ;;  %v21101_v34 = vld [vmem:[#allocation2 + $0x3c] ss:$24 sps:$4 sm:$0x3f]  }
 0x14c   : > { %16262 = vmatprep.subr.msk.bf16.mxu0 %vm640_vm0, %v18821_v35  ;;  %v21106_v35 = vld [vmem:[#allocation2 + $0x14] ss:$24 sps:$4 sm:$0xff]  }
 0x14f   : > { %947 = vmatpush1.bf16.msra.mxu0 %v20878_v37 }
 0x150   : > { %1070 = vmatprep.subr.bf16.mxu0 %v18832_v38  ;;  %v21118_v38 = vld [vmem:[#allocation2 + $0x190] ss:$24 sps:$4 sm:$0xff]  }
 0x151   : > { %16245 = vmatmul.mubr.msk.bf16.gmra.mrb[20].mxu0 %vm630_vm1, %v20798_v12  ;;  %16300 = vmatmul.mubr.msk.bf16.vlgmr.msra.gmra.mrb[8].mxu1 %vm630_vm1, %v20881_v39  ;;  %v18857_v12 = vld [vmem:[#allocation2 + $0x100] ss:$24 sps:$4 sm:$0x3f]  }
 0x152   : > { %1654 = vmatpush1.bf16.msra.mxu1 %v18816_v40  ;;  %837 = vmatprep.mubr.bf16.mxu0 %v24298_v0  ;;  %v18881_v40 = vld [vmem:[#allocation2 + $0x1c0] ss:$24 sps:$4 sm:$0x3f]  }
 0x153   : > { %1354 = vmatprep.mubr.bf16.mxu1 %v24298_v0  ;;  %16332 = vmatprep.subr.msk.bf16.mxu1 %vm640_vm0, %v18823_v41  ;;  %v19827_v41 = vld [vmem:[%s20775_s28 + $0x28] sm:$0xff]   ;;  %v21132_v42 = vsel %vm640_vm0, %v18881_v40, 0 }
 0x154   : > { %24554 = vst [vmem:[#allocation35_spill] sm:$0xff] %v21132_v42 }
 0x156   : > { %1656 = vmatpush1.bf16.msra.mxu1 %v20895_v45 }
 0x157   : > { %1994 = vmatprep.subr.bf16.mxu1 %v18829_v43  ;;  %v21135_v43 = vld [vmem:[#allocation2 + $0x64] ss:$24 sps:$4 sm:$0xff]  }
 0x159   : > { %16246 = vmatmul.mubr.msk.bf16.gmra.mrb[24].mxu0 %vm630_vm1, %v20815_v19  ;;  %16301 = vmatmul.mubr.msk.bf16.gmra.mrb[0].mxu1 %vm630_vm1, %v20891_v44  ;;  %v18869_v19 = vld [vmem:[#allocation2 + $0x160] ss:$24 sps:$4 sm:$0x3f]  }
 0x15a   : > { %976 = vmatprep.mubr.bf16.mxu0 %v24298_v0  ;;  %1364 = vmatprep.mubr.bf16.mxu1 %v24298_v0 }
 0x161   : > { %16263 = vmatmul.mubr.msk.bf16.vlgmr.msra.gmra.mrb[0].mxu0 %vm630_vm1, %v20831_v21  ;;  %16302 = vmatmul.mubr.msk.bf16.gmra.mrb[4].mxu1 %vm630_vm1, %v20905_v46 }
 0x162   : > { %986 = vmatprep.mubr.bf16.mxu0 %v24298_v0  ;;  %1685 = vmatprep.mubr.bf16.mxu1 %v24298_v0 }
 0x163   : > { %1071 = vmatpush1.bf16.msra.mxu0 %v18835_v47  ;;  %v21151_v47 = vld [vmem:[#allocation2 + $0xc4] ss:$24 sps:$4 sm:$0xff]  }
 0x164   : > { %16270 = vmatprep.subr.msk.bf16.mxu0 %vm640_vm0, %v18836_v48  ;;  %v21161_v48 = vld [vmem:[%s20775_s28 + $0x60] sm:$0xff]  }
 0x167   : > { %1073 = vmatpush1.bf16.msra.mxu0 %v20918_v53 }
 0x168   : > { %1249 = vmatprep.subr.bf16.mxu0 %v18844_v50  ;;  %v21171_v50 = vld [vmem:[#allocation2 + $0x94] ss:$24 sps:$4 sm:$0x3f]  }
 0x169   : > { %16264 = vmatmul.mubr.msk.bf16.gmra.mrb[4].mxu0 %vm630_vm1, %v20844_v27  ;;  %16333 = vmatmul.mubr.msk.bf16.vlgmr.msra.gmra.mrb[8].mxu1 %vm630_vm1, %v20914_v51 }
 0x16a   : > { %1995 = vmatpush1.bf16.msra.mxu1 %v18831_v52  ;;  %996 = vmatprep.mubr.bf16.mxu0 %v24298_v0  ;;  %v21180_v52 = vld [vmem:[%s20775_s28 + $0x68] sm:$0xff]  }
 0x16b   : > { %1695 = vmatprep.mubr.bf16.mxu1 %v24298_v0  ;;  %16365 = vmatprep.subr.msk.bf16.mxu1 %vm640_vm0, %v18838_v54  ;;  %v21185_v54 = vld [vmem:[#allocation2 + $0xc0] ss:$24 sps:$4 sm:$0xff]  }
 0x16e   : > { %1997 = vmatpush1.bf16.msra.mxu1 %v20932_v57 }
 0x16f   : > { %2259 = vmatprep.subr.bf16.mxu1 %v20763_v1  ;;  %v20956_v1 = vsel %vm640_vm0, %v18850_v61, 0 }
 0x171   : > { %16265 = vmatmul.mubr.msk.bf16.gmra.mrb[8].mxu0 %vm630_vm1, %v20866_v33  ;;  %16334 = vmatmul.mubr.msk.bf16.gmra.mrb[0].mxu1 %vm630_vm1, %v20928_v56 }
 0x172   : > { %1102 = vmatprep.mubr.bf16.mxu0 %v24298_v0  ;;  %1705 = vmatprep.mubr.bf16.mxu1 %v24298_v0 }
 0x179   : > { %16271 = vmatmul.mubr.msk.bf16.vlgmr.msra.gmra.mrb[16].mxu0 %vm630_vm1, %v20831_v21  ;;  %16335 = vmatmul.mubr.msk.bf16.gmra.mrb[4].mxu1 %vm630_vm1, %v20943_v58  ;;  %v21046_v21 = vsel %vm640_vm0, %v18869_v19, 0  ;;  %v21289_v19 = vld [vmem:[#allocation2 + $0x104] ss:$24 sps:$4 sm:$0x3f]  }
 0x17a   : > { %1112 = vmatprep.mubr.bf16.mxu0 %v24298_v0  ;;  %2026 = vmatprep.mubr.bf16.mxu1 %v24298_v0  ;;  %24558 = vst [vmem:[#allocation39_spill] sm:$0xff] %v21289_v19 }
 0x17b   : > { %1250 = vmatpush1.bf16.msra.mxu0 %v18847_v59 }
 0x17c   : > { %16295 = vmatprep.subr.msk.bf16.mxu0 %vm640_vm0, %v18848_v60  ;;  %v21201_v60 = vld [vmem:[#allocation2 + $0xcc] ss:$24 sps:$4 sm:$0xff]  }
 0x17f   : > { %1252 = vmatpush1.bf16.msra.mxu0 %v20956_v1 }
 0x180   : > { %1375 = vmatprep.subr.bf16.mxu0 %v18852_v62  ;;  %v21207_v62 = vld [vmem:[%s20775_s28 + $0x70] sm:$0xff]  }
 0x181   : > { %16272 = vmatmul.mubr.msk.bf16.gmra.mrb[20].mxu0 %vm630_vm1, %v20844_v27  ;;  %16366 = vmatmul.mubr.msk.bf16.vlgmr.msra.gmra.mrb[8].mxu1 %vm630_vm1, %v20952_v63  ;;  %v21074_v27 = vld [vmem:[#allocation2 + $0x1b4] ss:$24 sps:$4 sm:$0x3f]  }
 0x182   : > { %2260 = vmatpush1.bf16.msra.mxu1 %v20768_v3  ;;  %1122 = vmatprep.mubr.bf16.mxu0 %v24298_v0  ;;  %v20980_v3 = vld [vmem:[%s20775_s28 + $0x70] sm:$0xff]  }
 0x183   : > { %2036 = vmatprep.mubr.bf16.mxu1 %v24298_v0  ;;  %16373 = vmatprep.subr.msk.bf16.mxu1 %vm640_vm0, %v20778_v5  ;;  %v20990_v5 = vsel %vm640_vm0, %v18857_v12, 0  ;;  %v21241_v12 = vld [vmem:[#allocation2 + $0xc8] ss:$24 sps:$4 sm:$0xff]  }
 0x184   : > { %24552 = vst [vmem:[#allocation33_spill] sm:$0xff] %v20990_v5 }
 0x186   : > { %2262 = vmatpush1.bf16.msra.mxu1 %v20792_v10 }
 0x187   : > { %2322 = vmatprep.subr.bf16.mxu1 %v20765_v2  ;;  %v18858_v2 = vld [vmem:[#allocation2 + $0x124] ss:$24 sps:$4 sm:$0xff]  }
 0x189   : > { %16273 = vmatmul.mubr.msk.bf16.gmra.mrb[24].mxu0 %vm630_vm1, %v20866_v33  ;;  %16367 = vmatmul.mubr.msk.bf16.gmra.mrb[0].mxu1 %vm630_vm1, %v20967_v7  ;;  %v21096_v33 = vld [vmem:[#allocation2 + $0x8] ss:$24 sps:$4 sm:$0xff]  }
 0x18a   : > { %1281 = vmatprep.mubr.bf16.mxu0 %v24298_v0  ;;  %2046 = vmatprep.mubr.bf16.mxu1 %v24298_v0 }
 0x191   : > { %16296 = vmatmul.mubr.msk.bf16.vlgmr.msra.gmra.mrb[0].mxu0 %vm630_vm1, %v20881_v39  ;;  %16368 = vmatmul.mubr.msk.bf16.gmra.mrb[4].mxu1 %vm630_vm1, %v20980_v3 }
 0x192   : > { %1291 = vmatprep.mubr.bf16.mxu0 %v24298_v0  ;;  %2291 = vmatprep.mubr.bf16.mxu1 %v24298_v0 }
 0x193   : > { %1376 = vmatpush1.bf16.msra.mxu0 %v18854_v8  ;;  %v21231_v8 = vld [vmem:[#allocation2 + $0x74] ss:$24 sps:$4 sm:$0xff]  }
 0x194   : > { %16303 = vmatprep.subr.msk.bf16.mxu0 %vm640_vm0, %v18855_v9  ;;  %v21237_v9 = vld [vmem:[%s20775_s28 + $0x50] sm:$0xff]  }
 0x197   : > { %1378 = vmatpush1.bf16.msra.mxu0 %v20990_v5 }
 0x198   : > { %1590 = vmatprep.subr.bf16.mxu0 %v18858_v2  ;;  %v21246_v2 = vld [vmem:[#allocation2 + $0xfc] ss:$24 sps:$4 sm:$0x3f]  }
 0x199   : > { %16297 = vmatmul.mubr.msk.bf16.gmra.mrb[4].mxu0 %vm630_vm1, %v20891_v44  ;;  %16374 = vmatmul.mubr.msk.bf16.vlgmr.msra.gmra.mrb[12].mxu1 %vm630_vm1, %v20881_v39 }
 0x19a   : > { %2323 = vmatpush1.bf16.msra.mxu1 %v20770_v4  ;;  %1301 = vmatprep.mubr.bf16.mxu0 %v24298_v0  ;;  %v18860_v4 = vld [vmem:[#allocation2 + $0x120] ss:$24 sps:$4 sm:$0xff]  }
 0x19b   : > { %2301 = vmatprep.mubr.bf16.mxu1 %v24298_v0  ;;  %16377 = vmatprep.subr.msk.bf16.mxu1 %vm640_vm0, %v20782_v6  ;;  %v18864_v6 = vld [vmem:[#allocation2 + $0x134] ss:$24 sps:$4 sm:$0xff]  }
 0x19e   : > { %2325 = vmatpush1.bf16.msra.mxu1 %v20795_v11 }
 0x19f   : > { %2385 = vmatprep.subr.bf16.mxu1 %v20820_v20  ;;  %v18870_v20 = vld [vmem:[#allocation2 + $0x184] ss:$24 sps:$4 sm:$0xff]  }
 0x1a1   : > { %16298 = vmatmul.mubr.msk.bf16.gmra.mrb[8].mxu0 %vm630_vm1, %v20905_v46  ;;  %16375 = vmatmul.mubr.msk.bf16.gmra.mrb[16].mxu1 %vm630_vm1, %v20891_v44 }
 0x1a2   : > { %1407 = vmatprep.mubr.bf16.mxu0 %v24298_v0  ;;  %2311 = vmatprep.mubr.bf16.mxu1 %v24298_v0 }
 0x1a9   : > { %16304 = vmatmul.mubr.msk.bf16.vlgmr.msra.gmra.mrb[16].mxu0 %vm630_vm1, %v20881_v39  ;;  %16376 = vmatmul.mubr.msk.bf16.gmra.mrb[20].mxu1 %vm630_vm1, %v20905_v46 }
 0x1aa   : > { %1417 = vmatprep.mubr.bf16.mxu0 %v24298_v0  ;;  %2354 = vmatprep.mubr.bf16.mxu1 %v24298_v0 }
 0x1ab   : > { %1591 = vmatpush1.bf16.msra.mxu0 %v18860_v4  ;;  %v21251_v4 = vld [vmem:[#allocation2 + $0xd4] ss:$24 sps:$4 sm:$0xff]  }
 0x1ac   : > { %16328 = vmatprep.subr.msk.bf16.mxu0 %vm640_vm0, %v18861_v13  ;;  %24555 = vst [vmem:[#allocation36_spill] sm:$0xff] %v21251_v4  ;;  %v21257_v13 = vld [vmem:[%s20775_s28 + $0x58] sm:$0xff]  }
 0x1af   : > { %1593 = vmatpush1.bf16.msra.mxu0 %v21018_v15 }
 0x1b0   : > { %1716 = vmatprep.subr.bf16.mxu0 %v18864_v6  ;;  %v21272_v6 = vld [vmem:[#allocation2 + $0xa4] ss:$24 sps:$4 sm:$0x3f]  }
 0x1b1   : > { %16305 = vmatmul.mubr.msk.bf16.gmra.mrb[20].mxu0 %vm630_vm1, %v20891_v44  ;;  %16378 = vmatmul.mubr.msk.bf16.vlgmr.msra.gmra.mrb[24].mxu1 %vm630_vm1, %v20881_v39 }
 0x1b2   : > { %2386 = vmatpush1.bf16.msra.mxu1 %v20846_v28  ;;  %1427 = vmatprep.mubr.bf16.mxu0 %v24298_v0  ;;  %v18875_v28 = vld [vmem:[#allocation2 + $0x1b0] ss:$24 sps:$4 sm:$0x3f]  }
 0x1b3   : > { %2364 = vmatprep.mubr.bf16.mxu1 %v24298_v0  ;;  %16381 = vmatprep.subr.msk.bf16.mxu1 %vm640_vm0, %v20849_v30  ;;  %v21088_v30 = vsel %vm640_vm0, %v18875_v28, 0 }
 0x1b6   : > { %2388 = vmatpush1.bf16.msra.mxu1 %v20857_v31 }
 0x1b7   : > { %2448 = vmatprep.subr.bf16.mxu1 %v20863_v32  ;;  %v19822_v32 = vld [vmem:[%s20775_s28 + $0x18] sm:$0xff]  }
 0x1b9   : > { %16306 = vmatmul.mubr.msk.bf16.gmra.mrb[24].mxu0 %vm630_vm1, %v20905_v46  ;;  %16379 = vmatmul.mubr.msk.bf16.gmra.mrb[28].mxu1 %vm630_vm1, %v20891_v44 }
 0x1ba   : > { %1622 = vmatprep.mubr.bf16.mxu0 %v24298_v0  ;;  %2374 = vmatprep.mubr.bf16.mxu1 %v24298_v0 }
 0x1c1   : > { %16329 = vmatmul.mubr.msk.bf16.vlgmr.msra.gmra.mrb[0].mxu0 %vm630_vm1, %v20914_v51  ;;  %16380 = vmatmul.mubr.msk.bf16.gmra.mrb[32].mxu1 %vm630_vm1, %v20905_v46 }
 0x1c2   : > { %1632 = vmatprep.mubr.bf16.mxu0 %v24298_v0  ;;  %2417 = vmatprep.mubr.bf16.mxu1 %v24298_v0 }
 0x1c3   : > { %1717 = vmatpush1.bf16.msra.mxu0 %v18866_v16  ;;  %v21277_v16 = vld [vmem:[#allocation2 + $0x4] ss:$24 sps:$4 sm:$0xff]  }
 0x1c4   : > { %16336 = vmatprep.subr.msk.bf16.mxu0 %vm640_vm0, %v18867_v18  ;;  %24556 = vst [vmem:[#allocation37_spill] sm:$0xff] %v21277_v16  ;;  %v21284_v18 = vld [vmem:[#allocation2 + $0xd0] ss:$24 sps:$4 sm:$0xff]  }
 0x1c5   : > { %24557 = vst [vmem:[#allocation38_spill] sm:$0xff] %v21284_v18 }
 0x1c7   : > { %1719 = vmatpush1.bf16.msra.mxu0 %v21046_v21 }
 0x1c8   : > { %1931 = vmatprep.subr.bf16.mxu0 %v18870_v20  ;;  %v21294_v20 = vld [vmem:[#allocation2 + $0x124] ss:$24 sps:$4 sm:$0xff]  }
 0x1c9   : > { %16330 = vmatmul.mubr.msk.bf16.gmra.mrb[4].mxu0 %vm630_vm1, %v20928_v56  ;;  %16382 = vmatmul.mubr.msk.bf16.vlgmr.msra.gmra.mrb[36].mxu1 %vm630_vm1, %v20881_v39  ;;  %v21120_v39 = vld [vmem:[#allocation2 + $0x1c4] ss:$24 sps:$4 sm:$0x3f]   ;;  %24559 = vst [vmem:[#allocation40_spill] sm:$0xff] %v21294_v20 }
 0x1ca   : > { %2449 = vmatpush1.bf16.msra.mxu1 %v21053_v22  ;;  %1642 = vmatprep.mubr.bf16.mxu0 %v24298_v0 }
 0x1cb   : > { %2427 = vmatprep.mubr.bf16.mxu1 %v24298_v0  ;;  %16385 = vmatprep.subr.msk.bf16.mxu1 %vm640_vm0, %v21058_v23 }
 0x1ce   : > { %2451 = vmatpush1.bf16.msra.mxu1 %v20878_v37 }
 0x1cf   : > { %2511 = vmatprep.subr.bf16.mxu1 %v21063_v24 }
 0x1d1   : > { %16331 = vmatmul.mubr.msk.bf16.gmra.mrb[8].mxu0 %vm630_vm1, %v20943_v58  ;;  %16383 = vmatmul.mubr.msk.bf16.gmra.mrb[40].mxu1 %vm630_vm1, %v20891_v44  ;;  %v21141_v44 = vld [vmem:[#allocation2 + $0x10] ss:$24 sps:$4 sm:$0xff]  }
 0x1d2   : > { %1748 = vmatprep.mubr.bf16.mxu0 %v24298_v0  ;;  %2437 = vmatprep.mubr.bf16.mxu1 %v24298_v0 }
 0x1d9   : > { %16337 = vmatmul.mubr.msk.bf16.vlgmr.msra.gmra.mrb[16].mxu0 %vm630_vm1, %v20914_v51  ;;  %16384 = vmatmul.mubr.msk.bf16.gmra.mrb[44].mxu1 %vm630_vm1, %v20905_v46  ;;  %v21146_v46 = vld [vmem:[#allocation2 + $0x44] ss:$24 sps:$4 sm:$0x3f]  }
 0x1da   : > { %1758 = vmatprep.mubr.bf16.mxu0 %v24298_v0  ;;  %2480 = vmatprep.mubr.bf16.mxu1 %v24298_v0  ;;  %v21176_v51 = vld [vmem:[#allocation2 + $0x6c] ss:$24 sps:$4 sm:$0xff]  }
 0x1db   : > { %1932 = vmatpush1.bf16.msra.mxu0 %v21072_v26 }
 0x1dc   : > { %16361 = vmatprep.subr.msk.bf16.mxu0 %vm640_vm0, %v21074_v27 }
 0x1df   : > { %1934 = vmatpush1.bf16.msra.mxu0 %v21088_v30 }
 0x1e0   : > { %2057 = vmatprep.subr.bf16.mxu0 %v21082_v29 }
 0x1e1   : > { %16338 = vmatmul.mubr.msk.bf16.gmra.mrb[20].mxu0 %vm630_vm1, %v20928_v56  ;;  %16386 = vmatmul.mubr.msk.bf16.vlgmr.msra.gmra.mrb[12].mxu1 %vm630_vm1, %v19822_v32 }
 0x1e2   : > { %2512 = vmatpush1.bf16.msra.mxu1 %v21096_v33  ;;  %1768 = vmatprep.mubr.bf16.mxu0 %v24298_v0 }
 0x1e3   : > { %2490 = vmatprep.mubr.bf16.mxu1 %v24298_v0  ;;  %16389 = vmatprep.subr.msk.bf16.mxu1 %vm640_vm0, %v21101_v34 }
 0x1e6   : > { %2514 = vmatpush1.bf16.msra.mxu1 %v20811_v17 }
 0x1e7   : > { %2574 = vmatprep.subr.bf16.mxu1 %v21106_v35 }
 0x1e9   : > { %16339 = vmatmul.mubr.msk.bf16.gmra.mrb[24].mxu0 %vm630_vm1, %v20943_v58  ;;  %16387 = vmatmul.mubr.msk.bf16.gmra.mrb[16].mxu1 %vm630_vm1, %v21112_v36 }
 0x1ea   : > { %1963 = vmatprep.mubr.bf16.mxu0 %v24298_v0  ;;  %2500 = vmatprep.mubr.bf16.mxu1 %v24298_v0 }
 0x1f1   : > { %16362 = vmatmul.mubr.msk.bf16.vlgmr.msra.gmra.mrb[0].mxu0 %vm630_vm1, %v20952_v63  ;;  %16388 = vmatmul.mubr.msk.bf16.gmra.mrb[20].mxu1 %vm630_vm1, %v19827_v41  ;;  %v21217_v63 = vld [vmem:[%s20775_s28 + $0x48] sm:$0xff]  }
 0x1f2   : > { %1973 = vmatprep.mubr.bf16.mxu0 %v24298_v0  ;;  %2543 = vmatprep.mubr.bf16.mxu1 %v24298_v0 }
 0x1f3   : > { %2058 = vmatpush1.bf16.msra.mxu0 %v21118_v38 }
 0x1f4   : > { %16369 = vmatprep.subr.msk.bf16.mxu0 %vm640_vm0, %v21120_v39 }
 0x1f7   : > { %2060 = vmatpush1.bf16.msra.mxu0 %v21132_v42 }
 0x1f8   : > { %3469 = vmatprep.subr.bf16.mxu0 %v21135_v43 }
 0x1f9   : > { %16363 = vmatmul.mubr.msk.bf16.gmra.mrb[4].mxu0 %vm630_vm1, %v20967_v7  ;;  %16390 = vmatmul.mubr.msk.bf16.vlgmr.msra.gmra.mrb[24].mxu1 %vm630_vm1, %v19822_v32  ;;  %v21223_v7 = vld [vmem:[#allocation2 + $0x68] ss:$24 sps:$4 sm:$0xff]  }
 0x1fa   : > { %2575 = vmatpush1.bf16.msra.mxu1 %v21141_v44  ;;  %1983 = vmatprep.mubr.bf16.mxu0 %v24298_v0 }
 0x1fb   : > { %2553 = vmatprep.mubr.bf16.mxu1 %v24298_v0  ;;  %16393 = vmatprep.subr.msk.bf16.mxu1 %vm640_vm0, %v21146_v46 }
 0x1fe   : > { %2577 = vmatpush1.bf16.msra.mxu1 %v20918_v53 }
 0x1ff   : > { %2637 = vmatprep.subr.bf16.mxu1 %v21151_v47 }
 0x201   : > { %16364 = vmatmul.mubr.msk.bf16.gmra.mrb[8].mxu0 %vm630_vm1, %v20980_v3  ;;  %16391 = vmatmul.mubr.msk.bf16.gmra.mrb[28].mxu1 %vm630_vm1, %v21112_v36  ;;  %v21226_v3 = vld [vmem:[#allocation2 + $0x9c] ss:$24 sps:$4 sm:$0x3f]  }
 0x202   : > { %2089 = vmatprep.mubr.bf16.mxu0 %v24298_v0  ;;  %2563 = vmatprep.mubr.bf16.mxu1 %v24298_v0 }
 0x209   : > { %16370 = vmatmul.mubr.msk.bf16.vlgmr.msra.gmra.mrb[16].mxu0 %vm630_vm1, %v21161_v48  ;;  %16392 = vmatmul.mubr.msk.bf16.gmra.mrb[32].mxu1 %vm630_vm1, %v19827_v41 }
 0x20a   : > { %2099 = vmatprep.mubr.bf16.mxu0 %v24298_v0  ;;  %2606 = vmatprep.mubr.bf16.mxu1 %v24298_v0 }
 0x20b   : > { %3470 = vmatpush1.bf16.msra.mxu0 %v21168_v49 }
 0x20c   : > { %16442 = vmatprep.subr.msk.bf16.mxu0 %vm640_vm0, %v21171_v50 }
 0x20f   : > { %3472 = vmatpush1.bf16.msra.mxu0 %v20792_v10 }
 0x210   : > { %3532 = vmatprep.subr.bf16.mxu0 %v21176_v51 }
 0x211   : > { %16371 = vmatmul.mubr.msk.bf16.gmra.mrb[20].mxu0 %vm630_vm1, %v21180_v52  ;;  %16394 = vmatmul.mubr.msk.bf16.vlgmr.msra.gmra.mrb[36].mxu1 %vm630_vm1, %v19822_v32 }
 0x212   : > { %2638 = vmatpush1.bf16.msra.mxu1 %v21185_v54  ;;  %2109 = vmatprep.mubr.bf16.mxu0 %v24298_v0 }
 0x213   : > { %2616 = vmatprep.mubr.bf16.mxu1 %v24298_v0  ;;  %16397 = vmatprep.subr.msk.bf16.mxu1 %vm640_vm0, %v21190_v55 }
 0x214   : > { %v21194_v56 = vpop.f32.mrb[12].mxu0 }
 0x215   : > { %v21196_v58 = vpop.f32.mrb[13].mxu0 }
 0x216   : > { %2640 = vmatpush1.bf16.msra.mxu1 %v20956_v1  ;;  %v21199_v59 = vpop.f32.mrb[14].mxu0 }
 0x217   : > { %2700 = vmatprep.subr.bf16.mxu1 %v21201_v60  ;;  %v21204_v61 = vpop.f32.mrb[15].mxu0 }
 0x219   : > { %16372 = vmatmul.mubr.msk.bf16.gmra.mrb[24].mxu0 %vm630_vm1, %v21207_v62  ;;  %16395 = vmatmul.mubr.msk.bf16.gmra.mrb[40].mxu1 %vm630_vm1, %v21112_v36 }
 0x21a   : > { %2626 = vmatprep.mubr.bf16.mxu1 %v24298_v0  ;;  %3501 = vmatprep.mubr.bf16.mxu0 %v24298_v0 }
 0x221   : > { %16396 = vmatmul.mubr.msk.bf16.gmra.mrb[44].mxu1 %vm630_vm1, %v19827_v41  ;;  %16443 = vmatmul.mubr.msk.bf16.vlgmr.msra.gmra.mrb[28].mxu0 %vm630_vm1, %v21217_v63 }
 0x222   : > { %2669 = vmatprep.mubr.bf16.mxu1 %v24298_v0  ;;  %3511 = vmatprep.mubr.bf16.mxu0 %v24298_v0 }
 0x223   : > { %3533 = vmatpush1.bf16.msra.mxu0 %v21223_v7 }
 0x224   : > { %16446 = vmatprep.subr.msk.bf16.mxu0 %vm640_vm0, %v21226_v3 }
 0x227   : > { %3535 = vmatpush1.bf16.msra.mxu0 %v20795_v11 }
 0x228   : > { %3595 = vmatprep.subr.bf16.mxu0 %v21231_v8 }
 0x229   : > { %16398 = vmatmul.mubr.msk.bf16.vlgmr.msra.gmra.mrb[12].mxu1 %vm630_vm1, %v21217_v63  ;;  %16444 = vmatmul.mubr.msk.bf16.gmra.mrb[32].mxu0 %vm630_vm1, %v21237_v9 }
 0x22a   : > { %2701 = vmatpush1.bf16.msra.mxu1 %v21241_v12  ;;  %2679 = vmatprep.mubr.bf16.mxu1 %v24298_v0 }
 0x22b   : > { %3521 = vmatprep.mubr.bf16.mxu0 %v24298_v0  ;;  %16401 = vmatprep.subr.msk.bf16.mxu1 %vm640_vm0, %v21246_v2 }
 0x22e   : > { %2703 = vmatpush1.bf16.msra.mxu1 %v20839_v25 }
 0x22f   : > { %2763 = vmatprep.subr.bf16.mxu1 %v21251_v4 }
 0x231   : > { %16399 = vmatmul.mubr.msk.bf16.gmra.mrb[16].mxu1 %vm630_vm1, %v21237_v9  ;;  %16445 = vmatmul.mubr.msk.bf16.gmra.mrb[36].mxu0 %vm630_vm1, %v21257_v13 }
 0x232   : > { %2689 = vmatprep.mubr.bf16.mxu1 %v24298_v0  ;;  %3564 = vmatprep.mubr.bf16.mxu0 %v24298_v0 }
 0x239   : > { %16400 = vmatmul.mubr.msk.bf16.gmra.mrb[20].mxu1 %vm630_vm1, %v21257_v13  ;;  %16447 = vmatmul.mubr.msk.bf16.vlgmr.msra.gmra.mrb[40].mxu0 %vm630_vm1, %v21217_v63 }
 0x23a   : > { %2732 = vmatprep.mubr.bf16.mxu1 %v24298_v0  ;;  %3574 = vmatprep.mubr.bf16.mxu0 %v24298_v0 }
 0x23b   : > { %3596 = vmatpush1.bf16.msra.mxu0 %v21269_v14 }
 0x23c   : > { %16450 = vmatprep.subr.msk.bf16.mxu0 %vm640_vm0, %v21272_v6 }
 0x23f   : > { %3598 = vmatpush1.bf16.msra.mxu0 %v20857_v31 }
 0x240   : > { %3658 = vmatprep.subr.bf16.mxu0 %v21277_v16 }
 0x241   : > { %16402 = vmatmul.mubr.msk.bf16.vlgmr.msra.gmra.mrb[24].mxu1 %vm630_vm1, %v21217_v63  ;;  %16448 = vmatmul.mubr.msk.bf16.gmra.mrb[44].mxu0 %vm630_vm1, %v21237_v9 }
 0x242   : > { %2764 = vmatpush1.bf16.msra.mxu1 %v21284_v18  ;;  %2742 = vmatprep.mubr.bf16.mxu1 %v24298_v0 }
 0x243   : > { %3584 = vmatprep.mubr.bf16.mxu0 %v24298_v0  ;;  %16405 = vmatprep.subr.msk.bf16.mxu1 %vm640_vm0, %v21289_v19 }
 0x246   : > { %2766 = vmatpush1.bf16.msra.mxu1 %v20990_v5 }
 0x247   : > { %2862 = vmatprep.subr.bf16.mxu1 %v21294_v20 }
 0x249   : > { %16403 = vmatmul.mubr.msk.bf16.gmra.mrb[28].mxu1 %vm630_vm1, %v21237_v9  ;;  %16449 = vmatmul.mubr.msk.bf16.gmra.mrb[48].mxu0 %vm630_vm1, %v21257_v13 }
 0x24a   : > { %2752 = vmatprep.mubr.bf16.mxu1 %v24298_v0  ;;  %3627 = vmatprep.mubr.bf16.mxu0 %v24298_v0 }
 0x251   : > { %16404 = vmatmul.mubr.msk.bf16.gmra.mrb[32].mxu1 %vm630_vm1, %v21257_v13  ;;  %16451 = vmatmul.mubr.msk.bf16.vlgmr.msra.gmra.mrb[52].mxu0 %vm630_vm1, %v21217_v63 }
 0x252   : > { %2795 = vmatprep.mubr.bf16.mxu1 %v24298_v0  ;;  %3637 = vmatprep.mubr.bf16.mxu0 %v24298_v0 }
 0x253   : > { %3659 = vmatpush1.bf16.msra.mxu0 %v21053_v22 }
 0x254   : > { %v2028_v28 = vpop.f32.mrb[8].mxu1  ;;  %16454 = vmatprep.subr.msk.bf16.mxu0 %vm640_vm0, %v21058_v23  ;;  %v21330_v23 = vld [vmem:[#allocation2 + $0x120] ss:$24 sps:$4 sm:$0xff]  }
 0x255   : > { %v21313_v32 = vadd.f32 %v2028_v28, %v21194_v56  ;;  %v2030_v36 = vpop.f32.mrb[9].mxu1  ;;  %v21335_v56 = vld [vmem:[#allocation2 + $0x154] ss:$24 sps:$4 sm:$0x3f]  }
 0x256   : > { %v21316_v40 = vadd.f32 %v2030_v36, %v21196_v58  ;;  %v2032_v41 = vpop.f32.mrb[10].mxu1 }
 0x257   : > { %24560 = vst [vmem:[#allocation41_spill] sm:$0xff] %v21313_v32  ;;  %v21319_v16 = vadd.f32 %v2032_v41, %v21199_v59  ;;  %v2034_v31 = vpop.f32.mrb[11].mxu1  ;;  %3661 = vmatpush1.bf16.msra.mxu0 %v20878_v37 }
 0x258   : > { %24561 = vst [vmem:[#allocation42_spill] sm:$0xff] %v21316_v40  ;;  %v21323_v22 = vadd.f32 %v2034_v31, %v21204_v61  ;;  %3721 = vmatprep.subr.bf16.mxu0 %v21063_v24  ;;  %v21348_v61 = vld [vmem:[#allocation2 + $0x12c] ss:$24 sps:$4 sm:$0xff]  }
 0x259   : > { %24562 = vst [vmem:[#allocation43_spill] sm:$0xff] %v21319_v16  ;;  %16406 = vmatmul.mubr.msk.bf16.vlgmr.msra.gmra.mrb[36].mxu1 %vm630_vm1, %v21217_v63  ;;  %16452 = vmatmul.mubr.msk.bf16.gmra.mrb[56].mxu0 %vm630_vm1, %v21237_v9  ;;  %24568 = vst [vmem:[#allocation49_spill] sm:$0xff] %v21348_v61 }
 0x25a   : > { %24563 = vst [vmem:[#allocation44_spill] sm:$0xff] %v21323_v22  ;;  %2863 = vmatpush1.bf16.msra.mxu1 %v21330_v23  ;;  %2805 = vmatprep.mubr.bf16.mxu1 %v24298_v0 }
 0x25b   : > { %3647 = vmatprep.mubr.bf16.mxu0 %v24298_v0  ;;  %16409 = vmatprep.subr.msk.bf16.mxu1 %vm640_vm0, %v21335_v56 }
 0x25c   : > { %v21339_v31 = vpop.f32.mrb[0].mxu1 }
 0x25d   : > { %24564 = vst [vmem:[#allocation45_spill] sm:$0xff] %v21339_v31  ;;  %v21341_v24 = vpop.f32.mrb[1].mxu1 }
 0x25e   : > { %24565 = vst [vmem:[#allocation46_spill] sm:$0xff] %v21341_v24  ;;  %v21343_v58 = vpop.f32.mrb[2].mxu1  ;;  %2865 = vmatpush1.bf16.msra.mxu1 %v21018_v15  ;;  %v21498_v24 = vld [vmem:[%s20775_s28 + $0x88] sm:$0xff]  }
 0x25f   : > { %24566 = vst [vmem:[#allocation47_spill] sm:$0xff] %v21343_v58  ;;  %v21346_v59 = vpop.f32.mrb[3].mxu1  ;;  %2925 = vmatprep.subr.bf16.mxu1 %v21348_v61  ;;  %v19859_v58 = vld [vmem:[%s20775_s28 + $0x30] sm:$0xff]  }
 0x260   : > { %24567 = vst [vmem:[#allocation48_spill] sm:$0xff] %v21346_v59 }
 0x261   : > { %16407 = vmatmul.mubr.msk.bf16.gmra.mrb[40].mxu1 %vm630_vm1, %v21237_v9  ;;  %16453 = vmatmul.mubr.msk.bf16.gmra.mrb[60].mxu0 %vm630_vm1, %v21257_v13 }
 0x262   : > { %2815 = vmatprep.mubr.bf16.mxu1 %v24298_v0  ;;  %3690 = vmatprep.mubr.bf16.mxu0 %v24298_v0 }
 0x264   : > { %v21357_v28 = vpop.f32.mrb[4].mxu1 }
 0x265   : > { %24569 = vst [vmem:[#allocation50_spill] sm:$0xff] %v21357_v28  ;;  %v21359_v36 = vpop.f32.mrb[5].mxu1 }
 0x266   : > { %24570 = vst [vmem:[#allocation51_spill] sm:$0xff] %v21359_v36  ;;  %v21361_v41 = vpop.f32.mrb[6].mxu1  ;;  %v21412_v36 = vld [vmem:[#allocation2 + $0x130] ss:$24 sps:$4 sm:$0xff]  }
 0x267   : > { %24571 = vst [vmem:[#allocation52_spill] sm:$0xff] %v21361_v41  ;;  %v21363_v59 = vpop.f32.mrb[7].mxu1  ;;  %v21380_v41 = vld [vmem:[#allocation2 + $0x128] ss:$24 sps:$4 sm:$0xff]  }
 0x268   : > { %24572 = vst [vmem:[#allocation53_spill] sm:$0xff] %v21363_v59  ;;  %v19860_v59 = vld [vmem:[%s20775_s28 + $0x38] sm:$0xff]  }
 0x269   : > { %16408 = vmatmul.mubr.msk.bf16.gmra.mrb[44].mxu1 %vm630_vm1, %v21257_v13  ;;  %16455 = vmatmul.mubr.msk.bf16.vlgmr.msra.gmra.mrb[28].mxu0 %vm630_vm1, %v19859_v58 }
 0x26a   : > { %2894 = vmatprep.mubr.bf16.mxu1 %v24298_v0  ;;  %3700 = vmatprep.mubr.bf16.mxu0 %v24298_v0 }
 0x26b   : > { %3722 = vmatpush1.bf16.msra.mxu0 %v21096_v33  ;;  %v21385_v33 = vld [vmem:[#allocation2 + $0x15c] ss:$24 sps:$4 sm:$0x3f]  }
 0x26c   : > { %16458 = vmatprep.subr.msk.bf16.mxu0 %vm640_vm0, %v21101_v34  ;;  %v21390_v34 = vld [vmem:[#allocation2 + $0x134] ss:$24 sps:$4 sm:$0xff]  }
 0x26f   : > { %3724 = vmatpush1.bf16.msra.mxu0 %v20811_v17 }
 0x270   : > { %3784 = vmatprep.subr.bf16.mxu0 %v21106_v35  ;;  %v19864_v35 = vld [vmem:[%s20775_s28 + $0x40] sm:$0xff]  }
 0x271   : > { %16410 = vmatmul.mubr.msk.bf16.vlgmr.msra.gmra.mrb[12].mxu1 %vm630_vm1, %v21161_v48  ;;  %16456 = vmatmul.mubr.msk.bf16.gmra.mrb[32].mxu0 %vm630_vm1, %v19860_v59 }
 0x272   : > { %2926 = vmatpush1.bf16.msra.mxu1 %v21380_v41  ;;  %2904 = vmatprep.mubr.bf16.mxu1 %v24298_v0 }
 0x273   : > { %3710 = vmatprep.mubr.bf16.mxu0 %v24298_v0  ;;  %16413 = vmatprep.subr.msk.bf16.mxu1 %vm640_vm0, %v21385_v33 }
 0x276   : > { %2928 = vmatpush1.bf16.msra.mxu1 %v20895_v45 }
 0x277   : > { %2988 = vmatprep.subr.bf16.mxu1 %v21390_v34 }
 0x279   : > { %16411 = vmatmul.mubr.msk.bf16.gmra.mrb[16].mxu1 %vm630_vm1, %v21180_v52  ;;  %16457 = vmatmul.mubr.msk.bf16.gmra.mrb[36].mxu0 %vm630_vm1, %v19864_v35 }
 0x27a   : > { %2914 = vmatprep.mubr.bf16.mxu1 %v24298_v0  ;;  %3753 = vmatprep.mubr.bf16.mxu0 %v24298_v0 }
 0x281   : > { %16412 = vmatmul.mubr.msk.bf16.gmra.mrb[20].mxu1 %vm630_vm1, %v21207_v62  ;;  %16459 = vmatmul.mubr.msk.bf16.vlgmr.msra.gmra.mrb[40].mxu0 %vm630_vm1, %v19859_v58 }
 0x282   : > { %2957 = vmatprep.mubr.bf16.mxu1 %v24298_v0  ;;  %3763 = vmatprep.mubr.bf16.mxu0 %v24298_v0 }
 0x283   : > { %3785 = vmatpush1.bf16.msra.mxu0 %v21141_v44  ;;  %v21417_v44 = vld [vmem:[#allocation2 + $0x164] ss:$24 sps:$4 sm:$0x3f]  }
 0x284   : > { %16462 = vmatprep.subr.msk.bf16.mxu0 %vm640_vm0, %v21146_v46  ;;  %v21422_v46 = vld [vmem:[#allocation2 + $0x184] ss:$24 sps:$4 sm:$0xff]  }
 0x287   : > { %3787 = vmatpush1.bf16.msra.mxu0 %v20918_v53 }
 0x288   : > { %3847 = vmatprep.subr.bf16.mxu0 %v21151_v47 }
 0x289   : > { %16414 = vmatmul.mubr.msk.bf16.vlgmr.msra.gmra.mrb[24].mxu1 %vm630_vm1, %v21161_v48  ;;  %16460 = vmatmul.mubr.msk.bf16.gmra.mrb[44].mxu0 %vm630_vm1, %v19860_v59 }
 0x28a   : > { %2989 = vmatpush1.bf16.msra.mxu1 %v21412_v36  ;;  %2967 = vmatprep.mubr.bf16.mxu1 %v24298_v0 }
 0x28b   : > { %3773 = vmatprep.mubr.bf16.mxu0 %v24298_v0  ;;  %16417 = vmatprep.subr.msk.bf16.mxu1 %vm640_vm0, %v21417_v44 }
 0x28e   : > { %2991 = vmatpush1.bf16.msra.mxu1 %v21046_v21 }
 0x28f   : > { %3118 = vmatprep.subr.bf16.mxu1 %v21422_v46 }
 0x291   : > { %16415 = vmatmul.mubr.msk.bf16.gmra.mrb[28].mxu1 %vm630_vm1, %v21180_v52  ;;  %16461 = vmatmul.mubr.msk.bf16.gmra.mrb[48].mxu0 %vm630_vm1, %v19864_v35 }
 0x292   : > { %2977 = vmatprep.mubr.bf16.mxu1 %v24298_v0  ;;  %3816 = vmatprep.mubr.bf16.mxu0 %v24298_v0 }
 0x299   : > { %16416 = vmatmul.mubr.msk.bf16.gmra.mrb[32].mxu1 %vm630_vm1, %v21207_v62  ;;  %16463 = vmatmul.mubr.msk.bf16.vlgmr.msra.gmra.mrb[52].mxu0 %vm630_vm1, %v19859_v58  ;;  %v21449_v58 = vld [vmem:[#allocation2 + $0x18c] ss:$24 sps:$4 sm:$0xff]  }
 0x29a   : > { %3020 = vmatprep.mubr.bf16.mxu1 %v24298_v0  ;;  %3826 = vmatprep.mubr.bf16.mxu0 %v24298_v0 }
 0x29b   : > { %3848 = vmatpush1.bf16.msra.mxu0 %v21185_v54 }
 0x29c   : > { %16466 = vmatprep.subr.msk.bf16.mxu0 %vm640_vm0, %v21190_v55 }
 0x29f   : > { %3850 = vmatpush1.bf16.msra.mxu0 %v20956_v1 }
 0x2a0   : > { %3910 = vmatprep.subr.bf16.mxu0 %v21201_v60 }
 0x2a1   : > { %16418 = vmatmul.mubr.msk.bf16.vlgmr.msra.gmra.mrb[36].mxu1 %vm630_vm1, %v21161_v48  ;;  %16464 = vmatmul.mubr.msk.bf16.gmra.mrb[56].mxu0 %vm630_vm1, %v19860_v59  ;;  %v21480_v59 = vld [vmem:[#allocation2 + $0x1bc] ss:$24 sps:$4 sm:$0x3f]  }
 0x2a2   : > { %3119 = vmatpush1.bf16.msra.mxu1 %v21072_v26  ;;  %3030 = vmatprep.mubr.bf16.mxu1 %v24298_v0  ;;  %v21467_v26 = vld [vmem:[%s20775_s28 + $0x78] sm:$0xff]  }
 0x2a3   : > { %3836 = vmatprep.mubr.bf16.mxu0 %v24298_v0  ;;  %16430 = vmatprep.subr.msk.bf16.mxu1 %vm640_vm0, %v21074_v27  ;;  %v21475_v27 = vld [vmem:[#allocation2 + $0x188] ss:$24 sps:$4 sm:$0xff]  }
 0x2a6   : > { %3121 = vmatpush1.bf16.msra.mxu1 %v21088_v30 }
 0x2a7   : > { %3181 = vmatprep.subr.bf16.mxu1 %v21449_v58 }
 0x2a9   : > { %16419 = vmatmul.mubr.msk.bf16.gmra.mrb[40].mxu1 %vm630_vm1, %v21180_v52  ;;  %16465 = vmatmul.mubr.msk.bf16.gmra.mrb[60].mxu0 %vm630_vm1, %v19864_v35  ;;  %v21485_v35 = vld [vmem:[%s20775_s28 + $0x80] sm:$0xff]  }
 0x2aa   : > { %3040 = vmatprep.mubr.bf16.mxu1 %v24298_v0  ;;  %3879 = vmatprep.mubr.bf16.mxu0 %v24298_v0 }
 0x2b1   : > { %16420 = vmatmul.mubr.msk.bf16.gmra.mrb[44].mxu1 %vm630_vm1, %v21207_v62  ;;  %16467 = vmatmul.mubr.msk.bf16.vlgmr.msra.gmra.mrb[28].mxu0 %vm630_vm1, %v21161_v48 }
 0x2b2   : > { %3150 = vmatprep.mubr.bf16.mxu1 %v24298_v0  ;;  %3889 = vmatprep.mubr.bf16.mxu0 %v24298_v0 }
 0x2b3   : > { %3911 = vmatpush1.bf16.msra.mxu0 %v21241_v12 }
 0x2b4   : > { %16470 = vmatprep.subr.msk.bf16.mxu0 %vm640_vm0, %v21246_v2 }
 0x2b7   : > { %3913 = vmatpush1.bf16.msra.mxu0 %v20839_v25 }
 0x2b8   : > { %3973 = vmatprep.subr.bf16.mxu0 %v21251_v4 }
 0x2b9   : > { %16431 = vmatmul.mubr.msk.bf16.vlgmr.msra.gmra.mrb[12].mxu1 %vm630_vm1, %v21467_v26  ;;  %16468 = vmatmul.mubr.msk.bf16.gmra.mrb[32].mxu0 %vm630_vm1, %v21180_v52 }
 0x2ba   : > { %3182 = vmatpush1.bf16.msra.mxu1 %v21475_v27  ;;  %3160 = vmatprep.mubr.bf16.mxu1 %v24298_v0 }
 0x2bb   : > { %3899 = vmatprep.mubr.bf16.mxu0 %v24298_v0  ;;  %16434 = vmatprep.subr.msk.bf16.mxu1 %vm640_vm0, %v21480_v59 }
 0x2be   : > { %3184 = vmatpush1.bf16.msra.mxu1 %v20932_v57 }
 0x2bf   : > { %3244 = vmatprep.subr.bf16.mxu1 %v21082_v29 }
 0x2c1   : > { %16432 = vmatmul.mubr.msk.bf16.gmra.mrb[16].mxu1 %vm630_vm1, %v21485_v35  ;;  %16469 = vmatmul.mubr.msk.bf16.gmra.mrb[36].mxu0 %vm630_vm1, %v21207_v62 }
 0x2c2   : > { %3170 = vmatprep.mubr.bf16.mxu1 %v24298_v0  ;;  %3942 = vmatprep.mubr.bf16.mxu0 %v24298_v0 }
 0x2c4   : > { %v21495_v28 = vpop.f32.mrb[0].mxu0 }
 0x2c5   : > { %v21500_v31 = vpop.f32.mrb[1].mxu0 }
 0x2c6   : > { %v21502_v22 = vpop.f32.mrb[2].mxu0 }
 0x2c7   : > { %v21504_v16 = vpop.f32.mrb[3].mxu0 }
 0x2c9   : > { %16433 = vmatmul.mubr.msk.bf16.gmra.mrb[20].mxu1 %vm630_vm1, %v21498_v24  ;;  %16471 = vmatmul.mubr.msk.bf16.vlgmr.msra.gmra.mrb[40].mxu0 %vm630_vm1, %v21161_v48 }
 0x2ca   : > { %3213 = vmatprep.mubr.bf16.mxu1 %v24298_v0  ;;  %3952 = vmatprep.mubr.bf16.mxu0 %v24298_v0 }
 0x2cb   : > { %3974 = vmatpush1.bf16.msra.mxu0 %v21284_v18 }
 0x2cc   : > { %16474 = vmatprep.subr.msk.bf16.mxu0 %vm640_vm0, %v21289_v19  ;;  %v21515_v29 = vpop.f32.mrb[4].mxu0 }
 0x2cd   : > { %v21517_v40 = vpop.f32.mrb[5].mxu0 }
 0x2ce   : > { %v21519_v32 = vpop.f32.mrb[6].mxu0 }
 0x2cf   : > { %3976 = vmatpush1.bf16.msra.mxu0 %v20990_v5  ;;  %v21522_v4 = vpop.f32.mrb[7].mxu0 }
 0x2d0   : > { %4072 = vmatprep.subr.bf16.mxu0 %v21294_v20 }
 0x2d1   : > { %16435 = vmatmul.mubr.msk.bf16.vlgmr.msra.gmra.mrb[24].mxu1 %vm630_vm1, %v21467_v26  ;;  %16472 = vmatmul.mubr.msk.bf16.gmra.mrb[44].mxu0 %vm630_vm1, %v21180_v52 }
 0x2d2   : > { %3245 = vmatpush1.bf16.msra.mxu1 %v21118_v38  ;;  %3223 = vmatprep.mubr.bf16.mxu1 %v24298_v0 }
 0x2d3   : > { %3962 = vmatprep.mubr.bf16.mxu0 %v24298_v0  ;;  %16438 = vmatprep.subr.msk.bf16.mxu1 %vm640_vm0, %v21120_v39 }
 0x2d4   : > { %v21534_v5 = vpop.f32.mrb[8].mxu0 }
 0x2d5   : > { %v21536_v19 = vpop.f32.mrb[9].mxu0 }
 0x2d6   : > { %24573 = vst [vmem:[#allocation54_spill] sm:$0xff] %v21536_v19  ;;  %3247 = vmatpush1.bf16.msra.mxu1 %v21132_v42  ;;  %v21539_v20 = vpop.f32.mrb[10].mxu0 }
 0x2d7   : > { %24574 = vst [vmem:[#allocation55_spill] sm:$0xff] %v21539_v20  ;;  %4625 = vmatprep.subr.bf16.mxu1 %v21135_v43  ;;  %v21542_v18 = vpop.f32.mrb[11].mxu0 }
 0x2d9   : > { %16436 = vmatmul.mubr.msk.bf16.gmra.mrb[28].mxu1 %vm630_vm1, %v21485_v35  ;;  %16473 = vmatmul.mubr.msk.bf16.gmra.mrb[48].mxu0 %vm630_vm1, %v21207_v62 }
 0x2da   : > { %3233 = vmatprep.mubr.bf16.mxu1 %v24298_v0  ;;  %4005 = vmatprep.mubr.bf16.mxu0 %v24298_v0 }
 0x2dc   : > { %v21550_v38 = vpop.f32.mrb[16].mxu0 }
 0x2dd   : > { %v21552_v39 = vpop.f32.mrb[17].mxu0 }
 0x2de   : > { %24575 = vst [vmem:[#allocation56_spill] sm:$0xff] %v21552_v39  ;;  %v21554_v19 = vpop.f32.mrb[18].mxu0 }
 0x2df   : > { %24576 = vst [vmem:[#allocation57_spill] sm:$0xff] %v21554_v19  ;;  %v21556_v20 = vpop.f32.mrb[19].mxu0 }
 0x2e0   : > { %24577 = vst [vmem:[#allocation58_spill] sm:$0xff] %v21556_v20 }
 0x2e1   : > { %16437 = vmatmul.mubr.msk.bf16.gmra.mrb[32].mxu1 %vm630_vm1, %v21498_v24  ;;  %16475 = vmatmul.mubr.msk.bf16.vlgmr.msra.gmra.mrb[52].mxu0 %vm630_vm1, %v21161_v48 }
 0x2e2   : > { %3276 = vmatprep.mubr.bf16.mxu1 %v24298_v0  ;;  %4015 = vmatprep.mubr.bf16.mxu0 %v24298_v0 }
 0x2e3   : > { %4073 = vmatpush1.bf16.msra.mxu0 %v21330_v23 }
 0x2e4   : > { %16478 = vmatprep.subr.msk.bf16.mxu0 %vm640_vm0, %v21335_v56  ;;  %v21567_v43 = vpop.f32.mrb[20].mxu0 }
 0x2e5   : > { %v21569_v19 = vpop.f32.mrb[21].mxu0 }
 0x2e6   : > { %v21571_v20 = vpop.f32.mrb[22].mxu0 }
 0x2e7   : > { %24578 = vst [vmem:[#allocation59_spill] sm:$0xff] %v21571_v20  ;;  %4075 = vmatpush1.bf16.msra.mxu0 %v21018_v15  ;;  %v21574_v39 = vpop.f32.mrb[23].mxu0 }
 0x2e8   : > { %24579 = vst [vmem:[#allocation60_spill] sm:$0xff] %v21574_v39  ;;  %4135 = vmatprep.subr.bf16.mxu0 %v21348_v61 }
 0x2e9   : > { %16439 = vmatmul.mubr.msk.bf16.vlgmr.msra.gmra.mrb[36].mxu1 %vm630_vm1, %v21467_v26  ;;  %16476 = vmatmul.mubr.msk.bf16.gmra.mrb[56].mxu0 %vm630_vm1, %v21180_v52 }
 0x2ea   : > { %4626 = vmatpush1.bf16.msra.mxu1 %v21168_v49  ;;  %3286 = vmatprep.mubr.bf16.mxu1 %v24298_v0  ;;  %v21664_v49 = vld [vmem:[#allocation2 + $0x180] ss:$24 sps:$4 sm:$0xff]  }
 0x2eb   : > { %4025 = vmatprep.mubr.bf16.mxu0 %v24298_v0  ;;  %16511 = vmatprep.subr.msk.bf16.mxu1 %vm640_vm0, %v21171_v50  ;;  %v21667_v50 = vld [vmem:[#allocation2 + $0x1b4] ss:$24 sps:$4 sm:$0x3f]  }
 0x2ec   : > { %v21586_v15 = vpop.f32.mrb[24].mxu0 }
 0x2ed   : > { %v21588_v39 = vpop.f32.mrb[25].mxu0 }
 0x2ee   : > { %4628 = vmatpush1.bf16.msra.mxu1 %v20792_v10  ;;  %v21591_v61 = vpop.f32.mrb[26].mxu0  ;;  %v24580_v10 = vld [vmem:[#allocation32_spill] sm:$0xff] }
 0x2ef   : > { %4688 = vmatprep.subr.bf16.mxu1 %v21176_v51  ;;  %v21594_v20 = vpop.f32.mrb[27].mxu0  ;;  %v19873_v51 = vld [vmem:[#allocation2] ss:$24 sps:$4 sm:$0xff]  }
 0x2f1   : > { %16440 = vmatmul.mubr.msk.bf16.gmra.mrb[40].mxu1 %vm630_vm1, %v21485_v35  ;;  %16477 = vmatmul.mubr.msk.bf16.gmra.mrb[60].mxu0 %vm630_vm1, %v21207_v62 }
 0x2f2   : > { %3296 = vmatprep.mubr.bf16.mxu1 %v24298_v0  ;;  %4104 = vmatprep.mubr.bf16.mxu0 %v24298_v0 }
 0x2f9   : > { %16441 = vmatmul.mubr.msk.bf16.gmra.mrb[44].mxu1 %vm630_vm1, %v21498_v24  ;;  %16479 = vmatmul.mubr.msk.bf16.vlgmr.msra.gmra.mrb[28].mxu0 %vm630_vm1, %v21467_v26 }
 0x2fa   : > { %4114 = vmatprep.mubr.bf16.mxu0 %v24298_v0  ;;  %4657 = vmatprep.mubr.bf16.mxu1 %v24298_v0 }
 0x2fb   : > { %4136 = vmatpush1.bf16.msra.mxu0 %v21380_v41  ;;  %v19882_v41 = vld [vmem:[#allocation2 + $0x10] ss:$24 sps:$4 sm:$0xff]  }
 0x2fc   : > { %16482 = vmatprep.subr.msk.bf16.mxu0 %vm640_vm0, %v21385_v33  ;;  %v19883_v33 = vld [vmem:[#allocation2 + $0x44] ss:$24 sps:$4 sm:$0x3f]  }
 0x2ff   : > { %4138 = vmatpush1.bf16.msra.mxu0 %v20895_v45 }
 0x300   : > { %4198 = vmatprep.subr.bf16.mxu0 %v21390_v34 }
 0x301   : > { %16480 = vmatmul.mubr.msk.bf16.gmra.mrb[32].mxu0 %vm630_vm1, %v21485_v35  ;;  %16512 = vmatmul.mubr.msk.bf16.vlgmr.msra.gmra.mrb[48].mxu1 %vm630_vm1, %v21161_v48 }
 0x302   : > { %4689 = vmatpush1.bf16.msra.mxu1 %v21223_v7  ;;  %4124 = vmatprep.mubr.bf16.mxu0 %v24298_v0  ;;  %v19874_v7 = vld [vmem:[#allocation2 + $0x34] ss:$24 sps:$4 sm:$0x3f]  }
 0x303   : > { %4667 = vmatprep.mubr.bf16.mxu1 %v24298_v0  ;;  %16515 = vmatprep.subr.msk.bf16.mxu1 %vm640_vm0, %v21226_v3  ;;  %v19875_v3 = vld [vmem:[#allocation2 + $0xc] ss:$24 sps:$4 sm:$0xff]  }
 0x306   : > { %4691 = vmatpush1.bf16.msra.mxu1 %v20795_v11  ;;  %v24581_v11 = vld [vmem:[#allocation37_spill] sm:$0xff] }
 0x307   : > { %4751 = vmatprep.subr.bf16.mxu1 %v21231_v8  ;;  %v19878_v8 = vld [vmem:[#allocation2 + $0x3c] ss:$24 sps:$4 sm:$0x3f]  }
 0x309   : > { %16481 = vmatmul.mubr.msk.bf16.gmra.mrb[36].mxu0 %vm630_vm1, %v21498_v24  ;;  %16513 = vmatmul.mubr.msk.bf16.gmra.mrb[52].mxu1 %vm630_vm1, %v21180_v52 }
 0x30a   : > { %4167 = vmatprep.mubr.bf16.mxu0 %v24298_v0  ;;  %4677 = vmatprep.mubr.bf16.mxu1 %v24298_v0 }
 0x311   : > { %16483 = vmatmul.mubr.msk.bf16.vlgmr.msra.gmra.mrb[40].mxu0 %vm630_vm1, %v21467_v26  ;;  %16514 = vmatmul.mubr.msk.bf16.gmra.mrb[56].mxu1 %vm630_vm1, %v21207_v62 }
 0x312   : > { %4177 = vmatprep.mubr.bf16.mxu0 %v24298_v0  ;;  %4720 = vmatprep.mubr.bf16.mxu1 %v24298_v0 }
 0x313   : > { %4199 = vmatpush1.bf16.msra.mxu0 %v21412_v36  ;;  %v21732_v36 = vld [vmem:[#allocation2 + $0x1c4] ss:$24 sps:$4 sm:$0x3f]  }
 0x314   : > { %16486 = vmatprep.subr.msk.bf16.mxu0 %vm640_vm0, %v21417_v44 }
 0x317   : > { %4201 = vmatpush1.bf16.msra.mxu0 %v21046_v21 }
 0x318   : > { %4328 = vmatprep.subr.bf16.mxu0 %v21422_v46 }
 0x319   : > { %16484 = vmatmul.mubr.msk.bf16.gmra.mrb[44].mxu0 %vm630_vm1, %v21485_v35  ;;  %16516 = vmatmul.mubr.msk.bf16.vlgmr.msra.gmra.mrb[60].mxu1 %vm630_vm1, %v21161_v48 }
 0x31a   : > { %4752 = vmatpush1.bf16.msra.mxu1 %v21269_v14  ;;  %4187 = vmatprep.mubr.bf16.mxu0 %v24298_v0  ;;  %v21714_v14 = vld [vmem:[%s20775_s28 + $0xa0] sm:$0xff]  }
 0x31b   : > { %4730 = vmatprep.mubr.bf16.mxu1 %v24298_v0  ;;  %16519 = vmatprep.subr.msk.bf16.mxu1 %vm640_vm0, %v21272_v6  ;;  %v19879_v6 = vld [vmem:[#allocation2 + $0x14] ss:$24 sps:$4 sm:$0xff]  }
 0x31e   : > { %4754 = vmatpush1.bf16.msra.mxu1 %v24580_v10 }
 0x31f   : > { %4814 = vmatprep.subr.bf16.mxu1 %v24581_v11 }
 0x321   : > { %16485 = vmatmul.mubr.msk.bf16.gmra.mrb[48].mxu0 %vm630_vm1, %v21498_v24  ;;  %16517 = vmatmul.mubr.msk.bf16.gmra.mrb[64].mxu1 %vm630_vm1, %v21180_v52 }
 0x322   : > { %4230 = vmatprep.mubr.bf16.mxu0 %v24298_v0  ;;  %4740 = vmatprep.mubr.bf16.mxu1 %v24298_v0 }
 0x329   : > { %16487 = vmatmul.mubr.msk.bf16.vlgmr.msra.gmra.mrb[52].mxu0 %vm630_vm1, %v21467_v26  ;;  %16518 = vmatmul.mubr.msk.bf16.gmra.mrb[68].mxu1 %vm630_vm1, %v21207_v62 }
 0x32a   : > { %4240 = vmatprep.mubr.bf16.mxu0 %v24298_v0  ;;  %4783 = vmatprep.mubr.bf16.mxu1 %v24298_v0 }
 0x32b   : > { %4329 = vmatpush1.bf16.msra.mxu0 %v21664_v49 }
 0x32c   : > { %16499 = vmatprep.subr.msk.bf16.mxu0 %vm640_vm0, %v21667_v50 }
 0x32f   : > { %4331 = vmatpush1.bf16.msra.mxu0 %v21088_v30 }
 0x330   : > { %4391 = vmatprep.subr.bf16.mxu0 %v21449_v58 }
 0x331   : > { %16488 = vmatmul.mubr.msk.bf16.gmra.mrb[56].mxu0 %vm630_vm1, %v21485_v35  ;;  %16520 = vmatmul.mubr.msk.bf16.vlgmr.msra.gmra.mrb[72].mxu1 %vm630_vm1, %v21161_v48  ;;  %v21688_v48 = vld [vmem:[%s20775_s28 + $0x90] sm:$0xff]  }
 0x332   : > { %4815 = vmatpush1.bf16.msra.mxu1 %v19873_v51  ;;  %4250 = vmatprep.mubr.bf16.mxu0 %v24298_v0 }
 0x333   : > { %4793 = vmatprep.mubr.bf16.mxu1 %v24298_v0  ;;  %16523 = vmatprep.subr.msk.bf16.mxu1 %vm640_vm0, %v19874_v7 }
 0x336   : > { %4817 = vmatpush1.bf16.msra.mxu1 %v20878_v37  ;;  %v21700_v37 = vld [vmem:[%s20775_s28 + $0x98] sm:$0xff]  }
 0x337   : > { %4877 = vmatprep.subr.bf16.mxu1 %v19875_v3 }
 0x339   : > { %16489 = vmatmul.mubr.msk.bf16.gmra.mrb[60].mxu0 %vm630_vm1, %v21498_v24  ;;  %16521 = vmatmul.mubr.msk.bf16.gmra.mrb[76].mxu1 %vm630_vm1, %v21180_v52  ;;  %v21703_v52 = vld [vmem:[#allocation2 + $0x194] ss:$24 sps:$4 sm:$0xff]  }
 0x33a   : > { %4360 = vmatprep.mubr.bf16.mxu0 %v24298_v0  ;;  %4803 = vmatprep.mubr.bf16.mxu1 %v24298_v0 }
 0x341   : > { %16500 = vmatmul.mubr.msk.bf16.vlgmr.msra.gmra.mrb[28].mxu0 %vm630_vm1, %v21688_v48  ;;  %16522 = vmatmul.mubr.msk.bf16.gmra.mrb[80].mxu1 %vm630_vm1, %v21207_v62  ;;  %v19877_v62 = vld [vmem:[#allocation2 + $0x8] ss:$24 sps:$4 sm:$0xff]  }
 0x342   : > { %4370 = vmatprep.mubr.bf16.mxu0 %v24298_v0  ;;  %4846 = vmatprep.mubr.bf16.mxu1 %v24298_v0 }
 0x343   : > { %4392 = vmatpush1.bf16.msra.mxu0 %v21475_v27 }
 0x344   : > { %16503 = vmatprep.subr.msk.bf16.mxu0 %vm640_vm0, %v21480_v59 }
 0x347   : > { %4394 = vmatpush1.bf16.msra.mxu0 %v20932_v57 }
 0x348   : > { %4454 = vmatprep.subr.bf16.mxu0 %v21703_v52 }
 0x349   : > { %16501 = vmatmul.mubr.msk.bf16.gmra.mrb[32].mxu0 %vm630_vm1, %v21700_v37  ;;  %16524 = vmatmul.mubr.msk.bf16.vlgmr.msra.gmra.mrb[48].mxu1 %vm630_vm1, %v21217_v63 }
 0x34a   : > { %4878 = vmatpush1.bf16.msra.mxu1 %v19877_v62  ;;  %4380 = vmatprep.mubr.bf16.mxu0 %v24298_v0 }
 0x34b   : > { %4856 = vmatprep.mubr.bf16.mxu1 %v24298_v0  ;;  %16527 = vmatprep.subr.msk.bf16.mxu1 %vm640_vm0, %v19878_v8 }
 0x34e   : > { %4880 = vmatpush1.bf16.msra.mxu1 %v20811_v17  ;;  %v21729_v17 = vld [vmem:[#allocation2 + $0x190] ss:$24 sps:$4 sm:$0xff]  }
 0x34f   : > { %4940 = vmatprep.subr.bf16.mxu1 %v19879_v6 }
 0x351   : > { %16502 = vmatmul.mubr.msk.bf16.gmra.mrb[36].mxu0 %vm630_vm1, %v21714_v14  ;;  %16525 = vmatmul.mubr.msk.bf16.gmra.mrb[52].mxu1 %vm630_vm1, %v21237_v9 }
 0x352   : > { %4423 = vmatprep.mubr.bf16.mxu0 %v24298_v0  ;;  %4866 = vmatprep.mubr.bf16.mxu1 %v24298_v0 }
 0x359   : > { %16504 = vmatmul.mubr.msk.bf16.vlgmr.msra.gmra.mrb[40].mxu0 %vm630_vm1, %v21688_v48  ;;  %16526 = vmatmul.mubr.msk.bf16.gmra.mrb[56].mxu1 %vm630_vm1, %v21257_v13 }
 0x35a   : > { %4433 = vmatprep.mubr.bf16.mxu0 %v24298_v0  ;;  %4909 = vmatprep.mubr.bf16.mxu1 %v24298_v0 }
 0x35b   : > { %4455 = vmatpush1.bf16.msra.mxu0 %v21729_v17 }
 0x35c   : > { %16507 = vmatprep.subr.msk.bf16.mxu0 %vm640_vm0, %v21732_v36 }
 0x35f   : > { %4457 = vmatpush1.bf16.msra.mxu0 %v21132_v42 }
 0x361   : > { %16505 = vmatmul.mubr.msk.bf16.gmra.mrb[44].mxu0 %vm630_vm1, %v21700_v37  ;;  %16528 = vmatmul.mubr.msk.bf16.vlgmr.msra.gmra.mrb[60].mxu1 %vm630_vm1, %v21217_v63 }
 0x362   : > { %4941 = vmatpush1.bf16.msra.mxu1 %v19882_v41  ;;  %4443 = vmatprep.mubr.bf16.mxu0 %v24298_v0 }
 0x363   : > { %4919 = vmatprep.mubr.bf16.mxu1 %v24298_v0  ;;  %16531 = vmatprep.subr.msk.bf16.mxu1 %vm640_vm0, %v19883_v33 }
 0x366   : > { %4943 = vmatpush1.bf16.msra.mxu1 %v20918_v53  ;;  %v2157_v53 = vlaneseq }
 0x367   : > { %5003 = vmatprep.subr.bf16.mxu1 %v21151_v47 }
 0x368   : > { %v21769_v47 = vshrl.u32 %v2157_v53, 7 }
 0x369   : > { %16506 = vmatmul.mubr.msk.bf16.gmra.mrb[48].mxu0 %vm630_vm1, %v21714_v14  ;;  %16529 = vmatmul.mubr.msk.bf16.gmra.mrb[64].mxu1 %vm630_vm1, %v21237_v9 }
 0x36a   : > { %4486 = vmatprep.mubr.bf16.mxu0 %v24298_v0  ;;  %4929 = vmatprep.mubr.bf16.mxu1 %v24298_v0  ;;  %24582 = vst [vmem:[#allocation32_spill] sm:$0xff] %v21769_v47 }
 0x371   : > { %16508 = vmatmul.mubr.msk.bf16.vlgmr.msra.gmra.mrb[52].mxu0 %vm630_vm1, %v21688_v48  ;;  %16530 = vmatmul.mubr.msk.bf16.gmra.mrb[68].mxu1 %vm630_vm1, %v21257_v13 }
 0x372   : > { %4496 = vmatprep.mubr.bf16.mxu0 %v24298_v0  ;;  %4972 = vmatprep.mubr.bf16.mxu1 %v24298_v0 }
 0x379   : > { %16509 = vmatmul.mubr.msk.bf16.gmra.mrb[56].mxu0 %vm630_vm1, %v21700_v37  ;;  %16532 = vmatmul.mubr.msk.bf16.vlgmr.msra.gmra.mrb[72].mxu1 %vm630_vm1, %v21217_v63  ;;  %v21782_v63 = vld [vmem:[#allocation5] sm:$0x3f] }
 0x37a   : > { %5004 = vmatpush1.bf16.msra.mxu1 %v21185_v54  ;;  %4506 = vmatprep.mubr.bf16.mxu0 %v24298_v0  ;;  %v21777_v54 = vsub.s32 0, %v21769_v47 }
 0x37b   : > { %4982 = vmatprep.mubr.bf16.mxu1 %v24298_v0  ;;  %16535 = vmatprep.subr.msk.bf16.mxu1 %vm640_vm0, %v21190_v55  ;;  %v21780_v55 = vsub.s32 1, %v21769_v47 }
 0x37c   : > { %24583 = vst [vmem:[#allocation37_spill] sm:$0xff] %v21777_v54 }
 0x37d   : > { %24584 = vst [vmem:[#allocation61_spill] sm:$0xff] %v21780_v55 }
 0x37e   : > { %5006 = vmatpush1.bf16.msra.mxu1 %v20956_v1  ;;  %v21786_v1 = vrot.slane %v21782_v63, %v21777_v54 }
 0x37f   : > { %5066 = vmatprep.subr.bf16.mxu1 %v21201_v60  ;;  %v21790_v60 = vrot.slane %v21782_v63, %v21780_v55 }
 0x380   : > { %24585 = vst [vmem:[#allocation62_spill] sm:$0xff] %v21786_v1  ;;  %v2193_v46 = vadd.f32 %v21786_v1, %v21502_v22  ;;  %v2199_v53 = vadd.f32 %v21786_v1, %v21515_v29 }
 0x381   : > { %16510 = vmatmul.mubr.msk.bf16.gmra.mrb[60].mxu0 %vm630_vm1, %v21714_v14  ;;  %16533 = vmatmul.mubr.msk.bf16.gmra.mrb[76].mxu1 %vm630_vm1, %v21237_v9  ;;  %24586 = vst [vmem:[#allocation63_spill] sm:$0xff] %v21790_v60  ;;  %v2187_v9 = vadd.f32 %v21786_v1, %v21495_v28  ;;  %v2188_v34 = vadd.f32 %v21790_v60, %v21500_v31 }
 0x382   : > { %4992 = vmatprep.mubr.bf16.mxu1 %v24298_v0  ;;  %v2194_v59 = vadd.f32 %v21790_v60, %v21504_v16  ;;  %v2229_v8 = vmax.f32 %v2193_v46, 0.0  ;;  %v2206_v29 = vadd.f32 %v21790_v60, %v21522_v4 }
 0x383   : > { %v2223_v11 = vmax.f32 %v2187_v9, 0.0  ;;  %v2224_v3 = vmax.f32 %v2188_v34, 0.0  ;;  %v2200_v34 = vadd.f32 %v21790_v60, %v21517_v40 }
 0x384   : > { %v2230_v16 = vmax.f32 %v2194_v59, 0.0 }
 0x389   : > { %16534 = vmatmul.mubr.msk.bf16.gmra.mrb[80].mxu1 %vm630_vm1, %v21257_v13 }
 0x38a   : > { %5035 = vmatprep.mubr.bf16.mxu1 %v24298_v0 }
 0x38c   : > { %v3152_v44 = vpop.f32.mrb[12].mxu1 }
 0x38d   : > { %v3343_v58 = vadd.f32 %v3152_v44, %v21786_v1  ;;  %v3154_v27 = vpop.f32.mrb[13].mxu1 }
 0x38e   : > { %v3344_v13 = vadd.f32 %v3154_v27, %v21790_v60  ;;  %v3156_v10 = vpop.f32.mrb[14].mxu1 }
 0x38f   : > { %v3379_v51 = vmax.f32 %v3343_v58, 0.0  ;;  %v3349_v28 = vadd.f32 %v3156_v10, %v21786_v1  ;;  %v3158_v7 = vpop.f32.mrb[15].mxu1  ;;  %v2205_v58 = vadd.f32 %v21786_v1, %v21519_v32 }
 0x390   : > { %v3380_v31 = vmax.f32 %v3344_v13, 0.0  ;;  %v3350_v62 = vadd.f32 %v3158_v7, %v21790_v60 }
 0x391   : > { %v21807_v22 = vmax.f32 %v2223_v11, %v3379_v51  ;;  %v3385_v6 = vmax.f32 %v3349_v28, 0.0  ;;  %16536 = vmatmul.mubr.msk.bf16.vlgmr.msra.gmra.mrb[48].mxu1 %vm630_vm1, %v21467_v26  ;;  %v24587_v51 = vld [vmem:[#allocation36_spill] sm:$0xff]  ;;  %v2236_v28 = vmax.f32 %v2200_v34, 0.0  ;;  %v24590_v34 = vld [vmem:[#allocation54_spill] sm:$0xff] }
 0x392   : > { %v21811_v41 = vmax.f32 %v2224_v3, %v3380_v31  ;;  %v3386_v33 = vmax.f32 %v3350_v62, 0.0  ;;  %5067 = vmatpush1.bf16.msra.mxu1 %v21241_v12  ;;  %5045 = vmatprep.mubr.bf16.mxu1 %v24298_v0  ;;  %v2241_v3 = vmax.f32 %v2205_v58, 0.0  ;;  %v2242_v62 = vmax.f32 %v2206_v29, 0.0 }
 0x393   : > { %v21817_v9 = vmax.f32 %v2229_v8, %v3385_v6  ;;  %16539 = vmatprep.subr.msk.bf16.mxu1 %vm640_vm0, %v21246_v2  ;;  %v2235_v2 = vmax.f32 %v2199_v53, 0.0  ;;  %v21843_v6 = vsub.s32 2, %v21769_v47  ;;  %v21850_v53 = vsub.s32 3, %v21769_v47 }
 0x394   : > { %v21823_v44 = vmax.f32 %v2230_v16, %v3386_v33  ;;  %v3162_v46 = vpop.f32.mrb[16].mxu1  ;;  %v2211_v16 = vadd.f32 %v21786_v1, %v21534_v5  ;;  %v2218_v5 = vadd.f32 %v21790_v60, %v21542_v18 }
 0x395   : > { %v3355_v12 = vadd.f32 %v3162_v46, %v21786_v1  ;;  %v3164_v27 = vpop.f32.mrb[17].mxu1  ;;  %24588 = vst [vmem:[#allocation36_spill] sm:$0xff] %v21843_v6  ;;  %24589 = vst [vmem:[#allocation64_spill] sm:$0xff] %v21850_v53  ;;  %v2212_v46 = vadd.f32 %v21790_v60, %v24590_v34 }
 0x396   : > { %v3356_v59 = vadd.f32 %v3164_v27, %v21790_v60  ;;  %v3166_v13 = vpop.f32.mrb[18].mxu1  ;;  %5069 = vmatpush1.bf16.msra.mxu1 %v20839_v25  ;;  %v24591_v27 = vld [vmem:[#allocation55_spill] sm:$0xff] }
 0x397   : > { %v3391_v10 = vmax.f32 %v3355_v12, 0.0  ;;  %v3361_v40 = vadd.f32 %v3166_v13, %v21786_v1  ;;  %v3168_v11 = vpop.f32.mrb[19].mxu1  ;;  %5129 = vmatprep.subr.bf16.mxu1 %v24587_v51  ;;  %v2217_v29 = vadd.f32 %v21786_v1, %v24591_v27 }
 0x398   : > { %v3392_v32 = vmax.f32 %v3356_v59, 0.0  ;;  %v3362_v7 = vadd.f32 %v3168_v11, %v21790_v60  ;;  %v2247_v11 = vmax.f32 %v2211_v16, 0.0  ;;  %v2254_v16 = vmax.f32 %v2218_v5, 0.0 }
 0x399   : > { %v21835_v31 = vmax.f32 %v2235_v2, %v3391_v10  ;;  %v3397_v4 = vmax.f32 %v3361_v40, 0.0  ;;  %16537 = vmatmul.mubr.msk.bf16.gmra.mrb[52].mxu1 %vm630_vm1, %v21485_v35  ;;  %v21864_v40 = vrot.slane %v21782_v63, %v21843_v6  ;;  %v24597_v6 = vld [vmem:[#allocation38_spill] sm:$0xff] }
 0x39a   : > { %v21839_v25 = vmax.f32 %v2236_v28, %v3392_v32  ;;  %v3398_v8 = vmax.f32 %v3362_v7, 0.0  ;;  %5055 = vmatprep.mubr.bf16.mxu1 %v24298_v0  ;;  %v21869_v7 = vrot.slane %v21782_v63, %v21850_v53 }
 0x39b   : > { %v21847_v33 = vmax.f32 %v2241_v3, %v3397_v4  ;;  %v2248_v3 = vmax.f32 %v2212_v46, 0.0 }
 0x39c   : > { %v21854_v58 = vmax.f32 %v2242_v62, %v3398_v8  ;;  %v3172_v12 = vpop.f32.mrb[20].mxu1  ;;  %24592 = vst [vmem:[#allocation54_spill] sm:$0xff] %v21869_v7  ;;  %v2253_v62 = vmax.f32 %v2217_v29, 0.0 }
 0x39d   : > { %v3367_v59 = vadd.f32 %v3172_v12, %v21786_v1  ;;  %v3174_v13 = vpop.f32.mrb[21].mxu1 }
 0x39e   : > { %v3368_v2 = vadd.f32 %v3174_v13, %v21790_v60  ;;  %v3176_v10 = vpop.f32.mrb[22].mxu1 }
 0x39f   : > { %v3403_v51 = vmax.f32 %v3367_v59, 0.0  ;;  %v3373_v28 = vadd.f32 %v3176_v10, %v21786_v1  ;;  %v3178_v32 = vpop.f32.mrb[23].mxu1  ;;  %v24593_v59 = vld [vmem:[#allocation41_spill] sm:$0xff] }
 0x3a0   : > { %v3404_v4 = vmax.f32 %v3368_v2, 0.0  ;;  %v3374_v18 = vadd.f32 %v3178_v32, %v21790_v60  ;;  %v2189_v13 = vadd.f32 %v24593_v59, %v21864_v40  ;;  %v24594_v2 = vld [vmem:[#allocation42_spill] sm:$0xff]  ;;  %v24604_v60 = vld [vmem:[#allocation33_spill] sm:$0xff] }
 0x3a1   : > { %v21872_v8 = vmax.f32 %v2247_v11, %v3403_v51  ;;  %v3409_v34 = vmax.f32 %v3373_v28, 0.0  ;;  %16538 = vmatmul.mubr.msk.bf16.gmra.mrb[56].mxu1 %vm630_vm1, %v21498_v24  ;;  %v2190_v29 = vadd.f32 %v24594_v2, %v21869_v7  ;;  %v24595_v51 = vld [vmem:[#allocation43_spill] sm:$0xff] }
 0x3a2   : > { %v21876_v12 = vmax.f32 %v2248_v3, %v3404_v4  ;;  %v3410_v27 = vmax.f32 %v3374_v18, 0.0  ;;  %5098 = vmatprep.mubr.bf16.mxu1 %v24298_v0  ;;  %v2195_v28 = vadd.f32 %v24595_v51, %v21864_v40  ;;  %v24596_v3 = vld [vmem:[#allocation44_spill] sm:$0xff] }
 0x3a3   : > { %v21881_v46 = vmax.f32 %v2253_v62, %v3409_v34  ;;  %v2196_v4 = vadd.f32 %v24596_v3, %v21869_v7  ;;  %v2225_v62 = vmax.f32 %v2189_v13, 0.0  ;;  %v24598_v13 = vmov 0  }
 0x3a4   : > { %v21885_v10 = vmax.f32 %v2254_v16, %v3410_v27  ;;  %v3215_v11 = vpop.f32.mrb[24].mxu1  ;;  %v2226_v16 = vmax.f32 %v2190_v29, 0.0  ;;  %v2231_v54 = vmax.f32 %v2195_v28, 0.0  ;;  %v24601_v28 = vld [vmem:[#allocation46_spill] sm:$0xff] }
 0x3a5   : > { %v3345_v5 = vadd.f32 %v3215_v11, %v21864_v40  ;;  %v3217_v32 = vpop.f32.mrb[25].mxu1  ;;  %v2232_v3 = vmax.f32 %v2196_v4, 0.0 }
 0x3a6   : > { %v3346_v18 = vadd.f32 %v3217_v32, %v21869_v7  ;;  %v3219_v59 = vpop.f32.mrb[26].mxu1 }
 0x3a7   : > { %v3381_v34 = vmax.f32 %v3345_v5, 0.0  ;;  %v3351_v0 = vadd.f32 %v3219_v59, %v21864_v40  ;;  %v3221_v2 = vpop.f32.mrb[27].mxu1  ;;  %v24599_v5 = vld [vmem:[#allocation45_spill] sm:$0xff]  ;;  %v24600_v59 = vld [vmem:[#allocation39_spill] sm:$0xff] }
 0x3a8   : > { %v3382_v27 = vmax.f32 %v3346_v18, 0.0  ;;  %v3352_v55 = vadd.f32 %v3221_v2, %v21869_v7  ;;  %v2201_v29 = vadd.f32 %v21864_v40, %v24599_v5 }
 0x3a9   : > { %v21895_v51 = vmax.f32 %v2225_v62, %v3381_v34  ;;  %v3387_v11 = vmax.f32 %v3351_v0, 0.0  ;;  %16540 = vmatmul.mubr.msk.bf16.vlgmr.msra.gmra.mrb[60].mxu1 %vm630_vm1, %v21467_v26  ;;  %v2202_v0 = vadd.f32 %v21869_v7, %v24601_v28 }
 0x3aa   : > { %v3418_v53 = vmax.f32 %v2226_v16, %v3382_v27  ;;  %v3388_v32 = vmax.f32 %v3352_v55, 0.0  ;;  %5130 = vmatpush1.bf16.msra.mxu1 %v24597_v6  ;;  %5108 = vmatprep.mubr.bf16.mxu1 %v24598_v13  ;;  %v24602_v55 = vld [vmem:[#allocation47_spill] sm:$0xff]  ;;  %v24603_v27 = vld [vmem:[#allocation48_spill] sm:$0xff]  ;;  %v2237_v28 = vmax.f32 %v2201_v29, 0.0 }
 0x3ab   : > { %v21903_v18 = vmax.f32 %v2231_v54, %v3387_v11  ;;  %16543 = vmatprep.subr.msk.bf16.mxu1 %vm640_vm0, %v24600_v59  ;;  %v2207_v6 = vadd.f32 %v21864_v40, %v24602_v55  ;;  %v2208_v54 = vadd.f32 %v21869_v7, %v24603_v27  ;;  %v2238_v55 = vmax.f32 %v2202_v0, 0.0  ;;  %v24608_v0 = vld [vmem:[#allocation51_spill] sm:$0xff] }
 0x3ac   : > { %v3451_v62 = vmax.f32 %v21807_v22, %v3418_v53  ;;  %v3424_v4 = vmax.f32 %v2232_v3, %v3388_v32  ;;  %v3225_v34 = vpop.f32.mrb[28].mxu1  ;;  %v24605_v32 = vld [vmem:[#allocation40_spill] sm:$0xff] }
 0x3ad   : > { %v3357_v2 = vadd.f32 %v3225_v34, %v21864_v40  ;;  %v3227_v16 = vpop.f32.mrb[29].mxu1  ;;  %v2243_v42 = vmax.f32 %v2207_v6, 0.0  ;;  %v2244_v29 = vmax.f32 %v2208_v54, 0.0 }
 0x3ae   : > { %v3454_v11 = vmax.f32 %v21817_v9, %v3424_v4  ;;  %v3358_v5 = vadd.f32 %v3227_v16, %v21869_v7  ;;  %v3229_v59 = vpop.f32.mrb[30].mxu1  ;;  %5132 = vmatpush1.bf16.msra.mxu1 %v24604_v60  ;;  %v24607_v9 = vld [vmem:[#allocation50_spill] sm:$0xff] }
 0x3af   : > { %v3393_v22 = vmax.f32 %v3357_v2, 0.0  ;;  %v3363_v53 = vadd.f32 %v3229_v59, %v21864_v40  ;;  %v3231_v3 = vpop.f32.mrb[31].mxu1  ;;  %5228 = vmatprep.subr.bf16.mxu1 %v24605_v32  ;;  %v2213_v4 = vadd.f32 %v21864_v40, %v24607_v9  ;;  %v24609_v9 = vld [vmem:[#allocation52_spill] sm:$0xff] }
 0x3b0   : > { %v21920_v34 = vpack.c.bf16 %v3454_v11, %v3451_v62  ;;  %v3394_v1 = vmax.f32 %v3358_v5, 0.0  ;;  %v3364_v27 = vadd.f32 %v3231_v3, %v21869_v7  ;;  %v2214_v62 = vadd.f32 %v21869_v7, %v24608_v0 }
 0x3b1   : > { %v21925_v16 = vmax.f32 %v2237_v28, %v3393_v22  ;;  %v3399_v60 = vmax.f32 %v3363_v53, 0.0  ;;  %16541 = vmatmul.mubr.msk.bf16.gmra.mrb[64].mxu1 %vm630_vm1, %v21485_v35  ;;  %v24314_v5 = vsub.s32 4, %v21769_v47  ;;  %v2249_v32 = vmax.f32 %v2213_v4, 0.0 }
 0x3b2   : > { %24606 = vst [vmem:[#allocation55_spill] sm:$0xff] %v21920_v34  ;;  %v3430_v2 = vmax.f32 %v2238_v55, %v3394_v1  ;;  %v3400_v59 = vmax.f32 %v3364_v27, 0.0  ;;  %5118 = vmatprep.mubr.bf16.mxu1 %v24598_v13  ;;  %v2219_v1 = vadd.f32 %v21864_v40, %v24609_v9  ;;  %v24610_v27 = vld [vmem:[#allocation53_spill] sm:$0xff] }
 0x3b3   : > { %v21933_v6 = vmax.f32 %v2243_v42, %v3399_v60  ;;  %v2220_v0 = vadd.f32 %v21869_v7, %v24610_v27  ;;  %v21949_v4 = vrot.slane %v21782_v63, %v24314_v5 }
 0x3b4   : > { %v3457_v28 = vmax.f32 %v21835_v31, %v3430_v2  ;;  %v3436_v22 = vmax.f32 %v2244_v29, %v3400_v59  ;;  %v3235_v53 = vpop.f32.mrb[32].mxu1  ;;  %v2250_v31 = vmax.f32 %v2214_v62, 0.0  ;;  %v2255_v62 = vmax.f32 %v2219_v1, 0.0 }
 0x3b5   : > { %v3369_v54 = vadd.f32 %v3235_v53, %v21864_v40  ;;  %v3237_v55 = vpop.f32.mrb[33].mxu1  ;;  %v24612_v53 = vsub.s32 5, %v21769_v47 }
 0x3b6   : > { %v21942_v34 = vpack.c.bf16 %v3457_v28, %v3454_v11  ;;  %v3460_v42 = vmax.f32 %v21847_v33, %v3436_v22  ;;  %v3370_v60 = vadd.f32 %v3237_v55, %v21869_v7  ;;  %v3239_v3 = vpop.f32.mrb[34].mxu1 }
 0x3b7   : > { %v3405_v29 = vmax.f32 %v3369_v54, 0.0  ;;  %v3375_v2 = vadd.f32 %v3239_v3, %v21864_v40  ;;  %v3241_v59 = vpop.f32.mrb[35].mxu1  ;;  %v21955_v11 = vrot.slane %v21782_v63, %v24612_v53  ;;  %v2256_v54 = vmax.f32 %v2220_v0, 0.0 }
 0x3b8   : > { %24611 = vst [vmem:[#allocation41_spill] sm:$0xff] %v21942_v34  ;;  %v21957_v9 = vpack.c.bf16 %v3460_v42, %v3457_v28  ;;  %v3406_v33 = vmax.f32 %v3370_v60, 0.0  ;;  %v3376_v22 = vadd.f32 %v3241_v59, %v21869_v7  ;;  %v2191_v63 = vadd.f32 %v21949_v4, %v21550_v38  ;;  %v24614_v60 = vld [vmem:[#allocation56_spill] sm:$0xff] }
 0x3b9   : > { %v21960_v55 = vmax.f32 %v2249_v32, %v3405_v29  ;;  %v3411_v27 = vmax.f32 %v3375_v2, 0.0  ;;  %16542 = vmatmul.mubr.msk.bf16.gmra.mrb[68].mxu1 %vm630_vm1, %v21498_v24  ;;  %v2192_v59 = vadd.f32 %v21955_v11, %v24614_v60  ;;  %v24615_v2 = vld [vmem:[#allocation57_spill] sm:$0xff] }
 0x3ba   : > { %24613 = vst [vmem:[#allocation42_spill] sm:$0xff] %v21957_v9  ;;  %v3442_v3 = vmax.f32 %v2250_v31, %v3406_v33  ;;  %v3412_v5 = vmax.f32 %v3376_v22, 0.0  ;;  %5161 = vmatprep.mubr.bf16.mxu1 %v24598_v13  ;;  %v2197_v53 = vadd.f32 %v21949_v4, %v24615_v2  ;;  %v24616_v33 = vld [vmem:[#allocation58_spill] sm:$0xff]  ;;  %v2227_v60 = vmax.f32 %v2191_v63, 0.0 }
 0x3bb   : > { %v21967_v28 = vmax.f32 %v2255_v62, %v3411_v27  ;;  %v2198_v22 = vadd.f32 %v21955_v11, %v24616_v33  ;;  %v2203_v63 = vadd.f32 %v21949_v4, %v21567_v43 }
 0x3bc   : > { %v3463_v32 = vmax.f32 %v21872_v8, %v3442_v3  ;;  %v3448_v1 = vmax.f32 %v2256_v54, %v3412_v5  ;;  %v3278_v29 = vpop.f32.mrb[36].mxu1  ;;  %v2228_v3 = vmax.f32 %v2192_v59, 0.0  ;;  %v2233_v7 = vmax.f32 %v2197_v53, 0.0 }
 0x3bd   : > { %v3347_v0 = vadd.f32 %v3278_v29, %v21949_v4  ;;  %v3280_v31 = vpop.f32.mrb[37].mxu1  ;;  %v2204_v53 = vadd.f32 %v21955_v11, %v21569_v19 }
 0x3be   : > { %v21977_v47 = vpack.c.bf16 %v3463_v32, %v3460_v42  ;;  %v3466_v38 = vmax.f32 %v21881_v46, %v3448_v1  ;;  %v3348_v62 = vadd.f32 %v3280_v31, %v21955_v11  ;;  %v3282_v27 = vpop.f32.mrb[38].mxu1  ;;  %v2234_v46 = vmax.f32 %v2198_v22, 0.0  ;;  %v24619_v22 = vld [vmem:[#allocation59_spill] sm:$0xff] }
 0x3bf   : > { %v3383_v8 = vmax.f32 %v3347_v0, 0.0  ;;  %v3353_v5 = vadd.f32 %v3282_v27, %v21949_v4  ;;  %v3284_v54 = vpop.f32.mrb[39].mxu1 }
 0x3c0   : > { %24617 = vst [vmem:[#allocation43_spill] sm:$0xff] %v21977_v47  ;;  %v21982_v2 = vpack.c.bf16 %v3466_v38, %v3463_v32  ;;  %v3384_v29 = vmax.f32 %v3348_v62, 0.0  ;;  %v3354_v9 = vadd.f32 %v3284_v54, %v21955_v11 }
 0x3c1   : > { %v3419_v33 = vmax.f32 %v2227_v60, %v3383_v8  ;;  %v3389_v42 = vmax.f32 %v3353_v5, 0.0  ;;  %16544 = vmatmul.mubr.msk.bf16.vlgmr.msra.gmra.mrb[72].mxu1 %vm630_vm1, %v21467_v26  ;;  %v24621_v60 = vld [vmem:[#allocation34_spill] sm:$0xff] }
 0x3c2   : > { %24618 = vst [vmem:[#allocation44_spill] sm:$0xff] %v21982_v2  ;;  %v3420_v1 = vmax.f32 %v2228_v3, %v3384_v29  ;;  %v3390_v31 = vmax.f32 %v3354_v9, 0.0  ;;  %5229 = vmatpush1.bf16.msra.mxu1 %v21330_v23  ;;  %5171 = vmatprep.mubr.bf16.mxu1 %v24598_v13  ;;  %v2209_v23 = vadd.f32 %v21949_v4, %v24619_v22  ;;  %v24622_v3 = vld [vmem:[#allocation49_spill] sm:$0xff]  ;;  %v2240_v29 = vmax.f32 %v2204_v53, 0.0  ;;  %v18969_v2 = vld [vmem:[#allocation7 + $0x320] ss:$16 sps:$4 sm:$0xff]  }
 0x3c3   : > { %v3452_v59 = vmax.f32 %v21811_v41, %v3419_v33  ;;  %v3425_v32 = vmax.f32 %v2233_v7, %v3389_v42  ;;  %16547 = vmatprep.subr.msk.bf16.mxu1 %vm640_vm0, %v21335_v56  ;;  %v24620_v41 = vld [vmem:[#allocation60_spill] sm:$0xff] }
 0x3c4   : > { %v3453_v26 = vmax.f32 %v21895_v51, %v3420_v1  ;;  %v3426_v0 = vmax.f32 %v2234_v46, %v3390_v31  ;;  %v3288_v9 = vpop.f32.mrb[40].mxu1  ;;  %v2210_v7 = vadd.f32 %v21955_v11, %v24620_v41  ;;  %v2239_v51 = vmax.f32 %v2203_v63, 0.0 }
 0x3c5   : > { %v3455_v38 = vmax.f32 %v21823_v44, %v3425_v32  ;;  %v3359_v43 = vadd.f32 %v3288_v9, %v21949_v4  ;;  %v3290_v62 = vpop.f32.mrb[41].mxu1  ;;  %v2245_v46 = vmax.f32 %v2209_v23, 0.0  ;;  %v2216_v9 = vadd.f32 %v21955_v11, %v21588_v39 }
 0x3c6   : > { %v3456_v56 = vmax.f32 %v21903_v18, %v3426_v0  ;;  %v3360_v27 = vadd.f32 %v3290_v62, %v21955_v11  ;;  %v3292_v19 = vpop.f32.mrb[42].mxu1  ;;  %5231 = vmatpush1.bf16.msra.mxu1 %v24621_v60  ;;  %v2246_v63 = vmax.f32 %v2210_v7, 0.0 }
 0x3c7   : > { %v3395_v8 = vmax.f32 %v3359_v43, 0.0  ;;  %v3365_v5 = vadd.f32 %v3292_v19, %v21949_v4  ;;  %v3294_v54 = vpop.f32.mrb[43].mxu1  ;;  %5291 = vmatprep.subr.bf16.mxu1 %v24622_v3  ;;  %v22008_v44 = vpack.c.bf16 %v3455_v38, %v3452_v59  ;;  %v2215_v59 = vadd.f32 %v21949_v4, %v21586_v15 }
 0x3c8   : > { %v22010_v33 = vpack.c.bf16 %v3456_v56, %v3453_v26  ;;  %v3396_v42 = vmax.f32 %v3360_v27, 0.0  ;;  %v3366_v18 = vadd.f32 %v3294_v54, %v21955_v11 }
 0x3c9   : > { %v3431_v1 = vmax.f32 %v2239_v51, %v3395_v8  ;;  %v3401_v31 = vmax.f32 %v3365_v5, 0.0  ;;  %16545 = vmatmul.mubr.msk.bf16.gmra.mrb[76].mxu1 %vm630_vm1, %v21485_v35  ;;  %v2221_v35 = vadd.f32 %v21949_v4, %v21591_v61  ;;  %v2251_v60 = vmax.f32 %v2215_v59, 0.0 }
 0x3ca   : > { %v3432_v32 = vmax.f32 %v2240_v29, %v3396_v42  ;;  %v3402_v0 = vmax.f32 %v3366_v18, 0.0  ;;  %5181 = vmatprep.mubr.bf16.mxu1 %v24598_v13  ;;  %v2252_v8 = vmax.f32 %v2216_v9, 0.0  ;;  %v19889_v9 = vld [vmem:[#allocation2 + $0x184] ss:$24 sps:$4 sm:$0xff]  }
 0x3cb   : > { %v3458_v53 = vmax.f32 %v21839_v25, %v3431_v1  ;;  %v3437_v26 = vmax.f32 %v2245_v46, %v3401_v31  ;;  %v2222_v25 = vadd.f32 %v21955_v11, %v21594_v20 }
 0x3cc   : > { %v3459_v22 = vmax.f32 %v21925_v16, %v3432_v32  ;;  %v3438_v23 = vmax.f32 %v2246_v63, %v3402_v0  ;;  %v3298_v43 = vpop.f32.mrb[44].mxu1 }
 0x3cd   : > { %v22024_v62 = vpack.c.bf16 %v3458_v53, %v3455_v38  ;;  %v3461_v41 = vmax.f32 %v21854_v58, %v3437_v26  ;;  %v3371_v7 = vadd.f32 %v3298_v43, %v21949_v4  ;;  %v3300_v15 = vpop.f32.mrb[45].mxu1 }
 0x3ce   : > { %v22030_v27 = vpack.c.bf16 %v3459_v22, %v3456_v56  ;;  %v3462_v39 = vmax.f32 %v21933_v6, %v3438_v23  ;;  %v3372_v16 = vadd.f32 %v3300_v15, %v21955_v11  ;;  %v3302_v19 = vpop.f32.mrb[46].mxu1  ;;  %v2257_v56 = vmax.f32 %v2221_v35, 0.0 }
 0x3cf   : > { %24623 = vst [vmem:[#allocation38_spill] sm:$0xff] %v22024_v62  ;;  %v22034_v51 = vpack.c.bf16 %v3461_v41, %v3458_v53  ;;  %v3407_v61 = vmax.f32 %v3371_v7, 0.0  ;;  %v3377_v38 = vadd.f32 %v3302_v19, %v21949_v4  ;;  %v3304_v58 = vpop.f32.mrb[47].mxu1  ;;  %v2258_v6 = vmax.f32 %v2222_v25, 0.0  ;;  %v18889_v25 = vld [vmem:[%s20775_s28 + $0xb0] sm:$0xff]  }
 0x3d0   : > { %24624 = vst [vmem:[#allocation45_spill] sm:$0xff] %v22030_v27  ;;  %v22037_v5 = vpack.c.bf16 %v3462_v39, %v3459_v22  ;;  %v3408_v54 = vmax.f32 %v3372_v16, 0.0  ;;  %v3378_v20 = vadd.f32 %v3304_v58, %v21955_v11  ;;  %v19892_v7 = vld [vmem:[#allocation2 + $0x1bc] ss:$24 sps:$4 sm:$0x3f]  }
 0x3d1   : > { %24625 = vst [vmem:[#allocation39_spill] sm:$0xff] %v22034_v51  ;;  %v3443_v3 = vmax.f32 %v2251_v60, %v3407_v61  ;;  %v3413_v29 = vmax.f32 %v3377_v38, 0.0  ;;  %16546 = vmatmul.mubr.msk.bf16.gmra.mrb[80].mxu1 %vm630_vm1, %v21498_v24  ;;  %v18890_v61 = vld [vmem:[%s20775_s28 + $0xb8] sm:$0xff]  }
 0x3d2   : > { %24626 = vst [vmem:[#allocation46_spill] sm:$0xff] %v22037_v5  ;;  %v3444_v42 = vmax.f32 %v2252_v8, %v3408_v54  ;;  %v3414_v18 = vmax.f32 %v3378_v20, 0.0  ;;  %5260 = vmatprep.mubr.bf16.mxu1 %v24598_v13  ;;  %v18963_v20 = vld [vmem:[#allocation7 + $0x300] ss:$16 sps:$4 sm:$0xff]  }
 0x3d3   : > { %v3464_v46 = vmax.f32 %v21876_v12, %v3443_v3  ;;  %v3449_v1 = vmax.f32 %v2257_v56, %v3413_v29  ;;  %v19884_v12 = vld [vmem:[#allocation2 + $0x128] ss:$24 sps:$4 sm:$0xff]  }
 0x3d4   : > { %v3465_v31 = vmax.f32 %v21960_v55, %v3444_v42  ;;  %v3450_v63 = vmax.f32 %v2258_v6, %v3414_v18  ;;  %v19885_v55 = vld [vmem:[#allocation2 + $0x15c] ss:$24 sps:$4 sm:$0x3f]  }
 0x3d5   : > { %v22045_v32 = vpack.c.bf16 %v3464_v46, %v3461_v41  ;;  %v3467_v0 = vmax.f32 %v21885_v10, %v3449_v1  ;;  %v19886_v10 = vld [vmem:[#allocation2 + $0x134] ss:$24 sps:$4 sm:$0xff]   ;;  %v19891_v41 = vld [vmem:[#allocation2 + $0x188] ss:$24 sps:$4 sm:$0xff]  }
 0x3d6   : > { %v22048_v59 = vpack.c.bf16 %v3465_v31, %v3462_v39  ;;  %v3468_v53 = vmax.f32 %v21967_v28, %v3450_v63  ;;  %v19887_v28 = vld [vmem:[#allocation2 + $0x130] ss:$24 sps:$4 sm:$0xff]   ;;  %v24631_v18 = vld [vmem:[#allocation35_spill] sm:$0xff] }
 0x3d7   : > { %24627 = vst [vmem:[#allocation47_spill] sm:$0xff] %v22045_v32  ;;  %v22051_v24 = vpack.c.bf16 %v3467_v0, %v3464_v46  ;;  %v18965_v56 = vld [vmem:[#allocation7 + $0x304] ss:$16 sps:$4 sm:$0xff]   ;;  %v18893_v3 = vld [vmem:[#allocation7 + $0x30c] ss:$16 sps:$4 sm:$0xff]  }
 0x3d8   : > { %24628 = vst [vmem:[#allocation48_spill] sm:$0xff] %v22048_v59  ;;  %v22053_v26 = vpack.c.bf16 %v3468_v53, %v3465_v31  ;;  %6521 = vmatprep.subr.bf16.mxu0 %v18965_v56  ;;  %v18902_v56 = vld [vmem:[#allocation7 + $0x36c] ss:$16 sps:$4 sm:$0xff]  }
 0x3d9   : > { %24629 = vst [vmem:[#allocation33_spill] sm:$0xff] %v22051_v24  ;;  %16548 = vmatmul.mubr.msk.bf16.vlgmr.msra.gmra.mrb[48].mxu1 %vm630_vm1, %v21688_v48  ;;  %6522 = vmatpush1.bf16.msra.mxu0 %v18963_v20 }
 0x3da   : > { %24630 = vst [vmem:[#allocation40_spill] sm:$0xff] %v22053_v26  ;;  %5292 = vmatpush1.bf16.msra.mxu1 %v19884_v12  ;;  %5270 = vmatprep.mubr.bf16.mxu1 %v24598_v13  ;;  %v18891_v12 = vld [vmem:[#allocation7 + $0x308] ss:$16 sps:$4 sm:$0xff]   ;;  %v18971_v26 = vld [vmem:[#allocation7 + $0x324] ss:$16 sps:$4 sm:$0xff]  }
 0x3db   : > { %16551 = vmatprep.subr.msk.bf16.mxu1 %vm640_vm0, %v19885_v55  ;;  %6523 = vmatprep.subr.bf16.mxu0 %v18971_v26  ;;  %v18989_v26 = vld [vmem:[#allocation7 + $0x384] ss:$16 sps:$4 sm:$0xff]  }
 0x3dd   : > { %6524 = vmatpush1.bf16.msra.mxu0 %v18969_v2  ;;  %v18930_v2 = vld [vmem:[#allocation7 + $0x4a8] ss:$16 sps:$4 sm:$0xff]  }
 0x3de   : > { %5294 = vmatpush1.bf16.msra.mxu1 %v20895_v45  ;;  %v19888_v45 = vld [vmem:[#allocation2 + $0x164] ss:$24 sps:$4 sm:$0x3f]  }
 0x3df   : > { %5354 = vmatprep.subr.bf16.mxu1 %v19886_v10  ;;  %v18896_v10 = vld [vmem:[#allocation7 + $0x32c] ss:$16 sps:$4 sm:$0xff]  }
 0x3e1   : > { %16549 = vmatmul.mubr.msk.bf16.gmra.mrb[52].mxu1 %vm630_vm1, %v21700_v37 }
 0x3e2   : > { %5280 = vmatprep.mubr.bf16.mxu1 %v24598_v13 }
 0x3e9   : > { %16550 = vmatmul.mubr.msk.bf16.gmra.mrb[56].mxu1 %vm630_vm1, %v21714_v14 }
 0x3ea   : > { %5323 = vmatprep.mubr.bf16.mxu1 %v24598_v13 }
 0x3f1   : > { %16552 = vmatmul.mubr.msk.bf16.vlgmr.msra.gmra.mrb[60].mxu1 %vm630_vm1, %v21688_v48 }
 0x3f2   : > { %5355 = vmatpush1.bf16.msra.mxu1 %v19887_v28  ;;  %5333 = vmatprep.mubr.bf16.mxu1 %v24598_v13  ;;  %v18894_v28 = vld [vmem:[#allocation7 + $0x328] ss:$16 sps:$4 sm:$0xff]  }
 0x3f3   : > { %16555 = vmatprep.subr.msk.bf16.mxu1 %vm640_vm0, %v19888_v45  ;;  %v18899_v45 = vld [vmem:[#allocation7 + $0x34c] ss:$16 sps:$4 sm:$0xff]  }
 0x3f6   : > { %5357 = vmatpush1.bf16.msra.mxu1 %v21046_v21  ;;  %v19890_v21 = vld [vmem:[#allocation2 + $0x18c] ss:$24 sps:$4 sm:$0xff]  }
 0x3f7   : > { %5484 = vmatprep.subr.bf16.mxu1 %v19889_v9 }
 0x3f9   : > { %16553 = vmatmul.mubr.msk.bf16.gmra.mrb[64].mxu1 %vm630_vm1, %v21700_v37 }
 0x3fa   : > { %5343 = vmatprep.mubr.bf16.mxu1 %v24598_v13 }
 0x401   : > { %16554 = vmatmul.mubr.msk.bf16.gmra.mrb[68].mxu1 %vm630_vm1, %v21714_v14 }
 0x402   : > { %5386 = vmatprep.mubr.bf16.mxu1 %v24598_v13 }
 0x409   : > { %16556 = vmatmul.mubr.msk.bf16.vlgmr.msra.gmra.mrb[72].mxu1 %vm630_vm1, %v21688_v48 }
 0x40a   : > { %5485 = vmatpush1.bf16.msra.mxu1 %v21664_v49  ;;  %5396 = vmatprep.mubr.bf16.mxu1 %v24598_v13 }
 0x40b   : > { %16568 = vmatprep.subr.msk.bf16.mxu1 %vm640_vm0, %v21667_v50 }
 0x40e   : > { %5487 = vmatpush1.bf16.msra.mxu1 %v21088_v30 }
 0x40f   : > { %5547 = vmatprep.subr.bf16.mxu1 %v19890_v21 }
 0x411   : > { %16557 = vmatmul.mubr.msk.bf16.gmra.mrb[76].mxu1 %vm630_vm1, %v21700_v37  ;;  %v18888_v37 = vld [vmem:[%s20775_s28 + $0xa8] sm:$0xff]  }
 0x412   : > { %5406 = vmatprep.mubr.bf16.mxu1 %v24598_v13 }
 0x414   : > { %v22087_v22 = vpop.f32.mrb[28].mxu0 }
 0x415   : > { %v22089_v48 = vpop.f32.mrb[29].mxu0 }
 0x416   : > { %v22091_v49 = vpop.f32.mrb[30].mxu0 }
 0x417   : > { %v22093_v23 = vpop.f32.mrb[31].mxu0 }
 0x419   : > { %16558 = vmatmul.mubr.msk.bf16.gmra.mrb[80].mxu1 %vm630_vm1, %v21714_v14 }
 0x41a   : > { %5516 = vmatprep.mubr.bf16.mxu1 %v24598_v13 }
 0x41c   : > { %v22098_v30 = vpop.f32.mrb[32].mxu0 }
 0x41d   : > { %v22100_v50 = vpop.f32.mrb[33].mxu0 }
 0x41e   : > { %v22103_v43 = vpop.f32.mrb[34].mxu0 }
 0x41f   : > { %v22105_v35 = vpop.f32.mrb[35].mxu0 }
 0x421   : > { %16569 = vmatmul.mubr.msk.bf16.vlgmr.msra.gmra.mrb[48].mxu1 %vm630_vm1, %v18888_v37 }
 0x422   : > { %5548 = vmatpush1.bf16.msra.mxu1 %v19891_v41  ;;  %5526 = vmatprep.mubr.bf16.mxu1 %v24598_v13 }
 0x423   : > { %16572 = vmatprep.subr.msk.bf16.mxu1 %vm640_vm0, %v19892_v7  ;;  %v18897_v7 = vld [vmem:[#allocation7 + $0x348] ss:$16 sps:$4 sm:$0xff]  }
 0x424   : > { %v22110_v14 = vpop.f32.mrb[36].mxu0 }
 0x425   : > { %v22112_v15 = vpop.f32.mrb[37].mxu0 }
 0x426   : > { %v22115_v39 = vpop.f32.mrb[38].mxu0  ;;  %5550 = vmatpush1.bf16.msra.mxu1 %v20932_v57 }
 0x427   : > { %v22118_v16 = vpop.f32.mrb[39].mxu0  ;;  %5610 = vmatprep.subr.bf16.mxu1 %v21703_v52 }
 0x429   : > { %16570 = vmatmul.mubr.msk.bf16.gmra.mrb[52].mxu1 %vm630_vm1, %v18889_v25 }
 0x42a   : > { %5536 = vmatprep.mubr.bf16.mxu1 %v24598_v13 }
 0x42c   : > { %v22123_v19 = vpop.f32.mrb[40].mxu0 }
 0x42d   : > { %v22125_v60 = vpop.f32.mrb[41].mxu0 }
 0x42e   : > { %v22128_v38 = vpop.f32.mrb[42].mxu0 }
 0x42f   : > { %v22130_v58 = vpop.f32.mrb[43].mxu0 }
 0x431   : > { %16571 = vmatmul.mubr.msk.bf16.gmra.mrb[56].mxu1 %vm630_vm1, %v18890_v61 }
 0x432   : > { %5579 = vmatprep.mubr.bf16.mxu1 %v24598_v13 }
 0x434   : > { %v22134_v57 = vpop.f32.mrb[44].mxu0 }
 0x435   : > { %v22136_v52 = vpop.f32.mrb[45].mxu0 }
 0x436   : > { %v22138_v8 = vpop.f32.mrb[46].mxu0 }
 0x437   : > { %v22140_v54 = vpop.f32.mrb[47].mxu0 }
 0x439   : > { %16573 = vmatmul.mubr.msk.bf16.vlgmr.msra.gmra.mrb[60].mxu1 %vm630_vm1, %v18888_v37 }
 0x43a   : > { %5611 = vmatpush1.bf16.msra.mxu1 %v21729_v17  ;;  %5589 = vmatprep.mubr.bf16.mxu1 %v24598_v13 }
 0x43b   : > { %16576 = vmatprep.subr.msk.bf16.mxu1 %vm640_vm0, %v21732_v36 }
 0x43c   : > { %v22147_v29 = vpop.f32.mrb[48].mxu0 }
 0x43d   : > { %v22149_v6 = vpop.f32.mrb[49].mxu0 }
 0x43e   : > { %v22151_v42 = vpop.f32.mrb[50].mxu0  ;;  %5613 = vmatpush1.bf16.msra.mxu1 %v24631_v18  ;;  %v18903_v18 = vld [vmem:[#allocation7 + $0x388] ss:$16 sps:$4 sm:$0xff]  }
 0x43f   : > { %v22154_v46 = vpop.f32.mrb[51].mxu0  ;;  %10014 = vmatprep.subr.bf16.mxu1 %v18893_v3  ;;  %v18905_v3 = vld [vmem:[#allocation7 + $0x38c] ss:$16 sps:$4 sm:$0xff]  }
 0x441   : > { %16574 = vmatmul.mubr.msk.bf16.gmra.mrb[64].mxu1 %vm630_vm1, %v18889_v25 }
 0x442   : > { %5599 = vmatprep.mubr.bf16.mxu1 %v24598_v13 }
 0x444   : > { %v22158_v17 = vpop.f32.mrb[52].mxu0 }
 0x445   : > { %v22160_v36 = vpop.f32.mrb[53].mxu0 }
 0x446   : > { %v22162_v1 = vpop.f32.mrb[54].mxu0 }
 0x447   : > { %v22164_v31 = vpop.f32.mrb[55].mxu0 }
 0x449   : > { %16575 = vmatmul.mubr.msk.bf16.gmra.mrb[68].mxu1 %vm630_vm1, %v18890_v61 }
 0x44a   : > { %5642 = vmatprep.mubr.bf16.mxu1 %v24598_v13 }
 0x44c   : > { %v22168_v63 = vpop.f32.mrb[56].mxu0 }
 0x44d   : > { %v22170_v0 = vpop.f32.mrb[57].mxu0 }
 0x44e   : > { %v22172_v53 = vpop.f32.mrb[58].mxu0 }
 0x44f   : > { %v22174_v55 = vpop.f32.mrb[59].mxu0 }
 0x451   : > { %16577 = vmatmul.mubr.msk.bf16.vlgmr.msra.gmra.mrb[72].mxu1 %vm630_vm1, %v18888_v37  ;;  %v18900_v37 = vld [vmem:[#allocation7 + $0x368] ss:$16 sps:$4 sm:$0xff]  }
 0x452   : > { %10015 = vmatpush1.bf16.msra.mxu1 %v18891_v12  ;;  %5652 = vmatprep.mubr.bf16.mxu1 %v24598_v13  ;;  %v18908_v12 = vld [vmem:[#allocation7 + $0x3ac] ss:$16 sps:$4 sm:$0xff]  }
 0x453   : > { %10016 = vmatprep.subr.bf16.mxu1 %v18896_v10  ;;  %v18906_v10 = vld [vmem:[#allocation7 + $0x3a8] ss:$16 sps:$4 sm:$0xff]  }
 0x454   : > { %v22178_v9 = vpop.f32.mrb[60].mxu0 }
 0x455   : > { %v22180_v21 = vpop.f32.mrb[61].mxu0 }
 0x456   : > { %10017 = vmatpush1.bf16.msra.mxu1 %v18894_v28  ;;  %v22182_v41 = vpop.f32.mrb[62].mxu0  ;;  %v18911_v28 = vld [vmem:[#allocation7 + $0x3cc] ss:$16 sps:$4 sm:$0xff]  }
 0x457   : > { %v22184_v20 = vpop.f32.mrb[63].mxu0  ;;  %10018 = vmatprep.subr.bf16.mxu1 %v18899_v45  ;;  %v18914_v45 = vld [vmem:[#allocation7 + $0x3ec] ss:$16 sps:$4 sm:$0xff]  }
 0x459   : > { %16578 = vmatmul.mubr.msk.bf16.gmra.mrb[76].mxu1 %vm630_vm1, %v18889_v25  ;;  %v18909_v25 = vld [vmem:[#allocation7 + $0x3c8] ss:$16 sps:$4 sm:$0xff]  }
 0x45a   : > { %10019 = vmatpush1.bf16.msra.mxu1 %v18897_v7  ;;  %5662 = vmatprep.mubr.bf16.mxu1 %v24598_v13  ;;  %v18912_v7 = vld [vmem:[#allocation7 + $0x3e8] ss:$16 sps:$4 sm:$0xff]  }
 0x45b   : > { %10020 = vmatprep.subr.bf16.mxu1 %v18902_v56  ;;  %v18917_v56 = vld [vmem:[#allocation7 + $0x40c] ss:$16 sps:$4 sm:$0xff]  }
 0x45e   : > { %10021 = vmatpush1.bf16.msra.mxu1 %v18900_v37  ;;  %v18915_v37 = vld [vmem:[#allocation7 + $0x408] ss:$16 sps:$4 sm:$0xff]  }
 0x45f   : > { %10022 = vmatprep.subr.bf16.mxu1 %v18905_v3  ;;  %v18920_v3 = vld [vmem:[#allocation7 + $0x42c] ss:$16 sps:$4 sm:$0xff]  }
 0x461   : > { %16579 = vmatmul.mubr.msk.bf16.gmra.mrb[80].mxu1 %vm630_vm1, %v18890_v61  ;;  %v18918_v61 = vld [vmem:[#allocation7 + $0x428] ss:$16 sps:$4 sm:$0xff]  }
 0x462   : > { %10023 = vmatpush1.bf16.msra.mxu1 %v18903_v18  ;;  %10046 = vmatprep.mubr.bf16.mxu1 %v22024_v62  ;;  %v18923_v18 = vld [vmem:[#allocation7 + $0x44c] ss:$16 sps:$4 sm:$0xff]   ;;  %v19920_v62 = vld [vmem:[#allocation7 + $0x4a8] ss:$16 sps:$4 sm:$0xff]  }
 0x463   : > { %10024 = vmatprep.subr.bf16.mxu1 %v18908_v12  ;;  %v18921_v12 = vld [vmem:[#allocation7 + $0x448] ss:$16 sps:$4 sm:$0xff]  }
 0x466   : > { %10025 = vmatpush1.bf16.msra.mxu1 %v18906_v10  ;;  %v18926_v10 = vld [vmem:[#allocation7 + $0x46c] ss:$16 sps:$4 sm:$0xff]  }
 0x467   : > { %10026 = vmatprep.subr.bf16.mxu1 %v18911_v28  ;;  %v18977_v28 = vld [vmem:[#allocation7 + $0x344] ss:$16 sps:$4 sm:$0xff]  }
 0x468   : > { %6525 = vmatprep.subr.bf16.mxu0 %v18977_v28  ;;  %v18995_v28 = vld [vmem:[#allocation7 + $0x3a4] ss:$16 sps:$4 sm:$0xff]  }
 0x46a   : > { %10027 = vmatpush1.bf16.msra.mxu1 %v18909_v25  ;;  %v18975_v25 = vld [vmem:[#allocation7 + $0x340] ss:$16 sps:$4 sm:$0xff]  }
 0x46b   : > { %10028 = vmatprep.subr.bf16.mxu1 %v18914_v45  ;;  %v18924_v45 = vld [vmem:[#allocation7 + $0x468] ss:$16 sps:$4 sm:$0xff]   ;;  %6526 = vmatpush1.bf16.msra.mxu0 %v18975_v25 }
 0x46c   : > { %v18933_v25 = vld [vmem:[#allocation7 + $0x4c8] ss:$16 sps:$4 sm:$0xff]  }
 0x46e   : > { %10029 = vmatpush1.bf16.msra.mxu1 %v18912_v7  ;;  %v18929_v7 = vld [vmem:[#allocation7 + $0x48c] ss:$16 sps:$4 sm:$0xff]  }
 0x46f   : > { %10030 = vmatprep.subr.bf16.mxu1 %v18917_v56  ;;  %v18983_v56 = vld [vmem:[#allocation7 + $0x364] ss:$16 sps:$4 sm:$0xff]  }
 0x470   : > { %6527 = vmatprep.subr.bf16.mxu0 %v18983_v56  ;;  %v19001_v56 = vld [vmem:[#allocation7 + $0x3c4] ss:$16 sps:$4 sm:$0xff]  }
 0x472   : > { %10031 = vmatpush1.bf16.msra.mxu1 %v18915_v37  ;;  %v18981_v37 = vld [vmem:[#allocation7 + $0x360] ss:$16 sps:$4 sm:$0xff]  }
 0x473   : > { %10032 = vmatprep.subr.bf16.mxu1 %v18920_v3  ;;  %v18927_v3 = vld [vmem:[#allocation7 + $0x488] ss:$16 sps:$4 sm:$0xff]   ;;  %6528 = vmatpush1.bf16.msra.mxu0 %v18981_v37 }
 0x474   : > { %6529 = vmatprep.subr.bf16.mxu0 %v18989_v26  ;;  %v18936_v37 = vld [vmem:[#allocation7 + $0x4e8] ss:$16 sps:$4 sm:$0xff]   ;;  %v19007_v26 = vld [vmem:[#allocation7 + $0x3e4] ss:$16 sps:$4 sm:$0xff]  }
 0x476   : > { %10033 = vmatpush1.bf16.msra.mxu1 %v18918_v61  ;;  %v18932_v61 = vld [vmem:[#allocation7 + $0x4ac] ss:$16 sps:$4 sm:$0xff]  }
 0x477   : > { %10034 = vmatprep.subr.bf16.mxu1 %v18923_v18  ;;  %v18987_v18 = vld [vmem:[#allocation7 + $0x380] ss:$16 sps:$4 sm:$0xff]  }
 0x478   : > { %6530 = vmatpush1.bf16.msra.mxu0 %v18987_v18  ;;  %v18939_v18 = vld [vmem:[#allocation7 + $0x508] ss:$16 sps:$4 sm:$0xff]  }
 0x479   : > { %6531 = vmatprep.subr.bf16.mxu0 %v18995_v28  ;;  %v19013_v28 = vld [vmem:[#allocation7 + $0x404] ss:$16 sps:$4 sm:$0xff]  }
 0x47a   : > { %10035 = vmatpush1.bf16.msra.mxu1 %v18921_v12  ;;  %v18935_v12 = vld [vmem:[#allocation7 + $0x4cc] ss:$16 sps:$4 sm:$0xff]  }
 0x47b   : > { %10036 = vmatprep.subr.bf16.mxu1 %v18926_v10  ;;  %v18993_v10 = vld [vmem:[#allocation7 + $0x3a0] ss:$16 sps:$4 sm:$0xff]  }
 0x47c   : > { %6532 = vmatpush1.bf16.msra.mxu0 %v18993_v10  ;;  %v18942_v10 = vld [vmem:[#allocation7 + $0x528] ss:$16 sps:$4 sm:$0xff]  }
 0x47d   : > { %6533 = vmatprep.subr.bf16.mxu0 %v19001_v56  ;;  %v19017_v56 = vld [vmem:[#allocation7 + $0x420] ss:$16 sps:$4 sm:$0xff]  }
 0x47e   : > { %10037 = vmatpush1.bf16.msra.mxu1 %v18924_v45  ;;  %v18938_v45 = vld [vmem:[#allocation7 + $0x4ec] ss:$16 sps:$4 sm:$0xff]  }
 0x47f   : > { %10038 = vmatprep.subr.bf16.mxu1 %v18929_v7  ;;  %v18999_v7 = vld [vmem:[#allocation7 + $0x3c0] ss:$16 sps:$4 sm:$0xff]  }
 0x480   : > { %6534 = vmatpush1.bf16.msra.mxu0 %v18999_v7  ;;  %v18945_v7 = vld [vmem:[#allocation7 + $0x548] ss:$16 sps:$4 sm:$0xff]  }
 0x481   : > { %6535 = vmatprep.subr.bf16.mxu0 %v19007_v26  ;;  %v19023_v26 = vld [vmem:[#allocation7 + $0x440] ss:$16 sps:$4 sm:$0xff]  }
 0x482   : > { %10039 = vmatpush1.bf16.msra.mxu1 %v18927_v3  ;;  %v18941_v3 = vld [vmem:[#allocation7 + $0x50c] ss:$16 sps:$4 sm:$0xff]  }
 0x483   : > { %10040 = vmatprep.subr.bf16.mxu1 %v18932_v61  ;;  %v19005_v61 = vld [vmem:[#allocation7 + $0x3e0] ss:$16 sps:$4 sm:$0xff]  }
 0x484   : > { %6536 = vmatpush1.bf16.msra.mxu0 %v19005_v61  ;;  %v18948_v61 = vld [vmem:[#allocation7 + $0x568] ss:$16 sps:$4 sm:$0xff]  }
 0x485   : > { %6537 = vmatprep.subr.bf16.mxu0 %v19013_v28  ;;  %v19029_v28 = vld [vmem:[#allocation7 + $0x460] ss:$16 sps:$4 sm:$0xff]  }
 0x486   : > { %10041 = vmatpush1.bf16.msra.mxu1 %v18930_v2  ;;  %v18944_v2 = vld [vmem:[#allocation7 + $0x52c] ss:$16 sps:$4 sm:$0xff]  }
 0x487   : > { %10042 = vmatprep.subr.bf16.mxu1 %v18935_v12  ;;  %v19011_v12 = vld [vmem:[#allocation7 + $0x400] ss:$16 sps:$4 sm:$0xff]  }
 0x488   : > { %6538 = vmatpush1.bf16.msra.mxu0 %v19011_v12  ;;  %v18951_v12 = vld [vmem:[#allocation7 + $0x588] ss:$16 sps:$4 sm:$0xff]  }
 0x48a   : > { %10043 = vmatpush1.bf16.msra.mxu1 %v18933_v25  ;;  %v18947_v25 = vld [vmem:[#allocation7 + $0x54c] ss:$16 sps:$4 sm:$0xff]  }
 0x48b   : > { %10044 = vmatprep.subr.bf16.mxu1 %v18938_v45  ;;  %v19019_v45 = vld [vmem:[#allocation7 + $0x424] ss:$16 sps:$4 sm:$0xff]  }
 0x48c   : > { %6539 = vmatprep.subr.bf16.mxu0 %v19019_v45  ;;  %v19035_v45 = vld [vmem:[#allocation7 + $0x480] ss:$16 sps:$4 sm:$0xff]  }
 0x48d   : > { %6540 = vmatpush1.bf16.msra.mxu0 %v19017_v56  ;;  %v18954_v56 = vld [vmem:[#allocation7 + $0x5a8] ss:$16 sps:$4 sm:$0xff]  }
 0x48e   : > { %10045 = vmatpush1.bf16.msra.mxu1 %v18936_v37  ;;  %v18950_v37 = vld [vmem:[#allocation7 + $0x56c] ss:$16 sps:$4 sm:$0xff]  }
 0x48f   : > { %10067 = vmatprep.subr.bf16.mxu1 %v18941_v3  ;;  %v19025_v3 = vld [vmem:[#allocation7 + $0x444] ss:$16 sps:$4 sm:$0xff]  }
 0x490   : > { %6541 = vmatprep.subr.bf16.mxu0 %v19025_v3  ;;  %v18957_v3 = vld [vmem:[#allocation7 + $0x5c8] ss:$16 sps:$4 sm:$0xff]  }
 0x491   : > { %10047 = vmatmul.mubr.bf16.vlgmr.msra.gmra.mrb[84].mxu1 %v21942_v34  ;;  %6542 = vmatpush1.bf16.msra.mxu0 %v19023_v26  ;;  %v18962_v26 = vld [vmem:[#allocation7 + $0x5ec] ss:$16 sps:$4 sm:$0xff]  }
 0x492   : > { %10056 = vmatprep.mubr.bf16.mxu1 %v22045_v32  ;;  %10068 = vmatpush1.bf16.msra.mxu1 %v18939_v18  ;;  %v18953_v18 = vld [vmem:[#allocation7 + $0x58c] ss:$16 sps:$4 sm:$0xff]  }
 0x493   : > { %10069 = vmatprep.subr.bf16.mxu1 %v18944_v2  ;;  %v19031_v2 = vld [vmem:[#allocation7 + $0x464] ss:$16 sps:$4 sm:$0xff]  }
 0x494   : > { %6543 = vmatprep.subr.bf16.mxu0 %v19031_v2  ;;  %v18960_v2 = vld [vmem:[#allocation7 + $0x5e8] ss:$16 sps:$4 sm:$0xff]  }
 0x495   : > { %6544 = vmatpush1.bf16.msra.mxu0 %v19029_v28  ;;  %v18968_v28 = vld [vmem:[#allocation7 + $0x4] ss:$16 sps:$4 sm:$0xff]  }
 0x496   : > { %10070 = vmatpush1.bf16.msra.mxu1 %v18942_v10  ;;  %v18956_v10 = vld [vmem:[#allocation7 + $0x5ac] ss:$16 sps:$4 sm:$0xff]  }
 0x497   : > { %10071 = vmatprep.subr.bf16.mxu1 %v18947_v25  ;;  %v19037_v25 = vld [vmem:[#allocation7 + $0x484] ss:$16 sps:$4 sm:$0xff]  }
 0x498   : > { %6545 = vmatprep.subr.bf16.mxu0 %v19037_v25  ;;  %v18966_v25 = vld [vmem:[#allocation7] ss:$16 sps:$4 sm:$0xff]  }
 0x499   : > { %10057 = vmatmul.mubr.bf16.gmra.mrb[88].mxu1 %v21977_v47  ;;  %6546 = vmatpush1.bf16.msra.mxu0 %v19035_v45  ;;  %v19041_v47 = vld [vmem:[#allocation7 + $0x4a0] ss:$16 sps:$4 sm:$0xff]   ;;  %v18974_v45 = vld [vmem:[#allocation7 + $0x24] ss:$16 sps:$4 sm:$0xff]  }
 0x49a   : > { %10072 = vmatpush1.bf16.msra.mxu1 %v18945_v7  ;;  %10099 = vmatprep.mubr.bf16.mxu1 %v24598_v13  ;;  %v18959_v7 = vld [vmem:[#allocation7 + $0x5cc] ss:$16 sps:$4 sm:$0xff]  }
 0x49b   : > { %10073 = vmatprep.subr.bf16.mxu1 %v18950_v37  ;;  %v19043_v37 = vld [vmem:[#allocation7 + $0x4a4] ss:$16 sps:$4 sm:$0xff]  }
 0x49c   : > { %6547 = vmatprep.subr.bf16.mxu0 %v19043_v37  ;;  %v18978_v37 = vld [vmem:[#allocation7 + $0x40] ss:$16 sps:$4 sm:$0xff]  }
 0x49d   : > { %6548 = vmatpush1.bf16.msra.mxu0 %v19041_v47  ;;  %v18972_v47 = vld [vmem:[#allocation7 + $0x20] ss:$16 sps:$4 sm:$0xff]  }
 0x49e   : > { %10074 = vmatpush1.bf16.msra.mxu1 %v18948_v61  ;;  %v19049_v61 = vld [vmem:[#allocation7 + $0x4c4] ss:$16 sps:$4 sm:$0xff]  }
 0x49f   : > { %10075 = vmatprep.subr.bf16.mxu1 %v18953_v18  ;;  %v19047_v18 = vld [vmem:[#allocation7 + $0x4c0] ss:$16 sps:$4 sm:$0xff]   ;;  %6549 = vmatprep.subr.bf16.mxu0 %v19049_v61  ;;  %v18992_v61 = vld [vmem:[#allocation7 + $0x84] ss:$16 sps:$4 sm:$0xff]  }
 0x4a1   : > { %6550 = vmatpush1.bf16.msra.mxu0 %v19047_v18  ;;  %v18990_v18 = vld [vmem:[#allocation7 + $0x80] ss:$16 sps:$4 sm:$0xff]  }
 0x4a2   : > { %10076 = vmatpush1.bf16.msra.mxu1 %v18951_v12  ;;  %v19055_v12 = vld [vmem:[#allocation7 + $0x4e4] ss:$16 sps:$4 sm:$0xff]  }
 0x4a3   : > { %10077 = vmatprep.subr.bf16.mxu1 %v18956_v10  ;;  %v19053_v10 = vld [vmem:[#allocation7 + $0x4e0] ss:$16 sps:$4 sm:$0xff]   ;;  %6551 = vmatprep.subr.bf16.mxu0 %v19055_v12  ;;  %v19004_v12 = vld [vmem:[#allocation7 + $0xc4] ss:$16 sps:$4 sm:$0xff]  }
 0x4a5   : > { %6552 = vmatpush1.bf16.msra.mxu0 %v19053_v10  ;;  %v19002_v10 = vld [vmem:[#allocation7 + $0xc0] ss:$16 sps:$4 sm:$0xff]  }
 0x4a6   : > { %10078 = vmatpush1.bf16.msra.mxu1 %v18954_v56  ;;  %v19061_v56 = vld [vmem:[#allocation7 + $0x504] ss:$16 sps:$4 sm:$0xff]  }
 0x4a7   : > { %10079 = vmatprep.subr.bf16.mxu1 %v18959_v7  ;;  %v18980_v7 = vld [vmem:[#allocation7 + $0x44] ss:$16 sps:$4 sm:$0xff]   ;;  %6574 = vmatprep.subr.bf16.mxu0 %v19061_v56 }
 0x4a8   : > { %v19016_v56 = vld [vmem:[#allocation7 + $0x104] ss:$16 sps:$4 sm:$0xff]  }
 0x4aa   : > { %10080 = vmatpush1.bf16.msra.mxu1 %v18957_v3  ;;  %v18986_v3 = vld [vmem:[#allocation7 + $0x64] ss:$16 sps:$4 sm:$0xff]  }
 0x4ab   : > { %10081 = vmatprep.subr.bf16.mxu1 %v18962_v26  ;;  %v18984_v26 = vld [vmem:[#allocation7 + $0x60] ss:$16 sps:$4 sm:$0xff]  }
 0x4ae   : > { %10082 = vmatpush1.bf16.msra.mxu1 %v18960_v2  ;;  %v18998_v2 = vld [vmem:[#allocation7 + $0xa4] ss:$16 sps:$4 sm:$0xff]  }
 0x4af   : > { %10120 = vmatprep.subr.bf16.mxu1 %v18968_v28  ;;  %v18996_v28 = vld [vmem:[#allocation7 + $0xa0] ss:$16 sps:$4 sm:$0xff]  }
 0x4b1   : > { %10100 = vmatmul.mubr.bf16.vlgmr.msra.gmra.mrb[84].mxu1 %v22030_v27 }
 0x4b2   : > { %10109 = vmatprep.mubr.bf16.mxu1 %v24598_v13  ;;  %10121 = vmatpush1.bf16.msra.mxu1 %v18966_v25  ;;  %v19010_v25 = vld [vmem:[#allocation7 + $0xe4] ss:$16 sps:$4 sm:$0xff]  }
 0x4b3   : > { %10122 = vmatprep.subr.bf16.mxu1 %v18974_v45  ;;  %v19008_v45 = vld [vmem:[#allocation7 + $0xe0] ss:$16 sps:$4 sm:$0xff]  }
 0x4b6   : > { %10123 = vmatpush1.bf16.msra.mxu1 %v18972_v47  ;;  %v19014_v47 = vld [vmem:[#allocation7 + $0x100] ss:$16 sps:$4 sm:$0xff]  }
 0x4b7   : > { %10124 = vmatprep.subr.bf16.mxu1 %v18980_v7  ;;  %v19022_v7 = vld [vmem:[#allocation7 + $0x124] ss:$16 sps:$4 sm:$0xff]  }
 0x4b9   : > { %10110 = vmatmul.mubr.bf16.gmra.mrb[88].mxu1 %v22048_v59 }
 0x4ba   : > { %10125 = vmatpush1.bf16.msra.mxu1 %v18978_v37  ;;  %v19020_v37 = vld [vmem:[#allocation7 + $0x120] ss:$16 sps:$4 sm:$0xff]  }
 0x4bb   : > { %10126 = vmatprep.subr.bf16.mxu1 %v18986_v3  ;;  %v19028_v3 = vld [vmem:[#allocation7 + $0x144] ss:$16 sps:$4 sm:$0xff]  }
 0x4be   : > { %10127 = vmatpush1.bf16.msra.mxu1 %v18984_v26  ;;  %v19026_v26 = vld [vmem:[#allocation7 + $0x140] ss:$16 sps:$4 sm:$0xff]  }
 0x4bf   : > { %10128 = vmatprep.subr.bf16.mxu1 %v18992_v61  ;;  %v19034_v61 = vld [vmem:[#allocation7 + $0x164] ss:$16 sps:$4 sm:$0xff]  }
 0x4c2   : > { %10129 = vmatpush1.bf16.msra.mxu1 %v18990_v18  ;;  %v19032_v18 = vld [vmem:[#allocation7 + $0x160] ss:$16 sps:$4 sm:$0xff]  }
 0x4c3   : > { %10130 = vmatprep.subr.bf16.mxu1 %v18998_v2  ;;  %v19040_v2 = vld [vmem:[#allocation7 + $0x184] ss:$16 sps:$4 sm:$0xff]  }
 0x4c6   : > { %10131 = vmatpush1.bf16.msra.mxu1 %v18996_v28  ;;  %v19038_v28 = vld [vmem:[#allocation7 + $0x180] ss:$16 sps:$4 sm:$0xff]  }
 0x4c7   : > { %10132 = vmatprep.subr.bf16.mxu1 %v19004_v12  ;;  %v19046_v12 = vld [vmem:[#allocation7 + $0x1a4] ss:$16 sps:$4 sm:$0xff]  }
 0x4ca   : > { %10133 = vmatpush1.bf16.msra.mxu1 %v19002_v10  ;;  %v19044_v10 = vld [vmem:[#allocation7 + $0x1a0] ss:$16 sps:$4 sm:$0xff]  }
 0x4cb   : > { %10134 = vmatprep.subr.bf16.mxu1 %v19010_v25  ;;  %v19052_v25 = vld [vmem:[#allocation7 + $0x1c4] ss:$16 sps:$4 sm:$0xff]  }
 0x4ce   : > { %10135 = vmatpush1.bf16.msra.mxu1 %v19008_v45  ;;  %v19050_v45 = vld [vmem:[#allocation7 + $0x1c0] ss:$16 sps:$4 sm:$0xff]  }
 0x4cf   : > { %10136 = vmatprep.subr.bf16.mxu1 %v19016_v56  ;;  %v19058_v56 = vld [vmem:[#allocation7 + $0x1e4] ss:$16 sps:$4 sm:$0xff]  }
 0x4d2   : > { %10137 = vmatpush1.bf16.msra.mxu1 %v19014_v47  ;;  %v19056_v47 = vld [vmem:[#allocation7 + $0x1e0] ss:$16 sps:$4 sm:$0xff]  }
 0x4d3   : > { %10138 = vmatprep.subr.bf16.mxu1 %v19022_v7  ;;  %v19064_v7 = vld [vmem:[#allocation7 + $0x204] ss:$16 sps:$4 sm:$0xff]  }
 0x4d6   : > { %10139 = vmatpush1.bf16.msra.mxu1 %v19020_v37  ;;  %v24632_v37 = vld [vmem:[#allocation62_spill] sm:$0xff] }
 0x4d7   : > { %10140 = vmatprep.subr.bf16.mxu1 %v19028_v3  ;;  %v4553_v3 = vadd.f32 %v22087_v22, %v24632_v37 }
 0x4da   : > { %10141 = vmatpush1.bf16.msra.mxu1 %v19026_v26  ;;  %v24633_v26 = vld [vmem:[#allocation63_spill] sm:$0xff] }
 0x4db   : > { %10142 = vmatprep.subr.bf16.mxu1 %v19034_v61  ;;  %v4554_v61 = vadd.f32 %v22089_v48, %v24633_v26 }
 0x4dd   : > { %v4590_v59 = vmax.f32 %v4554_v61, 0.0 }
 0x4de   : > { %10143 = vmatpush1.bf16.msra.mxu1 %v19032_v18 }
 0x4df   : > { %10144 = vmatprep.subr.bf16.mxu1 %v19040_v2  ;;  %v4559_v2 = vadd.f32 %v22091_v49, %v24632_v37 }
 0x4e1   : > { %v4595_v24 = vmax.f32 %v4559_v2, 0.0  ;;  %v4571_v2 = vadd.f32 %v22103_v43, %v24632_v37 }
 0x4e2   : > { %10145 = vmatpush1.bf16.msra.mxu1 %v19038_v28 }
 0x4e3   : > { %10146 = vmatprep.subr.bf16.mxu1 %v19046_v12 }
 0x4e6   : > { %10147 = vmatpush1.bf16.msra.mxu1 %v19044_v10  ;;  %v4560_v10 = vadd.f32 %v22093_v23, %v24633_v26 }
 0x4e7   : > { %10148 = vmatprep.subr.bf16.mxu1 %v19052_v25 }
 0x4e8   : > { %v4596_v32 = vmax.f32 %v4560_v10, 0.0 }
 0x4ea   : > { %10149 = vmatpush1.bf16.msra.mxu1 %v19050_v45 }
 0x4eb   : > { %10150 = vmatprep.subr.bf16.mxu1 %v19058_v56  ;;  %v4589_v56 = vmax.f32 %v4553_v3, 0.0 }
 0x4ee   : > { %10151 = vmatpush1.bf16.msra.mxu1 %v19056_v47 }
 0x4ef   : > { %10173 = vmatprep.subr.bf16.mxu1 %v19064_v7 }
 0x4f4   : > { %v5518_v18 = vpop.f32.mrb[48].mxu1 }
 0x4f5   : > { %v5709_v28 = vadd.f32 %v5518_v18, %v24632_v37  ;;  %v5520_v12 = vpop.f32.mrb[49].mxu1 }
 0x4f6   : > { %v5710_v25 = vadd.f32 %v5520_v12, %v24633_v26  ;;  %v5522_v45 = vpop.f32.mrb[50].mxu1  ;;  %v4565_v12 = vadd.f32 %v22098_v30, %v24632_v37 }
 0x4f7   : > { %v5745_v47 = vmax.f32 %v5709_v28, 0.0  ;;  %v5715_v22 = vadd.f32 %v5522_v45, %v24632_v37  ;;  %v5524_v7 = vpop.f32.mrb[51].mxu1  ;;  %v4566_v28 = vadd.f32 %v22100_v50, %v24633_v26 }
 0x4f8   : > { %v5746_v48 = vmax.f32 %v5710_v25, 0.0  ;;  %v5716_v27 = vadd.f32 %v5524_v7, %v24633_v26 }
 0x4f9   : > { %v22209_v49 = vmax.f32 %v4589_v56, %v5745_v47  ;;  %v5751_v18 = vmax.f32 %v5715_v22, 0.0 }
 0x4fa   : > { %v22211_v34 = vmax.f32 %v4590_v59, %v5746_v48  ;;  %v5752_v23 = vmax.f32 %v5716_v27, 0.0  ;;  %v4572_v27 = vadd.f32 %v22105_v35, %v24633_v26  ;;  %v4607_v48 = vmax.f32 %v4571_v2, 0.0 }
 0x4fb   : > { %v22215_v3 = vmax.f32 %v4595_v24, %v5751_v18  ;;  %v4601_v24 = vmax.f32 %v4565_v12, 0.0  ;;  %v4583_v2 = vadd.f32 %v22115_v39, %v24632_v37 }
 0x4fc   : > { %v22219_v61 = vmax.f32 %v4596_v32, %v5752_v23  ;;  %v5528_v25 = vpop.f32.mrb[52].mxu1  ;;  %v4602_v32 = vmax.f32 %v4566_v28, 0.0  ;;  %v4608_v23 = vmax.f32 %v4572_v27, 0.0 }
 0x4fd   : > { %v5721_v45 = vadd.f32 %v5528_v25, %v24632_v37  ;;  %v5530_v10 = vpop.f32.mrb[53].mxu1 }
 0x4fe   : > { %v5722_v59 = vadd.f32 %v5530_v10, %v24633_v26  ;;  %v5532_v30 = vpop.f32.mrb[54].mxu1  ;;  %v4577_v10 = vadd.f32 %v22110_v14, %v24632_v37 }
 0x4ff   : > { %v5757_v56 = vmax.f32 %v5721_v45, 0.0  ;;  %v5727_v47 = vadd.f32 %v5532_v30, %v24632_v37  ;;  %v5534_v50 = vpop.f32.mrb[55].mxu1  ;;  %v4578_v45 = vadd.f32 %v22112_v15, %v24633_v26 }
 0x500   : > { %v5758_v22 = vmax.f32 %v5722_v59, 0.0  ;;  %v5728_v7 = vadd.f32 %v5534_v50, %v24633_v26 }
 0x501   : > { %v22229_v43 = vmax.f32 %v4601_v24, %v5757_v56  ;;  %v5763_v18 = vmax.f32 %v5727_v47, 0.0  ;;  %v4584_v24 = vadd.f32 %v22118_v16, %v24633_v26  ;;  %v4613_v47 = vmax.f32 %v4577_v10, 0.0 }
 0x502   : > { %v22231_v25 = vmax.f32 %v4602_v32, %v5758_v22  ;;  %v5764_v35 = vmax.f32 %v5728_v7, 0.0  ;;  %v4614_v22 = vmax.f32 %v4578_v45, 0.0 }
 0x503   : > { %v22235_v12 = vmax.f32 %v4607_v48, %v5763_v18  ;;  %v4619_v18 = vmax.f32 %v4583_v2, 0.0 }
 0x504   : > { %v22239_v28 = vmax.f32 %v4608_v23, %v5764_v35  ;;  %v5538_v59 = vpop.f32.mrb[56].mxu1  ;;  %v4620_v35 = vmax.f32 %v4584_v24, 0.0 }
 0x505   : > { %v5733_v30 = vadd.f32 %v5538_v59, %v24632_v37  ;;  %v5540_v27 = vpop.f32.mrb[57].mxu1 }
 0x506   : > { %v5734_v56 = vadd.f32 %v5540_v27, %v24633_v26  ;;  %v5542_v14 = vpop.f32.mrb[58].mxu1  ;;  %v4555_v27 = vadd.f32 %v22123_v19, %v21864_v40 }
 0x507   : > { %v5769_v50 = vmax.f32 %v5733_v30, 0.0  ;;  %v5739_v32 = vadd.f32 %v5542_v14, %v24632_v37  ;;  %v5544_v15 = vpop.f32.mrb[59].mxu1  ;;  %v24634_v30 = vld [vmem:[#allocation54_spill] sm:$0xff] }
 0x508   : > { %v5770_v7 = vmax.f32 %v5734_v56, 0.0  ;;  %v5740_v48 = vadd.f32 %v5544_v15, %v24633_v26  ;;  %v4556_v37 = vadd.f32 %v22125_v60, %v24634_v30  ;;  %v4561_v26 = vadd.f32 %v22128_v38, %v21864_v40 }
 0x509   : > { %v22249_v39 = vmax.f32 %v4613_v47, %v5769_v50  ;;  %v5775_v23 = vmax.f32 %v5739_v32, 0.0  ;;  %v4562_v14 = vadd.f32 %v22130_v58, %v24634_v30  ;;  %v4591_v50 = vmax.f32 %v4555_v27, 0.0 }
 0x50a   : > { %v22251_v59 = vmax.f32 %v4614_v22, %v5770_v7  ;;  %v5776_v16 = vmax.f32 %v5740_v48, 0.0  ;;  %v4592_v22 = vmax.f32 %v4556_v37, 0.0  ;;  %v4567_v58 = vadd.f32 %v22134_v57, %v21864_v40 }
 0x50b   : > { %v22255_v10 = vmax.f32 %v4619_v18, %v5775_v23  ;;  %v4597_v18 = vmax.f32 %v4561_v26, 0.0  ;;  %v4568_v27 = vadd.f32 %v22136_v52, %v24634_v30  ;;  %v4573_v26 = vadd.f32 %v22138_v8, %v21864_v40 }
 0x50c   : > { %v22259_v45 = vmax.f32 %v4620_v35, %v5776_v16  ;;  %v5581_v56 = vpop.f32.mrb[60].mxu1  ;;  %v4598_v35 = vmax.f32 %v4562_v14, 0.0 }
 0x50d   : > { %v5711_v2 = vadd.f32 %v5581_v56, %v21864_v40  ;;  %v5583_v24 = vpop.f32.mrb[61].mxu1 }
 0x50e   : > { %v5712_v47 = vadd.f32 %v5583_v24, %v24634_v30  ;;  %v5585_v19 = vpop.f32.mrb[62].mxu1 }
 0x50f   : > { %v5747_v32 = vmax.f32 %v5711_v2, 0.0  ;;  %v5717_v15 = vadd.f32 %v5585_v19, %v21864_v40  ;;  %v5587_v60 = vpop.f32.mrb[63].mxu1 }
 0x510   : > { %v5748_v7 = vmax.f32 %v5712_v47, 0.0  ;;  %v5718_v48 = vadd.f32 %v5587_v60, %v24634_v30  ;;  %v4603_v60 = vmax.f32 %v4567_v58, 0.0  ;;  %v4579_v58 = vadd.f32 %v22147_v29, %v21864_v40 }
 0x511   : > { %v22269_v38 = vmax.f32 %v4591_v50, %v5747_v32  ;;  %v5753_v23 = vmax.f32 %v5717_v15, 0.0  ;;  %v4574_v50 = vadd.f32 %v22140_v54, %v24634_v30 }
 0x512   : > { %v5784_v16 = vmax.f32 %v4592_v22, %v5748_v7  ;;  %v5754_v56 = vmax.f32 %v5718_v48, 0.0  ;;  %v4604_v7 = vmax.f32 %v4568_v27, 0.0  ;;  %v4580_v27 = vadd.f32 %v22149_v6, %v24634_v30 }
 0x513   : > { %v22273_v24 = vmax.f32 %v4597_v18, %v5753_v23  ;;  %v4609_v23 = vmax.f32 %v4573_v26, 0.0  ;;  %v4585_v26 = vadd.f32 %v22151_v42, %v21864_v40 }
 0x514   : > { %v5817_v37 = vmax.f32 %v22209_v49, %v5784_v16  ;;  %v5790_v2 = vmax.f32 %v4598_v35, %v5754_v56  ;;  %v5591_v47 = vpop.f32.mrb[64].mxu1  ;;  %v4610_v16 = vmax.f32 %v4574_v50, 0.0 }
 0x515   : > { %v5723_v19 = vadd.f32 %v5591_v47, %v21864_v40  ;;  %v5593_v14 = vpop.f32.mrb[65].mxu1 }
 0x516   : > { %v5820_v57 = vmax.f32 %v22215_v3, %v5790_v2  ;;  %v5724_v32 = vadd.f32 %v5593_v14, %v24634_v30  ;;  %v5595_v15 = vpop.f32.mrb[66].mxu1 }
 0x517   : > { %v5759_v52 = vmax.f32 %v5723_v19, 0.0  ;;  %v5729_v49 = vadd.f32 %v5595_v15, %v21864_v40  ;;  %v5597_v22 = vpop.f32.mrb[67].mxu1 }
 0x518   : > { %v22286_v48 = vpack.c.bf16 %v5820_v57, %v5817_v37  ;;  %v5760_v8 = vmax.f32 %v5724_v32, 0.0  ;;  %v5730_v18 = vadd.f32 %v5597_v22, %v24634_v30  ;;  %v4586_v32 = vadd.f32 %v22154_v46, %v24634_v30 }
 0x519   : > { %v22289_v35 = vmax.f32 %v4603_v60, %v5759_v52  ;;  %v5765_v54 = vmax.f32 %v5729_v49, 0.0  ;;  %v4615_v52 = vmax.f32 %v4579_v58, 0.0 }
 0x51a   : > { %v5796_v3 = vmax.f32 %v4604_v7, %v5760_v8  ;;  %v5766_v56 = vmax.f32 %v5730_v18, 0.0  ;;  %v4616_v7 = vmax.f32 %v4580_v27, 0.0 }
 0x51b   : > { %v22293_v2 = vmax.f32 %v4609_v23, %v5765_v54  ;;  %v4621_v23 = vmax.f32 %v4585_v26, 0.0  ;;  %v4622_v54 = vmax.f32 %v4586_v32, 0.0  ;;  %v4564_v26 = vadd.f32 %v22164_v31, %v21955_v11 }
 0x51c   : > { %v5823_v37 = vmax.f32 %v22229_v43, %v5796_v3  ;;  %v5802_v47 = vmax.f32 %v4610_v16, %v5766_v56  ;;  %v5601_v19 = vpop.f32.mrb[68].mxu1  ;;  %v4557_v3 = vadd.f32 %v22158_v17, %v21949_v4  ;;  %v4569_v31 = vadd.f32 %v22168_v63, %v21949_v4 }
 0x51d   : > { %v5735_v14 = vadd.f32 %v5601_v19, %v21864_v40  ;;  %v5603_v50 = vpop.f32.mrb[69].mxu1 }
 0x51e   : > { %v22303_v15 = vpack.c.bf16 %v5823_v37, %v5820_v57  ;;  %v5826_v29 = vmax.f32 %v22235_v12, %v5802_v47  ;;  %v5736_v60 = vadd.f32 %v5603_v50, %v24634_v30  ;;  %v5605_v6 = vpop.f32.mrb[70].mxu1  ;;  %v4593_v32 = vmax.f32 %v4557_v3, 0.0 }
 0x51f   : > { %v5771_v43 = vmax.f32 %v5735_v14, 0.0  ;;  %v5741_v49 = vadd.f32 %v5605_v6, %v21864_v40  ;;  %v5607_v22 = vpop.f32.mrb[71].mxu1  ;;  %v4558_v40 = vadd.f32 %v22160_v36, %v21955_v11 }
 0x520   : > { %24635 = vst [vmem:[#allocation50_spill] sm:$0xff] %v22303_v15  ;;  %v22308_v42 = vpack.c.bf16 %v5826_v29, %v5823_v37  ;;  %v5772_v8 = vmax.f32 %v5736_v60, 0.0  ;;  %v5742_v18 = vadd.f32 %v5607_v22, %v24634_v30  ;;  %v4563_v30 = vadd.f32 %v22162_v1, %v21949_v4 }
 0x521   : > { %v22311_v46 = vmax.f32 %v4615_v52, %v5771_v43  ;;  %v5777_v57 = vmax.f32 %v5741_v49, 0.0  ;;  %v4594_v52 = vmax.f32 %v4558_v40, 0.0  ;;  %v4605_v40 = vmax.f32 %v4569_v31, 0.0 }
 0x522   : > { %24636 = vst [vmem:[#allocation51_spill] sm:$0xff] %v22308_v42  ;;  %v5808_v12 = vmax.f32 %v4616_v7, %v5772_v8  ;;  %v5778_v16 = vmax.f32 %v5742_v18, 0.0  ;;  %v4599_v22 = vmax.f32 %v4563_v30, 0.0  ;;  %v4600_v7 = vmax.f32 %v4564_v26, 0.0 }
 0x523   : > { %v22315_v56 = vmax.f32 %v4621_v23, %v5777_v57  ;;  %v4570_v8 = vadd.f32 %v22170_v0, %v21955_v11  ;;  %v4576_v0 = vadd.f32 %v22174_v55, %v21955_v11 }
 0x524   : > { %v5829_v58 = vmax.f32 %v22249_v39, %v5808_v12  ;;  %v5814_v27 = vmax.f32 %v4622_v54, %v5778_v16  ;;  %v5644_v37 = vpop.f32.mrb[72].mxu1 }
 0x525   : > { %v5713_v47 = vadd.f32 %v5644_v37, %v21949_v4  ;;  %v5646_v19 = vpop.f32.mrb[73].mxu1  ;;  %v4606_v30 = vmax.f32 %v4570_v8, 0.0 }
 0x526   : > { %v22325_v14 = vpack.c.bf16 %v5829_v58, %v5826_v29  ;;  %v5832_v17 = vmax.f32 %v22255_v10, %v5814_v27  ;;  %v5714_v50 = vadd.f32 %v5646_v19, %v21955_v11  ;;  %v5648_v36 = vpop.f32.mrb[74].mxu1 }
 0x527   : > { %v5749_v39 = vmax.f32 %v5713_v47, 0.0  ;;  %v5719_v60 = vadd.f32 %v5648_v36, %v21949_v4  ;;  %v5650_v6 = vpop.f32.mrb[75].mxu1  ;;  %v4581_v36 = vadd.f32 %v22178_v9, %v21949_v4 }
 0x528   : > { %24637 = vst [vmem:[#allocation52_spill] sm:$0xff] %v22325_v14  ;;  %v5750_v1 = vmax.f32 %v5714_v50, 0.0  ;;  %v5720_v43 = vadd.f32 %v5650_v6, %v21955_v11  ;;  %v22331_v49 = vpack.c.bf16 %v5832_v17, %v5829_v58  ;;  %v4575_v58 = vadd.f32 %v22172_v53, %v21949_v4  ;;  %v19059_v50 = vld [vmem:[#allocation7 + $0x500] ss:$16 sps:$4 sm:$0xff]  }
 0x529   : > { %v5785_v29 = vmax.f32 %v4593_v32, %v5749_v39  ;;  %v5755_v10 = vmax.f32 %v5719_v60, 0.0  ;;  %v19067_v39 = vld [vmem:[#allocation7 + $0x524] ss:$16 sps:$4 sm:$0xff]   ;;  %v4617_v8 = vmax.f32 %v4581_v36, 0.0 }
 0x52a   : > { %24638 = vst [vmem:[#allocation53_spill] sm:$0xff] %v22331_v49  ;;  %v5786_v18 = vmax.f32 %v4594_v52, %v5750_v1  ;;  %v5756_v23 = vmax.f32 %v5720_v43, 0.0  ;;  %v22357_v60 = vld [vmem:[#allocation7 + $0x224] ss:$16 sps:$4 sm:$0xff]   ;;  %v4611_v6 = vmax.f32 %v4575_v58, 0.0  ;;  %v4612_v43 = vmax.f32 %v4576_v0, 0.0 }
 0x52b   : > { %v5818_v57 = vmax.f32 %v22211_v34, %v5785_v29  ;;  %v5791_v54 = vmax.f32 %v4599_v22, %v5755_v10  ;;  %v19065_v10 = vld [vmem:[#allocation7 + $0x520] ss:$16 sps:$4 sm:$0xff]   ;;  %v19918_v49 = vld [vmem:[#allocation7 + $0x488] ss:$16 sps:$4 sm:$0xff]  }
 0x52c   : > { %v5819_v12 = vmax.f32 %v22269_v38, %v5786_v18  ;;  %v5792_v16 = vmax.f32 %v4600_v7, %v5756_v23  ;;  %v5654_v3 = vpop.f32.mrb[76].mxu1  ;;  %v22365_v7 = vld [vmem:[#allocation7 + $0x220] ss:$16 sps:$4 sm:$0xff]   ;;  %v4582_v18 = vadd.f32 %v22180_v21, %v21955_v11 }
 0x52d   : > { %v5821_v63 = vmax.f32 %v22219_v61, %v5791_v54  ;;  %v5725_v27 = vadd.f32 %v5654_v3, %v21949_v4  ;;  %v5656_v37 = vpop.f32.mrb[77].mxu1  ;;  %v22350_v61 = vld [vmem:[#allocation7 + $0x200] ss:$16 sps:$4 sm:$0xff]  }
 0x52e   : > { %v5822_v34 = vmax.f32 %v22273_v24, %v5792_v16  ;;  %v5726_v47 = vadd.f32 %v5656_v37, %v21955_v11  ;;  %v5658_v38 = vpop.f32.mrb[78].mxu1  ;;  %v4587_v16 = vadd.f32 %v22182_v41, %v21949_v4 }
 0x52f   : > { %v22347_v19 = vpack.c.bf16 %v5821_v63, %v5818_v57  ;;  %v5761_v26 = vmax.f32 %v5725_v27, 0.0  ;;  %v5731_v17 = vadd.f32 %v5658_v38, %v21949_v4  ;;  %v5660_v53 = vpop.f32.mrb[79].mxu1  ;;  %v19071_v38 = vld [vmem:[#allocation7 + $0x540] ss:$16 sps:$4 sm:$0xff]  }
 0x530   : > { %v22354_v32 = vpack.c.bf16 %v5822_v34, %v5819_v12  ;;  %v5762_v55 = vmax.f32 %v5726_v47, 0.0  ;;  %v5732_v24 = vadd.f32 %v5660_v53, %v21955_v11  ;;  %v19073_v12 = vld [vmem:[#allocation7 + $0x544] ss:$16 sps:$4 sm:$0xff]  }
 0x531   : > { %v5797_v52 = vmax.f32 %v4605_v40, %v5761_v26  ;;  %v5767_v1 = vmax.f32 %v5731_v17, 0.0  ;;  %6553 = vmatprep.mubr.bf16.mxu0 %v22347_v19  ;;  %10152 = vmatprep.mubr.bf16.mxu1 %v22347_v19  ;;  %v22389_v26 = vld [vmem:[#allocation7 + $0x240] ss:$16 sps:$4 sm:$0xff]   ;;  %v19079_v53 = vld [vmem:[#allocation7 + $0x564] ss:$16 sps:$4 sm:$0xff]  }
 0x532   : > { %v5798_v22 = vmax.f32 %v4606_v30, %v5762_v55  ;;  %v5768_v31 = vmax.f32 %v5732_v24, 0.0  ;;  %6554 = vmatmul.mubr.bf16.vlgmr.msra.gmra.mrb[64].mxu0 %v22286_v48  ;;  %10153 = vmatmul.mubr.bf16.vlgmr.msra.gmra.mrb[92].mxu1 %v22286_v48 }
 0x533   : > { %v5824_v9 = vmax.f32 %v22231_v25, %v5797_v52  ;;  %v5803_v29 = vmax.f32 %v4611_v6, %v5767_v1  ;;  %6575 = vmatpush1.bf16.msra.mxu0 %v19059_v50  ;;  %10174 = vmatpush1.bf16.msra.mxu1 %v22350_v61  ;;  %v22371_v25 = vld [vmem:[#allocation7 + $0x244] ss:$16 sps:$4 sm:$0xff]   ;;  %v19077_v1 = vld [vmem:[#allocation7 + $0x560] ss:$16 sps:$4 sm:$0xff]  }
 0x534   : > { %v5825_v23 = vmax.f32 %v22289_v35, %v5798_v22  ;;  %v5804_v57 = vmax.f32 %v4612_v43, %v5768_v31  ;;  %v5664_v54 = vpop.f32.mrb[80].mxu1  ;;  %6576 = vmatprep.subr.bf16.mxu0 %v19067_v39  ;;  %10175 = vmatprep.subr.bf16.mxu1 %v22357_v60  ;;  %v4588_v35 = vadd.f32 %v22184_v20, %v21955_v11  ;;  %v4618_v20 = vmax.f32 %v4582_v18, 0.0  ;;  %v22395_v50 = vld [vmem:[#allocation7 + $0x264] ss:$16 sps:$4 sm:$0xff]   ;;  %v22403_v43 = vld [vmem:[#allocation7 + $0x260] ss:$16 sps:$4 sm:$0xff]  }
 0x535   : > { %v22375_v3 = vpack.c.bf16 %v5824_v9, %v5821_v63  ;;  %v5827_v40 = vmax.f32 %v22239_v28, %v5803_v29  ;;  %v5737_v58 = vadd.f32 %v5664_v54, %v21949_v4  ;;  %v5666_v21 = vpop.f32.mrb[81].mxu1  ;;  %v22407_v29 = vld [vmem:[#allocation7 + $0x284] ss:$16 sps:$4 sm:$0xff]  }
 0x536   : > { %v22381_v27 = vpack.c.bf16 %v5825_v23, %v5822_v34  ;;  %v5828_v37 = vmax.f32 %v22293_v2, %v5804_v57  ;;  %v5738_v30 = vadd.f32 %v5666_v21, %v21955_v11  ;;  %v5668_v0 = vpop.f32.mrb[82].mxu1  ;;  %v4624_v24 = vmax.f32 %v4588_v35, 0.0  ;;  %v22423_v54 = vld [vmem:[#allocation7 + $0x2a4] ss:$16 sps:$4 sm:$0xff]   ;;  %v19095_v21 = vld [vmem:[#allocation7 + $0x5c0] ss:$16 sps:$4 sm:$0xff]  }
 0x537   : > { %24639 = vst [vmem:[#allocation56_spill] sm:$0xff] %v22375_v3  ;;  %v22385_v47 = vpack.c.bf16 %v5827_v40, %v5824_v9  ;;  %v5773_v41 = vmax.f32 %v5737_v58, 0.0  ;;  %v5743_v63 = vadd.f32 %v5668_v0, %v21949_v4  ;;  %6577 = vmatpush1.bf16.msra.mxu0 %v19065_v10  ;;  %10176 = vmatpush1.bf16.msra.mxu1 %v22365_v7  ;;  %v5670_v28 = vpop.f32.mrb[83].mxu1  ;;  %v4623_v4 = vmax.f32 %v4587_v16, 0.0  ;;  %v19085_v9 = vld [vmem:[#allocation7 + $0x584] ss:$16 sps:$4 sm:$0xff]  }
 0x538   : > { %24640 = vst [vmem:[#allocation57_spill] sm:$0xff] %v22381_v27  ;;  %v22391_v34 = vpack.c.bf16 %v5828_v37, %v5825_v23  ;;  %v5774_v17 = vmax.f32 %v5738_v30, 0.0  ;;  %v5744_v2 = vadd.f32 %v5670_v28, %v21955_v11  ;;  %6578 = vmatprep.subr.bf16.mxu0 %v19073_v12  ;;  %10177 = vmatprep.subr.bf16.mxu1 %v22371_v25  ;;  %v22418_v23 = vld [vmem:[#allocation7 + $0x280] ss:$16 sps:$4 sm:$0xff]   ;;  %v22431_v58 = vld [vmem:[#allocation7 + $0x2c4] ss:$16 sps:$4 sm:$0xff]  }
 0x539   : > { %24641 = vst [vmem:[#allocation58_spill] sm:$0xff] %v22385_v47  ;;  %v5809_v36 = vmax.f32 %v4617_v8, %v5773_v41  ;;  %v5779_v55 = vmax.f32 %v5743_v63, 0.0  ;;  %6563 = vmatprep.mubr.bf16.mxu0 %v22385_v47  ;;  %10162 = vmatprep.mubr.bf16.mxu1 %v22385_v47  ;;  %v22428_v16 = vld [vmem:[#allocation7 + $0x2a0] ss:$16 sps:$4 sm:$0xff]   ;;  %v22437_v30 = vld [vmem:[#allocation7 + $0x2e4] ss:$16 sps:$4 sm:$0xff]  }
 0x53a   : > { %24642 = vst [vmem:[#allocation59_spill] sm:$0xff] %v22391_v34  ;;  %v5810_v39 = vmax.f32 %v4618_v20, %v5774_v17  ;;  %v5780_v6 = vmax.f32 %v5744_v2, 0.0  ;;  %6564 = vmatmul.mubr.bf16.gmra.mrb[68].mxu0 %v22308_v42  ;;  %10163 = vmatmul.mubr.bf16.gmra.mrb[96].mxu1 %v22308_v42  ;;  %v22434_v35 = vld [vmem:[#allocation7 + $0x2c0] ss:$16 sps:$4 sm:$0xff]   ;;  %v22443_v63 = vld [vmem:[#allocation7 + $0xc] ss:$16 sps:$4 sm:$0xff]  }
 0x53b   : > { %v5830_v11 = vmax.f32 %v22251_v59, %v5809_v36  ;;  %v5815_v52 = vmax.f32 %v4623_v4, %v5779_v55  ;;  %6579 = vmatpush1.bf16.msra.mxu0 %v19071_v38  ;;  %10178 = vmatpush1.bf16.msra.mxu1 %v22389_v26  ;;  %v19101_v0 = vld [vmem:[#allocation7 + $0x5e0] ss:$16 sps:$4 sm:$0xff]   ;;  %v22446_v28 = vld [vmem:[#allocation7 + $0x8] ss:$16 sps:$4 sm:$0xff]   ;;  %v19893_v38 = vld [vmem:[#allocation7 + $0x30c] ss:$16 sps:$4 sm:$0xff]  }
 0x53c   : > { %v5831_v22 = vmax.f32 %v22311_v46, %v5810_v39  ;;  %v5816_v31 = vmax.f32 %v4624_v24, %v5780_v6  ;;  %6580 = vmatprep.subr.bf16.mxu0 %v19079_v53  ;;  %10179 = vmatprep.subr.bf16.mxu1 %v22395_v50  ;;  %v19083_v46 = vld [vmem:[#allocation7 + $0x580] ss:$16 sps:$4 sm:$0xff]   ;;  %v22449_v20 = vld [vmem:[#allocation7 + $0x2c] ss:$16 sps:$4 sm:$0xff]   ;;  %v19894_v17 = vld [vmem:[#allocation7 + $0x308] ss:$16 sps:$4 sm:$0xff]  }
 0x53d   : > { %v22409_v10 = vpack.c.bf16 %v5830_v11, %v5827_v40  ;;  %v5833_v59 = vmax.f32 %v22259_v45, %v5815_v52  ;;  %6606 = vmatprep.mubr.bf16.mxu0 %v24598_v13  ;;  %10205 = vmatprep.mubr.bf16.mxu1 %v24598_v13  ;;  %v19091_v45 = vld [vmem:[#allocation7 + $0x5a4] ss:$16 sps:$4 sm:$0xff]   ;;  %v22440_v41 = vld [vmem:[#allocation7 + $0x2e0] ss:$16 sps:$4 sm:$0xff]   ;;  %v22454_v2 = vld [vmem:[#allocation7 + $0x28] ss:$16 sps:$4 sm:$0xff]  }
 0x53e   : > { %v22414_v8 = vpack.c.bf16 %v5831_v22, %v5828_v37  ;;  %v5834_v18 = vmax.f32 %v22315_v56, %v5816_v31  ;;  %v19089_v56 = vld [vmem:[#allocation7 + $0x5a0] ss:$16 sps:$4 sm:$0xff]   ;;  %v19097_v40 = vld [vmem:[#allocation7 + $0x5c4] ss:$16 sps:$4 sm:$0xff]   ;;  %v19895_v53 = vld [vmem:[#allocation7 + $0x32c] ss:$16 sps:$4 sm:$0xff]  }
 0x53f   : > { %24643 = vst [vmem:[#allocation60_spill] sm:$0xff] %v22409_v10  ;;  %6581 = vmatpush1.bf16.msra.mxu0 %v19077_v1  ;;  %10180 = vmatpush1.bf16.msra.mxu1 %v22403_v43  ;;  %v22420_v57 = vpack.c.bf16 %v5833_v59, %v5830_v11  ;;  %v19103_v37 = vld [vmem:[#allocation7 + $0x5e4] ss:$16 sps:$4 sm:$0xff]   ;;  %v22457_v4 = vld [vmem:[#allocation7 + $0x4c] ss:$16 sps:$4 sm:$0xff]  }
 0x540   : > { %24644 = vst [vmem:[#allocation34_spill] sm:$0xff] %v22414_v8  ;;  %6582 = vmatprep.subr.bf16.mxu0 %v19085_v9  ;;  %10181 = vmatprep.subr.bf16.mxu1 %v22407_v29  ;;  %v22425_v12 = vpack.c.bf16 %v5834_v18, %v5831_v22  ;;  %v19896_v36 = vld [vmem:[#allocation7 + $0x328] ss:$16 sps:$4 sm:$0xff]   ;;  %v19897_v55 = vld [vmem:[#allocation7 + $0x34c] ss:$16 sps:$4 sm:$0xff]  }
 0x541   : > { %24645 = vst [vmem:[#allocation49_spill] sm:$0xff] %v22420_v57  ;;  %v22462_v24 = vld [vmem:[#allocation7 + $0x48] ss:$16 sps:$4 sm:$0xff]   ;;  %v22465_v39 = vld [vmem:[#allocation7 + $0x6c] ss:$16 sps:$4 sm:$0xff]  }
 0x542   : > { %24646 = vst [vmem:[#allocation35_spill] sm:$0xff] %v22425_v12  ;;  %v19898_v6 = vld [vmem:[#allocation7 + $0x348] ss:$16 sps:$4 sm:$0xff]   ;;  %v19899_v52 = vld [vmem:[#allocation7 + $0x36c] ss:$16 sps:$4 sm:$0xff]  }
 0x543   : > { %6583 = vmatpush1.bf16.msra.mxu0 %v19083_v46  ;;  %10182 = vmatpush1.bf16.msra.mxu1 %v22418_v23  ;;  %v22472_v11 = vld [vmem:[#allocation7 + $0x68] ss:$16 sps:$4 sm:$0xff]   ;;  %v22475_v1 = vld [vmem:[#allocation7 + $0x8c] ss:$16 sps:$4 sm:$0xff]  }
 0x544   : > { %6584 = vmatprep.subr.bf16.mxu0 %v19091_v45  ;;  %10183 = vmatprep.subr.bf16.mxu1 %v22423_v54  ;;  %v19900_v22 = vld [vmem:[#allocation7 + $0x368] ss:$16 sps:$4 sm:$0xff]   ;;  %v19901_v31 = vld [vmem:[#allocation7 + $0x38c] ss:$16 sps:$4 sm:$0xff]  }
 0x545   : > { %v22478_v9 = vld [vmem:[#allocation7 + $0x88] ss:$16 sps:$4 sm:$0xff]   ;;  %v22481_v59 = vld [vmem:[#allocation7 + $0xac] ss:$16 sps:$4 sm:$0xff]  }
 0x546   : > { %v19903_v18 = vld [vmem:[#allocation7 + $0x3ac] ss:$16 sps:$4 sm:$0xff]   ;;  %v22484_v46 = vld [vmem:[#allocation7 + $0xa8] ss:$16 sps:$4 sm:$0xff]  }
 0x547   : > { %6585 = vmatpush1.bf16.msra.mxu0 %v19089_v56  ;;  %10184 = vmatpush1.bf16.msra.mxu1 %v22428_v16  ;;  %v22487_v45 = vld [vmem:[#allocation7 + $0xcc] ss:$16 sps:$4 sm:$0xff]   ;;  %v19904_v56 = vld [vmem:[#allocation7 + $0x3a8] ss:$16 sps:$4 sm:$0xff]  }
 0x548   : > { %6586 = vmatprep.subr.bf16.mxu0 %v19097_v40  ;;  %10185 = vmatprep.subr.bf16.mxu1 %v22431_v58  ;;  %v19905_v40 = vld [vmem:[#allocation7 + $0x3cc] ss:$16 sps:$4 sm:$0xff]   ;;  %v22526_v12 = vld [vmem:[#allocation7 + $0x188] ss:$16 sps:$4 sm:$0xff]  }
 0x549   : > { %24648 = vst [vmem:[#allocation63_spill] sm:$0xff] %v22526_v12  ;;  %v22532_v57 = vld [vmem:[#allocation7 + $0x1a8] ss:$16 sps:$4 sm:$0xff]  }
 0x54a   : > { %24650 = vst [vmem:[#allocation65_spill] sm:$0xff] %v22532_v57 }
 0x54b   : > { %6587 = vmatpush1.bf16.msra.mxu0 %v19095_v21  ;;  %10186 = vmatpush1.bf16.msra.mxu1 %v22434_v35  ;;  %v22490_v21 = vld [vmem:[#allocation7 + $0xc8] ss:$16 sps:$4 sm:$0xff]  }
 0x54c   : > { %6588 = vmatprep.subr.bf16.mxu0 %v19103_v37  ;;  %10187 = vmatprep.subr.bf16.mxu1 %v22437_v30  ;;  %v22493_v37 = vld [vmem:[#allocation7 + $0xec] ss:$16 sps:$4 sm:$0xff]  }
 0x54f   : > { %6589 = vmatpush1.bf16.msra.mxu0 %v19101_v0  ;;  %10188 = vmatpush1.bf16.msra.mxu1 %v22440_v41  ;;  %v19906_v0 = vld [vmem:[#allocation7 + $0x3c8] ss:$16 sps:$4 sm:$0xff]  }
 0x550   : > { %6627 = vmatprep.subr.bf16.mxu0 %v19893_v38  ;;  %10226 = vmatprep.subr.bf16.mxu1 %v22443_v63  ;;  %v19907_v38 = vld [vmem:[#allocation7 + $0x3ec] ss:$16 sps:$4 sm:$0xff]  }
 0x552   : > { %6607 = vmatmul.mubr.bf16.vlgmr.msra.gmra.mrb[64].mxu0 %v22354_v32  ;;  %10206 = vmatmul.mubr.bf16.vlgmr.msra.gmra.mrb[92].mxu1 %v22354_v32 }
 0x553   : > { %6628 = vmatpush1.bf16.msra.mxu0 %v19894_v17  ;;  %10227 = vmatpush1.bf16.msra.mxu1 %v22446_v28  ;;  %v22496_v17 = vld [vmem:[#allocation7 + $0xe8] ss:$16 sps:$4 sm:$0xff]  }
 0x554   : > { %6629 = vmatprep.subr.bf16.mxu0 %v19895_v53  ;;  %10228 = vmatprep.subr.bf16.mxu1 %v22449_v20  ;;  %v22499_v53 = vld [vmem:[#allocation7 + $0x10c] ss:$16 sps:$4 sm:$0xff]  }
 0x555   : > { %6616 = vmatprep.mubr.bf16.mxu0 %v24598_v13  ;;  %10215 = vmatprep.mubr.bf16.mxu1 %v24598_v13 }
 0x557   : > { %6630 = vmatpush1.bf16.msra.mxu0 %v19896_v36  ;;  %10229 = vmatpush1.bf16.msra.mxu1 %v22454_v2  ;;  %v19908_v36 = vld [vmem:[#allocation7 + $0x3e8] ss:$16 sps:$4 sm:$0xff]  }
 0x558   : > { %6631 = vmatprep.subr.bf16.mxu0 %v19897_v55  ;;  %10230 = vmatprep.subr.bf16.mxu1 %v22457_v4  ;;  %v19909_v55 = vld [vmem:[#allocation7 + $0x40c] ss:$16 sps:$4 sm:$0xff]  }
 0x55a   : > { %6617 = vmatmul.mubr.bf16.gmra.mrb[68].mxu0 %v22391_v34  ;;  %10216 = vmatmul.mubr.bf16.gmra.mrb[96].mxu1 %v22391_v34 }
 0x55b   : > { %6632 = vmatpush1.bf16.msra.mxu0 %v19898_v6  ;;  %6659 = vmatprep.mubr.bf16.mxu0 %v22347_v19  ;;  %v22502_v6 = vld [vmem:[#allocation7 + $0x108] ss:$16 sps:$4 sm:$0xff]  }
 0x55c   : > { %10231 = vmatpush1.bf16.msra.mxu1 %v22462_v24  ;;  %10258 = vmatprep.mubr.bf16.mxu1 %v22347_v19  ;;  %v19902_v19 = vld [vmem:[#allocation7 + $0x388] ss:$16 sps:$4 sm:$0xff]  }
 0x55d   : > { %6633 = vmatprep.subr.bf16.mxu0 %v19899_v52  ;;  %10232 = vmatprep.subr.bf16.mxu1 %v22465_v39  ;;  %v22505_v52 = vld [vmem:[#allocation7 + $0x12c] ss:$16 sps:$4 sm:$0xff]  }
 0x55f   : > { %6634 = vmatpush1.bf16.msra.mxu0 %v19900_v22  ;;  %v19910_v22 = vld [vmem:[#allocation7 + $0x408] ss:$16 sps:$4 sm:$0xff]  }
 0x560   : > { %10233 = vmatpush1.bf16.msra.mxu1 %v22472_v11  ;;  %6635 = vmatprep.subr.bf16.mxu0 %v19901_v31  ;;  %v19911_v31 = vld [vmem:[#allocation7 + $0x42c] ss:$16 sps:$4 sm:$0xff]  }
 0x561   : > { %10234 = vmatprep.subr.bf16.mxu1 %v22475_v1 }
 0x563   : > { %6636 = vmatpush1.bf16.msra.mxu0 %v19902_v19  ;;  %v22508_v19 = vld [vmem:[#allocation7 + $0x128] ss:$16 sps:$4 sm:$0xff]  }
 0x564   : > { %10235 = vmatpush1.bf16.msra.mxu1 %v22478_v9  ;;  %6637 = vmatprep.subr.bf16.mxu0 %v19903_v18  ;;  %v22511_v18 = vld [vmem:[#allocation7 + $0x14c] ss:$16 sps:$4 sm:$0xff]  }
 0x565   : > { %10236 = vmatprep.subr.bf16.mxu1 %v22481_v59 }
 0x567   : > { %6638 = vmatpush1.bf16.msra.mxu0 %v19904_v56  ;;  %v19912_v56 = vld [vmem:[#allocation7 + $0x428] ss:$16 sps:$4 sm:$0xff]  }
 0x568   : > { %10237 = vmatpush1.bf16.msra.mxu1 %v22484_v46  ;;  %6639 = vmatprep.subr.bf16.mxu0 %v19905_v40  ;;  %v19913_v40 = vld [vmem:[#allocation7 + $0x44c] ss:$16 sps:$4 sm:$0xff]  }
 0x569   : > { %10238 = vmatprep.subr.bf16.mxu1 %v22487_v45 }
 0x56b   : > { %6640 = vmatpush1.bf16.msra.mxu0 %v19906_v0  ;;  %v22514_v0 = vld [vmem:[#allocation7 + $0x148] ss:$16 sps:$4 sm:$0xff]  }
 0x56c   : > { %10239 = vmatpush1.bf16.msra.mxu1 %v22490_v21  ;;  %6641 = vmatprep.subr.bf16.mxu0 %v19907_v38  ;;  %v22517_v38 = vld [vmem:[#allocation7 + $0x16c] ss:$16 sps:$4 sm:$0xff]  }
 0x56d   : > { %10240 = vmatprep.subr.bf16.mxu1 %v22493_v37 }
 0x56f   : > { %6642 = vmatpush1.bf16.msra.mxu0 %v19908_v36  ;;  %v19914_v36 = vld [vmem:[#allocation7 + $0x448] ss:$16 sps:$4 sm:$0xff]  }
 0x570   : > { %10241 = vmatpush1.bf16.msra.mxu1 %v22496_v17  ;;  %6643 = vmatprep.subr.bf16.mxu0 %v19909_v55  ;;  %v19915_v55 = vld [vmem:[#allocation7 + $0x46c] ss:$16 sps:$4 sm:$0xff]  }
 0x571   : > { %10242 = vmatprep.subr.bf16.mxu1 %v22499_v53 }
 0x573   : > { %6644 = vmatpush1.bf16.msra.mxu0 %v19910_v22  ;;  %v22520_v22 = vld [vmem:[#allocation7 + $0x168] ss:$16 sps:$4 sm:$0xff]  }
 0x574   : > { %10243 = vmatpush1.bf16.msra.mxu1 %v22502_v6  ;;  %6645 = vmatprep.subr.bf16.mxu0 %v19911_v31  ;;  %v22523_v31 = vld [vmem:[#allocation7 + $0x18c] ss:$16 sps:$4 sm:$0xff]  }
 0x575   : > { %10244 = vmatprep.subr.bf16.mxu1 %v22505_v52  ;;  %24647 = vst [vmem:[#allocation62_spill] sm:$0xff] %v22523_v31 }
 0x577   : > { %6646 = vmatpush1.bf16.msra.mxu0 %v19912_v56  ;;  %v19916_v56 = vld [vmem:[#allocation7 + $0x468] ss:$16 sps:$4 sm:$0xff]  }
 0x578   : > { %10245 = vmatpush1.bf16.msra.mxu1 %v22508_v19  ;;  %6647 = vmatprep.subr.bf16.mxu0 %v19913_v40  ;;  %v19917_v40 = vld [vmem:[#allocation7 + $0x48c] ss:$16 sps:$4 sm:$0xff]  }
 0x579   : > { %10246 = vmatprep.subr.bf16.mxu1 %v22511_v18 }
 0x57b   : > { %6648 = vmatpush1.bf16.msra.mxu0 %v19914_v36  ;;  %v22529_v36 = vld [vmem:[#allocation7 + $0x1ac] ss:$16 sps:$4 sm:$0xff]  }
 0x57c   : > { %10247 = vmatpush1.bf16.msra.mxu1 %v22514_v0  ;;  %6649 = vmatprep.subr.bf16.mxu0 %v19915_v55  ;;  %24649 = vst [vmem:[#allocation54_spill] sm:$0xff] %v22529_v36  ;;  %v19919_v55 = vld [vmem:[#allocation7 + $0x4ac] ss:$16 sps:$4 sm:$0xff]  }
 0x57d   : > { %10248 = vmatprep.subr.bf16.mxu1 %v22517_v38 }
 0x57f   : > { %6650 = vmatpush1.bf16.msra.mxu0 %v19916_v56  ;;  %v22535_v56 = vld [vmem:[#allocation7 + $0x1cc] ss:$16 sps:$4 sm:$0xff]  }
 0x580   : > { %10249 = vmatpush1.bf16.msra.mxu1 %v22520_v22  ;;  %6651 = vmatprep.subr.bf16.mxu0 %v19917_v40  ;;  %24651 = vst [vmem:[#allocation66_spill] sm:$0xff] %v22535_v56  ;;  %v19921_v40 = vld [vmem:[#allocation7 + $0x4cc] ss:$16 sps:$4 sm:$0xff]  }
 0x581   : > { %10250 = vmatprep.subr.bf16.mxu1 %v22523_v31  ;;  %v22538_v31 = vld [vmem:[#allocation7 + $0x1c8] ss:$16 sps:$4 sm:$0xff]  }
 0x583   : > { %6652 = vmatpush1.bf16.msra.mxu0 %v19918_v49  ;;  %v22541_v49 = vld [vmem:[#allocation7 + $0x1ec] ss:$16 sps:$4 sm:$0xff]  }
 0x584   : > { %10251 = vmatpush1.bf16.msra.mxu1 %v22526_v12  ;;  %6653 = vmatprep.subr.bf16.mxu0 %v19919_v55  ;;  %24652 = vst [vmem:[#allocation67_spill] sm:$0xff] %v22541_v49  ;;  %v19922_v12 = vld [vmem:[#allocation7 + $0x4c8] ss:$16 sps:$4 sm:$0xff]   ;;  %v19923_v55 = vld [vmem:[#allocation7 + $0x4ec] ss:$16 sps:$4 sm:$0xff]  }
 0x585   : > { %10252 = vmatprep.subr.bf16.mxu1 %v22529_v36  ;;  %v22544_v36 = vld [vmem:[#allocation7 + $0x1e8] ss:$16 sps:$4 sm:$0xff]  }
 0x586   : > { %24653 = vst [vmem:[#allocation68_spill] sm:$0xff] %v22544_v36 }
 0x587   : > { %6654 = vmatpush1.bf16.msra.mxu0 %v19920_v62  ;;  %v22547_v62 = vld [vmem:[#allocation7 + $0x20c] ss:$16 sps:$4 sm:$0xff]  }
 0x588   : > { %10253 = vmatpush1.bf16.msra.mxu1 %v22532_v57  ;;  %6655 = vmatprep.subr.bf16.mxu0 %v19921_v40  ;;  %24654 = vst [vmem:[#allocation69_spill] sm:$0xff] %v22547_v62  ;;  %v19924_v57 = vld [vmem:[#allocation7 + $0x4e8] ss:$16 sps:$4 sm:$0xff]   ;;  %v19925_v40 = vld [vmem:[#allocation7 + $0x50c] ss:$16 sps:$4 sm:$0xff]  }
 0x589   : > { %10254 = vmatprep.subr.bf16.mxu1 %v22535_v56  ;;  %v22550_v56 = vld [vmem:[#allocation7 + $0x208] ss:$16 sps:$4 sm:$0xff]  }
 0x58b   : > { %6656 = vmatpush1.bf16.msra.mxu0 %v19922_v12  ;;  %v22554_v12 = vld [vmem:[#allocation7 + $0x22c] ss:$16 sps:$4 sm:$0xff]  }
 0x58c   : > { %10255 = vmatpush1.bf16.msra.mxu1 %v22538_v31  ;;  %6657 = vmatprep.subr.bf16.mxu0 %v19923_v55  ;;  %v19926_v55 = vld [vmem:[#allocation7 + $0x508] ss:$16 sps:$4 sm:$0xff]  }
 0x58d   : > { %10256 = vmatprep.subr.bf16.mxu1 %v22541_v49  ;;  %v22566_v49 = vld [vmem:[#allocation7 + $0x248] ss:$16 sps:$4 sm:$0xff]  }
 0x58e   : > { %24657 = vst [vmem:[#allocation72_spill] sm:$0xff] %v22566_v49 }
 0x58f   : > { %6658 = vmatpush1.bf16.msra.mxu0 %v19924_v57  ;;  %v19927_v57 = vld [vmem:[#allocation7 + $0x52c] ss:$16 sps:$4 sm:$0xff]  }
 0x590   : > { %10257 = vmatpush1.bf16.msra.mxu1 %v22544_v36  ;;  %6680 = vmatprep.subr.bf16.mxu0 %v19925_v40  ;;  %v22560_v40 = vld [vmem:[#allocation7 + $0x228] ss:$16 sps:$4 sm:$0xff]  }
 0x591   : > { %10279 = vmatprep.subr.bf16.mxu1 %v22547_v62  ;;  %24655 = vst [vmem:[#allocation70_spill] sm:$0xff] %v22560_v40  ;;  %v22563_v62 = vld [vmem:[#allocation7 + $0x24c] ss:$16 sps:$4 sm:$0xff]   ;;  %v19928_v36 = vld [vmem:[#allocation7 + $0x528] ss:$16 sps:$4 sm:$0xff]  }
 0x592   : > { %6660 = vmatmul.mubr.bf16.vlgmr.msra.gmra.mrb[72].mxu0 %v22286_v48  ;;  %24656 = vst [vmem:[#allocation71_spill] sm:$0xff] %v22563_v62 }
 0x593   : > { %10259 = vmatmul.mubr.bf16.vlgmr.msra.gmra.mrb[84].mxu1 %v22286_v48  ;;  %6669 = vmatprep.mubr.bf16.mxu0 %v22385_v47  ;;  %v19929_v48 = vld [vmem:[#allocation7 + $0x54c] ss:$16 sps:$4 sm:$0xff]  }
 0x594   : > { %6681 = vmatpush1.bf16.msra.mxu0 %v19926_v55  ;;  %10268 = vmatprep.mubr.bf16.mxu1 %v22385_v47  ;;  %v22570_v55 = vld [vmem:[#allocation7 + $0x26c] ss:$16 sps:$4 sm:$0xff]  }
 0x595   : > { %10280 = vmatpush1.bf16.msra.mxu1 %v22550_v56  ;;  %6682 = vmatprep.subr.bf16.mxu0 %v19927_v57  ;;  %24658 = vst [vmem:[#allocation73_spill] sm:$0xff] %v22570_v55  ;;  %v19930_v57 = vld [vmem:[#allocation7 + $0x548] ss:$16 sps:$4 sm:$0xff]   ;;  %v22579_v47 = vld [vmem:[#allocation7 + $0x28c] ss:$16 sps:$4 sm:$0xff]  }
 0x596   : > { %10281 = vmatprep.subr.bf16.mxu1 %v22554_v12  ;;  %24660 = vst [vmem:[#allocation75_spill] sm:$0xff] %v22579_v47 }
 0x598   : > { %6683 = vmatpush1.bf16.msra.mxu0 %v19928_v36  ;;  %v19931_v36 = vld [vmem:[#allocation7 + $0x56c] ss:$16 sps:$4 sm:$0xff]  }
 0x599   : > { %10282 = vmatpush1.bf16.msra.mxu1 %v22560_v40  ;;  %6684 = vmatprep.subr.bf16.mxu0 %v19929_v48  ;;  %v22576_v48 = vld [vmem:[#allocation7 + $0x268] ss:$16 sps:$4 sm:$0xff]  }
 0x59a   : > { %6670 = vmatmul.mubr.bf16.gmra.mrb[76].mxu0 %v22308_v42  ;;  %10283 = vmatprep.subr.bf16.mxu1 %v22563_v62  ;;  %24659 = vst [vmem:[#allocation74_spill] sm:$0xff] %v22576_v48  ;;  %v19932_v62 = vld [vmem:[#allocation7 + $0x568] ss:$16 sps:$4 sm:$0xff]  }
 0x59b   : > { %10269 = vmatmul.mubr.bf16.gmra.mrb[88].mxu1 %v22308_v42  ;;  %6712 = vmatprep.mubr.bf16.mxu0 %v24598_v13  ;;  %v19933_v42 = vld [vmem:[#allocation7 + $0x58c] ss:$16 sps:$4 sm:$0xff]   ;;  %v22582_v40 = vld [vmem:[#allocation7 + $0x288] ss:$16 sps:$4 sm:$0xff]  }
 0x59c   : > { %6685 = vmatpush1.bf16.msra.mxu0 %v19930_v57  ;;  %10311 = vmatprep.mubr.bf16.mxu1 %v24598_v13  ;;  %24661 = vst [vmem:[#allocation76_spill] sm:$0xff] %v22582_v40  ;;  %v22585_v57 = vld [vmem:[#allocation7 + $0x2ac] ss:$16 sps:$4 sm:$0xff]  }
 0x59d   : > { %10284 = vmatpush1.bf16.msra.mxu1 %v22566_v49  ;;  %6686 = vmatprep.subr.bf16.mxu0 %v19931_v36  ;;  %24662 = vst [vmem:[#allocation77_spill] sm:$0xff] %v22585_v57  ;;  %v19934_v49 = vld [vmem:[#allocation7 + $0x588] ss:$16 sps:$4 sm:$0xff]   ;;  %v19935_v36 = vld [vmem:[#allocation7 + $0x5ac] ss:$16 sps:$4 sm:$0xff]  }
 0x59e   : > { %10285 = vmatprep.subr.bf16.mxu1 %v22570_v55  ;;  %v22588_v55 = vld [vmem:[#allocation7 + $0x2a8] ss:$16 sps:$4 sm:$0xff]  }
 0x59f   : > { %24663 = vst [vmem:[#allocation78_spill] sm:$0xff] %v22588_v55 }
 0x5a0   : > { %6687 = vmatpush1.bf16.msra.mxu0 %v19932_v62  ;;  %v22591_v62 = vld [vmem:[#allocation7 + $0x2cc] ss:$16 sps:$4 sm:$0xff]  }
 0x5a1   : > { %10286 = vmatpush1.bf16.msra.mxu1 %v22576_v48  ;;  %6688 = vmatprep.subr.bf16.mxu0 %v19933_v42  ;;  %24664 = vst [vmem:[#allocation79_spill] sm:$0xff] %v22591_v62  ;;  %v19936_v48 = vld [vmem:[#allocation7 + $0x5a8] ss:$16 sps:$4 sm:$0xff]   ;;  %v19937_v42 = vld [vmem:[#allocation7 + $0x5cc] ss:$16 sps:$4 sm:$0xff]  }
 0x5a2   : > { %10287 = vmatprep.subr.bf16.mxu1 %v22579_v47  ;;  %v22594_v47 = vld [vmem:[#allocation7 + $0x2c8] ss:$16 sps:$4 sm:$0xff]  }
 0x5a4   : > { %6689 = vmatpush1.bf16.msra.mxu0 %v19934_v49  ;;  %v22597_v49 = vld [vmem:[#allocation7 + $0x2ec] ss:$16 sps:$4 sm:$0xff]  }
 0x5a5   : > { %10288 = vmatpush1.bf16.msra.mxu1 %v22582_v40  ;;  %6690 = vmatprep.subr.bf16.mxu0 %v19935_v36  ;;  %24665 = vst [vmem:[#allocation80_spill] sm:$0xff] %v22597_v49  ;;  %v19938_v40 = vld [vmem:[#allocation7 + $0x5c8] ss:$16 sps:$4 sm:$0xff]   ;;  %v19939_v36 = vld [vmem:[#allocation7 + $0x5ec] ss:$16 sps:$4 sm:$0xff]  }
 0x5a6   : > { %10289 = vmatprep.subr.bf16.mxu1 %v22585_v57  ;;  %v22600_v57 = vld [vmem:[#allocation7 + $0x2e8] ss:$16 sps:$4 sm:$0xff]  }
 0x5a7   : > { %24666 = vst [vmem:[#allocation81_spill] sm:$0xff] %v22600_v57 }
 0x5a8   : > { %6691 = vmatpush1.bf16.msra.mxu0 %v19936_v48  ;;  %v22603_v48 = vld [vmem:[#allocation7 + $0x604] ss:$16 sps:$4 sm:$0xff]  }
 0x5a9   : > { %10290 = vmatpush1.bf16.msra.mxu1 %v22588_v55  ;;  %6692 = vmatprep.subr.bf16.mxu0 %v19937_v42  ;;  %24667 = vst [vmem:[#allocation82_spill] sm:$0xff] %v22603_v48  ;;  %v19940_v55 = vld [vmem:[#allocation7 + $0x5e8] ss:$16 sps:$4 sm:$0xff]   ;;  %v19941_v42 = vld [vmem:[#allocation7 + $0x4] ss:$16 sps:$4 sm:$0xff]  }
 0x5aa   : > { %10291 = vmatprep.subr.bf16.mxu1 %v22591_v62  ;;  %v22606_v62 = vld [vmem:[#allocation7 + $0x600] ss:$16 sps:$4 sm:$0xff]  }
 0x5ab   : > { %24668 = vst [vmem:[#allocation83_spill] sm:$0xff] %v22606_v62 }
 0x5ac   : > { %6693 = vmatpush1.bf16.msra.mxu0 %v19938_v40  ;;  %v22609_v40 = vld [vmem:[#allocation7 + $0x624] ss:$16 sps:$4 sm:$0xff]  }
 0x5ad   : > { %10292 = vmatpush1.bf16.msra.mxu1 %v22594_v47  ;;  %6694 = vmatprep.subr.bf16.mxu0 %v19939_v36  ;;  %24669 = vst [vmem:[#allocation84_spill] sm:$0xff] %v22609_v40  ;;  %v19942_v36 = vld [vmem:[#allocation7] ss:$16 sps:$4 sm:$0xff]  }
 0x5ae   : > { %10293 = vmatprep.subr.bf16.mxu1 %v22597_v49  ;;  %v19943_v49 = vld [vmem:[#allocation7 + $0x24] ss:$16 sps:$4 sm:$0xff]  }
 0x5b0   : > { %6695 = vmatpush1.bf16.msra.mxu0 %v19940_v55  ;;  %v22614_v55 = vld [vmem:[#allocation7 + $0x620] ss:$16 sps:$4 sm:$0xff]  }
 0x5b1   : > { %10294 = vmatpush1.bf16.msra.mxu1 %v22600_v57  ;;  %7213 = vmatprep.subr.bf16.mxu0 %v19941_v42  ;;  %24670 = vst [vmem:[#allocation85_spill] sm:$0xff] %v22614_v55  ;;  %v22618_v42 = vld [vmem:[#allocation7 + $0x644] ss:$16 sps:$4 sm:$0xff]   ;;  %v22644_v57 = vld [vmem:[#allocation7 + $0x6a0] ss:$16 sps:$4 sm:$0xff]  }
 0x5b2   : > { %10332 = vmatprep.subr.bf16.mxu1 %v22603_v48  ;;  %24671 = vst [vmem:[#allocation86_spill] sm:$0xff] %v22618_v42  ;;  %v19944_v48 = vld [vmem:[#allocation7 + $0x20] ss:$16 sps:$4 sm:$0xff]   ;;  %24677 = vst [vmem:[#allocation92_spill] sm:$0xff] %v22644_v57 }
 0x5b3   : > { %6713 = vmatmul.mubr.bf16.vlgmr.msra.gmra.mrb[72].mxu0 %v22354_v32 }
 0x5b4   : > { %10312 = vmatmul.mubr.bf16.vlgmr.msra.gmra.mrb[84].mxu1 %v22354_v32  ;;  %7214 = vmatpush1.bf16.msra.mxu0 %v19942_v36  ;;  %v19945_v32 = vld [vmem:[#allocation7 + $0x44] ss:$16 sps:$4 sm:$0xff]   ;;  %v22622_v36 = vld [vmem:[#allocation7 + $0x640] ss:$16 sps:$4 sm:$0xff]  }
 0x5b5   : > { %10333 = vmatpush1.bf16.msra.mxu1 %v22606_v62  ;;  %7215 = vmatprep.subr.bf16.mxu0 %v19943_v49  ;;  %24672 = vst [vmem:[#allocation87_spill] sm:$0xff] %v22622_v36  ;;  %v22626_v49 = vld [vmem:[#allocation7 + $0x664] ss:$16 sps:$4 sm:$0xff]   ;;  %v19950_v62 = vld [vmem:[#allocation7 + $0x80] ss:$16 sps:$4 sm:$0xff]  }
 0x5b6   : > { %10334 = vmatprep.subr.bf16.mxu1 %v22609_v40  ;;  %6722 = vmatprep.mubr.bf16.mxu0 %v24598_v13  ;;  %v19946_v40 = vld [vmem:[#allocation7 + $0x40] ss:$16 sps:$4 sm:$0xff]  }
 0x5b7   : > { %10321 = vmatprep.mubr.bf16.mxu1 %v24598_v13 }
 0x5b8   : > { %7216 = vmatpush1.bf16.msra.mxu0 %v19944_v48  ;;  %v22631_v48 = vld [vmem:[#allocation7 + $0x660] ss:$16 sps:$4 sm:$0xff]  }
 0x5b9   : > { %10335 = vmatpush1.bf16.msra.mxu1 %v22614_v55  ;;  %7217 = vmatprep.subr.bf16.mxu0 %v19945_v32  ;;  %24673 = vst [vmem:[#allocation88_spill] sm:$0xff] %v22631_v48  ;;  %v19947_v32 = vld [vmem:[#allocation7 + $0x64] ss:$16 sps:$4 sm:$0xff]  }
 0x5ba   : > { %10336 = vmatprep.subr.bf16.mxu1 %v22618_v42  ;;  %v22634_v55 = vld [vmem:[#allocation7 + $0x684] ss:$16 sps:$4 sm:$0xff]   ;;  %v19948_v42 = vld [vmem:[#allocation7 + $0x60] ss:$16 sps:$4 sm:$0xff]  }
 0x5bb   : > { %6723 = vmatmul.mubr.bf16.gmra.mrb[76].mxu0 %v22391_v34  ;;  %24674 = vst [vmem:[#allocation89_spill] sm:$0xff] %v22634_v55 }
 0x5bc   : > { %10322 = vmatmul.mubr.bf16.gmra.mrb[88].mxu1 %v22391_v34  ;;  %7218 = vmatpush1.bf16.msra.mxu0 %v19946_v40  ;;  %v19949_v34 = vld [vmem:[#allocation7 + $0x84] ss:$16 sps:$4 sm:$0xff]   ;;  %v22638_v40 = vld [vmem:[#allocation7 + $0x680] ss:$16 sps:$4 sm:$0xff]  }
 0x5bd   : > { %7245 = vmatprep.mubr.bf16.mxu0 %v22008_v44  ;;  %10337 = vmatpush1.bf16.msra.mxu1 %v22622_v36  ;;  %24675 = vst [vmem:[#allocation90_spill] sm:$0xff] %v22638_v40  ;;  %v22641_v36 = vld [vmem:[#allocation7 + $0x6a4] ss:$16 sps:$4 sm:$0xff]  }
 0x5be   : > { %10364 = vmatprep.mubr.bf16.mxu1 %v22375_v3  ;;  %7219 = vmatprep.subr.bf16.mxu0 %v19947_v32  ;;  %24676 = vst [vmem:[#allocation91_spill] sm:$0xff] %v22641_v36  ;;  %v19951_v32 = vld [vmem:[#allocation7 + $0xa4] ss:$16 sps:$4 sm:$0xff]  }
 0x5bf   : > { %10338 = vmatprep.subr.bf16.mxu1 %v22626_v49 }
 0x5c0   : > { %7220 = vmatpush1.bf16.msra.mxu0 %v19948_v42  ;;  %v22647_v42 = vld [vmem:[#allocation7 + $0x6c4] ss:$16 sps:$4 sm:$0xff]  }
 0x5c1   : > { %10339 = vmatpush1.bf16.msra.mxu1 %v22631_v48  ;;  %7221 = vmatprep.subr.bf16.mxu0 %v19949_v34  ;;  %24678 = vst [vmem:[#allocation93_spill] sm:$0xff] %v22647_v42  ;;  %v19952_v48 = vld [vmem:[#allocation7 + $0xa0] ss:$16 sps:$4 sm:$0xff]   ;;  %v19953_v34 = vld [vmem:[#allocation7 + $0xc4] ss:$16 sps:$4 sm:$0xff]  }
 0x5c2   : > { %10340 = vmatprep.subr.bf16.mxu1 %v22634_v55  ;;  %v22650_v55 = vld [vmem:[#allocation7 + $0x6c0] ss:$16 sps:$4 sm:$0xff]  }
 0x5c3   : > { %24679 = vst [vmem:[#allocation94_spill] sm:$0xff] %v22650_v55 }
 0x5c4   : > { %7222 = vmatpush1.bf16.msra.mxu0 %v19950_v62  ;;  %v22653_v62 = vld [vmem:[#allocation7 + $0x6e4] ss:$16 sps:$4 sm:$0xff]  }
 0x5c5   : > { %10341 = vmatpush1.bf16.msra.mxu1 %v22638_v40  ;;  %7223 = vmatprep.subr.bf16.mxu0 %v19951_v32  ;;  %24680 = vst [vmem:[#allocation95_spill] sm:$0xff] %v22653_v62  ;;  %v19954_v40 = vld [vmem:[#allocation7 + $0xc0] ss:$16 sps:$4 sm:$0xff]   ;;  %v19955_v32 = vld [vmem:[#allocation7 + $0xe4] ss:$16 sps:$4 sm:$0xff]  }
 0x5c6   : > { %10342 = vmatprep.subr.bf16.mxu1 %v22641_v36  ;;  %v22656_v36 = vld [vmem:[#allocation7 + $0x6e0] ss:$16 sps:$4 sm:$0xff]  }
 0x5c7   : > { %24681 = vst [vmem:[#allocation96_spill] sm:$0xff] %v22656_v36 }
 0x5c8   : > { %7224 = vmatpush1.bf16.msra.mxu0 %v19952_v48  ;;  %v22659_v48 = vld [vmem:[#allocation7 + $0x704] ss:$16 sps:$4 sm:$0xff]  }
 0x5c9   : > { %10343 = vmatpush1.bf16.msra.mxu1 %v22644_v57  ;;  %7225 = vmatprep.subr.bf16.mxu0 %v19953_v34  ;;  %24682 = vst [vmem:[#allocation97_spill] sm:$0xff] %v22659_v48  ;;  %v19956_v57 = vld [vmem:[#allocation7 + $0xe0] ss:$16 sps:$4 sm:$0xff]   ;;  %v19957_v34 = vld [vmem:[#allocation7 + $0x104] ss:$16 sps:$4 sm:$0xff]  }
 0x5ca   : > { %10344 = vmatprep.subr.bf16.mxu1 %v22647_v42  ;;  %v22662_v42 = vld [vmem:[#allocation7 + $0x700] ss:$16 sps:$4 sm:$0xff]  }
 0x5cb   : > { %24683 = vst [vmem:[#allocation98_spill] sm:$0xff] %v22662_v42 }
 0x5cc   : > { %7226 = vmatpush1.bf16.msra.mxu0 %v19954_v40  ;;  %v22665_v40 = vld [vmem:[#allocation7 + $0x724] ss:$16 sps:$4 sm:$0xff]  }
 0x5cd   : > { %10345 = vmatpush1.bf16.msra.mxu1 %v22650_v55  ;;  %7227 = vmatprep.subr.bf16.mxu0 %v19955_v32  ;;  %24684 = vst [vmem:[#allocation99_spill] sm:$0xff] %v22665_v40  ;;  %v19958_v55 = vld [vmem:[#allocation7 + $0x100] ss:$16 sps:$4 sm:$0xff]   ;;  %v19959_v32 = vld [vmem:[#allocation7 + $0x124] ss:$16 sps:$4 sm:$0xff]  }
 0x5ce   : > { %10346 = vmatprep.subr.bf16.mxu1 %v22653_v62  ;;  %v22668_v62 = vld [vmem:[#allocation7 + $0x720] ss:$16 sps:$4 sm:$0xff]  }
 0x5cf   : > { %24685 = vst [vmem:[#allocation100_spill] sm:$0xff] %v22668_v62 }
 0x5d0   : > { %7228 = vmatpush1.bf16.msra.mxu0 %v19956_v57  ;;  %v22671_v57 = vld [vmem:[#allocation7 + $0x744] ss:$16 sps:$4 sm:$0xff]  }
 0x5d1   : > { %10347 = vmatpush1.bf16.msra.mxu1 %v22656_v36  ;;  %7229 = vmatprep.subr.bf16.mxu0 %v19957_v34  ;;  %24686 = vst [vmem:[#allocation101_spill] sm:$0xff] %v22671_v57  ;;  %v19960_v36 = vld [vmem:[#allocation7 + $0x120] ss:$16 sps:$4 sm:$0xff]   ;;  %v19961_v34 = vld [vmem:[#allocation7 + $0x144] ss:$16 sps:$4 sm:$0xff]  }
 0x5d2   : > { %10348 = vmatprep.subr.bf16.mxu1 %v22659_v48  ;;  %v22674_v48 = vld [vmem:[#allocation7 + $0x740] ss:$16 sps:$4 sm:$0xff]  }
 0x5d3   : > { %24687 = vst [vmem:[#allocation102_spill] sm:$0xff] %v22674_v48 }
 0x5d4   : > { %7230 = vmatpush1.bf16.msra.mxu0 %v19958_v55  ;;  %v22677_v55 = vld [vmem:[#allocation7 + $0x764] ss:$16 sps:$4 sm:$0xff]  }
 0x5d5   : > { %10349 = vmatpush1.bf16.msra.mxu1 %v22662_v42  ;;  %7231 = vmatprep.subr.bf16.mxu0 %v19959_v32  ;;  %24688 = vst [vmem:[#allocation103_spill] sm:$0xff] %v22677_v55  ;;  %v19962_v42 = vld [vmem:[#allocation7 + $0x140] ss:$16 sps:$4 sm:$0xff]   ;;  %v19963_v32 = vld [vmem:[#allocation7 + $0x164] ss:$16 sps:$4 sm:$0xff]  }
 0x5d6   : > { %10350 = vmatprep.subr.bf16.mxu1 %v22665_v40  ;;  %v22680_v40 = vld [vmem:[#allocation7 + $0x760] ss:$16 sps:$4 sm:$0xff]  }
 0x5d7   : > { %24689 = vst [vmem:[#allocation104_spill] sm:$0xff] %v22680_v40 }
 0x5d8   : > { %7232 = vmatpush1.bf16.msra.mxu0 %v19960_v36  ;;  %v22683_v36 = vld [vmem:[#allocation7 + $0x784] ss:$16 sps:$4 sm:$0xff]  }
 0x5d9   : > { %10351 = vmatpush1.bf16.msra.mxu1 %v22668_v62  ;;  %7233 = vmatprep.subr.bf16.mxu0 %v19961_v34  ;;  %24690 = vst [vmem:[#allocation105_spill] sm:$0xff] %v22683_v36  ;;  %v19964_v62 = vld [vmem:[#allocation7 + $0x160] ss:$16 sps:$4 sm:$0xff]   ;;  %v19965_v34 = vld [vmem:[#allocation7 + $0x184] ss:$16 sps:$4 sm:$0xff]  }
 0x5da   : > { %10352 = vmatprep.subr.bf16.mxu1 %v22671_v57  ;;  %v22686_v57 = vld [vmem:[#allocation7 + $0x780] ss:$16 sps:$4 sm:$0xff]  }
 0x5db   : > { %24691 = vst [vmem:[#allocation106_spill] sm:$0xff] %v22686_v57 }
 0x5dc   : > { %7234 = vmatpush1.bf16.msra.mxu0 %v19962_v42  ;;  %v22689_v42 = vld [vmem:[#allocation7 + $0x7a4] ss:$16 sps:$4 sm:$0xff]  }
 0x5dd   : > { %10353 = vmatpush1.bf16.msra.mxu1 %v22674_v48  ;;  %7235 = vmatprep.subr.bf16.mxu0 %v19963_v32  ;;  %24692 = vst [vmem:[#allocation107_spill] sm:$0xff] %v22689_v42  ;;  %v19966_v48 = vld [vmem:[#allocation7 + $0x180] ss:$16 sps:$4 sm:$0xff]   ;;  %v19967_v32 = vld [vmem:[#allocation7 + $0x1a4] ss:$16 sps:$4 sm:$0xff]  }
 0x5de   : > { %10354 = vmatprep.subr.bf16.mxu1 %v22677_v55  ;;  %v22692_v55 = vld [vmem:[#allocation7 + $0x7a0] ss:$16 sps:$4 sm:$0xff]  }
 0x5df   : > { %24693 = vst [vmem:[#allocation108_spill] sm:$0xff] %v22692_v55 }
 0x5e0   : > { %7236 = vmatpush1.bf16.msra.mxu0 %v19964_v62  ;;  %v22695_v62 = vld [vmem:[#allocation7 + $0x7c4] ss:$16 sps:$4 sm:$0xff]  }
 0x5e1   : > { %10355 = vmatpush1.bf16.msra.mxu1 %v22680_v40  ;;  %7237 = vmatprep.subr.bf16.mxu0 %v19965_v34  ;;  %24694 = vst [vmem:[#allocation109_spill] sm:$0xff] %v22695_v62  ;;  %v19968_v40 = vld [vmem:[#allocation7 + $0x1a0] ss:$16 sps:$4 sm:$0xff]   ;;  %v19969_v34 = vld [vmem:[#allocation7 + $0x1c4] ss:$16 sps:$4 sm:$0xff]  }
 0x5e2   : > { %10356 = vmatprep.subr.bf16.mxu1 %v22683_v36  ;;  %v22698_v36 = vld [vmem:[#allocation7 + $0x7c0] ss:$16 sps:$4 sm:$0xff]  }
 0x5e3   : > { %24695 = vst [vmem:[#allocation110_spill] sm:$0xff] %v22698_v36 }
 0x5e4   : > { %7238 = vmatpush1.bf16.msra.mxu0 %v19966_v48  ;;  %v22701_v48 = vld [vmem:[#allocation7 + $0x7e4] ss:$16 sps:$4 sm:$0xff]  }
 0x5e5   : > { %10357 = vmatpush1.bf16.msra.mxu1 %v22686_v57  ;;  %7239 = vmatprep.subr.bf16.mxu0 %v19967_v32  ;;  %v19970_v57 = vld [vmem:[#allocation7 + $0x1c0] ss:$16 sps:$4 sm:$0xff]   ;;  %v19971_v32 = vld [vmem:[#allocation7 + $0x1e4] ss:$16 sps:$4 sm:$0xff]  }
 0x5e6   : > { %10358 = vmatprep.subr.bf16.mxu1 %v22689_v42  ;;  %v22704_v42 = vld [vmem:[#allocation7 + $0x7e0] ss:$16 sps:$4 sm:$0xff]  }
 0x5e8   : > { %7240 = vmatpush1.bf16.msra.mxu0 %v19968_v40  ;;  %v22707_v40 = vld [vmem:[#allocation7 + $0x804] ss:$16 sps:$4 sm:$0xff]  }
 0x5e9   : > { %10359 = vmatpush1.bf16.msra.mxu1 %v22692_v55  ;;  %7241 = vmatprep.subr.bf16.mxu0 %v19969_v34  ;;  %v19972_v55 = vld [vmem:[#allocation7 + $0x1e0] ss:$16 sps:$4 sm:$0xff]   ;;  %v19973_v34 = vld [vmem:[#allocation7 + $0x204] ss:$16 sps:$4 sm:$0xff]  }
 0x5ea   : > { %10360 = vmatprep.subr.bf16.mxu1 %v22695_v62  ;;  %v22710_v62 = vld [vmem:[#allocation7 + $0x800] ss:$16 sps:$4 sm:$0xff]  }
 0x5eb   : > { %24696 = vst [vmem:[#allocation111_spill] sm:$0xff] %v22710_v62 }
 0x5ec   : > { %7242 = vmatpush1.bf16.msra.mxu0 %v19970_v57  ;;  %v24697_v57 = vld [vmem:[#allocation55_spill] sm:$0xff] }
 0x5ed   : > { %10361 = vmatpush1.bf16.msra.mxu1 %v22698_v36  ;;  %7243 = vmatprep.subr.bf16.mxu0 %v19971_v32  ;;  %v22714_v36 = vld [vmem:[#allocation7 + $0x824] ss:$16 sps:$4 sm:$0xff]  }
 0x5ee   : > { %10362 = vmatprep.subr.bf16.mxu1 %v22701_v48  ;;  %v22725_v32 = vld [vmem:[#allocation7 + $0x844] ss:$16 sps:$4 sm:$0xff]  }
 0x5f0   : > { %7244 = vmatpush1.bf16.msra.mxu0 %v19972_v55  ;;  %v22722_v55 = vld [vmem:[#allocation7 + $0x820] ss:$16 sps:$4 sm:$0xff]  }
 0x5f1   : > { %10363 = vmatpush1.bf16.msra.mxu1 %v22704_v42  ;;  %7266 = vmatprep.subr.bf16.mxu0 %v19973_v34  ;;  %v22730_v34 = vld [vmem:[#allocation7 + $0x840] ss:$16 sps:$4 sm:$0xff]  }
 0x5f2   : > { %10385 = vmatprep.subr.bf16.mxu1 %v22707_v40 }
 0x5f3   : > { %7246 = vmatmul.mubr.bf16.vlgmr.msra.gmra.mrb[64].mxu0 %v24697_v57 }
 0x5f4   : > { %10365 = vmatmul.mubr.bf16.vlgmr.msra.gmra.mrb[92].mxu1 %v22303_v15  ;;  %7255 = vmatprep.mubr.bf16.mxu0 %v22034_v51 }
 0x5f5   : > { %7267 = vmatpush1.bf16.msra.mxu0 %v22350_v61  ;;  %10374 = vmatprep.mubr.bf16.mxu1 %v22409_v10  ;;  %v24698_v61 = vld [vmem:[#allocation42_spill] sm:$0xff] }
 0x5f6   : > { %10386 = vmatpush1.bf16.msra.mxu1 %v22710_v62  ;;  %7268 = vmatprep.subr.bf16.mxu0 %v22357_v60  ;;  %v22734_v62 = vld [vmem:[#allocation7 + $0x864] ss:$16 sps:$4 sm:$0xff]   ;;  %v22742_v60 = vld [vmem:[#allocation7 + $0x860] ss:$16 sps:$4 sm:$0xff]  }
 0x5f7   : > { %10387 = vmatprep.subr.bf16.mxu1 %v22714_v36 }
 0x5f9   : > { %7269 = vmatpush1.bf16.msra.mxu0 %v22365_v7  ;;  %v22745_v7 = vld [vmem:[#allocation7 + $0x884] ss:$16 sps:$4 sm:$0xff]  }
 0x5fa   : > { %10388 = vmatpush1.bf16.msra.mxu1 %v22722_v55  ;;  %7270 = vmatprep.subr.bf16.mxu0 %v22371_v25  ;;  %v22750_v25 = vld [vmem:[#allocation7 + $0x880] ss:$16 sps:$4 sm:$0xff]  }
 0x5fb   : > { %7256 = vmatmul.mubr.bf16.gmra.mrb[68].mxu0 %v24698_v61  ;;  %10389 = vmatprep.subr.bf16.mxu1 %v22725_v32 }
 0x5fc   : > { %10375 = vmatmul.mubr.bf16.gmra.mrb[96].mxu1 %v22325_v14  ;;  %7298 = vmatprep.mubr.bf16.mxu0 %v24598_v13 }
 0x5fd   : > { %7271 = vmatpush1.bf16.msra.mxu0 %v22389_v26  ;;  %10417 = vmatprep.mubr.bf16.mxu1 %v24598_v13  ;;  %v22753_v26 = vld [vmem:[#allocation7 + $0x8a4] ss:$16 sps:$4 sm:$0xff]  }
 0x5fe   : > { %10390 = vmatpush1.bf16.msra.mxu1 %v22730_v34  ;;  %7272 = vmatprep.subr.bf16.mxu0 %v22395_v50  ;;  %v22758_v50 = vld [vmem:[#allocation7 + $0x8a0] ss:$16 sps:$4 sm:$0xff]  }
 0x5ff   : > { %10391 = vmatprep.subr.bf16.mxu1 %v22734_v62 }
 0x601   : > { %7273 = vmatpush1.bf16.msra.mxu0 %v22403_v43  ;;  %v22761_v43 = vld [vmem:[#allocation7 + $0x8c4] ss:$16 sps:$4 sm:$0xff]  }
 0x602   : > { %10392 = vmatpush1.bf16.msra.mxu1 %v22742_v60  ;;  %7274 = vmatprep.subr.bf16.mxu0 %v22407_v29  ;;  %v22766_v29 = vld [vmem:[#allocation7 + $0x8c0] ss:$16 sps:$4 sm:$0xff]  }
 0x603   : > { %10393 = vmatprep.subr.bf16.mxu1 %v22745_v7 }
 0x605   : > { %7275 = vmatpush1.bf16.msra.mxu0 %v22418_v23  ;;  %v22769_v23 = vld [vmem:[#allocation7 + $0x8e4] ss:$16 sps:$4 sm:$0xff]  }
 0x606   : > { %10394 = vmatpush1.bf16.msra.mxu1 %v22750_v25  ;;  %7276 = vmatprep.subr.bf16.mxu0 %v22423_v54  ;;  %v22774_v54 = vld [vmem:[#allocation7 + $0x8e0] ss:$16 sps:$4 sm:$0xff]  }
 0x607   : > { %10395 = vmatprep.subr.bf16.mxu1 %v22753_v26 }
 0x609   : > { %7277 = vmatpush1.bf16.msra.mxu0 %v22428_v16  ;;  %v22777_v16 = vld [vmem:[#allocation7 + $0x60c] ss:$16 sps:$4 sm:$0xff]  }
 0x60a   : > { %10396 = vmatpush1.bf16.msra.mxu1 %v22758_v50  ;;  %7278 = vmatprep.subr.bf16.mxu0 %v22431_v58  ;;  %v22782_v58 = vld [vmem:[#allocation7 + $0x608] ss:$16 sps:$4 sm:$0xff]  }
 0x60b   : > { %10397 = vmatprep.subr.bf16.mxu1 %v22761_v43 }
 0x60d   : > { %7279 = vmatpush1.bf16.msra.mxu0 %v22434_v35  ;;  %v22785_v35 = vld [vmem:[#allocation7 + $0x62c] ss:$16 sps:$4 sm:$0xff]  }
 0x60e   : > { %10398 = vmatpush1.bf16.msra.mxu1 %v22766_v29  ;;  %7280 = vmatprep.subr.bf16.mxu0 %v22437_v30  ;;  %v22792_v30 = vld [vmem:[#allocation7 + $0x628] ss:$16 sps:$4 sm:$0xff]  }
 0x60f   : > { %10399 = vmatprep.subr.bf16.mxu1 %v22769_v23 }
 0x611   : > { %7281 = vmatpush1.bf16.msra.mxu0 %v22440_v41  ;;  %v22796_v41 = vld [vmem:[#allocation7 + $0x64c] ss:$16 sps:$4 sm:$0xff]  }
 0x612   : > { %10400 = vmatpush1.bf16.msra.mxu1 %v22774_v54  ;;  %7319 = vmatprep.subr.bf16.mxu0 %v22443_v63  ;;  %v22802_v63 = vld [vmem:[#allocation7 + $0x648] ss:$16 sps:$4 sm:$0xff]  }
 0x613   : > { %10438 = vmatprep.subr.bf16.mxu1 %v22777_v16 }
 0x614   : > { %7299 = vmatmul.mubr.bf16.vlgmr.msra.gmra.mrb[64].mxu0 %v22010_v33 }
 0x615   : > { %10418 = vmatmul.mubr.bf16.vlgmr.msra.gmra.mrb[92].mxu1 %v22381_v27  ;;  %7320 = vmatpush1.bf16.msra.mxu0 %v22446_v28  ;;  %v22806_v28 = vld [vmem:[#allocation7 + $0x66c] ss:$16 sps:$4 sm:$0xff]  }
 0x616   : > { %10439 = vmatpush1.bf16.msra.mxu1 %v22782_v58  ;;  %7321 = vmatprep.subr.bf16.mxu0 %v22449_v20  ;;  %v22812_v20 = vld [vmem:[#allocation7 + $0x668] ss:$16 sps:$4 sm:$0xff]  }
 0x617   : > { %10440 = vmatprep.subr.bf16.mxu1 %v22785_v35  ;;  %7308 = vmatprep.mubr.bf16.mxu0 %v24598_v13 }
 0x618   : > { %10427 = vmatprep.mubr.bf16.mxu1 %v24598_v13 }
 0x619   : > { %7322 = vmatpush1.bf16.msra.mxu0 %v22454_v2  ;;  %v22816_v2 = vld [vmem:[#allocation7 + $0x68c] ss:$16 sps:$4 sm:$0xff]  }
 0x61a   : > { %10441 = vmatpush1.bf16.msra.mxu1 %v22792_v30  ;;  %7323 = vmatprep.subr.bf16.mxu0 %v22457_v4  ;;  %v22822_v4 = vld [vmem:[#allocation7 + $0x688] ss:$16 sps:$4 sm:$0xff]  }
 0x61b   : > { %10442 = vmatprep.subr.bf16.mxu1 %v22796_v41 }
 0x61c   : > { %7309 = vmatmul.mubr.bf16.gmra.mrb[68].mxu0 %v22037_v5 }
 0x61d   : > { %10428 = vmatmul.mubr.bf16.gmra.mrb[96].mxu1 %v22414_v8  ;;  %7324 = vmatpush1.bf16.msra.mxu0 %v22462_v24  ;;  %v22830_v24 = vld [vmem:[#allocation7 + $0x6a8] ss:$16 sps:$4 sm:$0xff]  }
 0x61e   : > { %7351 = vmatprep.mubr.bf16.mxu0 %v22008_v44  ;;  %10443 = vmatpush1.bf16.msra.mxu1 %v22802_v63  ;;  %v22825_v44 = vld [vmem:[#allocation7 + $0x6ac] ss:$16 sps:$4 sm:$0xff]  }
 0x61f   : > { %10470 = vmatprep.mubr.bf16.mxu1 %v22375_v3  ;;  %7325 = vmatprep.subr.bf16.mxu0 %v22465_v39  ;;  %v22833_v39 = vld [vmem:[#allocation7 + $0x6cc] ss:$16 sps:$4 sm:$0xff]  }
 0x620   : > { %10444 = vmatprep.subr.bf16.mxu1 %v22806_v28  ;;  %v24704_v3 = vld [vmem:[#allocation63_spill] sm:$0xff] }
 0x621   : > { %7326 = vmatpush1.bf16.msra.mxu0 %v22472_v11  ;;  %v22838_v11 = vld [vmem:[#allocation7 + $0x6c8] ss:$16 sps:$4 sm:$0xff]  }
 0x622   : > { %10445 = vmatpush1.bf16.msra.mxu1 %v22812_v20  ;;  %7327 = vmatprep.subr.bf16.mxu0 %v22475_v1  ;;  %v22841_v1 = vld [vmem:[#allocation7 + $0x6ec] ss:$16 sps:$4 sm:$0xff]  }
 0x623   : > { %10446 = vmatprep.subr.bf16.mxu1 %v22816_v2 }
 0x625   : > { %7328 = vmatpush1.bf16.msra.mxu0 %v22478_v9  ;;  %v22846_v9 = vld [vmem:[#allocation7 + $0x6e8] ss:$16 sps:$4 sm:$0xff]  }
 0x626   : > { %10447 = vmatpush1.bf16.msra.mxu1 %v22822_v4  ;;  %7329 = vmatprep.subr.bf16.mxu0 %v22481_v59  ;;  %v22849_v59 = vld [vmem:[#allocation7 + $0x70c] ss:$16 sps:$4 sm:$0xff]  }
 0x627   : > { %10448 = vmatprep.subr.bf16.mxu1 %v22825_v44 }
 0x629   : > { %7330 = vmatpush1.bf16.msra.mxu0 %v22484_v46  ;;  %v22854_v46 = vld [vmem:[#allocation7 + $0x708] ss:$16 sps:$4 sm:$0xff]  }
 0x62a   : > { %10449 = vmatpush1.bf16.msra.mxu1 %v22830_v24  ;;  %7331 = vmatprep.subr.bf16.mxu0 %v22487_v45  ;;  %v22857_v45 = vld [vmem:[#allocation7 + $0x72c] ss:$16 sps:$4 sm:$0xff]  }
 0x62b   : > { %10450 = vmatprep.subr.bf16.mxu1 %v22833_v39 }
 0x62d   : > { %7332 = vmatpush1.bf16.msra.mxu0 %v22490_v21  ;;  %v22862_v21 = vld [vmem:[#allocation7 + $0x728] ss:$16 sps:$4 sm:$0xff]  }
 0x62e   : > { %10451 = vmatpush1.bf16.msra.mxu1 %v22838_v11  ;;  %7333 = vmatprep.subr.bf16.mxu0 %v22493_v37  ;;  %v22865_v37 = vld [vmem:[#allocation7 + $0x74c] ss:$16 sps:$4 sm:$0xff]  }
 0x62f   : > { %10452 = vmatprep.subr.bf16.mxu1 %v22841_v1 }
 0x631   : > { %7334 = vmatpush1.bf16.msra.mxu0 %v22496_v17  ;;  %v22870_v17 = vld [vmem:[#allocation7 + $0x748] ss:$16 sps:$4 sm:$0xff]  }
 0x632   : > { %10453 = vmatpush1.bf16.msra.mxu1 %v22846_v9  ;;  %7335 = vmatprep.subr.bf16.mxu0 %v22499_v53  ;;  %v22873_v53 = vld [vmem:[#allocation7 + $0x76c] ss:$16 sps:$4 sm:$0xff]  }
 0x633   : > { %10454 = vmatprep.subr.bf16.mxu1 %v22849_v59  ;;  %24699 = vst [vmem:[#allocation55_spill] sm:$0xff] %v22873_v53 }
 0x635   : > { %7336 = vmatpush1.bf16.msra.mxu0 %v22502_v6  ;;  %v22878_v6 = vld [vmem:[#allocation7 + $0x768] ss:$16 sps:$4 sm:$0xff]  }
 0x636   : > { %10455 = vmatpush1.bf16.msra.mxu1 %v22854_v46  ;;  %7337 = vmatprep.subr.bf16.mxu0 %v22505_v52  ;;  %24700 = vst [vmem:[#allocation112_spill] sm:$0xff] %v22878_v6  ;;  %v22881_v52 = vld [vmem:[#allocation7 + $0x78c] ss:$16 sps:$4 sm:$0xff]  }
 0x637   : > { %10456 = vmatprep.subr.bf16.mxu1 %v22857_v45  ;;  %24701 = vst [vmem:[#allocation113_spill] sm:$0xff] %v22881_v52 }
 0x639   : > { %7338 = vmatpush1.bf16.msra.mxu0 %v22508_v19  ;;  %v24702_v19 = vld [vmem:[#allocation62_spill] sm:$0xff] }
 0x63a   : > { %10457 = vmatpush1.bf16.msra.mxu1 %v22862_v21  ;;  %7339 = vmatprep.subr.bf16.mxu0 %v22511_v18  ;;  %v22886_v18 = vld [vmem:[#allocation7 + $0x788] ss:$16 sps:$4 sm:$0xff]  }
 0x63b   : > { %10458 = vmatprep.subr.bf16.mxu1 %v22865_v37 }
 0x63d   : > { %7340 = vmatpush1.bf16.msra.mxu0 %v22514_v0  ;;  %v22889_v0 = vld [vmem:[#allocation7 + $0x7ac] ss:$16 sps:$4 sm:$0xff]  }
 0x63e   : > { %10459 = vmatpush1.bf16.msra.mxu1 %v22870_v17  ;;  %7341 = vmatprep.subr.bf16.mxu0 %v22517_v38  ;;  %24703 = vst [vmem:[#allocation62_spill] sm:$0xff] %v22889_v0  ;;  %v24705_v38 = vld [vmem:[#allocation54_spill] sm:$0xff] }
 0x63f   : > { %10460 = vmatprep.subr.bf16.mxu1 %v22873_v53  ;;  %v22894_v53 = vld [vmem:[#allocation7 + $0x7a8] ss:$16 sps:$4 sm:$0xff]  }
 0x640   : > { %24706 = vst [vmem:[#allocation63_spill] sm:$0xff] %v22894_v53 }
 0x641   : > { %7342 = vmatpush1.bf16.msra.mxu0 %v22520_v22  ;;  %v22897_v22 = vld [vmem:[#allocation7 + $0x7cc] ss:$16 sps:$4 sm:$0xff]  }
 0x642   : > { %10461 = vmatpush1.bf16.msra.mxu1 %v22878_v6  ;;  %7343 = vmatprep.subr.bf16.mxu0 %v24702_v19  ;;  %24707 = vst [vmem:[#allocation54_spill] sm:$0xff] %v22897_v22  ;;  %v24708_v6 = vld [vmem:[#allocation65_spill] sm:$0xff]  ;;  %v24709_v19 = vld [vmem:[#allocation66_spill] sm:$0xff] }
 0x643   : > { %10462 = vmatprep.subr.bf16.mxu1 %v22881_v52  ;;  %v22902_v52 = vld [vmem:[#allocation7 + $0x7c8] ss:$16 sps:$4 sm:$0xff]  }
 0x645   : > { %7344 = vmatpush1.bf16.msra.mxu0 %v24704_v3  ;;  %v22905_v3 = vld [vmem:[#allocation7 + $0x7ec] ss:$16 sps:$4 sm:$0xff]  }
 0x646   : > { %10463 = vmatpush1.bf16.msra.mxu1 %v22886_v18  ;;  %7345 = vmatprep.subr.bf16.mxu0 %v24705_v38  ;;  %v24710_v38 = vld [vmem:[#allocation67_spill] sm:$0xff] }
 0x647   : > { %10464 = vmatprep.subr.bf16.mxu1 %v22889_v0  ;;  %v22910_v0 = vld [vmem:[#allocation7 + $0x7e8] ss:$16 sps:$4 sm:$0xff]  }
 0x649   : > { %7346 = vmatpush1.bf16.msra.mxu0 %v24708_v6  ;;  %v22913_v6 = vld [vmem:[#allocation7 + $0x80c] ss:$16 sps:$4 sm:$0xff]  }
 0x64a   : > { %10465 = vmatpush1.bf16.msra.mxu1 %v22894_v53  ;;  %7347 = vmatprep.subr.bf16.mxu0 %v24709_v19  ;;  %v24711_v53 = vld [vmem:[#allocation68_spill] sm:$0xff]  ;;  %v24712_v19 = vld [vmem:[#allocation69_spill] sm:$0xff] }
 0x64b   : > { %10466 = vmatprep.subr.bf16.mxu1 %v22897_v22  ;;  %v22918_v22 = vld [vmem:[#allocation7 + $0x808] ss:$16 sps:$4 sm:$0xff]  }
 0x64d   : > { %7348 = vmatpush1.bf16.msra.mxu0 %v22538_v31  ;;  %v22922_v31 = vld [vmem:[#allocation7 + $0x82c] ss:$16 sps:$4 sm:$0xff]  }
 0x64e   : > { %10467 = vmatpush1.bf16.msra.mxu1 %v22902_v52  ;;  %7349 = vmatprep.subr.bf16.mxu0 %v24710_v38  ;;  %v22933_v38 = vld [vmem:[#allocation7 + $0x84c] ss:$16 sps:$4 sm:$0xff]  }
 0x64f   : > { %10468 = vmatprep.subr.bf16.mxu1 %v22905_v3  ;;  %24714 = vst [vmem:[#allocation66_spill] sm:$0xff] %v22933_v38 }
 0x651   : > { %7350 = vmatpush1.bf16.msra.mxu0 %v24711_v53  ;;  %v22930_v53 = vld [vmem:[#allocation7 + $0x828] ss:$16 sps:$4 sm:$0xff]  }
 0x652   : > { %10469 = vmatpush1.bf16.msra.mxu1 %v22910_v0  ;;  %7372 = vmatprep.subr.bf16.mxu0 %v24712_v19  ;;  %24713 = vst [vmem:[#allocation65_spill] sm:$0xff] %v22930_v53  ;;  %v24716_v19 = vld [vmem:[#allocation71_spill] sm:$0xff] }
 0x653   : > { %10491 = vmatprep.subr.bf16.mxu1 %v22913_v6 }
 0x654   : > { %7352 = vmatmul.mubr.bf16.vlgmr.msra.gmra.mrb[72].mxu0 %v24697_v57  ;;  %v24715_v57 = vld [vmem:[#allocation70_spill] sm:$0xff] }
 0x655   : > { %10471 = vmatmul.mubr.bf16.vlgmr.msra.gmra.mrb[84].mxu1 %v22303_v15  ;;  %7361 = vmatprep.mubr.bf16.mxu0 %v22034_v51  ;;  %v22938_v15 = vld [vmem:[#allocation7 + $0x848] ss:$16 sps:$4 sm:$0xff]  }
 0x656   : > { %7373 = vmatpush1.bf16.msra.mxu0 %v22550_v56  ;;  %10480 = vmatprep.mubr.bf16.mxu1 %v22409_v10  ;;  %24717 = vst [vmem:[#allocation67_spill] sm:$0xff] %v22938_v15  ;;  %v22942_v56 = vld [vmem:[#allocation7 + $0x86c] ss:$16 sps:$4 sm:$0xff]  }
 0x657   : > { %10492 = vmatpush1.bf16.msra.mxu1 %v22918_v22  ;;  %7374 = vmatprep.subr.bf16.mxu0 %v22554_v12  ;;  %24718 = vst [vmem:[#allocation68_spill] sm:$0xff] %v22942_v56  ;;  %v24719_v12 = vld [vmem:[#allocation72_spill] sm:$0xff]  ;;  %v22953_v10 = vld [vmem:[#allocation7 + $0x88c] ss:$16 sps:$4 sm:$0xff]  }
 0x658   : > { %10493 = vmatprep.subr.bf16.mxu1 %v22922_v31  ;;  %24722 = vst [vmem:[#allocation70_spill] sm:$0xff] %v22953_v10 }
 0x65a   : > { %7375 = vmatpush1.bf16.msra.mxu0 %v24715_v57  ;;  %v24720_v57 = vld [vmem:[#allocation73_spill] sm:$0xff] }
 0x65b   : > { %10494 = vmatpush1.bf16.msra.mxu1 %v22930_v53  ;;  %7376 = vmatprep.subr.bf16.mxu0 %v24716_v19  ;;  %v22950_v19 = vld [vmem:[#allocation7 + $0x868] ss:$16 sps:$4 sm:$0xff]  }
 0x65c   : > { %7362 = vmatmul.mubr.bf16.gmra.mrb[76].mxu0 %v24698_v61  ;;  %10495 = vmatprep.subr.bf16.mxu1 %v22933_v38  ;;  %24721 = vst [vmem:[#allocation69_spill] sm:$0xff] %v22950_v19  ;;  %v24723_v38 = vld [vmem:[#allocation74_spill] sm:$0xff]  ;;  %v22958_v53 = vld [vmem:[#allocation7 + $0x888] ss:$16 sps:$4 sm:$0xff]  }
 0x65d   : > { %10481 = vmatmul.mubr.bf16.gmra.mrb[88].mxu1 %v22325_v14  ;;  %7404 = vmatprep.mubr.bf16.mxu0 %v24598_v13  ;;  %v24724_v14 = vld [vmem:[#allocation75_spill] sm:$0xff] }
 0x65e   : > { %7377 = vmatpush1.bf16.msra.mxu0 %v24719_v12  ;;  %10523 = vmatprep.mubr.bf16.mxu1 %v24598_v13  ;;  %v22961_v12 = vld [vmem:[#allocation7 + $0x8ac] ss:$16 sps:$4 sm:$0xff]  }
 0x65f   : > { %10496 = vmatpush1.bf16.msra.mxu1 %v22938_v15  ;;  %7378 = vmatprep.subr.bf16.mxu0 %v24720_v57  ;;  %24725 = vst [vmem:[#allocation71_spill] sm:$0xff] %v22961_v12  ;;  %v24726_v15 = vld [vmem:[#allocation76_spill] sm:$0xff]  ;;  %v24727_v57 = vld [vmem:[#allocation77_spill] sm:$0xff] }
 0x660   : > { %10497 = vmatprep.subr.bf16.mxu1 %v22942_v56  ;;  %v22966_v56 = vld [vmem:[#allocation7 + $0x8a8] ss:$16 sps:$4 sm:$0xff]  }
 0x661   : > { %24728 = vst [vmem:[#allocation72_spill] sm:$0xff] %v22966_v56 }
 0x662   : > { %7379 = vmatpush1.bf16.msra.mxu0 %v24723_v38  ;;  %v22969_v38 = vld [vmem:[#allocation7 + $0x8cc] ss:$16 sps:$4 sm:$0xff]  }
 0x663   : > { %10498 = vmatpush1.bf16.msra.mxu1 %v22950_v19  ;;  %7380 = vmatprep.subr.bf16.mxu0 %v24724_v14  ;;  %24729 = vst [vmem:[#allocation73_spill] sm:$0xff] %v22969_v38  ;;  %v24730_v19 = vld [vmem:[#allocation78_spill] sm:$0xff]  ;;  %v24731_v14 = vld [vmem:[#allocation79_spill] sm:$0xff] }
 0x664   : > { %10499 = vmatprep.subr.bf16.mxu1 %v22953_v10  ;;  %v22974_v10 = vld [vmem:[#allocation7 + $0x8c8] ss:$16 sps:$4 sm:$0xff]  }
 0x666   : > { %7381 = vmatpush1.bf16.msra.mxu0 %v24726_v15  ;;  %v22977_v15 = vld [vmem:[#allocation7 + $0x8ec] ss:$16 sps:$4 sm:$0xff]  }
 0x667   : > { %10500 = vmatpush1.bf16.msra.mxu1 %v22958_v53  ;;  %7382 = vmatprep.subr.bf16.mxu0 %v24727_v57  ;;  %24732 = vst [vmem:[#allocation74_spill] sm:$0xff] %v22977_v15  ;;  %v24733_v57 = vld [vmem:[#allocation80_spill] sm:$0xff] }
 0x668   : > { %10501 = vmatprep.subr.bf16.mxu1 %v22961_v12  ;;  %v22982_v12 = vld [vmem:[#allocation7 + $0x8e8] ss:$16 sps:$4 sm:$0xff]  }
 0x66a   : > { %7383 = vmatpush1.bf16.msra.mxu0 %v24730_v19  ;;  %v22985_v19 = vld [vmem:[#allocation7 + $0x904] ss:$16 sps:$4 sm:$0xff]  }
 0x66b   : > { %10502 = vmatpush1.bf16.msra.mxu1 %v22966_v56  ;;  %7384 = vmatprep.subr.bf16.mxu0 %v24731_v14  ;;  %24734 = vst [vmem:[#allocation75_spill] sm:$0xff] %v22985_v19  ;;  %v24735_v56 = vld [vmem:[#allocation81_spill] sm:$0xff]  ;;  %v24736_v14 = vld [vmem:[#allocation82_spill] sm:$0xff] }
 0x66c   : > { %10503 = vmatprep.subr.bf16.mxu1 %v22969_v38  ;;  %v22990_v38 = vld [vmem:[#allocation7 + $0x900] ss:$16 sps:$4 sm:$0xff]  }
 0x66d   : > { %24737 = vst [vmem:[#allocation76_spill] sm:$0xff] %v22990_v38 }
 0x66e   : > { %7385 = vmatpush1.bf16.msra.mxu0 %v22594_v47  ;;  %v22993_v47 = vld [vmem:[#allocation7 + $0x924] ss:$16 sps:$4 sm:$0xff]  }
 0x66f   : > { %10504 = vmatpush1.bf16.msra.mxu1 %v22974_v10  ;;  %7386 = vmatprep.subr.bf16.mxu0 %v24733_v57  ;;  %24738 = vst [vmem:[#allocation77_spill] sm:$0xff] %v22993_v47  ;;  %v24739_v57 = vld [vmem:[#allocation83_spill] sm:$0xff] }
 0x670   : > { %10505 = vmatprep.subr.bf16.mxu1 %v22977_v15  ;;  %v24740_v15 = vld [vmem:[#allocation84_spill] sm:$0xff] }
 0x672   : > { %7387 = vmatpush1.bf16.msra.mxu0 %v24735_v56  ;;  %v23000_v56 = vld [vmem:[#allocation7 + $0x920] ss:$16 sps:$4 sm:$0xff]  }
 0x673   : > { %10506 = vmatpush1.bf16.msra.mxu1 %v22982_v12  ;;  %8008 = vmatprep.subr.bf16.mxu0 %v24736_v14  ;;  %24741 = vst [vmem:[#allocation78_spill] sm:$0xff] %v23000_v56  ;;  %v23004_v14 = vld [vmem:[#allocation7 + $0x944] ss:$16 sps:$4 sm:$0xff]  }
 0x674   : > { %10560 = vmatprep.subr.bf16.mxu1 %v22985_v19  ;;  %24742 = vst [vmem:[#allocation79_spill] sm:$0xff] %v23004_v14  ;;  %v24743_v19 = vld [vmem:[#allocation85_spill] sm:$0xff] }
 0x675   : > { %7405 = vmatmul.mubr.bf16.vlgmr.msra.gmra.mrb[72].mxu0 %v22010_v33  ;;  %v24744_v33 = vld [vmem:[#allocation86_spill] sm:$0xff] }
 0x676   : > { %10524 = vmatmul.mubr.bf16.vlgmr.msra.gmra.mrb[84].mxu1 %v22381_v27  ;;  %8009 = vmatpush1.bf16.msra.mxu0 %v24739_v57  ;;  %v23010_v57 = vld [vmem:[#allocation7 + $0x940] ss:$16 sps:$4 sm:$0xff]   ;;  %v24746_v27 = vld [vmem:[#allocation87_spill] sm:$0xff] }
 0x677   : > { %10561 = vmatpush1.bf16.msra.mxu1 %v22990_v38  ;;  %8010 = vmatprep.subr.bf16.mxu0 %v24740_v15  ;;  %24745 = vst [vmem:[#allocation80_spill] sm:$0xff] %v23010_v57  ;;  %v23014_v15 = vld [vmem:[#allocation7 + $0x964] ss:$16 sps:$4 sm:$0xff]   ;;  %v23038_v38 = vld [vmem:[#allocation7 + $0x9a0] ss:$16 sps:$4 sm:$0xff]  }
 0x678   : > { %10562 = vmatprep.subr.bf16.mxu1 %v22993_v47  ;;  %7414 = vmatprep.mubr.bf16.mxu0 %v24598_v13  ;;  %v24747_v47 = vld [vmem:[#allocation38_spill] sm:$0xff]  ;;  %24756 = vst [vmem:[#allocation85_spill] sm:$0xff] %v23038_v38 }
 0x679   : > { %10533 = vmatprep.mubr.bf16.mxu1 %v24598_v13 }
 0x67a   : > { %8011 = vmatpush1.bf16.msra.mxu0 %v24743_v19  ;;  %v23020_v19 = vld [vmem:[#allocation7 + $0x960] ss:$16 sps:$4 sm:$0xff]  }
 0x67b   : > { %10563 = vmatpush1.bf16.msra.mxu1 %v23000_v56  ;;  %8012 = vmatprep.subr.bf16.mxu0 %v24744_v33  ;;  %24748 = vst [vmem:[#allocation81_spill] sm:$0xff] %v23020_v19  ;;  %v23024_v33 = vld [vmem:[#allocation7 + $0x984] ss:$16 sps:$4 sm:$0xff]  }
 0x67c   : > { %10564 = vmatprep.subr.bf16.mxu1 %v23004_v14  ;;  %24749 = vst [vmem:[#allocation82_spill] sm:$0xff] %v23024_v33  ;;  %v24750_v14 = vld [vmem:[#allocation88_spill] sm:$0xff]  ;;  %v24754_v56 = vld [vmem:[#allocation90_spill] sm:$0xff] }
 0x67d   : > { %7415 = vmatmul.mubr.bf16.gmra.mrb[76].mxu0 %v22037_v5 }
 0x67e   : > { %10534 = vmatmul.mubr.bf16.gmra.mrb[88].mxu1 %v22414_v8  ;;  %8013 = vmatpush1.bf16.msra.mxu0 %v24746_v27  ;;  %v24751_v8 = vld [vmem:[#allocation89_spill] sm:$0xff]  ;;  %v23030_v27 = vld [vmem:[#allocation7 + $0x980] ss:$16 sps:$4 sm:$0xff]  }
 0x67f   : > { %8040 = vmatprep.mubr.bf16.mxu0 %v24747_v47  ;;  %10565 = vmatpush1.bf16.msra.mxu1 %v23010_v57  ;;  %24752 = vst [vmem:[#allocation83_spill] sm:$0xff] %v23030_v27  ;;  %v23033_v57 = vld [vmem:[#allocation7 + $0x9a4] ss:$16 sps:$4 sm:$0xff]  }
 0x680   : > { %10592 = vmatprep.mubr.bf16.mxu1 %v22034_v51  ;;  %8014 = vmatprep.subr.bf16.mxu0 %v22626_v49  ;;  %24753 = vst [vmem:[#allocation84_spill] sm:$0xff] %v23033_v57  ;;  %v24755_v49 = vld [vmem:[#allocation91_spill] sm:$0xff] }
 0x681   : > { %10566 = vmatprep.subr.bf16.mxu1 %v23014_v15 }
 0x682   : > { %8015 = vmatpush1.bf16.msra.mxu0 %v24750_v14  ;;  %v23041_v14 = vld [vmem:[#allocation7 + $0x9c4] ss:$16 sps:$4 sm:$0xff]  }
 0x683   : > { %10567 = vmatpush1.bf16.msra.mxu1 %v23020_v19  ;;  %8016 = vmatprep.subr.bf16.mxu0 %v24751_v8  ;;  %24757 = vst [vmem:[#allocation86_spill] sm:$0xff] %v23041_v14  ;;  %v24758_v19 = vld [vmem:[#allocation92_spill] sm:$0xff]  ;;  %v24759_v8 = vld [vmem:[#allocation93_spill] sm:$0xff] }
 0x684   : > { %10568 = vmatprep.subr.bf16.mxu1 %v23024_v33  ;;  %v23046_v33 = vld [vmem:[#allocation7 + $0x9c0] ss:$16 sps:$4 sm:$0xff]  }
 0x685   : > { %24760 = vst [vmem:[#allocation87_spill] sm:$0xff] %v23046_v33 }
 0x686   : > { %8017 = vmatpush1.bf16.msra.mxu0 %v24754_v56  ;;  %v23049_v56 = vld [vmem:[#allocation7 + $0x9e4] ss:$16 sps:$4 sm:$0xff]  }
 0x687   : > { %10569 = vmatpush1.bf16.msra.mxu1 %v23030_v27  ;;  %8018 = vmatprep.subr.bf16.mxu0 %v24755_v49  ;;  %24761 = vst [vmem:[#allocation88_spill] sm:$0xff] %v23049_v56  ;;  %v24762_v27 = vld [vmem:[#allocation94_spill] sm:$0xff]  ;;  %v24763_v49 = vld [vmem:[#allocation95_spill] sm:$0xff] }
 0x688   : > { %10570 = vmatprep.subr.bf16.mxu1 %v23033_v57  ;;  %v23054_v57 = vld [vmem:[#allocation7 + $0x9e0] ss:$16 sps:$4 sm:$0xff]  }
 0x689   : > { %24764 = vst [vmem:[#allocation89_spill] sm:$0xff] %v23054_v57 }
 0x68a   : > { %8019 = vmatpush1.bf16.msra.mxu0 %v24758_v19  ;;  %v23057_v19 = vld [vmem:[#allocation7 + $0xa04] ss:$16 sps:$4 sm:$0xff]  }
 0x68b   : > { %10571 = vmatpush1.bf16.msra.mxu1 %v23038_v38  ;;  %8020 = vmatprep.subr.bf16.mxu0 %v24759_v8  ;;  %24765 = vst [vmem:[#allocation90_spill] sm:$0xff] %v23057_v19  ;;  %v24766_v38 = vld [vmem:[#allocation96_spill] sm:$0xff]  ;;  %v24767_v8 = vld [vmem:[#allocation97_spill] sm:$0xff] }
 0x68c   : > { %10572 = vmatprep.subr.bf16.mxu1 %v23041_v14  ;;  %v23062_v14 = vld [vmem:[#allocation7 + $0xa00] ss:$16 sps:$4 sm:$0xff]  }
 0x68d   : > { %24768 = vst [vmem:[#allocation91_spill] sm:$0xff] %v23062_v14 }
 0x68e   : > { %8021 = vmatpush1.bf16.msra.mxu0 %v24762_v27  ;;  %v23065_v27 = vld [vmem:[#allocation7 + $0xa24] ss:$16 sps:$4 sm:$0xff]  }
 0x68f   : > { %10573 = vmatpush1.bf16.msra.mxu1 %v23046_v33  ;;  %8022 = vmatprep.subr.bf16.mxu0 %v24763_v49  ;;  %24769 = vst [vmem:[#allocation92_spill] sm:$0xff] %v23065_v27  ;;  %v24770_v33 = vld [vmem:[#allocation98_spill] sm:$0xff]  ;;  %v24771_v49 = vld [vmem:[#allocation99_spill] sm:$0xff] }
 0x690   : > { %10574 = vmatprep.subr.bf16.mxu1 %v23049_v56  ;;  %v23070_v56 = vld [vmem:[#allocation7 + $0xa20] ss:$16 sps:$4 sm:$0xff]  }
 0x691   : > { %24772 = vst [vmem:[#allocation93_spill] sm:$0xff] %v23070_v56 }
 0x692   : > { %8023 = vmatpush1.bf16.msra.mxu0 %v24766_v38  ;;  %v23073_v38 = vld [vmem:[#allocation7 + $0xa44] ss:$16 sps:$4 sm:$0xff]  }
 0x693   : > { %10575 = vmatpush1.bf16.msra.mxu1 %v23054_v57  ;;  %8024 = vmatprep.subr.bf16.mxu0 %v24767_v8  ;;  %24773 = vst [vmem:[#allocation94_spill] sm:$0xff] %v23073_v38  ;;  %v24774_v57 = vld [vmem:[#allocation100_spill] sm:$0xff]  ;;  %v24775_v8 = vld [vmem:[#allocation101_spill] sm:$0xff] }
 0x694   : > { %10576 = vmatprep.subr.bf16.mxu1 %v23057_v19  ;;  %v23078_v19 = vld [vmem:[#allocation7 + $0xa40] ss:$16 sps:$4 sm:$0xff]  }
 0x695   : > { %24776 = vst [vmem:[#allocation95_spill] sm:$0xff] %v23078_v19 }
 0x696   : > { %8025 = vmatpush1.bf16.msra.mxu0 %v24770_v33  ;;  %v23081_v33 = vld [vmem:[#allocation7 + $0xa64] ss:$16 sps:$4 sm:$0xff]  }
 0x697   : > { %10577 = vmatpush1.bf16.msra.mxu1 %v23062_v14  ;;  %8026 = vmatprep.subr.bf16.mxu0 %v24771_v49  ;;  %24777 = vst [vmem:[#allocation96_spill] sm:$0xff] %v23081_v33  ;;  %v24778_v14 = vld [vmem:[#allocation102_spill] sm:$0xff]  ;;  %v24779_v49 = vld [vmem:[#allocation103_spill] sm:$0xff] }
 0x698   : > { %10578 = vmatprep.subr.bf16.mxu1 %v23065_v27  ;;  %v23086_v27 = vld [vmem:[#allocation7 + $0xa60] ss:$16 sps:$4 sm:$0xff]  }
 0x699   : > { %24780 = vst [vmem:[#allocation97_spill] sm:$0xff] %v23086_v27 }
 0x69a   : > { %8027 = vmatpush1.bf16.msra.mxu0 %v24774_v57  ;;  %v23089_v57 = vld [vmem:[#allocation7 + $0xa84] ss:$16 sps:$4 sm:$0xff]  }
 0x69b   : > { %10579 = vmatpush1.bf16.msra.mxu1 %v23070_v56  ;;  %8028 = vmatprep.subr.bf16.mxu0 %v24775_v8  ;;  %24781 = vst [vmem:[#allocation98_spill] sm:$0xff] %v23089_v57  ;;  %v24782_v56 = vld [vmem:[#allocation104_spill] sm:$0xff]  ;;  %v24783_v8 = vld [vmem:[#allocation105_spill] sm:$0xff] }
 0x69c   : > { %10580 = vmatprep.subr.bf16.mxu1 %v23073_v38  ;;  %v23094_v38 = vld [vmem:[#allocation7 + $0xa80] ss:$16 sps:$4 sm:$0xff]  }
 0x69d   : > { %24784 = vst [vmem:[#allocation99_spill] sm:$0xff] %v23094_v38 }
 0x69e   : > { %8029 = vmatpush1.bf16.msra.mxu0 %v24778_v14  ;;  %v23097_v14 = vld [vmem:[#allocation7 + $0xaa4] ss:$16 sps:$4 sm:$0xff]  }
 0x69f   : > { %10581 = vmatpush1.bf16.msra.mxu1 %v23078_v19  ;;  %8030 = vmatprep.subr.bf16.mxu0 %v24779_v49  ;;  %v24785_v19 = vld [vmem:[#allocation106_spill] sm:$0xff]  ;;  %v24786_v49 = vld [vmem:[#allocation107_spill] sm:$0xff] }
 0x6a0   : > { %10582 = vmatprep.subr.bf16.mxu1 %v23081_v33  ;;  %v23102_v33 = vld [vmem:[#allocation7 + $0xaa0] ss:$16 sps:$4 sm:$0xff]  }
 0x6a2   : > { %8031 = vmatpush1.bf16.msra.mxu0 %v24782_v56  ;;  %v23105_v56 = vld [vmem:[#allocation7 + $0xac4] ss:$16 sps:$4 sm:$0xff]  }
 0x6a3   : > { %10583 = vmatpush1.bf16.msra.mxu1 %v23086_v27  ;;  %8032 = vmatprep.subr.bf16.mxu0 %v24783_v8  ;;  %24787 = vst [vmem:[#allocation100_spill] sm:$0xff] %v23105_v56  ;;  %v24788_v27 = vld [vmem:[#allocation108_spill] sm:$0xff]  ;;  %v24789_v8 = vld [vmem:[#allocation109_spill] sm:$0xff] }
 0x6a4   : > { %10584 = vmatprep.subr.bf16.mxu1 %v23089_v57  ;;  %v23110_v57 = vld [vmem:[#allocation7 + $0xac0] ss:$16 sps:$4 sm:$0xff]  }
 0x6a5   : > { %24790 = vst [vmem:[#allocation101_spill] sm:$0xff] %v23110_v57 }
 0x6a6   : > { %8033 = vmatpush1.bf16.msra.mxu0 %v24785_v19  ;;  %v23113_v19 = vld [vmem:[#allocation7 + $0xae4] ss:$16 sps:$4 sm:$0xff]  }
 0x6a7   : > { %10585 = vmatpush1.bf16.msra.mxu1 %v23094_v38  ;;  %8034 = vmatprep.subr.bf16.mxu0 %v24786_v49  ;;  %24791 = vst [vmem:[#allocation102_spill] sm:$0xff] %v23113_v19  ;;  %v24792_v38 = vld [vmem:[#allocation110_spill] sm:$0xff] }
 0x6a8   : > { %10586 = vmatprep.subr.bf16.mxu1 %v23097_v14  ;;  %v23118_v49 = vld [vmem:[#allocation7 + $0xae0] ss:$16 sps:$4 sm:$0xff]  }
 0x6aa   : > { %8035 = vmatpush1.bf16.msra.mxu0 %v24788_v27  ;;  %v23121_v27 = vld [vmem:[#allocation7 + $0xb04] ss:$16 sps:$4 sm:$0xff]  }
 0x6ab   : > { %10587 = vmatpush1.bf16.msra.mxu1 %v23102_v33  ;;  %8036 = vmatprep.subr.bf16.mxu0 %v24789_v8  ;;  %24793 = vst [vmem:[#allocation103_spill] sm:$0xff] %v23121_v27  ;;  %v23126_v8 = vld [vmem:[#allocation7 + $0xb00] ss:$16 sps:$4 sm:$0xff]  }
 0x6ac   : > { %10588 = vmatprep.subr.bf16.mxu1 %v23105_v56  ;;  %24794 = vst [vmem:[#allocation104_spill] sm:$0xff] %v23126_v8  ;;  %v24798_v56 = vld [vmem:[#allocation33_spill] sm:$0xff] }
 0x6ae   : > { %8037 = vmatpush1.bf16.msra.mxu0 %v24792_v38  ;;  %v24795_v38 = vld [vmem:[#allocation41_spill] sm:$0xff] }
 0x6af   : > { %10589 = vmatpush1.bf16.msra.mxu1 %v23110_v57  ;;  %8038 = vmatprep.subr.bf16.mxu0 %v22701_v48  ;;  %v23130_v57 = vld [vmem:[#allocation7 + $0xb24] ss:$16 sps:$4 sm:$0xff]   ;;  %v24796_v48 = vld [vmem:[#allocation47_spill] sm:$0xff] }
 0x6b0   : > { %10590 = vmatprep.subr.bf16.mxu1 %v23113_v19  ;;  %v24797_v19 = vld [vmem:[#allocation111_spill] sm:$0xff] }
 0x6b2   : > { %8039 = vmatpush1.bf16.msra.mxu0 %v22704_v42  ;;  %v23138_v42 = vld [vmem:[#allocation7 + $0xb20] ss:$16 sps:$4 sm:$0xff]  }
 0x6b3   : > { %10591 = vmatpush1.bf16.msra.mxu1 %v23118_v49  ;;  %8061 = vmatprep.subr.bf16.mxu0 %v22707_v40  ;;  %v23141_v40 = vld [vmem:[#allocation7 + $0xb44] ss:$16 sps:$4 sm:$0xff]  }
 0x6b4   : > { %10613 = vmatprep.subr.bf16.mxu1 %v23121_v27  ;;  %24799 = vst [vmem:[#allocation105_spill] sm:$0xff] %v23141_v40  ;;  %v23146_v27 = vld [vmem:[#allocation7 + $0xb40] ss:$16 sps:$4 sm:$0xff]  }
 0x6b5   : > { %8041 = vmatmul.mubr.bf16.vlgmr.msra.gmra.mrb[64].mxu0 %v24795_v38 }
 0x6b6   : > { %10593 = vmatmul.mubr.bf16.vlgmr.msra.gmra.mrb[92].mxu1 %v24698_v61  ;;  %8050 = vmatprep.mubr.bf16.mxu0 %v24796_v48 }
 0x6b7   : > { %8062 = vmatpush1.bf16.msra.mxu0 %v24797_v19  ;;  %10602 = vmatprep.mubr.bf16.mxu1 %v24798_v56  ;;  %v24800_v19 = vld [vmem:[#allocation43_spill] sm:$0xff] }
 0x6b8   : > { %10614 = vmatpush1.bf16.msra.mxu1 %v23126_v8  ;;  %8063 = vmatprep.subr.bf16.mxu0 %v22714_v36  ;;  %v23150_v8 = vld [vmem:[#allocation7 + $0xb64] ss:$16 sps:$4 sm:$0xff]  }
 0x6b9   : > { %10615 = vmatprep.subr.bf16.mxu1 %v23130_v57  ;;  %v24801_v36 = vld [vmem:[#allocation44_spill] sm:$0xff] }
 0x6bb   : > { %8064 = vmatpush1.bf16.msra.mxu0 %v22722_v55  ;;  %v23158_v55 = vld [vmem:[#allocation7 + $0xb60] ss:$16 sps:$4 sm:$0xff]  }
 0x6bc   : > { %10616 = vmatpush1.bf16.msra.mxu1 %v23138_v42  ;;  %8065 = vmatprep.subr.bf16.mxu0 %v22725_v32  ;;  %v23161_v32 = vld [vmem:[#allocation7 + $0xb84] ss:$16 sps:$4 sm:$0xff]  }
 0x6bd   : > { %8051 = vmatmul.mubr.bf16.gmra.mrb[68].mxu0 %v24800_v19  ;;  %10617 = vmatprep.subr.bf16.mxu1 %v23141_v40  ;;  %v23166_v40 = vld [vmem:[#allocation7 + $0xb80] ss:$16 sps:$4 sm:$0xff]  }
 0x6be   : > { %10603 = vmatmul.mubr.bf16.gmra.mrb[96].mxu1 %v24801_v36  ;;  %8093 = vmatprep.mubr.bf16.mxu0 %v24598_v13 }
 0x6bf   : > { %8066 = vmatpush1.bf16.msra.mxu0 %v22730_v34  ;;  %10645 = vmatprep.mubr.bf16.mxu1 %v24598_v13  ;;  %v23169_v34 = vld [vmem:[#allocation7 + $0xba4] ss:$16 sps:$4 sm:$0xff]  }
 0x6c0   : > { %10618 = vmatpush1.bf16.msra.mxu1 %v23146_v27  ;;  %8067 = vmatprep.subr.bf16.mxu0 %v22734_v62  ;;  %v23174_v62 = vld [vmem:[#allocation7 + $0xba0] ss:$16 sps:$4 sm:$0xff]  }
 0x6c1   : > { %10619 = vmatprep.subr.bf16.mxu1 %v23150_v8 }
 0x6c3   : > { %8068 = vmatpush1.bf16.msra.mxu0 %v22742_v60  ;;  %v23177_v60 = vld [vmem:[#allocation7 + $0xbc4] ss:$16 sps:$4 sm:$0xff]  }
 0x6c4   : > { %10620 = vmatpush1.bf16.msra.mxu1 %v23158_v55  ;;  %8069 = vmatprep.subr.bf16.mxu0 %v22745_v7  ;;  %v23182_v7 = vld [vmem:[#allocation7 + $0xbc0] ss:$16 sps:$4 sm:$0xff]  }
 0x6c5   : > { %10621 = vmatprep.subr.bf16.mxu1 %v23161_v32  ;;  %24802 = vst [vmem:[#allocation106_spill] sm:$0xff] %v23182_v7 }
 0x6c7   : > { %8070 = vmatpush1.bf16.msra.mxu0 %v22750_v25  ;;  %v23185_v25 = vld [vmem:[#allocation7 + $0xbe4] ss:$16 sps:$4 sm:$0xff]  }
 0x6c8   : > { %10622 = vmatpush1.bf16.msra.mxu1 %v23166_v40  ;;  %8071 = vmatprep.subr.bf16.mxu0 %v22753_v26  ;;  %v23190_v26 = vld [vmem:[#allocation7 + $0xbe0] ss:$16 sps:$4 sm:$0xff]  }
 0x6c9   : > { %10623 = vmatprep.subr.bf16.mxu1 %v23169_v34 }
 0x6cb   : > { %8072 = vmatpush1.bf16.msra.mxu0 %v22758_v50  ;;  %v23193_v50 = vld [vmem:[#allocation7 + $0x90c] ss:$16 sps:$4 sm:$0xff]  }
 0x6cc   : > { %10624 = vmatpush1.bf16.msra.mxu1 %v23174_v62  ;;  %8073 = vmatprep.subr.bf16.mxu0 %v22761_v43  ;;  %v23198_v43 = vld [vmem:[#allocation7 + $0x908] ss:$16 sps:$4 sm:$0xff]  }
 0x6cd   : > { %10625 = vmatprep.subr.bf16.mxu1 %v23177_v60 }
 0x6cf   : > { %8074 = vmatpush1.bf16.msra.mxu0 %v22766_v29  ;;  %v23201_v29 = vld [vmem:[#allocation7 + $0x92c] ss:$16 sps:$4 sm:$0xff]  }
 0x6d0   : > { %10626 = vmatpush1.bf16.msra.mxu1 %v23182_v7  ;;  %8075 = vmatprep.subr.bf16.mxu0 %v22769_v23  ;;  %24803 = vst [vmem:[#allocation107_spill] sm:$0xff] %v23201_v29  ;;  %v24804_v7 = vld [vmem:[#allocation45_spill] sm:$0xff] }
 0x6d1   : > { %10627 = vmatprep.subr.bf16.mxu1 %v23185_v25  ;;  %v23208_v23 = vld [vmem:[#allocation7 + $0x928] ss:$16 sps:$4 sm:$0xff]  }
 0x6d3   : > { %8076 = vmatpush1.bf16.msra.mxu0 %v22774_v54  ;;  %v23212_v54 = vld [vmem:[#allocation7 + $0x94c] ss:$16 sps:$4 sm:$0xff]  }
 0x6d4   : > { %10628 = vmatpush1.bf16.msra.mxu1 %v23190_v26  ;;  %8114 = vmatprep.subr.bf16.mxu0 %v22777_v16  ;;  %v23218_v16 = vld [vmem:[#allocation7 + $0x948] ss:$16 sps:$4 sm:$0xff]  }
 0x6d5   : > { %10666 = vmatprep.subr.bf16.mxu1 %v23193_v50 }
 0x6d6   : > { %8094 = vmatmul.mubr.bf16.vlgmr.msra.gmra.mrb[64].mxu0 %v24804_v7 }
 0x6d7   : > { %10646 = vmatmul.mubr.bf16.vlgmr.msra.gmra.mrb[92].mxu1 %v22037_v5  ;;  %8115 = vmatpush1.bf16.msra.mxu0 %v22782_v58  ;;  %v24805_v58 = vld [vmem:[#allocation48_spill] sm:$0xff] }
 0x6d8   : > { %10667 = vmatpush1.bf16.msra.mxu1 %v23198_v43  ;;  %8116 = vmatprep.subr.bf16.mxu0 %v22785_v35  ;;  %v23222_v35 = vld [vmem:[#allocation7 + $0x96c] ss:$16 sps:$4 sm:$0xff]  }
 0x6d9   : > { %10668 = vmatprep.subr.bf16.mxu1 %v23201_v29  ;;  %8103 = vmatprep.mubr.bf16.mxu0 %v24598_v13  ;;  %v24806_v29 = vld [vmem:[#allocation40_spill] sm:$0xff] }
 0x6da   : > { %10655 = vmatprep.mubr.bf16.mxu1 %v24598_v13 }
 0x6db   : > { %8117 = vmatpush1.bf16.msra.mxu0 %v22792_v30  ;;  %v23228_v30 = vld [vmem:[#allocation7 + $0x968] ss:$16 sps:$4 sm:$0xff]  }
 0x6dc   : > { %10669 = vmatpush1.bf16.msra.mxu1 %v23208_v23  ;;  %8118 = vmatprep.subr.bf16.mxu0 %v22796_v41  ;;  %v23232_v41 = vld [vmem:[#allocation7 + $0x98c] ss:$16 sps:$4 sm:$0xff]  }
 0x6dd   : > { %10670 = vmatprep.subr.bf16.mxu1 %v23212_v54 }
 0x6de   : > { %8104 = vmatmul.mubr.bf16.gmra.mrb[68].mxu0 %v24805_v58 }
 0x6df   : > { %10656 = vmatmul.mubr.bf16.gmra.mrb[96].mxu1 %v24806_v29  ;;  %8119 = vmatpush1.bf16.msra.mxu0 %v22802_v63  ;;  %v23238_v63 = vld [vmem:[#allocation7 + $0x988] ss:$16 sps:$4 sm:$0xff]  }
 0x6e0   : > { %8146 = vmatprep.mubr.bf16.mxu0 %v24747_v47  ;;  %10671 = vmatpush1.bf16.msra.mxu1 %v23218_v16  ;;  %v23241_v47 = vld [vmem:[#allocation7 + $0x9ac] ss:$16 sps:$4 sm:$0xff]  }
 0x6e1   : > { %10698 = vmatprep.mubr.bf16.mxu1 %v22034_v51  ;;  %8120 = vmatprep.subr.bf16.mxu0 %v22806_v28  ;;  %v23246_v28 = vld [vmem:[#allocation7 + $0x9a8] ss:$16 sps:$4 sm:$0xff]  }
 0x6e2   : > { %10672 = vmatprep.subr.bf16.mxu1 %v23222_v35  ;;  %v23294_v51 = vld [vmem:[#allocation7 + $0xa68] ss:$16 sps:$4 sm:$0xff]  }
 0x6e3   : > { %8121 = vmatpush1.bf16.msra.mxu0 %v22812_v20  ;;  %v23249_v20 = vld [vmem:[#allocation7 + $0x9cc] ss:$16 sps:$4 sm:$0xff]   ;;  %24811 = vst [vmem:[#allocation111_spill] sm:$0xff] %v23294_v51 }
 0x6e4   : > { %10673 = vmatpush1.bf16.msra.mxu1 %v23228_v30  ;;  %8122 = vmatprep.subr.bf16.mxu0 %v22816_v2  ;;  %v23254_v2 = vld [vmem:[#allocation7 + $0x9c8] ss:$16 sps:$4 sm:$0xff]  }
 0x6e5   : > { %10674 = vmatprep.subr.bf16.mxu1 %v23232_v41 }
 0x6e7   : > { %8123 = vmatpush1.bf16.msra.mxu0 %v22822_v4  ;;  %v23257_v4 = vld [vmem:[#allocation7 + $0x9ec] ss:$16 sps:$4 sm:$0xff]  }
 0x6e8   : > { %10675 = vmatpush1.bf16.msra.mxu1 %v23238_v63  ;;  %8124 = vmatprep.subr.bf16.mxu0 %v22825_v44  ;;  %v23262_v44 = vld [vmem:[#allocation7 + $0x9e8] ss:$16 sps:$4 sm:$0xff]  }
 0x6e9   : > { %10676 = vmatprep.subr.bf16.mxu1 %v23241_v47 }
 0x6eb   : > { %8125 = vmatpush1.bf16.msra.mxu0 %v22830_v24  ;;  %v23265_v24 = vld [vmem:[#allocation7 + $0xa0c] ss:$16 sps:$4 sm:$0xff]  }
 0x6ec   : > { %10677 = vmatpush1.bf16.msra.mxu1 %v23246_v28  ;;  %8126 = vmatprep.subr.bf16.mxu0 %v22833_v39  ;;  %v23270_v39 = vld [vmem:[#allocation7 + $0xa08] ss:$16 sps:$4 sm:$0xff]  }
 0x6ed   : > { %10678 = vmatprep.subr.bf16.mxu1 %v23249_v20 }
 0x6ef   : > { %8127 = vmatpush1.bf16.msra.mxu0 %v22838_v11  ;;  %v23273_v11 = vld [vmem:[#allocation7 + $0xa2c] ss:$16 sps:$4 sm:$0xff]  }
 0x6f0   : > { %10679 = vmatpush1.bf16.msra.mxu1 %v23254_v2  ;;  %8128 = vmatprep.subr.bf16.mxu0 %v22841_v1  ;;  %v23278_v1 = vld [vmem:[#allocation7 + $0xa28] ss:$16 sps:$4 sm:$0xff]  }
 0x6f1   : > { %10680 = vmatprep.subr.bf16.mxu1 %v23257_v4  ;;  %24807 = vst [vmem:[#allocation108_spill] sm:$0xff] %v23278_v1 }
 0x6f3   : > { %8129 = vmatpush1.bf16.msra.mxu0 %v22846_v9  ;;  %v23281_v9 = vld [vmem:[#allocation7 + $0xa4c] ss:$16 sps:$4 sm:$0xff]  }
 0x6f4   : > { %10681 = vmatpush1.bf16.msra.mxu1 %v23262_v44  ;;  %8130 = vmatprep.subr.bf16.mxu0 %v22849_v59  ;;  %24808 = vst [vmem:[#allocation109_spill] sm:$0xff] %v23281_v9  ;;  %v23286_v59 = vld [vmem:[#allocation7 + $0xa48] ss:$16 sps:$4 sm:$0xff]  }
 0x6f5   : > { %10682 = vmatprep.subr.bf16.mxu1 %v23265_v24 }
 0x6f7   : > { %8131 = vmatpush1.bf16.msra.mxu0 %v22854_v46  ;;  %v23289_v46 = vld [vmem:[#allocation7 + $0xa6c] ss:$16 sps:$4 sm:$0xff]  }
 0x6f8   : > { %10683 = vmatpush1.bf16.msra.mxu1 %v23270_v39  ;;  %8132 = vmatprep.subr.bf16.mxu0 %v22857_v45  ;;  %24809 = vst [vmem:[#allocation110_spill] sm:$0xff] %v23289_v46  ;;  %v24810_v45 = vld [vmem:[#allocation55_spill] sm:$0xff] }
 0x6f9   : > { %10684 = vmatprep.subr.bf16.mxu1 %v23273_v11 }
 0x6fb   : > { %8133 = vmatpush1.bf16.msra.mxu0 %v22862_v21  ;;  %v23297_v21 = vld [vmem:[#allocation7 + $0xa8c] ss:$16 sps:$4 sm:$0xff]  }
 0x6fc   : > { %10685 = vmatpush1.bf16.msra.mxu1 %v23278_v1  ;;  %8134 = vmatprep.subr.bf16.mxu0 %v22865_v37  ;;  %24812 = vst [vmem:[#allocation55_spill] sm:$0xff] %v23297_v21  ;;  %v24813_v1 = vld [vmem:[#allocation112_spill] sm:$0xff]  ;;  %v24814_v37 = vld [vmem:[#allocation113_spill] sm:$0xff] }
 0x6fd   : > { %10686 = vmatprep.subr.bf16.mxu1 %v23281_v9  ;;  %v23302_v9 = vld [vmem:[#allocation7 + $0xa88] ss:$16 sps:$4 sm:$0xff]  }
 0x6ff   : > { %8135 = vmatpush1.bf16.msra.mxu0 %v22870_v17  ;;  %v23305_v17 = vld [vmem:[#allocation7 + $0xaac] ss:$16 sps:$4 sm:$0xff]  }
 0x700   : > { %10687 = vmatpush1.bf16.msra.mxu1 %v23286_v59  ;;  %8136 = vmatprep.subr.bf16.mxu0 %v24810_v45  ;;  %v24815_v45 = vld [vmem:[#allocation62_spill] sm:$0xff] }
 0x701   : > { %10688 = vmatprep.subr.bf16.mxu1 %v23289_v46  ;;  %v23310_v46 = vld [vmem:[#allocation7 + $0xaa8] ss:$16 sps:$4 sm:$0xff]  }
 0x703   : > { %8137 = vmatpush1.bf16.msra.mxu0 %v24813_v1  ;;  %v23313_v1 = vld [vmem:[#allocation7 + $0xacc] ss:$16 sps:$4 sm:$0xff]  }
 0x704   : > { %10689 = vmatpush1.bf16.msra.mxu1 %v23294_v51  ;;  %8138 = vmatprep.subr.bf16.mxu0 %v24814_v37  ;;  %v24816_v51 = vld [vmem:[#allocation63_spill] sm:$0xff]  ;;  %v24817_v37 = vld [vmem:[#allocation54_spill] sm:$0xff] }
 0x705   : > { %10690 = vmatprep.subr.bf16.mxu1 %v23297_v21  ;;  %v23318_v21 = vld [vmem:[#allocation7 + $0xac8] ss:$16 sps:$4 sm:$0xff]  }
 0x707   : > { %8139 = vmatpush1.bf16.msra.mxu0 %v22886_v18  ;;  %v23321_v18 = vld [vmem:[#allocation7 + $0xaec] ss:$16 sps:$4 sm:$0xff]  }
 0x708   : > { %10691 = vmatpush1.bf16.msra.mxu1 %v23302_v9  ;;  %8140 = vmatprep.subr.bf16.mxu0 %v24815_v45  ;;  %v23326_v45 = vld [vmem:[#allocation7 + $0xae8] ss:$16 sps:$4 sm:$0xff]  }
 0x709   : > { %10692 = vmatprep.subr.bf16.mxu1 %v23305_v17 }
 0x70b   : > { %8141 = vmatpush1.bf16.msra.mxu0 %v24816_v51  ;;  %v23329_v51 = vld [vmem:[#allocation7 + $0xb0c] ss:$16 sps:$4 sm:$0xff]  }
 0x70c   : > { %10693 = vmatpush1.bf16.msra.mxu1 %v23310_v46  ;;  %8142 = vmatprep.subr.bf16.mxu0 %v24817_v37  ;;  %v23334_v37 = vld [vmem:[#allocation7 + $0xb08] ss:$16 sps:$4 sm:$0xff]  }
 0x70d   : > { %10694 = vmatprep.subr.bf16.mxu1 %v23313_v1 }
 0x70f   : > { %8143 = vmatpush1.bf16.msra.mxu0 %v22902_v52  ;;  %v23338_v52 = vld [vmem:[#allocation7 + $0xb2c] ss:$16 sps:$4 sm:$0xff]  }
 0x710   : > { %10695 = vmatpush1.bf16.msra.mxu1 %v23318_v21  ;;  %8144 = vmatprep.subr.bf16.mxu0 %v22905_v3  ;;  %v23349_v3 = vld [vmem:[#allocation7 + $0xb4c] ss:$16 sps:$4 sm:$0xff]  }
 0x711   : > { %10696 = vmatprep.subr.bf16.mxu1 %v23321_v18 }
 0x713   : > { %8145 = vmatpush1.bf16.msra.mxu0 %v22910_v0  ;;  %v23346_v0 = vld [vmem:[#allocation7 + $0xb28] ss:$16 sps:$4 sm:$0xff]  }
 0x714   : > { %10697 = vmatpush1.bf16.msra.mxu1 %v23326_v45  ;;  %8167 = vmatprep.subr.bf16.mxu0 %v22913_v6  ;;  %v24818_v6 = vld [vmem:[#allocation65_spill] sm:$0xff] }
 0x715   : > { %10719 = vmatprep.subr.bf16.mxu1 %v23329_v51 }
 0x716   : > { %8147 = vmatmul.mubr.bf16.vlgmr.msra.gmra.mrb[72].mxu0 %v24795_v38  ;;  %v24819_v38 = vld [vmem:[#allocation66_spill] sm:$0xff] }
 0x717   : > { %10699 = vmatmul.mubr.bf16.vlgmr.msra.gmra.mrb[84].mxu1 %v24698_v61  ;;  %8156 = vmatprep.mubr.bf16.mxu0 %v24796_v48  ;;  %v23354_v48 = vld [vmem:[#allocation7 + $0xb48] ss:$16 sps:$4 sm:$0xff]  }
 0x718   : > { %8168 = vmatpush1.bf16.msra.mxu0 %v22918_v22  ;;  %10708 = vmatprep.mubr.bf16.mxu1 %v24798_v56  ;;  %v23358_v22 = vld [vmem:[#allocation7 + $0xb6c] ss:$16 sps:$4 sm:$0xff]   ;;  %v23374_v61 = vld [vmem:[#allocation7 + $0xb88] ss:$16 sps:$4 sm:$0xff]  }
 0x719   : > { %10720 = vmatpush1.bf16.msra.mxu1 %v23334_v37  ;;  %8169 = vmatprep.subr.bf16.mxu0 %v22922_v31  ;;  %24820 = vst [vmem:[#allocation112_spill] sm:$0xff] %v23358_v22  ;;  %v24821_v31 = vld [vmem:[#allocation67_spill] sm:$0xff]  ;;  %v24825_v56 = vld [vmem:[#allocation69_spill] sm:$0xff] }
 0x71a   : > { %10721 = vmatprep.subr.bf16.mxu1 %v23338_v52 }
 0x71c   : > { %8170 = vmatpush1.bf16.msra.mxu0 %v24818_v6  ;;  %v24822_v6 = vld [vmem:[#allocation68_spill] sm:$0xff] }
 0x71d   : > { %10722 = vmatpush1.bf16.msra.mxu1 %v23346_v0  ;;  %8171 = vmatprep.subr.bf16.mxu0 %v24819_v38  ;;  %v23366_v38 = vld [vmem:[#allocation7 + $0xb68] ss:$16 sps:$4 sm:$0xff]  }
 0x71e   : > { %8157 = vmatmul.mubr.bf16.gmra.mrb[76].mxu0 %v24800_v19  ;;  %10723 = vmatprep.subr.bf16.mxu1 %v23349_v3  ;;  %24823 = vst [vmem:[#allocation113_spill] sm:$0xff] %v23366_v38  ;;  %v23369_v19 = vld [vmem:[#allocation7 + $0xb8c] ss:$16 sps:$4 sm:$0xff]  }
 0x71f   : > { %10709 = vmatmul.mubr.bf16.gmra.mrb[88].mxu1 %v24801_v36  ;;  %8199 = vmatprep.mubr.bf16.mxu0 %v24598_v13  ;;  %24824 = vst [vmem:[#allocation62_spill] sm:$0xff] %v23369_v19  ;;  %v24826_v36 = vld [vmem:[#allocation70_spill] sm:$0xff] }
 0x720   : > { %8172 = vmatpush1.bf16.msra.mxu0 %v24821_v31  ;;  %10751 = vmatprep.mubr.bf16.mxu1 %v24598_v13  ;;  %v23377_v31 = vld [vmem:[#allocation7 + $0xbac] ss:$16 sps:$4 sm:$0xff]  }
 0x721   : > { %10724 = vmatpush1.bf16.msra.mxu1 %v23354_v48  ;;  %8173 = vmatprep.subr.bf16.mxu0 %v24822_v6  ;;  %24827 = vst [vmem:[#allocation63_spill] sm:$0xff] %v23377_v31  ;;  %v24828_v6 = vld [vmem:[#allocation71_spill] sm:$0xff] }
 0x722   : > { %10725 = vmatprep.subr.bf16.mxu1 %v23358_v22  ;;  %v23382_v22 = vld [vmem:[#allocation7 + $0xba8] ss:$16 sps:$4 sm:$0xff]  }
 0x724   : > { %8174 = vmatpush1.bf16.msra.mxu0 %v24825_v56  ;;  %v23385_v56 = vld [vmem:[#allocation7 + $0xbcc] ss:$16 sps:$4 sm:$0xff]  }
 0x725   : > { %10726 = vmatpush1.bf16.msra.mxu1 %v23366_v38  ;;  %8175 = vmatprep.subr.bf16.mxu0 %v24826_v36  ;;  %24829 = vst [vmem:[#allocation54_spill] sm:$0xff] %v23385_v56  ;;  %v24830_v38 = vld [vmem:[#allocation72_spill] sm:$0xff]  ;;  %v24831_v36 = vld [vmem:[#allocation73_spill] sm:$0xff] }
 0x726   : > { %10727 = vmatprep.subr.bf16.mxu1 %v23369_v19  ;;  %v23390_v19 = vld [vmem:[#allocation7 + $0xbc8] ss:$16 sps:$4 sm:$0xff]  }
 0x728   : > { %8176 = vmatpush1.bf16.msra.mxu0 %v22958_v53  ;;  %v23393_v53 = vld [vmem:[#allocation7 + $0xbec] ss:$16 sps:$4 sm:$0xff]  }
 0x729   : > { %10728 = vmatpush1.bf16.msra.mxu1 %v23374_v61  ;;  %8177 = vmatprep.subr.bf16.mxu0 %v24828_v6  ;;  %24832 = vst [vmem:[#allocation65_spill] sm:$0xff] %v23393_v53  ;;  %v24833_v6 = vld [vmem:[#allocation74_spill] sm:$0xff] }
 0x72a   : > { %10729 = vmatprep.subr.bf16.mxu1 %v23377_v31  ;;  %v23398_v31 = vld [vmem:[#allocation7 + $0xbe8] ss:$16 sps:$4 sm:$0xff]  }
 0x72c   : > { %8178 = vmatpush1.bf16.msra.mxu0 %v24830_v38  ;;  %v23401_v38 = vld [vmem:[#allocation7 + $0xc04] ss:$16 sps:$4 sm:$0xff]  }
 0x72d   : > { %10730 = vmatpush1.bf16.msra.mxu1 %v23382_v22  ;;  %8179 = vmatprep.subr.bf16.mxu0 %v24831_v36  ;;  %24834 = vst [vmem:[#allocation66_spill] sm:$0xff] %v23401_v38  ;;  %v24835_v36 = vld [vmem:[#allocation75_spill] sm:$0xff] }
 0x72e   : > { %10731 = vmatprep.subr.bf16.mxu1 %v23385_v56  ;;  %v23406_v56 = vld [vmem:[#allocation7 + $0xc00] ss:$16 sps:$4 sm:$0xff]  }
 0x72f   : > { %24836 = vst [vmem:[#allocation67_spill] sm:$0xff] %v23406_v56 }
 0x730   : > { %8180 = vmatpush1.bf16.msra.mxu0 %v22974_v10  ;;  %v23409_v10 = vld [vmem:[#allocation7 + $0xc24] ss:$16 sps:$4 sm:$0xff]  }
 0x731   : > { %10732 = vmatpush1.bf16.msra.mxu1 %v23390_v19  ;;  %8181 = vmatprep.subr.bf16.mxu0 %v24833_v6  ;;  %24837 = vst [vmem:[#allocation68_spill] sm:$0xff] %v23409_v10  ;;  %v24838_v6 = vld [vmem:[#allocation76_spill] sm:$0xff] }
 0x732   : > { %10733 = vmatprep.subr.bf16.mxu1 %v23393_v53  ;;  %v24839_v53 = vld [vmem:[#allocation77_spill] sm:$0xff] }
 0x734   : > { %8182 = vmatpush1.bf16.msra.mxu0 %v22982_v12  ;;  %v23416_v12 = vld [vmem:[#allocation7 + $0xc20] ss:$16 sps:$4 sm:$0xff]  }
 0x735   : > { %10734 = vmatpush1.bf16.msra.mxu1 %v23398_v31  ;;  %8819 = vmatprep.subr.bf16.mxu0 %v24835_v36  ;;  %24840 = vst [vmem:[#allocation69_spill] sm:$0xff] %v23416_v12  ;;  %v23420_v36 = vld [vmem:[#allocation7 + $0xc44] ss:$16 sps:$4 sm:$0xff]  }
 0x736   : > { %10791 = vmatprep.subr.bf16.mxu1 %v23401_v38  ;;  %24841 = vst [vmem:[#allocation70_spill] sm:$0xff] %v23420_v36  ;;  %v24842_v38 = vld [vmem:[#allocation78_spill] sm:$0xff] }
 0x737   : > { %8200 = vmatmul.mubr.bf16.vlgmr.msra.gmra.mrb[72].mxu0 %v24804_v7  ;;  %v24843_v7 = vld [vmem:[#allocation79_spill] sm:$0xff] }
 0x738   : > { %10752 = vmatmul.mubr.bf16.vlgmr.msra.gmra.mrb[84].mxu1 %v22037_v5  ;;  %8820 = vmatpush1.bf16.msra.mxu0 %v24838_v6  ;;  %v23426_v6 = vld [vmem:[#allocation7 + $0xc40] ss:$16 sps:$4 sm:$0xff]  }
 0x739   : > { %10792 = vmatpush1.bf16.msra.mxu1 %v23406_v56  ;;  %8821 = vmatprep.subr.bf16.mxu0 %v24839_v53  ;;  %24844 = vst [vmem:[#allocation71_spill] sm:$0xff] %v23426_v6  ;;  %v23430_v53 = vld [vmem:[#allocation7 + $0xc64] ss:$16 sps:$4 sm:$0xff]   ;;  %v23454_v56 = vld [vmem:[#allocation7 + $0xca0] ss:$16 sps:$4 sm:$0xff]  }
 0x73a   : > { %10793 = vmatprep.subr.bf16.mxu1 %v23409_v10  ;;  %8209 = vmatprep.mubr.bf16.mxu0 %v24598_v13  ;;  %v24845_v5 = vld [vmem:[#allocation80_spill] sm:$0xff]  ;;  %24856 = vst [vmem:[#allocation76_spill] sm:$0xff] %v23454_v56 }
 0x73b   : > { %10761 = vmatprep.mubr.bf16.mxu1 %v24598_v13  ;;  %v24846_v10 = vld [vmem:[#allocation56_spill] sm:$0xff] }
 0x73c   : > { %8822 = vmatpush1.bf16.msra.mxu0 %v24842_v38  ;;  %v23436_v38 = vld [vmem:[#allocation7 + $0xc60] ss:$16 sps:$4 sm:$0xff]  }
 0x73d   : > { %10794 = vmatpush1.bf16.msra.mxu1 %v23416_v12  ;;  %8823 = vmatprep.subr.bf16.mxu0 %v24843_v7  ;;  %24847 = vst [vmem:[#allocation72_spill] sm:$0xff] %v23436_v38  ;;  %v24848_v12 = vld [vmem:[#allocation58_spill] sm:$0xff] }
 0x73e   : > { %10795 = vmatprep.subr.bf16.mxu1 %v23420_v36  ;;  %v23440_v7 = vld [vmem:[#allocation7 + $0xc84] ss:$16 sps:$4 sm:$0xff]   ;;  %v24854_v36 = vld [vmem:[#allocation83_spill] sm:$0xff] }
 0x73f   : > { %8210 = vmatmul.mubr.bf16.gmra.mrb[76].mxu0 %v24805_v58  ;;  %24849 = vst [vmem:[#allocation73_spill] sm:$0xff] %v23440_v7  ;;  %v24850_v58 = vld [vmem:[#allocation81_spill] sm:$0xff] }
 0x740   : > { %10762 = vmatmul.mubr.bf16.gmra.mrb[88].mxu1 %v24806_v29  ;;  %8824 = vmatpush1.bf16.msra.mxu0 %v24845_v5  ;;  %v24851_v29 = vld [vmem:[#allocation82_spill] sm:$0xff] }
 0x741   : > { %8851 = vmatprep.mubr.bf16.mxu0 %v24846_v10  ;;  %10796 = vmatpush1.bf16.msra.mxu1 %v23426_v6  ;;  %v23446_v5 = vld [vmem:[#allocation7 + $0xc80] ss:$16 sps:$4 sm:$0xff]   ;;  %v23449_v6 = vld [vmem:[#allocation7 + $0xca4] ss:$16 sps:$4 sm:$0xff]  }
 0x742   : > { %10823 = vmatprep.mubr.bf16.mxu1 %v24848_v12  ;;  %8825 = vmatprep.subr.bf16.mxu0 %v23014_v15  ;;  %24852 = vst [vmem:[#allocation74_spill] sm:$0xff] %v23446_v5  ;;  %24853 = vst [vmem:[#allocation75_spill] sm:$0xff] %v23449_v6  ;;  %v24855_v15 = vld [vmem:[#allocation84_spill] sm:$0xff] }
 0x743   : > { %10797 = vmatprep.subr.bf16.mxu1 %v23430_v53 }
 0x744   : > { %8826 = vmatpush1.bf16.msra.mxu0 %v24850_v58  ;;  %v23457_v58 = vld [vmem:[#allocation7 + $0xcc4] ss:$16 sps:$4 sm:$0xff]  }
 0x745   : > { %10798 = vmatpush1.bf16.msra.mxu1 %v23436_v38  ;;  %8827 = vmatprep.subr.bf16.mxu0 %v24851_v29  ;;  %24857 = vst [vmem:[#allocation77_spill] sm:$0xff] %v23457_v58  ;;  %v24858_v38 = vld [vmem:[#allocation85_spill] sm:$0xff]  ;;  %v24859_v29 = vld [vmem:[#allocation86_spill] sm:$0xff] }
 0x746   : > { %10799 = vmatprep.subr.bf16.mxu1 %v23440_v7  ;;  %v23462_v7 = vld [vmem:[#allocation7 + $0xcc0] ss:$16 sps:$4 sm:$0xff]  }
 0x747   : > { %24860 = vst [vmem:[#allocation78_spill] sm:$0xff] %v23462_v7 }
 0x748   : > { %8828 = vmatpush1.bf16.msra.mxu0 %v24854_v36  ;;  %v23465_v36 = vld [vmem:[#allocation7 + $0xce4] ss:$16 sps:$4 sm:$0xff]  }
 0x749   : > { %10800 = vmatpush1.bf16.msra.mxu1 %v23446_v5  ;;  %8829 = vmatprep.subr.bf16.mxu0 %v24855_v15  ;;  %24861 = vst [vmem:[#allocation79_spill] sm:$0xff] %v23465_v36  ;;  %v24862_v5 = vld [vmem:[#allocation87_spill] sm:$0xff]  ;;  %v24863_v15 = vld [vmem:[#allocation88_spill] sm:$0xff] }
 0x74a   : > { %10801 = vmatprep.subr.bf16.mxu1 %v23449_v6  ;;  %v23470_v6 = vld [vmem:[#allocation7 + $0xce0] ss:$16 sps:$4 sm:$0xff]  }
 0x74b   : > { %24864 = vst [vmem:[#allocation80_spill] sm:$0xff] %v23470_v6 }
 0x74c   : > { %8830 = vmatpush1.bf16.msra.mxu0 %v24858_v38  ;;  %v23473_v38 = vld [vmem:[#allocation7 + $0xd04] ss:$16 sps:$4 sm:$0xff]  }
 0x74d   : > { %10802 = vmatpush1.bf16.msra.mxu1 %v23454_v56  ;;  %8831 = vmatprep.subr.bf16.mxu0 %v24859_v29  ;;  %24865 = vst [vmem:[#allocation56_spill] sm:$0xff] %v23473_v38  ;;  %v24866_v56 = vld [vmem:[#allocation89_spill] sm:$0xff]  ;;  %v24867_v29 = vld [vmem:[#allocation90_spill] sm:$0xff] }
 0x74e   : > { %10803 = vmatprep.subr.bf16.mxu1 %v23457_v58  ;;  %v23478_v58 = vld [vmem:[#allocation7 + $0xd00] ss:$16 sps:$4 sm:$0xff]  }
 0x74f   : > { %24868 = vst [vmem:[#allocation58_spill] sm:$0xff] %v23478_v58 }
 0x750   : > { %8832 = vmatpush1.bf16.msra.mxu0 %v24862_v5  ;;  %v23481_v5 = vld [vmem:[#allocation7 + $0xd24] ss:$16 sps:$4 sm:$0xff]  }
 0x751   : > { %10804 = vmatpush1.bf16.msra.mxu1 %v23462_v7  ;;  %8833 = vmatprep.subr.bf16.mxu0 %v24863_v15  ;;  %24869 = vst [vmem:[#allocation81_spill] sm:$0xff] %v23481_v5  ;;  %v24870_v7 = vld [vmem:[#allocation91_spill] sm:$0xff]  ;;  %v24871_v15 = vld [vmem:[#allocation92_spill] sm:$0xff] }
 0x752   : > { %10805 = vmatprep.subr.bf16.mxu1 %v23465_v36  ;;  %v23486_v36 = vld [vmem:[#allocation7 + $0xd20] ss:$16 sps:$4 sm:$0xff]  }
 0x753   : > { %24872 = vst [vmem:[#allocation82_spill] sm:$0xff] %v23486_v36 }
 0x754   : > { %8834 = vmatpush1.bf16.msra.mxu0 %v24866_v56  ;;  %v23489_v56 = vld [vmem:[#allocation7 + $0xd44] ss:$16 sps:$4 sm:$0xff]  }
 0x755   : > { %10806 = vmatpush1.bf16.msra.mxu1 %v23470_v6  ;;  %8835 = vmatprep.subr.bf16.mxu0 %v24867_v29  ;;  %24873 = vst [vmem:[#allocation83_spill] sm:$0xff] %v23489_v56  ;;  %v24874_v6 = vld [vmem:[#allocation93_spill] sm:$0xff]  ;;  %v24875_v29 = vld [vmem:[#allocation94_spill] sm:$0xff] }
 0x756   : > { %10807 = vmatprep.subr.bf16.mxu1 %v23473_v38  ;;  %v23494_v38 = vld [vmem:[#allocation7 + $0xd40] ss:$16 sps:$4 sm:$0xff]  }
 0x757   : > { %24876 = vst [vmem:[#allocation84_spill] sm:$0xff] %v23494_v38 }
 0x758   : > { %8836 = vmatpush1.bf16.msra.mxu0 %v24870_v7  ;;  %v23497_v7 = vld [vmem:[#allocation7 + $0xd64] ss:$16 sps:$4 sm:$0xff]  }
 0x759   : > { %10808 = vmatpush1.bf16.msra.mxu1 %v23478_v58  ;;  %8837 = vmatprep.subr.bf16.mxu0 %v24871_v15  ;;  %v24877_v58 = vld [vmem:[#allocation95_spill] sm:$0xff]  ;;  %v24878_v15 = vld [vmem:[#allocation96_spill] sm:$0xff] }
 0x75a   : > { %10809 = vmatprep.subr.bf16.mxu1 %v23481_v5  ;;  %v23502_v5 = vld [vmem:[#allocation7 + $0xd60] ss:$16 sps:$4 sm:$0xff]  }
 0x75b   : > { %24879 = vst [vmem:[#allocation85_spill] sm:$0xff] %v23502_v5 }
 0x75c   : > { %8838 = vmatpush1.bf16.msra.mxu0 %v24874_v6  ;;  %v23505_v6 = vld [vmem:[#allocation7 + $0xd84] ss:$16 sps:$4 sm:$0xff]  }
 0x75d   : > { %10810 = vmatpush1.bf16.msra.mxu1 %v23486_v36  ;;  %8839 = vmatprep.subr.bf16.mxu0 %v24875_v29  ;;  %24880 = vst [vmem:[#allocation86_spill] sm:$0xff] %v23505_v6  ;;  %v24881_v36 = vld [vmem:[#allocation97_spill] sm:$0xff]  ;;  %v24882_v29 = vld [vmem:[#allocation98_spill] sm:$0xff] }
 0x75e   : > { %10811 = vmatprep.subr.bf16.mxu1 %v23489_v56  ;;  %v23510_v56 = vld [vmem:[#allocation7 + $0xd80] ss:$16 sps:$4 sm:$0xff]  }
 0x75f   : > { %24883 = vst [vmem:[#allocation87_spill] sm:$0xff] %v23510_v56 }
 0x760   : > { %8840 = vmatpush1.bf16.msra.mxu0 %v24877_v58  ;;  %v23513_v58 = vld [vmem:[#allocation7 + $0xda4] ss:$16 sps:$4 sm:$0xff]  }
 0x761   : > { %10812 = vmatpush1.bf16.msra.mxu1 %v23494_v38  ;;  %8841 = vmatprep.subr.bf16.mxu0 %v24878_v15  ;;  %24884 = vst [vmem:[#allocation88_spill] sm:$0xff] %v23513_v58  ;;  %v24885_v38 = vld [vmem:[#allocation99_spill] sm:$0xff]  ;;  %v23518_v15 = vld [vmem:[#allocation7 + $0xda0] ss:$16 sps:$4 sm:$0xff]  }
 0x762   : > { %10813 = vmatprep.subr.bf16.mxu1 %v23497_v7  ;;  %24886 = vst [vmem:[#allocation89_spill] sm:$0xff] %v23518_v15 }
 0x764   : > { %8842 = vmatpush1.bf16.msra.mxu0 %v24881_v36  ;;  %v23521_v36 = vld [vmem:[#allocation7 + $0xdc4] ss:$16 sps:$4 sm:$0xff]  }
 0x765   : > { %10814 = vmatpush1.bf16.msra.mxu1 %v23502_v5  ;;  %8843 = vmatprep.subr.bf16.mxu0 %v24882_v29  ;;  %24887 = vst [vmem:[#allocation90_spill] sm:$0xff] %v23521_v36  ;;  %v24888_v29 = vld [vmem:[#allocation100_spill] sm:$0xff]  ;;  %v24901_v5 = vld [vmem:[#allocation49_spill] sm:$0xff] }
 0x766   : > { %10815 = vmatprep.subr.bf16.mxu1 %v23505_v6  ;;  %v23526_v6 = vld [vmem:[#allocation7 + $0xdc0] ss:$16 sps:$4 sm:$0xff]  }
 0x767   : > { %24889 = vst [vmem:[#allocation91_spill] sm:$0xff] %v23526_v6 }
 0x768   : > { %8844 = vmatpush1.bf16.msra.mxu0 %v24885_v38  ;;  %v23529_v38 = vld [vmem:[#allocation7 + $0xde4] ss:$16 sps:$4 sm:$0xff]  }
 0x769   : > { %10816 = vmatpush1.bf16.msra.mxu1 %v23510_v56  ;;  %8845 = vmatprep.subr.bf16.mxu0 %v23097_v14  ;;  %24890 = vst [vmem:[#allocation92_spill] sm:$0xff] %v23529_v38  ;;  %v24891_v56 = vld [vmem:[#allocation101_spill] sm:$0xff]  ;;  %v24892_v14 = vld [vmem:[#allocation102_spill] sm:$0xff] }
 0x76a   : > { %10817 = vmatprep.subr.bf16.mxu1 %v23513_v58  ;;  %v23534_v58 = vld [vmem:[#allocation7 + $0xde0] ss:$16 sps:$4 sm:$0xff]  }
 0x76b   : > { %24893 = vst [vmem:[#allocation93_spill] sm:$0xff] %v23534_v58 }
 0x76c   : > { %8846 = vmatpush1.bf16.msra.mxu0 %v23102_v33  ;;  %v23537_v33 = vld [vmem:[#allocation7 + $0xe04] ss:$16 sps:$4 sm:$0xff]  }
 0x76d   : > { %10818 = vmatpush1.bf16.msra.mxu1 %v23518_v15  ;;  %8847 = vmatprep.subr.bf16.mxu0 %v24888_v29  ;;  %24894 = vst [vmem:[#allocation94_spill] sm:$0xff] %v23537_v33  ;;  %v24895_v29 = vld [vmem:[#allocation103_spill] sm:$0xff]  ;;  %v24899_v15 = vld [vmem:[#allocation60_spill] sm:$0xff] }
 0x76e   : > { %10819 = vmatprep.subr.bf16.mxu1 %v23521_v36  ;;  %v23542_v36 = vld [vmem:[#allocation7 + $0xe00] ss:$16 sps:$4 sm:$0xff]  }
 0x76f   : > { %24896 = vst [vmem:[#allocation95_spill] sm:$0xff] %v23542_v36 }
 0x770   : > { %8848 = vmatpush1.bf16.msra.mxu0 %v24891_v56  ;;  %v24897_v56 = vld [vmem:[#allocation50_spill] sm:$0xff] }
 0x771   : > { %10820 = vmatpush1.bf16.msra.mxu1 %v23526_v6  ;;  %8849 = vmatprep.subr.bf16.mxu0 %v24892_v14  ;;  %v23546_v6 = vld [vmem:[#allocation7 + $0xe24] ss:$16 sps:$4 sm:$0xff]   ;;  %v24898_v14 = vld [vmem:[#allocation51_spill] sm:$0xff] }
 0x772   : > { %10821 = vmatprep.subr.bf16.mxu1 %v23529_v38  ;;  %v24900_v38 = vld [vmem:[#allocation104_spill] sm:$0xff] }
 0x774   : > { %8850 = vmatpush1.bf16.msra.mxu0 %v23118_v49  ;;  %v23554_v49 = vld [vmem:[#allocation7 + $0xe20] ss:$16 sps:$4 sm:$0xff]  }
 0x775   : > { %10822 = vmatpush1.bf16.msra.mxu1 %v23534_v58  ;;  %8872 = vmatprep.subr.bf16.mxu0 %v24895_v29  ;;  %v23557_v29 = vld [vmem:[#allocation7 + $0xe44] ss:$16 sps:$4 sm:$0xff]   ;;  %v23562_v58 = vld [vmem:[#allocation7 + $0xe40] ss:$16 sps:$4 sm:$0xff]  }
 0x776   : > { %10844 = vmatprep.subr.bf16.mxu1 %v23537_v33  ;;  %24902 = vst [vmem:[#allocation96_spill] sm:$0xff] %v23557_v29  ;;  %v24903_v33 = vld [vmem:[#allocation105_spill] sm:$0xff] }
 0x777   : > { %8852 = vmatmul.mubr.bf16.vlgmr.msra.gmra.mrb[64].mxu0 %v24897_v56 }
 0x778   : > { %10824 = vmatmul.mubr.bf16.vlgmr.msra.gmra.mrb[92].mxu1 %v24898_v14  ;;  %8861 = vmatprep.mubr.bf16.mxu0 %v24899_v15 }
 0x779   : > { %8873 = vmatpush1.bf16.msra.mxu0 %v24900_v38  ;;  %10833 = vmatprep.mubr.bf16.mxu1 %v24901_v5  ;;  %v24904_v38 = vld [vmem:[#allocation52_spill] sm:$0xff] }
 0x77a   : > { %10845 = vmatpush1.bf16.msra.mxu1 %v23542_v36  ;;  %8874 = vmatprep.subr.bf16.mxu0 %v23130_v57  ;;  %v23566_v36 = vld [vmem:[#allocation7 + $0xe64] ss:$16 sps:$4 sm:$0xff]   ;;  %v24905_v57 = vld [vmem:[#allocation53_spill] sm:$0xff] }
 0x77b   : > { %10846 = vmatprep.subr.bf16.mxu1 %v23546_v6 }
 0x77d   : > { %8875 = vmatpush1.bf16.msra.mxu0 %v23138_v42  ;;  %v23574_v42 = vld [vmem:[#allocation7 + $0xe60] ss:$16 sps:$4 sm:$0xff]  }
 0x77e   : > { %10847 = vmatpush1.bf16.msra.mxu1 %v23554_v49  ;;  %8876 = vmatprep.subr.bf16.mxu0 %v24903_v33  ;;  %v23577_v33 = vld [vmem:[#allocation7 + $0xe84] ss:$16 sps:$4 sm:$0xff]  }
 0x77f   : > { %8862 = vmatmul.mubr.bf16.gmra.mrb[68].mxu0 %v24904_v38  ;;  %10848 = vmatprep.subr.bf16.mxu1 %v23557_v29  ;;  %v23582_v29 = vld [vmem:[#allocation7 + $0xe80] ss:$16 sps:$4 sm:$0xff]  }
 0x780   : > { %10834 = vmatmul.mubr.bf16.gmra.mrb[96].mxu1 %v24905_v57  ;;  %8904 = vmatprep.mubr.bf16.mxu0 %v24598_v13  ;;  %24906 = vst [vmem:[#allocation97_spill] sm:$0xff] %v23582_v29 }
 0x781   : > { %8877 = vmatpush1.bf16.msra.mxu0 %v23146_v27  ;;  %10876 = vmatprep.mubr.bf16.mxu1 %v24598_v13  ;;  %v23585_v27 = vld [vmem:[#allocation7 + $0xea4] ss:$16 sps:$4 sm:$0xff]  }
 0x782   : > { %10849 = vmatpush1.bf16.msra.mxu1 %v23562_v58  ;;  %8878 = vmatprep.subr.bf16.mxu0 %v23150_v8  ;;  %v23590_v8 = vld [vmem:[#allocation7 + $0xea0] ss:$16 sps:$4 sm:$0xff]  }
 0x783   : > { %10850 = vmatprep.subr.bf16.mxu1 %v23566_v36 }
 0x785   : > { %8879 = vmatpush1.bf16.msra.mxu0 %v23158_v55  ;;  %v23593_v55 = vld [vmem:[#allocation7 + $0xec4] ss:$16 sps:$4 sm:$0xff]  }
 0x786   : > { %10851 = vmatpush1.bf16.msra.mxu1 %v23574_v42  ;;  %8880 = vmatprep.subr.bf16.mxu0 %v23161_v32  ;;  %v23598_v32 = vld [vmem:[#allocation7 + $0xec0] ss:$16 sps:$4 sm:$0xff]  }
 0x787   : > { %10852 = vmatprep.subr.bf16.mxu1 %v23577_v33  ;;  %24907 = vst [vmem:[#allocation98_spill] sm:$0xff] %v23598_v32 }
 0x789   : > { %8881 = vmatpush1.bf16.msra.mxu0 %v23166_v40  ;;  %v23601_v40 = vld [vmem:[#allocation7 + $0xee4] ss:$16 sps:$4 sm:$0xff]  }
 0x78a   : > { %10853 = vmatpush1.bf16.msra.mxu1 %v23582_v29  ;;  %8882 = vmatprep.subr.bf16.mxu0 %v23169_v34  ;;  %24908 = vst [vmem:[#allocation99_spill] sm:$0xff] %v23601_v40  ;;  %v24909_v29 = vld [vmem:[#allocation106_spill] sm:$0xff] }
 0x78b   : > { %10854 = vmatprep.subr.bf16.mxu1 %v23585_v27  ;;  %v23606_v34 = vld [vmem:[#allocation7 + $0xee0] ss:$16 sps:$4 sm:$0xff]  }
 0x78d   : > { %8883 = vmatpush1.bf16.msra.mxu0 %v23174_v62  ;;  %v23609_v62 = vld [vmem:[#allocation7 + $0xc0c] ss:$16 sps:$4 sm:$0xff]  }
 0x78e   : > { %10855 = vmatpush1.bf16.msra.mxu1 %v23590_v8  ;;  %8884 = vmatprep.subr.bf16.mxu0 %v23177_v60  ;;  %v23614_v60 = vld [vmem:[#allocation7 + $0xc08] ss:$16 sps:$4 sm:$0xff]  }
 0x78f   : > { %10856 = vmatprep.subr.bf16.mxu1 %v23593_v55  ;;  %24910 = vst [vmem:[#allocation100_spill] sm:$0xff] %v23614_v60 }
 0x791   : > { %8885 = vmatpush1.bf16.msra.mxu0 %v24909_v29  ;;  %v23617_v29 = vld [vmem:[#allocation7 + $0xc2c] ss:$16 sps:$4 sm:$0xff]  }
 0x792   : > { %10857 = vmatpush1.bf16.msra.mxu1 %v23598_v32  ;;  %8886 = vmatprep.subr.bf16.mxu0 %v23185_v25  ;;  %24911 = vst [vmem:[#allocation101_spill] sm:$0xff] %v23617_v29  ;;  %v24912_v32 = vld [vmem:[#allocation57_spill] sm:$0xff]  ;;  %v24913_v25 = vld [vmem:[#allocation59_spill] sm:$0xff] }
 0x793   : > { %10858 = vmatprep.subr.bf16.mxu1 %v23601_v40  ;;  %v24914_v40 = vld [vmem:[#allocation107_spill] sm:$0xff] }
 0x795   : > { %8887 = vmatpush1.bf16.msra.mxu0 %v23190_v26  ;;  %v23624_v26 = vld [vmem:[#allocation7 + $0xc28] ss:$16 sps:$4 sm:$0xff]  }
 0x796   : > { %10859 = vmatpush1.bf16.msra.mxu1 %v23606_v34  ;;  %8925 = vmatprep.subr.bf16.mxu0 %v23193_v50  ;;  %v23628_v50 = vld [vmem:[#allocation7 + $0xc4c] ss:$16 sps:$4 sm:$0xff]  }
 0x797   : > { %10897 = vmatprep.subr.bf16.mxu1 %v23609_v62 }
 0x798   : > { %8905 = vmatmul.mubr.bf16.vlgmr.msra.gmra.mrb[64].mxu0 %v24912_v32 }
 0x799   : > { %10877 = vmatmul.mubr.bf16.vlgmr.msra.gmra.mrb[92].mxu1 %v24913_v25  ;;  %8926 = vmatpush1.bf16.msra.mxu0 %v23198_v43  ;;  %v23634_v43 = vld [vmem:[#allocation7 + $0xc48] ss:$16 sps:$4 sm:$0xff]  }
 0x79a   : > { %10898 = vmatpush1.bf16.msra.mxu1 %v23614_v60  ;;  %8927 = vmatprep.subr.bf16.mxu0 %v24914_v40  ;;  %v24915_v40 = vld [vmem:[#allocation34_spill] sm:$0xff]  ;;  %v23638_v60 = vld [vmem:[#allocation7 + $0xc6c] ss:$16 sps:$4 sm:$0xff]  }
 0x79b   : > { %10899 = vmatprep.subr.bf16.mxu1 %v23617_v29  ;;  %8914 = vmatprep.mubr.bf16.mxu0 %v24598_v13  ;;  %v24916_v29 = vld [vmem:[#allocation35_spill] sm:$0xff] }
 0x79c   : > { %10886 = vmatprep.mubr.bf16.mxu1 %v24598_v13 }
 0x79d   : > { %8928 = vmatpush1.bf16.msra.mxu0 %v23208_v23  ;;  %v23644_v23 = vld [vmem:[#allocation7 + $0xc68] ss:$16 sps:$4 sm:$0xff]  }
 0x79e   : > { %10900 = vmatpush1.bf16.msra.mxu1 %v23624_v26  ;;  %8929 = vmatprep.subr.bf16.mxu0 %v23212_v54  ;;  %v23648_v54 = vld [vmem:[#allocation7 + $0xc8c] ss:$16 sps:$4 sm:$0xff]  }
 0x79f   : > { %10901 = vmatprep.subr.bf16.mxu1 %v23628_v50 }
 0x7a0   : > { %8915 = vmatmul.mubr.bf16.gmra.mrb[68].mxu0 %v24915_v40 }
 0x7a1   : > { %10887 = vmatmul.mubr.bf16.gmra.mrb[96].mxu1 %v24916_v29  ;;  %8930 = vmatpush1.bf16.msra.mxu0 %v23218_v16  ;;  %v23654_v16 = vld [vmem:[#allocation7 + $0xc88] ss:$16 sps:$4 sm:$0xff]  }
 0x7a2   : > { %8957 = vmatprep.mubr.bf16.mxu0 %v24846_v10  ;;  %10902 = vmatpush1.bf16.msra.mxu1 %v23634_v43  ;;  %v23657_v10 = vld [vmem:[#allocation7 + $0xcac] ss:$16 sps:$4 sm:$0xff]  }
 0x7a3   : > { %10929 = vmatprep.mubr.bf16.mxu1 %v24848_v12  ;;  %8931 = vmatprep.subr.bf16.mxu0 %v23222_v35  ;;  %v23662_v35 = vld [vmem:[#allocation7 + $0xca8] ss:$16 sps:$4 sm:$0xff]   ;;  %v24921_v12 = vld [vmem:[#allocation108_spill] sm:$0xff] }
 0x7a4   : > { %10903 = vmatprep.subr.bf16.mxu1 %v23638_v60 }
 0x7a5   : > { %8932 = vmatpush1.bf16.msra.mxu0 %v23228_v30  ;;  %v23665_v30 = vld [vmem:[#allocation7 + $0xccc] ss:$16 sps:$4 sm:$0xff]  }
 0x7a6   : > { %10904 = vmatpush1.bf16.msra.mxu1 %v23644_v23  ;;  %8933 = vmatprep.subr.bf16.mxu0 %v23232_v41  ;;  %v23670_v41 = vld [vmem:[#allocation7 + $0xcc8] ss:$16 sps:$4 sm:$0xff]  }
 0x7a7   : > { %10905 = vmatprep.subr.bf16.mxu1 %v23648_v54 }
 0x7a9   : > { %8934 = vmatpush1.bf16.msra.mxu0 %v23238_v63  ;;  %v23673_v63 = vld [vmem:[#allocation7 + $0xcec] ss:$16 sps:$4 sm:$0xff]  }
 0x7aa   : > { %10906 = vmatpush1.bf16.msra.mxu1 %v23654_v16  ;;  %8935 = vmatprep.subr.bf16.mxu0 %v23241_v47  ;;  %v23678_v47 = vld [vmem:[#allocation7 + $0xce8] ss:$16 sps:$4 sm:$0xff]  }
 0x7ab   : > { %10907 = vmatprep.subr.bf16.mxu1 %v23657_v10 }
 0x7ad   : > { %8936 = vmatpush1.bf16.msra.mxu0 %v23246_v28  ;;  %v23681_v28 = vld [vmem:[#allocation7 + $0xd0c] ss:$16 sps:$4 sm:$0xff]  }
 0x7ae   : > { %10908 = vmatpush1.bf16.msra.mxu1 %v23662_v35  ;;  %8937 = vmatprep.subr.bf16.mxu0 %v23249_v20  ;;  %24917 = vst [vmem:[#allocation102_spill] sm:$0xff] %v23681_v28  ;;  %v23686_v20 = vld [vmem:[#allocation7 + $0xd08] ss:$16 sps:$4 sm:$0xff]  }
 0x7af   : > { %10909 = vmatprep.subr.bf16.mxu1 %v23665_v30 }
 0x7b1   : > { %8938 = vmatpush1.bf16.msra.mxu0 %v23254_v2  ;;  %v23689_v2 = vld [vmem:[#allocation7 + $0xd2c] ss:$16 sps:$4 sm:$0xff]  }
 0x7b2   : > { %10910 = vmatpush1.bf16.msra.mxu1 %v23670_v41  ;;  %8939 = vmatprep.subr.bf16.mxu0 %v23257_v4  ;;  %24918 = vst [vmem:[#allocation103_spill] sm:$0xff] %v23689_v2  ;;  %v23694_v4 = vld [vmem:[#allocation7 + $0xd28] ss:$16 sps:$4 sm:$0xff]  }
 0x7b3   : > { %10911 = vmatprep.subr.bf16.mxu1 %v23673_v63  ;;  %24919 = vst [vmem:[#allocation50_spill] sm:$0xff] %v23694_v4 }
 0x7b5   : > { %8940 = vmatpush1.bf16.msra.mxu0 %v23262_v44  ;;  %v23697_v44 = vld [vmem:[#allocation7 + $0xd4c] ss:$16 sps:$4 sm:$0xff]  }
 0x7b6   : > { %10912 = vmatpush1.bf16.msra.mxu1 %v23678_v47  ;;  %8941 = vmatprep.subr.bf16.mxu0 %v23265_v24  ;;  %24920 = vst [vmem:[#allocation51_spill] sm:$0xff] %v23697_v44  ;;  %v24922_v24 = vld [vmem:[#allocation109_spill] sm:$0xff] }
 0x7b7   : > { %10913 = vmatprep.subr.bf16.mxu1 %v23681_v28  ;;  %v23702_v28 = vld [vmem:[#allocation7 + $0xd48] ss:$16 sps:$4 sm:$0xff]  }
 0x7b9   : > { %8942 = vmatpush1.bf16.msra.mxu0 %v23270_v39  ;;  %v23705_v39 = vld [vmem:[#allocation7 + $0xd6c] ss:$16 sps:$4 sm:$0xff]  }
 0x7ba   : > { %10914 = vmatpush1.bf16.msra.mxu1 %v23686_v20  ;;  %8943 = vmatprep.subr.bf16.mxu0 %v23273_v11  ;;  %v24923_v11 = vld [vmem:[#allocation110_spill] sm:$0xff] }
 0x7bb   : > { %10915 = vmatprep.subr.bf16.mxu1 %v23689_v2  ;;  %v23710_v2 = vld [vmem:[#allocation7 + $0xd68] ss:$16 sps:$4 sm:$0xff]  }
 0x7bd   : > { %8944 = vmatpush1.bf16.msra.mxu0 %v24921_v12  ;;  %v23713_v12 = vld [vmem:[#allocation7 + $0xd8c] ss:$16 sps:$4 sm:$0xff]  }
 0x7be   : > { %10916 = vmatpush1.bf16.msra.mxu1 %v23694_v4  ;;  %8945 = vmatprep.subr.bf16.mxu0 %v24922_v24  ;;  %v24924_v4 = vld [vmem:[#allocation111_spill] sm:$0xff] }
 0x7bf   : > { %10917 = vmatprep.subr.bf16.mxu1 %v23697_v44  ;;  %v24925_v24 = vld [vmem:[#allocation55_spill] sm:$0xff] }
 0x7c0   : > { %v23718_v44 = vld [vmem:[#allocation7 + $0xd88] ss:$16 sps:$4 sm:$0xff]  }
 0x7c1   : > { %8946 = vmatpush1.bf16.msra.mxu0 %v23286_v59  ;;  %v23721_v59 = vld [vmem:[#allocation7 + $0xdac] ss:$16 sps:$4 sm:$0xff]  }
 0x7c2   : > { %10918 = vmatpush1.bf16.msra.mxu1 %v23702_v28  ;;  %8947 = vmatprep.subr.bf16.mxu0 %v24923_v11  ;;  %v23726_v11 = vld [vmem:[#allocation7 + $0xda8] ss:$16 sps:$4 sm:$0xff]  }
 0x7c3   : > { %10919 = vmatprep.subr.bf16.mxu1 %v23705_v39 }
 0x7c5   : > { %8948 = vmatpush1.bf16.msra.mxu0 %v24924_v4  ;;  %v23729_v4 = vld [vmem:[#allocation7 + $0xdcc] ss:$16 sps:$4 sm:$0xff]  }
 0x7c6   : > { %10920 = vmatpush1.bf16.msra.mxu1 %v23710_v2  ;;  %8949 = vmatprep.subr.bf16.mxu0 %v24925_v24  ;;  %v23734_v24 = vld [vmem:[#allocation7 + $0xdc8] ss:$16 sps:$4 sm:$0xff]  }
 0x7c7   : > { %10921 = vmatprep.subr.bf16.mxu1 %v23713_v12 }
 0x7c9   : > { %8950 = vmatpush1.bf16.msra.mxu0 %v23302_v9  ;;  %v23737_v9 = vld [vmem:[#allocation7 + $0xdec] ss:$16 sps:$4 sm:$0xff]  }
 0x7ca   : > { %10922 = vmatpush1.bf16.msra.mxu1 %v23718_v44  ;;  %8951 = vmatprep.subr.bf16.mxu0 %v23305_v17  ;;  %v23742_v17 = vld [vmem:[#allocation7 + $0xde8] ss:$16 sps:$4 sm:$0xff]  }
 0x7cb   : > { %10923 = vmatprep.subr.bf16.mxu1 %v23721_v59 }
 0x7cd   : > { %8952 = vmatpush1.bf16.msra.mxu0 %v23310_v46  ;;  %v23745_v46 = vld [vmem:[#allocation7 + $0xe0c] ss:$16 sps:$4 sm:$0xff]  }
 0x7ce   : > { %10924 = vmatpush1.bf16.msra.mxu1 %v23726_v11  ;;  %8953 = vmatprep.subr.bf16.mxu0 %v23313_v1  ;;  %v23750_v1 = vld [vmem:[#allocation7 + $0xe08] ss:$16 sps:$4 sm:$0xff]  }
 0x7cf   : > { %10925 = vmatprep.subr.bf16.mxu1 %v23729_v4 }
 0x7d1   : > { %8954 = vmatpush1.bf16.msra.mxu0 %v23318_v21  ;;  %v23754_v21 = vld [vmem:[#allocation7 + $0xe2c] ss:$16 sps:$4 sm:$0xff]  }
 0x7d2   : > { %10926 = vmatpush1.bf16.msra.mxu1 %v23734_v24  ;;  %8955 = vmatprep.subr.bf16.mxu0 %v23321_v18  ;;  %v23762_v18 = vld [vmem:[#allocation7 + $0xe28] ss:$16 sps:$4 sm:$0xff]  }
 0x7d3   : > { %10927 = vmatprep.subr.bf16.mxu1 %v23737_v9 }
 0x7d5   : > { %8956 = vmatpush1.bf16.msra.mxu0 %v23326_v45  ;;  %v23765_v45 = vld [vmem:[#allocation7 + $0xe4c] ss:$16 sps:$4 sm:$0xff]  }
 0x7d6   : > { %10928 = vmatpush1.bf16.msra.mxu1 %v23742_v17  ;;  %8978 = vmatprep.subr.bf16.mxu0 %v23329_v51  ;;  %v23770_v51 = vld [vmem:[#allocation7 + $0xe48] ss:$16 sps:$4 sm:$0xff]  }
 0x7d7   : > { %10950 = vmatprep.subr.bf16.mxu1 %v23745_v46 }
 0x7d8   : > { %8958 = vmatmul.mubr.bf16.vlgmr.msra.gmra.mrb[72].mxu0 %v24897_v56  ;;  %v23790_v56 = vld [vmem:[#allocation7 + $0xe88] ss:$16 sps:$4 sm:$0xff]  }
 0x7d9   : > { %10930 = vmatmul.mubr.bf16.vlgmr.msra.gmra.mrb[84].mxu1 %v24898_v14  ;;  %8967 = vmatprep.mubr.bf16.mxu0 %v24899_v15  ;;  %v24928_v15 = vld [vmem:[#allocation62_spill] sm:$0xff]  ;;  %v24929_v14 = vld [vmem:[#allocation63_spill] sm:$0xff] }
 0x7da   : > { %8979 = vmatpush1.bf16.msra.mxu0 %v23334_v37  ;;  %10939 = vmatprep.mubr.bf16.mxu1 %v24901_v5  ;;  %v23774_v37 = vld [vmem:[#allocation7 + $0xe6c] ss:$16 sps:$4 sm:$0xff]  }
 0x7db   : > { %10951 = vmatpush1.bf16.msra.mxu1 %v23750_v1  ;;  %8980 = vmatprep.subr.bf16.mxu0 %v23338_v52  ;;  %v24926_v52 = vld [vmem:[#allocation112_spill] sm:$0xff]  ;;  %v24927_v5 = vld [vmem:[#allocation113_spill] sm:$0xff] }
 0x7dc   : > { %10952 = vmatprep.subr.bf16.mxu1 %v23754_v21 }
 0x7de   : > { %8981 = vmatpush1.bf16.msra.mxu0 %v23346_v0  ;;  %v23782_v0 = vld [vmem:[#allocation7 + $0xe68] ss:$16 sps:$4 sm:$0xff]  }
 0x7df   : > { %10953 = vmatpush1.bf16.msra.mxu1 %v23762_v18  ;;  %8982 = vmatprep.subr.bf16.mxu0 %v23349_v3  ;;  %v23785_v3 = vld [vmem:[#allocation7 + $0xe8c] ss:$16 sps:$4 sm:$0xff]  }
 0x7e0   : > { %8968 = vmatmul.mubr.bf16.gmra.mrb[76].mxu0 %v24904_v38  ;;  %10954 = vmatprep.subr.bf16.mxu1 %v23765_v45  ;;  %v23798_v38 = vld [vmem:[#allocation7 + $0xea8] ss:$16 sps:$4 sm:$0xff]  }
 0x7e1   : > { %10940 = vmatmul.mubr.bf16.gmra.mrb[88].mxu1 %v24905_v57  ;;  %9010 = vmatprep.mubr.bf16.mxu0 %v24598_v13  ;;  %v23801_v57 = vld [vmem:[#allocation7 + $0xecc] ss:$16 sps:$4 sm:$0xff]  }
 0x7e2   : > { %8983 = vmatpush1.bf16.msra.mxu0 %v23354_v48  ;;  %10982 = vmatprep.mubr.bf16.mxu1 %v24598_v13  ;;  %v23793_v48 = vld [vmem:[#allocation7 + $0xeac] ss:$16 sps:$4 sm:$0xff]  }
 0x7e3   : > { %10955 = vmatpush1.bf16.msra.mxu1 %v23770_v51  ;;  %8984 = vmatprep.subr.bf16.mxu0 %v24926_v52  ;;  %v24930_v52 = vld [vmem:[#allocation54_spill] sm:$0xff] }
 0x7e4   : > { %10956 = vmatprep.subr.bf16.mxu1 %v23774_v37 }
 0x7e6   : > { %8985 = vmatpush1.bf16.msra.mxu0 %v24927_v5  ;;  %v23806_v5 = vld [vmem:[#allocation7 + $0xec8] ss:$16 sps:$4 sm:$0xff]  }
 0x7e7   : > { %10957 = vmatpush1.bf16.msra.mxu1 %v23782_v0  ;;  %8986 = vmatprep.subr.bf16.mxu0 %v24928_v15  ;;  %v24932_v15 = vld [vmem:[#allocation65_spill] sm:$0xff] }
 0x7e8   : > { %10958 = vmatprep.subr.bf16.mxu1 %v23785_v3 }
 0x7ea   : > { %8987 = vmatpush1.bf16.msra.mxu0 %v23374_v61  ;;  %v23809_v61 = vld [vmem:[#allocation7 + $0xeec] ss:$16 sps:$4 sm:$0xff]  }
 0x7eb   : > { %10959 = vmatpush1.bf16.msra.mxu1 %v23790_v56  ;;  %8988 = vmatprep.subr.bf16.mxu0 %v24929_v14  ;;  %24931 = vst [vmem:[#allocation60_spill] sm:$0xff] %v23809_v61  ;;  %v23814_v14 = vld [vmem:[#allocation7 + $0xee8] ss:$16 sps:$4 sm:$0xff]  }
 0x7ec   : > { %10960 = vmatprep.subr.bf16.mxu1 %v23793_v48  ;;  %24933 = vst [vmem:[#allocation104_spill] sm:$0xff] %v23814_v14 }
 0x7ee   : > { %8989 = vmatpush1.bf16.msra.mxu0 %v23382_v22  ;;  %v24934_v22 = vld [vmem:[#allocation66_spill] sm:$0xff] }
 0x7ef   : > { %10961 = vmatpush1.bf16.msra.mxu1 %v23798_v38  ;;  %8990 = vmatprep.subr.bf16.mxu0 %v24930_v52  ;;  %v24935_v52 = vld [vmem:[#allocation67_spill] sm:$0xff] }
 0x7f0   : > { %10962 = vmatprep.subr.bf16.mxu1 %v23801_v57 }
 0x7f2   : > { %8991 = vmatpush1.bf16.msra.mxu0 %v23390_v19  ;;  %v24936_v19 = vld [vmem:[#allocation68_spill] sm:$0xff] }
 0x7f3   : > { %10963 = vmatpush1.bf16.msra.mxu1 %v23806_v5  ;;  %8992 = vmatprep.subr.bf16.mxu0 %v24932_v15  ;;  %v24937_v15 = vld [vmem:[#allocation69_spill] sm:$0xff] }
 0x7f4   : > { %10964 = vmatprep.subr.bf16.mxu1 %v23809_v61  ;;  %v24938_v61 = vld [vmem:[#allocation70_spill] sm:$0xff] }
 0x7f6   : > { %8993 = vmatpush1.bf16.msra.mxu0 %v23398_v31  ;;  %v24939_v31 = vld [vmem:[#allocation71_spill] sm:$0xff] }
 0x7f7   : > { %10965 = vmatpush1.bf16.msra.mxu1 %v23814_v14  ;;  %9627 = vmatprep.subr.bf16.mxu0 %v24934_v22  ;;  %v24942_v22 = vld [vmem:[#allocation73_spill] sm:$0xff]  ;;  %v24950_v14 = vld [vmem:[#allocation56_spill] sm:$0xff] }
 0x7f9   : > { %9011 = vmatmul.mubr.bf16.vlgmr.msra.gmra.mrb[72].mxu0 %v24912_v32  ;;  %v24940_v32 = vld [vmem:[#allocation39_spill] sm:$0xff] }
 0x7fa   : > { %10983 = vmatmul.mubr.bf16.vlgmr.msra.gmra.mrb[84].mxu1 %v24913_v25  ;;  %9628 = vmatpush1.bf16.msra.mxu0 %v24935_v52  ;;  %v24941_v25 = vld [vmem:[#allocation72_spill] sm:$0xff]  ;;  %v24943_v52 = vld [vmem:[#allocation74_spill] sm:$0xff] }
 0x7fb   : > { %9629 = vmatprep.subr.bf16.mxu0 %v24936_v19  ;;  %9020 = vmatprep.mubr.bf16.mxu0 %v24598_v13  ;;  %v24944_v19 = vld [vmem:[#allocation75_spill] sm:$0xff] }
 0x7fc   : > { %10992 = vmatprep.mubr.bf16.mxu1 %v24598_v13 }
 0x7fe   : > { %9630 = vmatpush1.bf16.msra.mxu0 %v24937_v15  ;;  %v24945_v15 = vld [vmem:[#allocation76_spill] sm:$0xff] }
 0x7ff   : > { %9631 = vmatprep.subr.bf16.mxu0 %v24938_v61  ;;  %v24946_v61 = vld [vmem:[#allocation77_spill] sm:$0xff] }
 0x801   : > { %9021 = vmatmul.mubr.bf16.gmra.mrb[76].mxu0 %v24915_v40  ;;  %v24947_v40 = vld [vmem:[#allocation78_spill] sm:$0xff] }
 0x802   : > { %10993 = vmatmul.mubr.bf16.gmra.mrb[88].mxu1 %v24916_v29  ;;  %9632 = vmatpush1.bf16.msra.mxu0 %v24939_v31  ;;  %v24948_v29 = vld [vmem:[#allocation79_spill] sm:$0xff]  ;;  %v24949_v31 = vld [vmem:[#allocation80_spill] sm:$0xff] }
 0x803   : > { %9659 = vmatprep.mubr.bf16.mxu0 %v24940_v32  ;;  %9633 = vmatprep.subr.bf16.mxu0 %v23430_v53  ;;  %v24951_v53 = vld [vmem:[#allocation58_spill] sm:$0xff] }
 0x806   : > { %9634 = vmatpush1.bf16.msra.mxu0 %v24941_v25  ;;  %v24952_v25 = vld [vmem:[#allocation81_spill] sm:$0xff] }
 0x807   : > { %9635 = vmatprep.subr.bf16.mxu0 %v24942_v22  ;;  %v24953_v22 = vld [vmem:[#allocation82_spill] sm:$0xff] }
 0x80a   : > { %9636 = vmatpush1.bf16.msra.mxu0 %v24943_v52  ;;  %v24954_v52 = vld [vmem:[#allocation83_spill] sm:$0xff] }
 0x80b   : > { %9637 = vmatprep.subr.bf16.mxu0 %v24944_v19  ;;  %v24955_v19 = vld [vmem:[#allocation84_spill] sm:$0xff] }
 0x80e   : > { %9638 = vmatpush1.bf16.msra.mxu0 %v24945_v15  ;;  %v24956_v15 = vld [vmem:[#allocation85_spill] sm:$0xff] }
 0x80f   : > { %9639 = vmatprep.subr.bf16.mxu0 %v24946_v61  ;;  %v24957_v61 = vld [vmem:[#allocation86_spill] sm:$0xff] }
 0x812   : > { %9640 = vmatpush1.bf16.msra.mxu0 %v24947_v40  ;;  %v24958_v40 = vld [vmem:[#allocation87_spill] sm:$0xff] }
 0x813   : > { %9641 = vmatprep.subr.bf16.mxu0 %v24948_v29  ;;  %v24959_v29 = vld [vmem:[#allocation88_spill] sm:$0xff] }
 0x816   : > { %9642 = vmatpush1.bf16.msra.mxu0 %v24949_v31  ;;  %v24961_v31 = vld [vmem:[#allocation90_spill] sm:$0xff] }
 0x817   : > { %9643 = vmatprep.subr.bf16.mxu0 %v24950_v14  ;;  %v24960_v14 = vld [vmem:[#allocation89_spill] sm:$0xff] }
 0x81a   : > { %9644 = vmatpush1.bf16.msra.mxu0 %v24951_v53  ;;  %v24962_v53 = vld [vmem:[#allocation91_spill] sm:$0xff] }
 0x81b   : > { %9645 = vmatprep.subr.bf16.mxu0 %v24952_v25  ;;  %v24963_v25 = vld [vmem:[#allocation92_spill] sm:$0xff] }
 0x81e   : > { %9646 = vmatpush1.bf16.msra.mxu0 %v24953_v22  ;;  %v24964_v22 = vld [vmem:[#allocation93_spill] sm:$0xff] }
 0x81f   : > { %9647 = vmatprep.subr.bf16.mxu0 %v24954_v52  ;;  %v24965_v52 = vld [vmem:[#allocation94_spill] sm:$0xff] }
 0x822   : > { %9648 = vmatpush1.bf16.msra.mxu0 %v24955_v19  ;;  %v24967_v19 = vld [vmem:[#allocation33_spill] sm:$0xff] }
 0x823   : > { %9649 = vmatprep.subr.bf16.mxu0 %v23497_v7  ;;  %v24966_v7 = vld [vmem:[#allocation42_spill] sm:$0xff] }
 0x826   : > { %9650 = vmatpush1.bf16.msra.mxu0 %v24956_v15  ;;  %v24968_v15 = vld [vmem:[#allocation95_spill] sm:$0xff] }
 0x827   : > { %9651 = vmatprep.subr.bf16.mxu0 %v24957_v61  ;;  %v24969_v61 = vld [vmem:[#allocation96_spill] sm:$0xff] }
 0x82a   : > { %9652 = vmatpush1.bf16.msra.mxu0 %v24958_v40  ;;  %v24970_v40 = vld [vmem:[#allocation44_spill] sm:$0xff] }
 0x82b   : > { %9653 = vmatprep.subr.bf16.mxu0 %v24959_v29  ;;  %v24971_v29 = vld [vmem:[#allocation97_spill] sm:$0xff] }
 0x82e   : > { %9654 = vmatpush1.bf16.msra.mxu0 %v24960_v14  ;;  %v19996_v14 = vld [vmem:[#allocation7 + $0x464] ss:$16 sps:$4 sm:$0xff]  }
 0x82f   : > { %9655 = vmatprep.subr.bf16.mxu0 %v24961_v31  ;;  %v19997_v31 = vld [vmem:[#allocation7 + $0x460] ss:$16 sps:$4 sm:$0xff]  }
 0x832   : > { %9656 = vmatpush1.bf16.msra.mxu0 %v24962_v53  ;;  %v19998_v53 = vld [vmem:[#allocation7 + $0x484] ss:$16 sps:$4 sm:$0xff]  }
 0x833   : > { %9657 = vmatprep.subr.bf16.mxu0 %v24963_v25  ;;  %v19999_v25 = vld [vmem:[#allocation7 + $0x480] ss:$16 sps:$4 sm:$0xff]  }
 0x836   : > { %9658 = vmatpush1.bf16.msra.mxu0 %v24964_v22  ;;  %v20000_v22 = vld [vmem:[#allocation7 + $0x4a4] ss:$16 sps:$4 sm:$0xff]  }
 0x837   : > { %9680 = vmatprep.subr.bf16.mxu0 %v24965_v52  ;;  %v20001_v52 = vld [vmem:[#allocation7 + $0x4a0] ss:$16 sps:$4 sm:$0xff]  }
 0x839   : > { %9660 = vmatmul.mubr.bf16.vlgmr.msra.gmra.mrb[64].mxu0 %v24966_v7 }
 0x83a   : > { %9669 = vmatprep.mubr.bf16.mxu0 %v24967_v19  ;;  %9681 = vmatpush1.bf16.msra.mxu0 %v24968_v15  ;;  %v20004_v15 = vld [vmem:[#allocation7 + $0x4e4] ss:$16 sps:$4 sm:$0xff]  }
 0x83b   : > { %9682 = vmatprep.subr.bf16.mxu0 %v23546_v6  ;;  %v24972_v6 = vld [vmem:[#allocation98_spill] sm:$0xff] }
 0x83e   : > { %9683 = vmatpush1.bf16.msra.mxu0 %v23554_v49  ;;  %v24973_v49 = vld [vmem:[#allocation99_spill] sm:$0xff] }
 0x83f   : > { %9684 = vmatprep.subr.bf16.mxu0 %v24969_v61  ;;  %v20005_v61 = vld [vmem:[#allocation7 + $0x4e0] ss:$16 sps:$4 sm:$0xff]  }
 0x841   : > { %9670 = vmatmul.mubr.bf16.gmra.mrb[68].mxu0 %v24970_v40 }
 0x842   : > { %9685 = vmatpush1.bf16.msra.mxu0 %v23562_v58  ;;  %9712 = vmatprep.mubr.bf16.mxu0 %v24598_v13  ;;  %v24974_v58 = vld [vmem:[#allocation46_spill] sm:$0xff] }
 0x843   : > { %9686 = vmatprep.subr.bf16.mxu0 %v23566_v36  ;;  %v24975_v36 = vld [vmem:[#allocation100_spill] sm:$0xff] }
 0x846   : > { %9687 = vmatpush1.bf16.msra.mxu0 %v23574_v42  ;;  %v24976_v42 = vld [vmem:[#allocation101_spill] sm:$0xff] }
 0x847   : > { %9688 = vmatprep.subr.bf16.mxu0 %v23577_v33  ;;  %v24977_v33 = vld [vmem:[#allocation40_spill] sm:$0xff] }
 0x84a   : > { %9689 = vmatpush1.bf16.msra.mxu0 %v24971_v29  ;;  %v24985_v29 = vld [vmem:[#allocation41_spill] sm:$0xff] }
 0x84b   : > { %9690 = vmatprep.subr.bf16.mxu0 %v23585_v27 }
 0x84e   : > { %9691 = vmatpush1.bf16.msra.mxu0 %v23590_v8 }
 0x84f   : > { %9692 = vmatprep.subr.bf16.mxu0 %v23593_v55 }
 0x852   : > { %9693 = vmatpush1.bf16.msra.mxu0 %v24972_v6  ;;  %v24986_v6 = vld [vmem:[#allocation47_spill] sm:$0xff] }
 0x853   : > { %9694 = vmatprep.subr.bf16.mxu0 %v24973_v49  ;;  %v20007_v49 = vld [vmem:[#allocation7 + $0x500] ss:$16 sps:$4 sm:$0xff]  }
 0x856   : > { %9695 = vmatpush1.bf16.msra.mxu0 %v23606_v34 }
 0x857   : > { %9733 = vmatprep.subr.bf16.mxu0 %v23609_v62 }
 0x859   : > { %9713 = vmatmul.mubr.bf16.vlgmr.msra.gmra.mrb[64].mxu0 %v24974_v58 }
 0x85a   : > { %9734 = vmatpush1.bf16.msra.mxu0 %v24975_v36  ;;  %9722 = vmatprep.mubr.bf16.mxu0 %v24598_v13  ;;  %v20009_v36 = vld [vmem:[#allocation7 + $0x520] ss:$16 sps:$4 sm:$0xff]  }
 0x85b   : > { %9735 = vmatprep.subr.bf16.mxu0 %v24976_v42  ;;  %v20010_v42 = vld [vmem:[#allocation7 + $0x544] ss:$16 sps:$4 sm:$0xff]  }
 0x85e   : > { %9736 = vmatpush1.bf16.msra.mxu0 %v23624_v26 }
 0x85f   : > { %9737 = vmatprep.subr.bf16.mxu0 %v23628_v50 }
 0x861   : > { %9723 = vmatmul.mubr.bf16.gmra.mrb[68].mxu0 %v24977_v33 }
 0x862   : > { %9738 = vmatpush1.bf16.msra.mxu0 %v23634_v43  ;;  %9765 = vmatprep.mubr.bf16.mxu0 %v24940_v32  ;;  %v24978_v43 = vld [vmem:[#allocation102_spill] sm:$0xff] }
 0x863   : > { %9739 = vmatprep.subr.bf16.mxu0 %v23638_v60  ;;  %v19995_v32 = vld [vmem:[#allocation7 + $0x440] ss:$16 sps:$4 sm:$0xff]  }
 0x866   : > { %9740 = vmatpush1.bf16.msra.mxu0 %v23644_v23  ;;  %v24979_v23 = vld [vmem:[#allocation103_spill] sm:$0xff] }
 0x867   : > { %9741 = vmatprep.subr.bf16.mxu0 %v23648_v54  ;;  %v24980_v54 = vld [vmem:[#allocation50_spill] sm:$0xff] }
 0x86a   : > { %9742 = vmatpush1.bf16.msra.mxu0 %v23654_v16  ;;  %v24981_v16 = vld [vmem:[#allocation51_spill] sm:$0xff] }
 0x86b   : > { %9743 = vmatprep.subr.bf16.mxu0 %v23657_v10  ;;  %v24982_v10 = vld [vmem:[#allocation60_spill] sm:$0xff] }
 0x86c   : > { %v23893_v27 = vpop.f32.mrb[92].mxu1 }
 0x86d   : > { %v23895_v8 = vpop.f32.mrb[93].mxu1 }
 0x86e   : > { %9744 = vmatpush1.bf16.msra.mxu0 %v23662_v35  ;;  %v23898_v55 = vpop.f32.mrb[94].mxu1  ;;  %v24983_v35 = vld [vmem:[#allocation104_spill] sm:$0xff] }
 0x86f   : > { %v23900_v34 = vpop.f32.mrb[95].mxu1  ;;  %9745 = vmatprep.subr.bf16.mxu0 %v23665_v30  ;;  %v19974_v30 = vld [vmem:[#allocation7 + $0x304] ss:$16 sps:$4 sm:$0xff]  }
 0x872   : > { %9746 = vmatpush1.bf16.msra.mxu0 %v23670_v41  ;;  %v19975_v41 = vld [vmem:[#allocation7 + $0x300] ss:$16 sps:$4 sm:$0xff]  }
 0x873   : > { %9747 = vmatprep.subr.bf16.mxu0 %v23673_v63  ;;  %v19976_v63 = vld [vmem:[#allocation7 + $0x324] ss:$16 sps:$4 sm:$0xff]  }
 0x874   : > { %v23905_v62 = vpop.f32.mrb[96].mxu1 }
 0x875   : > { %v23907_v60 = vpop.f32.mrb[97].mxu1 }
 0x876   : > { %9748 = vmatpush1.bf16.msra.mxu0 %v23678_v47  ;;  %v23910_v26 = vpop.f32.mrb[98].mxu1  ;;  %v19977_v47 = vld [vmem:[#allocation7 + $0x320] ss:$16 sps:$4 sm:$0xff]  }
 0x877   : > { %v23912_v50 = vpop.f32.mrb[99].mxu1  ;;  %9749 = vmatprep.subr.bf16.mxu0 %v24978_v43  ;;  %v20011_v43 = vld [vmem:[#allocation7 + $0x540] ss:$16 sps:$4 sm:$0xff]  }
 0x87a   : > { %9750 = vmatpush1.bf16.msra.mxu0 %v23686_v20  ;;  %v19979_v20 = vld [vmem:[#allocation7 + $0x340] ss:$16 sps:$4 sm:$0xff]  }
 0x87b   : > { %9751 = vmatprep.subr.bf16.mxu0 %v24979_v23  ;;  %v20012_v23 = vld [vmem:[#allocation7 + $0x564] ss:$16 sps:$4 sm:$0xff]  }
 0x87e   : > { %9752 = vmatpush1.bf16.msra.mxu0 %v24980_v54  ;;  %v20013_v54 = vld [vmem:[#allocation7 + $0x560] ss:$16 sps:$4 sm:$0xff]  }
 0x87f   : > { %9753 = vmatprep.subr.bf16.mxu0 %v24981_v16  ;;  %v20014_v16 = vld [vmem:[#allocation7 + $0x584] ss:$16 sps:$4 sm:$0xff]  }
 0x882   : > { %9754 = vmatpush1.bf16.msra.mxu0 %v23702_v28  ;;  %v19978_v28 = vld [vmem:[#allocation7 + $0x344] ss:$16 sps:$4 sm:$0xff]  }
 0x883   : > { %9755 = vmatprep.subr.bf16.mxu0 %v23705_v39  ;;  %v19981_v39 = vld [vmem:[#allocation7 + $0x360] ss:$16 sps:$4 sm:$0xff]  }
 0x886   : > { %9756 = vmatpush1.bf16.msra.mxu0 %v23710_v2  ;;  %v24984_v2 = vld [vmem:[#allocation38_spill] sm:$0xff] }
 0x887   : > { %9757 = vmatprep.subr.bf16.mxu0 %v23713_v12  ;;  %v19982_v12 = vld [vmem:[#allocation7 + $0x384] ss:$16 sps:$4 sm:$0xff]  }
 0x88a   : > { %9758 = vmatpush1.bf16.msra.mxu0 %v23718_v44  ;;  %v19980_v44 = vld [vmem:[#allocation7 + $0x364] ss:$16 sps:$4 sm:$0xff]  }
 0x88b   : > { %9759 = vmatprep.subr.bf16.mxu0 %v23721_v59  ;;  %v19983_v59 = vld [vmem:[#allocation7 + $0x380] ss:$16 sps:$4 sm:$0xff]  }
 0x88e   : > { %9760 = vmatpush1.bf16.msra.mxu0 %v23726_v11  ;;  %v19984_v11 = vld [vmem:[#allocation7 + $0x3a4] ss:$16 sps:$4 sm:$0xff]  }
 0x88f   : > { %9761 = vmatprep.subr.bf16.mxu0 %v23729_v4 }
 0x892   : > { %9762 = vmatpush1.bf16.msra.mxu0 %v23734_v24 }
 0x893   : > { %9763 = vmatprep.subr.bf16.mxu0 %v23737_v9  ;;  %v19985_v9 = vld [vmem:[#allocation7 + $0x3a0] ss:$16 sps:$4 sm:$0xff]  }
 0x896   : > { %9764 = vmatpush1.bf16.msra.mxu0 %v23742_v17 }
 0x897   : > { %9786 = vmatprep.subr.bf16.mxu0 %v23745_v46  ;;  %v19986_v46 = vld [vmem:[#allocation7 + $0x3c4] ss:$16 sps:$4 sm:$0xff]  }
 0x899   : > { %9766 = vmatmul.mubr.bf16.vlgmr.msra.gmra.mrb[72].mxu0 %v24966_v7  ;;  %v20002_v7 = vld [vmem:[#allocation7 + $0x4c4] ss:$16 sps:$4 sm:$0xff]  }
 0x89a   : > { %9775 = vmatprep.mubr.bf16.mxu0 %v24967_v19  ;;  %9787 = vmatpush1.bf16.msra.mxu0 %v23750_v1  ;;  %v20003_v19 = vld [vmem:[#allocation7 + $0x4c0] ss:$16 sps:$4 sm:$0xff]  }
 0x89b   : > { %9788 = vmatprep.subr.bf16.mxu0 %v23754_v21  ;;  %v19987_v21 = vld [vmem:[#allocation7 + $0x3c0] ss:$16 sps:$4 sm:$0xff]  }
 0x89e   : > { %9789 = vmatpush1.bf16.msra.mxu0 %v23762_v18  ;;  %v19988_v18 = vld [vmem:[#allocation7 + $0x3e4] ss:$16 sps:$4 sm:$0xff]  }
 0x89f   : > { %9790 = vmatprep.subr.bf16.mxu0 %v23765_v45 }
 0x8a1   : > { %9776 = vmatmul.mubr.bf16.gmra.mrb[76].mxu0 %v24970_v40  ;;  %v20006_v40 = vld [vmem:[#allocation7 + $0x504] ss:$16 sps:$4 sm:$0xff]  }
 0x8a2   : > { %9791 = vmatpush1.bf16.msra.mxu0 %v23770_v51  ;;  %9818 = vmatprep.mubr.bf16.mxu0 %v24598_v13 }
 0x8a3   : > { %9792 = vmatprep.subr.bf16.mxu0 %v23774_v37  ;;  %v19989_v37 = vld [vmem:[#allocation7 + $0x3e0] ss:$16 sps:$4 sm:$0xff]  }
 0x8a6   : > { %9793 = vmatpush1.bf16.msra.mxu0 %v23782_v0 }
 0x8a7   : > { %9794 = vmatprep.subr.bf16.mxu0 %v23785_v3  ;;  %v19990_v3 = vld [vmem:[#allocation7 + $0x404] ss:$16 sps:$4 sm:$0xff]  }
 0x8aa   : > { %9795 = vmatpush1.bf16.msra.mxu0 %v23790_v56 }
 0x8ab   : > { %9796 = vmatprep.subr.bf16.mxu0 %v23793_v48  ;;  %v19991_v48 = vld [vmem:[#allocation7 + $0x400] ss:$16 sps:$4 sm:$0xff]  }
 0x8ae   : > { %9797 = vmatpush1.bf16.msra.mxu0 %v23798_v38  ;;  %v19992_v38 = vld [vmem:[#allocation7 + $0x424] ss:$16 sps:$4 sm:$0xff]  }
 0x8af   : > { %9798 = vmatprep.subr.bf16.mxu0 %v23801_v57  ;;  %v19993_v57 = vld [vmem:[#allocation7 + $0x420] ss:$16 sps:$4 sm:$0xff]  }
 0x8b2   : > { %9799 = vmatpush1.bf16.msra.mxu0 %v23806_v5  ;;  %v19994_v5 = vld [vmem:[#allocation7 + $0x444] ss:$16 sps:$4 sm:$0xff]  }
 0x8b3   : > { %9800 = vmatprep.subr.bf16.mxu0 %v24982_v10  ;;  %v20015_v10 = vld [vmem:[#allocation7 + $0x580] ss:$16 sps:$4 sm:$0xff]  }
 0x8b6   : > { %9801 = vmatpush1.bf16.msra.mxu0 %v24983_v35  ;;  %v20016_v35 = vld [vmem:[#allocation7 + $0x5a4] ss:$16 sps:$4 sm:$0xff]  }
 0x8b7   : > { %9908 = vmatprep.subr.bf16.mxu0 %v19974_v30  ;;  %v20017_v30 = vld [vmem:[#allocation7 + $0x5a0] ss:$16 sps:$4 sm:$0xff]  }
 0x8b9   : > { %9819 = vmatmul.mubr.bf16.vlgmr.msra.gmra.mrb[72].mxu0 %v24974_v58  ;;  %v20008_v58 = vld [vmem:[#allocation7 + $0x524] ss:$16 sps:$4 sm:$0xff]  }
 0x8ba   : > { %9909 = vmatpush1.bf16.msra.mxu0 %v19975_v41  ;;  %9828 = vmatprep.mubr.bf16.mxu0 %v24598_v13  ;;  %v20018_v41 = vld [vmem:[#allocation7 + $0x5c4] ss:$16 sps:$4 sm:$0xff]  }
 0x8bb   : > { %9910 = vmatprep.subr.bf16.mxu0 %v19976_v63  ;;  %v20019_v63 = vld [vmem:[#allocation7 + $0x5c0] ss:$16 sps:$4 sm:$0xff]  }
 0x8be   : > { %9911 = vmatpush1.bf16.msra.mxu0 %v19977_v47  ;;  %v20020_v47 = vld [vmem:[#allocation7 + $0x5e4] ss:$16 sps:$4 sm:$0xff]  }
 0x8bf   : > { %9912 = vmatprep.subr.bf16.mxu0 %v19978_v28  ;;  %v20021_v28 = vld [vmem:[#allocation7 + $0x5e0] ss:$16 sps:$4 sm:$0xff]  }
 0x8c1   : > { %9829 = vmatmul.mubr.bf16.gmra.mrb[76].mxu0 %v24977_v33  ;;  %v24987_v33 = vld [vmem:[#allocation43_spill] sm:$0xff] }
 0x8c2   : > { %9913 = vmatpush1.bf16.msra.mxu0 %v19979_v20  ;;  %9940 = vmatprep.mubr.bf16.mxu0 %v24984_v2  ;;  %v24988_v20 = vld [vmem:[#allocation45_spill] sm:$0xff] }
 0x8c3   : > { %9914 = vmatprep.subr.bf16.mxu0 %v19980_v44  ;;  %v11077_v2 = vld [vmem:[#allocation10] sm:$0xff] }
 0x8c4   : > { %v11081_v44 = vld [vmem:[#allocation10 + $0x20] sm:$0xff] }
 0x8c6   : > { %9915 = vmatpush1.bf16.msra.mxu0 %v19981_v39  ;;  %v11207_v39 = vld [vmem:[#allocation10 + $0x400] sm:$0xff] }
 0x8c7   : > { %9916 = vmatprep.subr.bf16.mxu0 %v19982_v12  ;;  %v17188_v12 = vcombine.low %v11077_v2, %v11081_v44 }
 0x8ca   : > { %9917 = vmatpush1.bf16.msra.mxu0 %v19983_v59  ;;  %v17189_v59 = vcombine.high %v11077_v2, %v11081_v44  ;;  %v11125_v44 = vld [vmem:[#allocation10 + $0x180] sm:$0xff] }
 0x8cb   : > { %9918 = vmatprep.subr.bf16.mxu0 %v19984_v11  ;;  %v11211_v11 = vld [vmem:[#allocation10 + $0x420] sm:$0xff] }
 0x8cc   : > { %12779 = vmatprep.subr.bf16.mxu1 %v17189_v59 }
 0x8cd   : > { %v23954_v4 = vpop.f32.mrb[84].mxu1  ;;  %12780 = vmatpush1.bf16.msra.mxu1 %v17188_v12 }
 0x8ce   : > { %v23956_v24 = vpop.f32.mrb[85].mxu1  ;;  %9919 = vmatpush1.bf16.msra.mxu0 %v19985_v9  ;;  %v11085_v9 = vld [vmem:[#allocation10 + $0x40] sm:$0xff] }
 0x8cf   : > { %v23958_v17 = vpop.f32.mrb[86].mxu1  ;;  %9920 = vmatprep.subr.bf16.mxu0 %v19986_v46  ;;  %v11089_v46 = vld [vmem:[#allocation10 + $0x60] sm:$0xff] }
 0x8d0   : > { %v23960_v1 = vpop.f32.mrb[87].mxu1 }
 0x8d2   : > { %9921 = vmatpush1.bf16.msra.mxu0 %v19987_v21  ;;  %v17060_v21 = vcombine.low %v11207_v39, %v11211_v11 }
 0x8d3   : > { %9922 = vmatprep.subr.bf16.mxu0 %v19988_v18  ;;  %v17061_v18 = vcombine.high %v11207_v39, %v11211_v11  ;;  %v11129_v39 = vld [vmem:[#allocation10 + $0x1a0] sm:$0xff] }
 0x8d5   : > { %v23962_v45 = vpop.f32.mrb[88].mxu1 }
 0x8d6   : > { %v23964_v51 = vpop.f32.mrb[89].mxu1  ;;  %9923 = vmatpush1.bf16.msra.mxu0 %v19989_v37  ;;  %v17197_v37 = vcombine.high %v11085_v9, %v11089_v46 }
 0x8d7   : > { %v23966_v0 = vpop.f32.mrb[90].mxu1  ;;  %9924 = vmatprep.subr.bf16.mxu0 %v19990_v3  ;;  %v11215_v3 = vld [vmem:[#allocation10 + $0x440] sm:$0xff] }
 0x8d8   : > { %v23968_v56 = vpop.f32.mrb[91].mxu1  ;;  %12781 = vmatprep.subr.bf16.mxu1 %v17197_v37  ;;  %v11133_v37 = vld [vmem:[#allocation10 + $0x1c0] sm:$0xff] }
 0x8da   : > { %9925 = vmatpush1.bf16.msra.mxu0 %v19991_v48  ;;  %v11219_v48 = vld [vmem:[#allocation10 + $0x460] sm:$0xff] }
 0x8db   : > { %9926 = vmatprep.subr.bf16.mxu0 %v19992_v38  ;;  %v11093_v38 = vld [vmem:[#allocation10 + $0x80] sm:$0xff] }
 0x8de   : > { %9927 = vmatpush1.bf16.msra.mxu0 %v19993_v57  ;;  %v17069_v57 = vcombine.high %v11215_v3, %v11219_v48 }
 0x8df   : > { %9928 = vmatprep.subr.bf16.mxu0 %v19994_v5  ;;  %v11097_v5 = vld [vmem:[#allocation10 + $0xa0] sm:$0xff] }
 0x8e2   : > { %9929 = vmatpush1.bf16.msra.mxu0 %v19995_v32  ;;  %v11223_v32 = vld [vmem:[#allocation10 + $0x480] sm:$0xff] }
 0x8e3   : > { %9930 = vmatprep.subr.bf16.mxu0 %v19996_v14  ;;  %v11227_v14 = vld [vmem:[#allocation10 + $0x4a0] sm:$0xff] }
 0x8e6   : > { %9931 = vmatpush1.bf16.msra.mxu0 %v19997_v31  ;;  %v24989_v31 = vld [vmem:[#allocation48_spill] sm:$0xff] }
 0x8e7   : > { %9932 = vmatprep.subr.bf16.mxu0 %v19998_v53  ;;  %v17205_v53 = vcombine.high %v11093_v38, %v11097_v5 }
 0x8ea   : > { %9933 = vmatpush1.bf16.msra.mxu0 %v19999_v25  ;;  %v17068_v25 = vcombine.low %v11215_v3, %v11219_v48  ;;  %v11137_v3 = vld [vmem:[#allocation10 + $0x1e0] sm:$0xff] }
 0x8eb   : > { %9934 = vmatprep.subr.bf16.mxu0 %v20000_v22  ;;  %v11101_v22 = vld [vmem:[#allocation10 + $0xc0] sm:$0xff] }
 0x8ee   : > { %9935 = vmatpush1.bf16.msra.mxu0 %v20001_v52  ;;  %v11105_v52 = vld [vmem:[#allocation10 + $0xe0] sm:$0xff] }
 0x8ef   : > { %9936 = vmatprep.subr.bf16.mxu0 %v20002_v7  ;;  %v17077_v7 = vcombine.high %v11223_v32, %v11227_v14 }
 0x8f2   : > { %9937 = vmatpush1.bf16.msra.mxu0 %v20003_v19  ;;  %v17204_v19 = vcombine.low %v11093_v38, %v11097_v5  ;;  %v11263_v5 = vld [vmem:[#allocation10 + $0x5c0] sm:$0xff] }
 0x8f3   : > { %9938 = vmatprep.subr.bf16.mxu0 %v20004_v15  ;;  %v11231_v15 = vld [vmem:[#allocation10 + $0x4c0] sm:$0xff] }
 0x8f6   : > { %9939 = vmatpush1.bf16.msra.mxu0 %v20005_v61  ;;  %v11235_v61 = vld [vmem:[#allocation10 + $0x4e0] sm:$0xff] }
 0x8f7   : > { %9961 = vmatprep.subr.bf16.mxu0 %v20006_v40  ;;  %v17213_v40 = vcombine.high %v11101_v22, %v11105_v52 }
 0x8f9   : > { %9941 = vmatmul.mubr.bf16.vlgmr.msra.gmra.mrb[80].mxu0 %v24985_v29  ;;  %v17076_v29 = vcombine.low %v11223_v32, %v11227_v14  ;;  %v17245_v14 = vcombine.high %v11133_v37, %v11137_v3 }
 0x8fa   : > { %9950 = vmatprep.mubr.bf16.mxu0 %v24986_v6  ;;  %9962 = vmatpush1.bf16.msra.mxu0 %v20007_v49  ;;  %v11109_v6 = vld [vmem:[#allocation10 + $0x100] sm:$0xff] }
 0x8fb   : > { %9963 = vmatprep.subr.bf16.mxu0 %v20008_v58  ;;  %v11113_v49 = vld [vmem:[#allocation10 + $0x120] sm:$0xff]  ;;  %v17085_v58 = vcombine.high %v11231_v15, %v11235_v61 }
 0x8fe   : > { %9964 = vmatpush1.bf16.msra.mxu0 %v20009_v36  ;;  %v17212_v36 = vcombine.low %v11101_v22, %v11105_v52  ;;  %v11145_v22 = vld [vmem:[#allocation10 + $0x220] sm:$0xff] }
 0x8ff   : > { %9965 = vmatprep.subr.bf16.mxu0 %v20010_v42  ;;  %v11239_v42 = vld [vmem:[#allocation10 + $0x500] sm:$0xff] }
 0x901   : > { %9951 = vmatmul.mubr.bf16.gmra.mrb[84].mxu0 %v24987_v33  ;;  %v11243_v33 = vld [vmem:[#allocation10 + $0x520] sm:$0xff] }
 0x902   : > { %9966 = vmatpush1.bf16.msra.mxu0 %v20011_v43  ;;  %9993 = vmatprep.mubr.bf16.mxu0 %v24598_v13  ;;  %v17221_v43 = vcombine.high %v11109_v6, %v11113_v49  ;;  %v17092_v2 = vcombine.low %v11239_v42, %v11243_v33 }
 0x903   : > { %9967 = vmatprep.subr.bf16.mxu0 %v20012_v23  ;;  %v17084_v23 = vcombine.low %v11231_v15, %v11235_v61  ;;  %v11271_v15 = vld [vmem:[#allocation10 + $0x600] sm:$0xff] }
 0x904   : > { %v11275_v61 = vld [vmem:[#allocation10 + $0x620] sm:$0xff] }
 0x906   : > { %9968 = vmatpush1.bf16.msra.mxu0 %v20013_v54  ;;  %v11117_v54 = vld [vmem:[#allocation10 + $0x140] sm:$0xff] }
 0x907   : > { %9969 = vmatprep.subr.bf16.mxu0 %v20014_v16  ;;  %v11121_v16 = vld [vmem:[#allocation10 + $0x160] sm:$0xff] }
 0x908   : > { %v17228_v11 = vcombine.low %v11117_v54, %v11121_v16 }
 0x90a   : > { %9970 = vmatpush1.bf16.msra.mxu0 %v20015_v10  ;;  %v17093_v10 = vcombine.high %v11239_v42, %v11243_v33  ;;  %v11279_v42 = vld [vmem:[#allocation10 + $0x640] sm:$0xff] }
 0x90b   : > { %9971 = vmatprep.subr.bf16.mxu0 %v20016_v35  ;;  %v11283_v33 = vld [vmem:[#allocation10 + $0x660] sm:$0xff] }
 0x90e   : > { %9972 = vmatpush1.bf16.msra.mxu0 %v20017_v30  ;;  %v17220_v30 = vcombine.low %v11109_v6, %v11113_v49  ;;  %v11149_v6 = vld [vmem:[#allocation10 + $0x240] sm:$0xff] }
 0x90f   : > { %9973 = vmatprep.subr.bf16.mxu0 %v20018_v41  ;;  %v11247_v41 = vld [vmem:[#allocation10 + $0x540] sm:$0xff] }
 0x910   : > { %v11153_v49 = vld [vmem:[#allocation10 + $0x260] sm:$0xff] }
 0x912   : > { %9974 = vmatpush1.bf16.msra.mxu0 %v20019_v63  ;;  %v11251_v63 = vld [vmem:[#allocation10 + $0x560] sm:$0xff] }
 0x913   : > { %9975 = vmatprep.subr.bf16.mxu0 %v20020_v47  ;;  %v17101_v59 = vcombine.high %v11247_v41, %v11251_v63 }
 0x916   : > { %9976 = vmatpush1.bf16.msra.mxu0 %v20021_v28  ;;  %v17229_v28 = vcombine.high %v11117_v54, %v11121_v16  ;;  %v11157_v54 = vld [vmem:[#allocation10 + $0x280] sm:$0xff] }
 0x917   : > { %11975 = vmatprep.subr.bf16.mxu0 %v17061_v18  ;;  %v17100_v18 = vcombine.low %v11247_v41, %v11251_v63  ;;  %v11161_v16 = vld [vmem:[#allocation10 + $0x2a0] sm:$0xff] }
 0x918   : > { %v11287_v41 = vld [vmem:[#allocation10 + $0x680] sm:$0xff] }
 0x919   : > { %9994 = vmatmul.mubr.bf16.vlgmr.msra.gmra.mrb[80].mxu0 %v24988_v20  ;;  %v11291_v63 = vld [vmem:[#allocation10 + $0x6a0] sm:$0xff] }
 0x91a   : > { %10003 = vmatprep.mubr.bf16.mxu0 %v24598_v13  ;;  %v17196_v13 = vcombine.low %v11085_v9, %v11089_v46  ;;  %11976 = vmatpush1.bf16.msra.mxu0 %v17060_v21  ;;  %v11255_v9 = vld [vmem:[#allocation10 + $0x580] sm:$0xff]  ;;  %v17237_v21 = vcombine.high %v11125_v44, %v11129_v39 }
 0x91b   : > { %11977 = vmatprep.subr.bf16.mxu0 %v17069_v57  ;;  %v11259_v46 = vld [vmem:[#allocation10 + $0x5a0] sm:$0xff]  ;;  %v17236_v57 = vcombine.low %v11125_v44, %v11129_v39 }
 0x91c   : > { %12782 = vmatpush1.bf16.msra.mxu1 %v17196_v13  ;;  %v17109_v48 = vcombine.high %v11255_v9, %v11259_v46  ;;  %v11267_v13 = vld [vmem:[#allocation10 + $0x5e0] sm:$0xff] }
 0x91d   : > { %12783 = vmatprep.subr.bf16.mxu1 %v17205_v53  ;;  %v17108_v53 = vcombine.low %v11255_v9, %v11259_v46  ;;  %v11165_v44 = vld [vmem:[#allocation10 + $0x2c0] sm:$0xff] }
 0x91e   : > { %11978 = vmatpush1.bf16.msra.mxu0 %v17068_v25  ;;  %v11141_v25 = vld [vmem:[#allocation10 + $0x200] sm:$0xff] }
 0x91f   : > { %11979 = vmatprep.subr.bf16.mxu0 %v17077_v7  ;;  %v17117_v7 = vcombine.high %v11263_v5, %v11267_v13  ;;  %v11169_v39 = vld [vmem:[#allocation10 + $0x2e0] sm:$0xff] }
 0x920   : > { %12784 = vmatpush1.bf16.msra.mxu1 %v17204_v19  ;;  %v17244_v19 = vcombine.low %v11133_v37, %v11137_v3  ;;  %v11295_v9 = vld [vmem:[#allocation10 + $0x6c0] sm:$0xff] }
 0x921   : > { %10004 = vmatmul.mubr.bf16.gmra.mrb[84].mxu0 %v24989_v31  ;;  %12785 = vmatprep.subr.bf16.mxu1 %v17213_v40  ;;  %v17253_v40 = vcombine.high %v11141_v25, %v11145_v22  ;;  %v11299_v46 = vld [vmem:[#allocation10 + $0x6e0] sm:$0xff] }
 0x922   : > { %11980 = vmatpush1.bf16.msra.mxu0 %v17076_v29  ;;  %v17116_v29 = vcombine.low %v11263_v5, %v11267_v13  ;;  %v11173_v37 = vld [vmem:[#allocation10 + $0x300] sm:$0xff]  ;;  %v17148_v13 = vcombine.low %v11295_v9, %v11299_v46 }
 0x923   : > { %11981 = vmatprep.subr.bf16.mxu0 %v17085_v58  ;;  %v17125_v58 = vcombine.high %v11271_v15, %v11275_v61  ;;  %v11177_v3 = vld [vmem:[#allocation10 + $0x320] sm:$0xff] }
 0x924   : > { %12786 = vmatpush1.bf16.msra.mxu1 %v17212_v36  ;;  %v17252_v36 = vcombine.low %v11141_v25, %v11145_v22  ;;  %v17285_v5 = vcombine.high %v11173_v37, %v11177_v3  ;;  %v11307_v25 = vld [vmem:[#allocation10 + $0x720] sm:$0xff] }
 0x925   : > { %12787 = vmatprep.subr.bf16.mxu1 %v17221_v43  ;;  %v17261_v43 = vcombine.high %v11149_v6, %v11153_v49 }
 0x926   : > { %11982 = vmatpush1.bf16.msra.mxu0 %v17084_v23  ;;  %v17124_v23 = vcombine.low %v11271_v15, %v11275_v61  ;;  %v11185_v15 = vld [vmem:[#allocation10 + $0x360] sm:$0xff] }
 0x927   : > { %11983 = vmatprep.subr.bf16.mxu0 %v17093_v10  ;;  %v17133_v10 = vcombine.high %v11279_v42, %v11283_v33 }
 0x928   : > { %12788 = vmatpush1.bf16.msra.mxu1 %v17220_v30  ;;  %v17260_v30 = vcombine.low %v11149_v6, %v11153_v49  ;;  %v11315_v6 = vld [vmem:[#allocation10 + $0x760] sm:$0xff] }
 0x929   : > { %12789 = vmatprep.subr.bf16.mxu1 %v17229_v28  ;;  %v17269_v28 = vcombine.high %v11157_v54, %v11161_v16 }
 0x92a   : > { %11984 = vmatpush1.bf16.msra.mxu0 %v17092_v2  ;;  %v17132_v2 = vcombine.low %v11279_v42, %v11283_v33  ;;  %v11193_v42 = vld [vmem:[#allocation10 + $0x3a0] sm:$0xff] }
 0x92b   : > { %11985 = vmatprep.subr.bf16.mxu0 %v17101_v59  ;;  %v17141_v59 = vcombine.high %v11287_v41, %v11291_v63 }
 0x92c   : > { %v23977_v35 = vpop.f32.mrb[64].mxu0  ;;  %12790 = vmatpush1.bf16.msra.mxu1 %v17228_v11  ;;  %v17268_v11 = vcombine.low %v11157_v54, %v11161_v16  ;;  %v11323_v54 = vld [vmem:[#allocation10 + $0x7a0] sm:$0xff] }
 0x92d   : > { %v23979_v47 = vpop.f32.mrb[65].mxu0  ;;  %12791 = vmatprep.subr.bf16.mxu1 %v17237_v21  ;;  %v17277_v21 = vcombine.high %v11165_v44, %v11169_v39 }
 0x92e   : > { %v23981_v20 = vpop.f32.mrb[66].mxu0  ;;  %11986 = vmatpush1.bf16.msra.mxu0 %v17100_v18  ;;  %v17140_v18 = vcombine.low %v11287_v41, %v11291_v63  ;;  %v11201_v41 = vld [vmem:[#allocation10 + $0x3e0] sm:$0xff] }
 0x92f   : > { %v23983_v12 = vpop.f32.mrb[67].mxu0  ;;  %11987 = vmatprep.subr.bf16.mxu0 %v17109_v48  ;;  %v17149_v48 = vcombine.high %v11295_v9, %v11299_v46  ;;  %v23995_v9 = vld [vmem:[#allocation10 + $0x30] sm:$0xff] }
 0x930   : > { %12792 = vmatpush1.bf16.msra.mxu1 %v17236_v57  ;;  %v17276_v57 = vcombine.low %v11165_v44, %v11169_v39  ;;  %v11331_v44 = vld [vmem:[#allocation10 + $0x7e0] sm:$0xff] }
 0x931   : > { %12793 = vmatprep.subr.bf16.mxu1 %v17245_v14  ;;  %v17284_v14 = vcombine.low %v11173_v37, %v11177_v3  ;;  %v24003_v37 = vld [vmem:[#allocation10 + $0x428] sm:$0xff] }
 0x932   : > { %11988 = vmatpush1.bf16.msra.mxu0 %v17108_v53  ;;  %v11303_v53 = vld [vmem:[#allocation10 + $0x700] sm:$0xff] }
 0x933   : > { %11989 = vmatprep.subr.bf16.mxu0 %v17117_v7  ;;  %v17157_v22 = vcombine.high %v11303_v53, %v11307_v25  ;;  %v17156_v7 = vcombine.low %v11303_v53, %v11307_v25 }
 0x934   : > { %v23985_v38 = vpop.f32.mrb[68].mxu0  ;;  %12794 = vmatpush1.bf16.msra.mxu1 %v17244_v19  ;;  %v11181_v19 = vld [vmem:[#allocation10 + $0x340] sm:$0xff] }
 0x935   : > { %v23987_v32 = vpop.f32.mrb[69].mxu0  ;;  %12795 = vmatprep.subr.bf16.mxu1 %v17253_v40  ;;  %v17293_v61 = vcombine.high %v11181_v19, %v11185_v15  ;;  %v17292_v40 = vcombine.low %v11181_v19, %v11185_v15 }
 0x936   : > { %v23989_v31 = vpop.f32.mrb[70].mxu0  ;;  %11990 = vmatpush1.bf16.msra.mxu0 %v17116_v29  ;;  %v11311_v29 = vld [vmem:[#allocation10 + $0x740] sm:$0xff] }
 0x937   : > { %v23991_v52 = vpop.f32.mrb[71].mxu0  ;;  %11991 = vmatprep.subr.bf16.mxu0 %v17125_v58  ;;  %v17165_v49 = vcombine.high %v11311_v29, %v11315_v6  ;;  %v17164_v58 = vcombine.low %v11311_v29, %v11315_v6 }
 0x938   : > { %12796 = vmatpush1.bf16.msra.mxu1 %v17252_v36  ;;  %v11189_v36 = vld [vmem:[#allocation10 + $0x380] sm:$0xff] }
 0x939   : > { %12797 = vmatprep.subr.bf16.mxu1 %v17261_v43  ;;  %v17301_v33 = vcombine.high %v11189_v36, %v11193_v42  ;;  %v17300_v43 = vcombine.low %v11189_v36, %v11193_v42 }
 0x93a   : > { %11992 = vmatpush1.bf16.msra.mxu0 %v17124_v23  ;;  %v11319_v23 = vld [vmem:[#allocation10 + $0x780] sm:$0xff] }
 0x93b   : > { %11993 = vmatprep.subr.bf16.mxu0 %v17133_v10  ;;  %v17173_v16 = vcombine.high %v11319_v23, %v11323_v54  ;;  %v17172_v10 = vcombine.low %v11319_v23, %v11323_v54 }
 0x93c   : > { %12798 = vmatpush1.bf16.msra.mxu1 %v17260_v30  ;;  %v11197_v30 = vld [vmem:[#allocation10 + $0x3c0] sm:$0xff] }
 0x93d   : > { %12799 = vmatprep.subr.bf16.mxu1 %v17269_v28  ;;  %v17309_v63 = vcombine.high %v11197_v30, %v11201_v41  ;;  %v17308_v28 = vcombine.low %v11197_v30, %v11201_v41 }
 0x93e   : > { %11994 = vmatpush1.bf16.msra.mxu0 %v17132_v2  ;;  %v11327_v2 = vld [vmem:[#allocation10 + $0x7c0] sm:$0xff] }
 0x93f   : > { %11995 = vmatprep.subr.bf16.mxu0 %v17141_v59  ;;  %v17181_v39 = vcombine.high %v11327_v2, %v11331_v44  ;;  %v17180_v59 = vcombine.low %v11327_v2, %v11331_v44 }
 0x940   : > { %12800 = vmatpush1.bf16.msra.mxu1 %v17268_v11  ;;  %v23993_v11 = vld [vmem:[#allocation10 + $0x10] sm:$0xff] }
 0x941   : > { %12801 = vmatprep.subr.bf16.mxu1 %v17277_v21  ;;  %v17193_v46 = vcombine.high %v23993_v11, %v23995_v9  ;;  %v17192_v21 = vcombine.low %v23993_v11, %v23995_v9  ;;  %v11103_v9 = vld [vmem:[#allocation10 + $0xd0] sm:$0xff] }
 0x942   : > { %11996 = vmatpush1.bf16.msra.mxu0 %v17140_v18  ;;  %v24001_v18 = vld [vmem:[#allocation10 + $0x408] sm:$0xff] }
 0x943   : > { %11997 = vmatprep.subr.bf16.mxu0 %v17149_v48  ;;  %v17063_v3 = vcombine.high %v24001_v18, %v24003_v37  ;;  %v17062_v48 = vcombine.low %v24001_v18, %v24003_v37 }
 0x944   : > { %12802 = vmatpush1.bf16.msra.mxu1 %v17276_v57  ;;  %v5835_v57 = vld [vmem:[#allocation8] sm:$0xf] }
 0x945   : > { %12803 = vmatprep.subr.bf16.mxu1 %v17285_v5  ;;  %v24990_v5 = vld [vmem:[#allocation36_spill] sm:$0xff] }
 0x946   : > { %11998 = vmatpush1.bf16.msra.mxu0 %v17148_v13  ;;  %v9867_v13 = vrot.slane %v5835_v57, %v24990_v5 }
 0x947   : > { %11999 = vmatprep.subr.bf16.mxu0 %v17157_v22 }
 0x948   : > { %12804 = vmatpush1.bf16.msra.mxu1 %v17284_v14  ;;  %v24991_v14 = vld [vmem:[#allocation64_spill] sm:$0xff]  ;;  %v11021_v25 = vadd.f32 %v23954_v4, %v9867_v13  ;;  %v11025_v19 = vadd.f32 %v23958_v17, %v9867_v13  ;;  %v11029_v30 = vadd.f32 %v23962_v45, %v9867_v13  ;;  %v11033_v2 = vadd.f32 %v23966_v0, %v9867_v13 }
 0x949   : > { %12805 = vmatprep.subr.bf16.mxu1 %v17293_v61  ;;  %v9871_v53 = vrot.slane %v5835_v57, %v24991_v14 }
 0x94a   : > { %12000 = vmatpush1.bf16.msra.mxu0 %v17156_v7  ;;  %v11041_v54 = vmax.f32 %v11025_v19, 0.0 }
 0x94b   : > { %12001 = vmatprep.subr.bf16.mxu0 %v17165_v49  ;;  %v11022_v22 = vadd.f32 %v23956_v24, %v9871_v53  ;;  %v11037_v49 = vmax.f32 %v11021_v25, 0.0  ;;  %v11030_v41 = vadd.f32 %v23964_v51, %v9871_v53  ;;  %v11045_v25 = vmax.f32 %v11029_v30, 0.0 }
 0x94c   : > { %12806 = vmatpush1.bf16.msra.mxu1 %v17292_v40  ;;  %v11026_v40 = vadd.f32 %v23960_v1, %v9871_v53 }
 0x94d   : > { %12807 = vmatprep.subr.bf16.mxu1 %v17301_v33  ;;  %v11038_v33 = vmax.f32 %v11022_v22, 0.0  ;;  %v11046_v45 = vmax.f32 %v11030_v41, 0.0 }
 0x94e   : > { %12002 = vmatpush1.bf16.msra.mxu0 %v17164_v58 }
 0x94f   : > { %12003 = vmatprep.subr.bf16.mxu0 %v17173_v16  ;;  %v11042_v16 = vmax.f32 %v11026_v40, 0.0  ;;  %v11049_v40 = vmax.f32 %v11033_v2, 0.0 }
 0x950   : > { %12808 = vmatpush1.bf16.msra.mxu1 %v17300_v43 }
 0x951   : > { %12809 = vmatprep.subr.bf16.mxu1 %v17309_v63 }
 0x952   : > { %12004 = vmatpush1.bf16.msra.mxu0 %v17172_v10 }
 0x953   : > { %12005 = vmatprep.subr.bf16.mxu0 %v17181_v39 }
 0x954   : > { %12810 = vmatpush1.bf16.msra.mxu1 %v17308_v28 }
 0x955   : > { %12861 = vmatprep.subr.bf16.mxu1 %v17193_v46 }
 0x956   : > { %12006 = vmatpush1.bf16.msra.mxu0 %v17180_v59  ;;  %v11034_v59 = vadd.f32 %v23968_v56, %v9871_v53 }
 0x957   : > { %12016 = vmatprep.subr.bf16.mxu0 %v17063_v3 }
 0x98c   : > { %v9820_v7 = vpop.f32.mrb[72].mxu0 }
 0x98d   : > { %v9878_v15 = vadd.f32 %v9867_v13, %v9820_v7  ;;  %v9822_v61 = vpop.f32.mrb[73].mxu0 }
 0x98e   : > { %v9879_v29 = vadd.f32 %v9871_v53, %v9822_v61  ;;  %v9824_v6 = vpop.f32.mrb[74].mxu0 }
 0x98f   : > { %v9894_v58 = vmax.f32 %v9878_v15, 0.0  ;;  %v9882_v36 = vadd.f32 %v9867_v13, %v9824_v6  ;;  %v9826_v42 = vpop.f32.mrb[75].mxu0  ;;  %v11050_v6 = vmax.f32 %v11034_v59, 0.0 }
 0x990   : > { %v9895_v43 = vmax.f32 %v9879_v29, 0.0  ;;  %v9883_v23 = vadd.f32 %v9871_v53, %v9826_v42 }
 0x991   : > { %v24015_v4 = vmax.f32 %v9894_v58, %v11037_v49  ;;  %v9898_v24 = vmax.f32 %v9882_v36, 0.0  ;;  %v24992_v36 = vld [vmem:[#allocation37_spill] sm:$0xff] }
 0x992   : > { %v24017_v10 = vmax.f32 %v9895_v43, %v11038_v33  ;;  %v9899_v17 = vmax.f32 %v9883_v23, 0.0  ;;  %v9859_v42 = vrot.slane %v5835_v57, %v24992_v36  ;;  %v24993_v33 = vld [vmem:[#allocation61_spill] sm:$0xff] }
 0x993   : > { %v24020_v1 = vmax.f32 %v9898_v24, %v11041_v54 }
 0x994   : > { %v24023_v63 = vmax.f32 %v9899_v17, %v11042_v16  ;;  %v9830_v28 = vpop.f32.mrb[76].mxu0  ;;  %v9876_v23 = vadd.f32 %v9859_v42, %v23977_v35  ;;  %v9880_v30 = vadd.f32 %v9859_v42, %v23981_v20 }
 0x995   : > { %v9886_v44 = vadd.f32 %v9867_v13, %v9830_v28  ;;  %v9832_v39 = vpop.f32.mrb[77].mxu0 }
 0x996   : > { %v9887_v46 = vadd.f32 %v9871_v53, %v9832_v39  ;;  %v9834_v3 = vpop.f32.mrb[78].mxu0  ;;  %v9896_v20 = vmax.f32 %v9880_v30, 0.0 }
 0x997   : > { %v9902_v22 = vmax.f32 %v9886_v44, 0.0  ;;  %v9890_v7 = vadd.f32 %v9867_v13, %v9834_v3  ;;  %v9836_v19 = vpop.f32.mrb[79].mxu0  ;;  %v9863_v13 = vrot.slane %v5835_v57, %v24993_v33  ;;  %v9884_v57 = vadd.f32 %v9859_v42, %v23985_v38 }
 0x998   : > { %v9903_v15 = vmax.f32 %v9887_v46, 0.0  ;;  %v9891_v61 = vadd.f32 %v9871_v53, %v9836_v19  ;;  %v9888_v38 = vadd.f32 %v9859_v42, %v23989_v31 }
 0x999   : > { %v24027_v51 = vmax.f32 %v9902_v22, %v11045_v25  ;;  %v9906_v29 = vmax.f32 %v9890_v7, 0.0  ;;  %v9877_v24 = vadd.f32 %v9863_v13, %v23979_v47  ;;  %v9881_v44 = vadd.f32 %v9863_v13, %v23983_v12 }
 0x99a   : > { %v24029_v49 = vmax.f32 %v9903_v15, %v11046_v45  ;;  %v9907_v0 = vmax.f32 %v9891_v61, 0.0  ;;  %v9900_v19 = vmax.f32 %v9884_v57, 0.0 }
 0x99b   : > { %v24031_v58 = vmax.f32 %v9906_v29, %v11049_v40  ;;  %v9893_v47 = vmax.f32 %v9877_v24, 0.0 }
 0x99c   : > { %v24033_v56 = vmax.f32 %v9907_v0, %v11050_v6 }
 0x9ec   : > { %v9995_v43 = vpop.f32.mrb[80].mxu0 }
 0x9ed   : > { %v17751_v53 = vadd.f32 %v23893_v27, %v9995_v43  ;;  %v9997_v54 = vpop.f32.mrb[81].mxu0  ;;  %v9892_v27 = vmax.f32 %v9876_v23, 0.0 }
 0x9ee   : > { %v17752_v16 = vadd.f32 %v23895_v8, %v9997_v54  ;;  %v9999_v17 = vpop.f32.mrb[82].mxu0  ;;  %v9885_v8 = vadd.f32 %v9863_v13, %v23987_v32 }
 0x9ef   : > { %v11019_v41 = vadd.f32 %v17751_v53, %v9859_v42  ;;  %v17753_v28 = vadd.f32 %v23898_v55, %v9999_v17  ;;  %v10001_v2 = vpop.f32.mrb[83].mxu0  ;;  %v9897_v55 = vmax.f32 %v9881_v44, 0.0  ;;  %v9889_v53 = vadd.f32 %v9863_v13, %v23991_v52  ;;  %v11091_v17 = vld [vmem:[#allocation10 + $0x70] sm:$0xff] }
 0x9f0   : > { %v11020_v39 = vadd.f32 %v17752_v16, %v9863_v13  ;;  %v17754_v35 = vadd.f32 %v23900_v34, %v10001_v2  ;;  %v9901_v6 = vmax.f32 %v9885_v8, 0.0  ;;  %v9904_v2 = vmax.f32 %v9888_v38, 0.0  ;;  %v11232_v38 = vld [vmem:[#allocation10 + $0x4c8] sm:$0xff] }
 0x9f1   : > { %v11035_v59 = vmax.f32 %v11019_v41, 0.0  ;;  %v11023_v46 = vadd.f32 %v17753_v28, %v9859_v42  ;;  %v11216_v28 = vld [vmem:[#allocation10 + $0x448] sm:$0xff]  ;;  %v9905_v8 = vmax.f32 %v9889_v53, 0.0 }
 0x9f2   : > { %v11036_v3 = vmax.f32 %v11020_v39, 0.0  ;;  %v11024_v25 = vadd.f32 %v17754_v35, %v9863_v13 }
 0x9f3   : > { %v11051_v22 = vmax.f32 %v9892_v27, %v11035_v59  ;;  %v11039_v7 = vmax.f32 %v11023_v46, 0.0  ;;  %v11099_v27 = vld [vmem:[#allocation10 + $0xb0] sm:$0xff] }
 0x9f4   : > { %v11052_v45 = vmax.f32 %v9893_v47, %v11036_v3  ;;  %v11040_v12 = vmax.f32 %v11024_v25, 0.0  ;;  %v10005_v15 = vpop.f32.mrb[84].mxu0 }
 0x9f5   : > { %v11067_v34 = vmax.f32 %v11051_v22, %v24015_v4  ;;  %v11055_v61 = vmax.f32 %v9896_v20, %v11039_v7  ;;  %v17755_v40 = vadd.f32 %v23905_v62, %v10005_v15  ;;  %v10007_v29 = vpop.f32.mrb[85].mxu0  ;;  %v11087_v4 = vld [vmem:[#allocation10 + $0x50] sm:$0xff]  ;;  %v11228_v20 = vld [vmem:[#allocation10 + $0x4a8] sm:$0xff] }
 0x9f6   : > { %v11068_v32 = vmax.f32 %v11052_v45, %v24017_v10  ;;  %v11056_v0 = vmax.f32 %v9897_v55, %v11040_v12  ;;  %v17756_v43 = vadd.f32 %v23907_v60, %v10007_v29  ;;  %v10009_v23 = vpop.f32.mrb[86].mxu0  ;;  %v11220_v60 = vld [vmem:[#allocation10 + $0x468] sm:$0xff]  ;;  %v17201_v35 = vcombine.high %v11087_v4, %v11091_v17 }
 0x9f7   : > { %v11069_v54 = vmax.f32 %v11055_v61, %v24020_v1  ;;  %v11027_v24 = vadd.f32 %v17755_v40, %v9859_v42  ;;  %v17757_v31 = vadd.f32 %v23910_v26, %v10009_v23  ;;  %v10011_v16 = vpop.f32.mrb[87].mxu0  ;;  %v24059_v44 = vpack.c.bf16 %v11067_v34, %v11067_v34  ;;  %v11236_v34 = vld [vmem:[#allocation10 + $0x4e8] sm:$0xff]  ;;  %v11115_v61 = vld [vmem:[#allocation10 + $0x130] sm:$0xff] }
 0x9f8   : > { %v11070_v62 = vmax.f32 %v11056_v0, %v24023_v63  ;;  %v11028_v30 = vadd.f32 %v17756_v43, %v9863_v13  ;;  %v17758_v41 = vadd.f32 %v23912_v50, %v10011_v16  ;;  %v24057_v10 = vpack.c.bf16 %v11068_v32, %v11068_v32  ;;  %v11095_v63 = vld [vmem:[#allocation10 + $0x90] sm:$0xff]  ;;  %v11240_v29 = vld [vmem:[#allocation10 + $0x508] sm:$0xff] }
 0x9f9   : > { %v11043_v52 = vmax.f32 %v11027_v24, 0.0  ;;  %v11031_v1 = vadd.f32 %v17757_v31, %v9859_v42  ;;  %v24064_v59 = vpack.c.bf16 %v11069_v54, %v11069_v54  ;;  %v17071_v47 = vcombine.high %v11216_v28, %v11220_v60  ;;  %v11119_v0 = vld [vmem:[#allocation10 + $0x150] sm:$0xff]  ;;  %v11248_v54 = vld [vmem:[#allocation10 + $0x548] sm:$0xff] }
 0x9fa   : > { %v11044_v57 = vmax.f32 %v11028_v30, 0.0  ;;  %v11032_v39 = vadd.f32 %v17758_v41, %v9863_v13  ;;  %12811 = vmatprep.mubr.bf16.mxu1 %v24057_v10  ;;  %v24062_v26 = vpack.c.bf16 %v11070_v62, %v11070_v62  ;;  %v17200_v42 = vcombine.low %v11087_v4, %v11091_v17  ;;  %v11224_v13 = vld [vmem:[#allocation10 + $0x488] sm:$0xff]  ;;  %v11123_v43 = vld [vmem:[#allocation10 + $0x170] sm:$0xff] }
 0x9fb   : > { %v11059_v50 = vmax.f32 %v9900_v19, %v11043_v52  ;;  %v11047_v46 = vmax.f32 %v11031_v1, 0.0  ;;  %12812 = vmatmul.mubr.bf16.vlgmr.msra.gmra.mrb[100].mxu1 %v24059_v44  ;;  %v17209_v55 = vcombine.high %v11095_v63, %v11099_v27  ;;  %v17070_v11 = vcombine.low %v11216_v28, %v11220_v60  ;;  %v11252_v24 = vld [vmem:[#allocation10 + $0x568] sm:$0xff]  ;;  %v11127_v4 = vld [vmem:[#allocation10 + $0x190] sm:$0xff] }
 0x9fc   : > { %v11060_v3 = vmax.f32 %v9901_v6, %v11044_v57  ;;  %v11048_v25 = vmax.f32 %v11032_v39, 0.0  ;;  %12862 = vmatpush1.bf16.msra.mxu1 %v17192_v21  ;;  %12007 = vmatprep.mubr.bf16.mxu0 %v24062_v26  ;;  %v11107_v21 = vld [vmem:[#allocation10 + $0xf0] sm:$0xff]  ;;  %v17079_v12 = vcombine.high %v11224_v13, %v11228_v20  ;;  %v17078_v37 = vcombine.low %v11224_v13, %v11228_v20  ;;  %v11244_v6 = vld [vmem:[#allocation10 + $0x528] sm:$0xff] }
 0x9fd   : > { %v24072_v22 = vmax.f32 %v11059_v50, %v24027_v51  ;;  %v11063_v7 = vmax.f32 %v9904_v2, %v11047_v46  ;;  %12893 = vmatprep.mubr.bf16.mxu1 %v24057_v10  ;;  %12008 = vmatmul.mubr.bf16.vlgmr.msra.gmra.mrb[88].mxu0 %v24064_v59  ;;  %v17217_v18 = vcombine.high %v11103_v9, %v11107_v21  ;;  %v11131_v17 = vld [vmem:[#allocation10 + $0x1b0] sm:$0xff]  ;;  %v11256_v41 = vld [vmem:[#allocation10 + $0x588] sm:$0xff] }
 0x9fe   : > { %v24077_v19 = vmax.f32 %v11060_v3, %v24029_v49  ;;  %v11064_v45 = vmax.f32 %v9905_v8, %v11048_v25  ;;  %12017 = vmatpush1.bf16.msra.mxu0 %v17062_v48  ;;  %12048 = vmatprep.mubr.bf16.mxu0 %v24062_v26  ;;  %v17208_v49 = vcombine.low %v11095_v63, %v11099_v27  ;;  %v11111_v48 = vld [vmem:[#allocation10 + $0x110] sm:$0xff]  ;;  %v11260_v28 = vld [vmem:[#allocation10 + $0x5a8] sm:$0xff] }
 0x9ff   : > { %v24084_v51 = vmax.f32 %v11063_v7, %v24031_v58  ;;  %12863 = vmatprep.subr.bf16.mxu1 %v17201_v35  ;;  %12018 = vmatprep.subr.bf16.mxu0 %v17071_v47  ;;  %v17087_v40 = vcombine.high %v11232_v38, %v11236_v34  ;;  %v17216_v58 = vcombine.low %v11103_v9, %v11107_v21  ;;  %v11135_v52 = vld [vmem:[#allocation10 + $0x1d0] sm:$0xff]  ;;  %v11264_v35 = vld [vmem:[#allocation10 + $0x5c8] sm:$0xff] }
 0xa00   : > { %v24087_v15 = vmax.f32 %v11064_v45, %v24033_v56  ;;  %12864 = vmatpush1.bf16.msra.mxu1 %v17200_v42  ;;  %v17225_v32 = vcombine.high %v11111_v48, %v11115_v61  ;;  %v17086_v56 = vcombine.low %v11232_v38, %v11236_v34  ;;  %v17095_v23 = vcombine.high %v11240_v29, %v11244_v6  ;;  %v11139_v1 = vld [vmem:[#allocation10 + $0x1f0] sm:$0xff]  ;;  %v11268_v63 = vld [vmem:[#allocation10 + $0x5e8] sm:$0xff] }
 0xa01   : > { %12865 = vmatprep.subr.bf16.mxu1 %v17209_v55  ;;  %v17224_v53 = vcombine.low %v11111_v48, %v11115_v61  ;;  %v17233_v31 = vcombine.high %v11119_v0, %v11123_v43  ;;  %v17094_v16 = vcombine.low %v11240_v29, %v11244_v6  ;;  %v17103_v62 = vcombine.high %v11248_v54, %v11252_v24  ;;  %v11143_v46 = vld [vmem:[#allocation10 + $0x210] sm:$0xff]  ;;  %v11272_v25 = vld [vmem:[#allocation10 + $0x608] sm:$0xff] }
 0xa02   : > { %12019 = vmatpush1.bf16.msra.mxu0 %v17070_v11  ;;  %v17232_v30 = vcombine.low %v11119_v0, %v11123_v43  ;;  %v17241_v60 = vcombine.high %v11127_v4, %v11131_v17  ;;  %v17102_v2 = vcombine.low %v11248_v54, %v11252_v24  ;;  %v17111_v57 = vcombine.high %v11256_v41, %v11260_v28  ;;  %v11147_v47 = vld [vmem:[#allocation10 + $0x230] sm:$0xff]  ;;  %v11276_v42 = vld [vmem:[#allocation10 + $0x628] sm:$0xff] }
 0xa03   : > { %12020 = vmatprep.subr.bf16.mxu0 %v17079_v12  ;;  %v17240_v39 = vcombine.low %v11127_v4, %v11131_v17  ;;  %v17249_v27 = vcombine.high %v11135_v52, %v11139_v1  ;;  %v17110_v50 = vcombine.low %v11256_v41, %v11260_v28  ;;  %v17119_v8 = vcombine.high %v11264_v35, %v11268_v63  ;;  %v11151_v7 = vld [vmem:[#allocation10 + $0x250] sm:$0xff]  ;;  %v11280_v9 = vld [vmem:[#allocation10 + $0x648] sm:$0xff] }
 0xa04   : > { %12866 = vmatpush1.bf16.msra.mxu1 %v17208_v49  ;;  %v17248_v3 = vcombine.low %v11135_v52, %v11139_v1  ;;  %v17257_v13 = vcombine.high %v11143_v46, %v11147_v47  ;;  %v17118_v20 = vcombine.low %v11264_v35, %v11268_v63  ;;  %v11155_v55 = vld [vmem:[#allocation10 + $0x270] sm:$0xff]  ;;  %v17127_v45 = vcombine.high %v11272_v25, %v11276_v42  ;;  %v11284_v21 = vld [vmem:[#allocation10 + $0x668] sm:$0xff] }
 0xa05   : > { %12867 = vmatprep.subr.bf16.mxu1 %v17217_v18  ;;  %v17256_v11 = vcombine.low %v11143_v46, %v11147_v47  ;;  %v17265_v12 = vcombine.high %v11151_v7, %v11155_v55  ;;  %v17126_v49 = vcombine.low %v11272_v25, %v11276_v42  ;;  %v11159_v38 = vld [vmem:[#allocation10 + $0x290] sm:$0xff]  ;;  %v17135_v18 = vcombine.high %v11280_v9, %v11284_v21  ;;  %v11288_v48 = vld [vmem:[#allocation10 + $0x688] sm:$0xff] }
 0xa06   : > { %12021 = vmatpush1.bf16.msra.mxu0 %v17078_v37  ;;  %v11163_v34 = vld [vmem:[#allocation10 + $0x2b0] sm:$0xff]  ;;  %v17264_v37 = vcombine.low %v11151_v7, %v11155_v55  ;;  %v11292_v61 = vld [vmem:[#allocation10 + $0x6a8] sm:$0xff] }
 0xa07   : > { %12022 = vmatprep.subr.bf16.mxu0 %v17087_v40  ;;  %v17273_v40 = vcombine.high %v11159_v38, %v11163_v34  ;;  %v11167_v29 = vld [vmem:[#allocation10 + $0x2d0] sm:$0xff]  ;;  %v11296_v0 = vld [vmem:[#allocation10 + $0x6c8] sm:$0xff] }
 0xa08   : > { %12868 = vmatpush1.bf16.msra.mxu1 %v17216_v58  ;;  %v17134_v58 = vcombine.low %v11280_v9, %v11284_v21  ;;  %v11171_v6 = vld [vmem:[#allocation10 + $0x2f0] sm:$0xff]  ;;  %v11300_v43 = vld [vmem:[#allocation10 + $0x6e8] sm:$0xff]  ;;  %v12945_v9 = vld [vmem:[#allocation10 + $0x800] sm:$0xff] }
 0xa09   : > { %12869 = vmatprep.subr.bf16.mxu1 %v17225_v32  ;;  %v17143_v32 = vcombine.high %v11288_v48, %v11292_v61  ;;  %v11175_v54 = vld [vmem:[#allocation10 + $0x310] sm:$0xff]  ;;  %v11304_v4 = vld [vmem:[#allocation10 + $0x708] sm:$0xff]  ;;  %v12949_v21 = vld [vmem:[#allocation10 + $0x820] sm:$0xff] }
 0xa0a   : > { %12023 = vmatpush1.bf16.msra.mxu0 %v17086_v56  ;;  %v17272_v56 = vcombine.low %v11159_v38, %v11163_v34  ;;  %v11179_v24 = vld [vmem:[#allocation10 + $0x330] sm:$0xff]  ;;  %v11308_v17 = vld [vmem:[#allocation10 + $0x728] sm:$0xff] }
 0xa0b   : > { %12024 = vmatprep.subr.bf16.mxu0 %v17095_v23  ;;  %v17281_v23 = vcombine.high %v11167_v29, %v11171_v6  ;;  %v11183_v41 = vld [vmem:[#allocation10 + $0x350] sm:$0xff]  ;;  %v11312_v52 = vld [vmem:[#allocation10 + $0x748] sm:$0xff] }
 0xa0c   : > { %12870 = vmatpush1.bf16.msra.mxu1 %v17224_v53  ;;  %v17142_v53 = vcombine.low %v11288_v48, %v11292_v61  ;;  %v11187_v28 = vld [vmem:[#allocation10 + $0x370] sm:$0xff]  ;;  %v11316_v1 = vld [vmem:[#allocation10 + $0x768] sm:$0xff]  ;;  %v12953_v48 = vld [vmem:[#allocation10 + $0x840] sm:$0xff] }
 0xa0d   : > { %12871 = vmatprep.subr.bf16.mxu1 %v17233_v31  ;;  %v17151_v31 = vcombine.high %v11296_v0, %v11300_v43  ;;  %v11191_v35 = vld [vmem:[#allocation10 + $0x390] sm:$0xff]  ;;  %v11320_v46 = vld [vmem:[#allocation10 + $0x788] sm:$0xff]  ;;  %v12957_v61 = vld [vmem:[#allocation10 + $0x860] sm:$0xff] }
 0xa0e   : > { %12025 = vmatpush1.bf16.msra.mxu0 %v17094_v16  ;;  %v17280_v16 = vcombine.low %v11167_v29, %v11171_v6  ;;  %v11195_v63 = vld [vmem:[#allocation10 + $0x3b0] sm:$0xff]  ;;  %v11324_v47 = vld [vmem:[#allocation10 + $0x7a8] sm:$0xff] }
 0xa0f   : > { %12026 = vmatprep.subr.bf16.mxu0 %v17103_v62  ;;  %v17289_v62 = vcombine.high %v11175_v54, %v11179_v24  ;;  %v11199_v25 = vld [vmem:[#allocation10 + $0x3d0] sm:$0xff]  ;;  %v11328_v7 = vld [vmem:[#allocation10 + $0x7c8] sm:$0xff] }
 0xa10   : > { %12872 = vmatpush1.bf16.msra.mxu1 %v17232_v30  ;;  %v17150_v30 = vcombine.low %v11296_v0, %v11300_v43  ;;  %v11203_v42 = vld [vmem:[#allocation10 + $0x3f0] sm:$0xff]  ;;  %v11332_v55 = vld [vmem:[#allocation10 + $0x7e8] sm:$0xff]  ;;  %v12961_v43 = vld [vmem:[#allocation10 + $0x880] sm:$0xff] }
 0xa11   : > { %12873 = vmatprep.subr.bf16.mxu1 %v17241_v60  ;;  %v17159_v60 = vcombine.high %v11304_v4, %v11308_v17  ;;  %v11209_v38 = vld [vmem:[#allocation10 + $0x410] sm:$0xff] }
 0xa12   : > { %12027 = vmatpush1.bf16.msra.mxu0 %v17102_v2  ;;  %v17288_v2 = vcombine.low %v11175_v54, %v11179_v24  ;;  %v11213_v34 = vld [vmem:[#allocation10 + $0x430] sm:$0xff]  ;;  %v17324_v54 = vcombine.low %v12953_v48, %v12957_v61 }
 0xa13   : > { %12028 = vmatprep.subr.bf16.mxu0 %v17111_v57  ;;  %v17297_v57 = vcombine.high %v11183_v41, %v11187_v28  ;;  %v11217_v29 = vld [vmem:[#allocation10 + $0x450] sm:$0xff]  ;;  %v17064_v0 = vcombine.low %v11209_v38, %v11213_v34 }
 0xa14   : > { %12874 = vmatpush1.bf16.msra.mxu1 %v17240_v39  ;;  %v17158_v39 = vcombine.low %v11304_v4, %v11308_v17  ;;  %v11221_v6 = vld [vmem:[#allocation10 + $0x470] sm:$0xff]  ;;  %v12969_v4 = vld [vmem:[#allocation10 + $0x8c0] sm:$0xff] }
 0xa15   : > { %12875 = vmatprep.subr.bf16.mxu1 %v17249_v27  ;;  %v17167_v27 = vcombine.high %v11312_v52, %v11316_v1  ;;  %v11225_v24 = vld [vmem:[#allocation10 + $0x490] sm:$0xff]  ;;  %v12973_v17 = vld [vmem:[#allocation10 + $0x8e0] sm:$0xff] }
 0xa16   : > { %12029 = vmatpush1.bf16.msra.mxu0 %v17110_v50  ;;  %v17296_v50 = vcombine.low %v11183_v41, %v11187_v28  ;;  %v11233_v41 = vld [vmem:[#allocation10 + $0x4d0] sm:$0xff] }
 0xa17   : > { %12030 = vmatprep.subr.bf16.mxu0 %v17119_v8  ;;  %v17305_v8 = vcombine.high %v11191_v35, %v11195_v63  ;;  %v11237_v28 = vld [vmem:[#allocation10 + $0x4f0] sm:$0xff] }
 0xa18   : > { %12876 = vmatpush1.bf16.msra.mxu1 %v17248_v3  ;;  %v17166_v3 = vcombine.low %v11312_v52, %v11316_v1  ;;  %v12977_v52 = vld [vmem:[#allocation10 + $0x900] sm:$0xff] }
 0xa19   : > { %12877 = vmatprep.subr.bf16.mxu1 %v17257_v13  ;;  %v17175_v13 = vcombine.high %v11320_v46, %v11324_v47  ;;  %v12981_v1 = vld [vmem:[#allocation10 + $0x920] sm:$0xff] }
 0xa1a   : > { %12031 = vmatpush1.bf16.msra.mxu0 %v17118_v20  ;;  %v17304_v20 = vcombine.low %v11191_v35, %v11195_v63  ;;  %v11241_v35 = vld [vmem:[#allocation10 + $0x510] sm:$0xff] }
 0xa1b   : > { %12032 = vmatprep.subr.bf16.mxu0 %v17127_v45  ;;  %v17313_v45 = vcombine.high %v11199_v25, %v11203_v42  ;;  %v11245_v63 = vld [vmem:[#allocation10 + $0x530] sm:$0xff] }
 0xa1c   : > { %12878 = vmatpush1.bf16.msra.mxu1 %v17256_v11  ;;  %v17174_v11 = vcombine.low %v11320_v46, %v11324_v47  ;;  %v12985_v46 = vld [vmem:[#allocation10 + $0x940] sm:$0xff] }
 0xa1d   : > { %12879 = vmatprep.subr.bf16.mxu1 %v17265_v12  ;;  %v17183_v12 = vcombine.high %v11328_v7, %v11332_v55  ;;  %v12989_v47 = vld [vmem:[#allocation10 + $0x960] sm:$0xff] }
 0xa1e   : > { %12033 = vmatpush1.bf16.msra.mxu0 %v17126_v49  ;;  %v17312_v49 = vcombine.low %v11199_v25, %v11203_v42  ;;  %v11249_v25 = vld [vmem:[#allocation10 + $0x550] sm:$0xff] }
 0xa1f   : > { %12034 = vmatprep.subr.bf16.mxu0 %v17135_v18  ;;  %v17317_v18 = vcombine.high %v12945_v9, %v12949_v21  ;;  %v11253_v42 = vld [vmem:[#allocation10 + $0x570] sm:$0xff] }
 0xa20   : > { %12880 = vmatpush1.bf16.msra.mxu1 %v17264_v37  ;;  %v17182_v37 = vcombine.low %v11328_v7, %v11332_v55  ;;  %v12993_v7 = vld [vmem:[#allocation10 + $0x980] sm:$0xff] }
 0xa21   : > { %12881 = vmatprep.subr.bf16.mxu1 %v17273_v40  ;;  %v17065_v40 = vcombine.high %v11209_v38, %v11213_v34  ;;  %v12997_v55 = vld [vmem:[#allocation10 + $0x9a0] sm:$0xff] }
 0xa22   : > { %12035 = vmatpush1.bf16.msra.mxu0 %v17134_v58  ;;  %v17316_v58 = vcombine.low %v12945_v9, %v12949_v21  ;;  %v11257_v9 = vld [vmem:[#allocation10 + $0x590] sm:$0xff]  ;;  %v13001_v38 = vld [vmem:[#allocation10 + $0x9c0] sm:$0xff] }
 0xa23   : > { %12036 = vmatprep.subr.bf16.mxu0 %v17143_v32  ;;  %v17325_v32 = vcombine.high %v12953_v48, %v12957_v61  ;;  %v11261_v21 = vld [vmem:[#allocation10 + $0x5b0] sm:$0xff]  ;;  %v13005_v34 = vld [vmem:[#allocation10 + $0x9e0] sm:$0xff] }
 0xa24   : > { %12882 = vmatpush1.bf16.msra.mxu1 %v17272_v56  ;;  %v24091_v56 = vpack.c.bf16 %v24077_v19, %v24077_v19  ;;  %v17072_v19 = vcombine.low %v11217_v29, %v11221_v6  ;;  %v11265_v48 = vld [vmem:[#allocation10 + $0x5d0] sm:$0xff] }
 0xa25   : > { %12883 = vmatprep.subr.bf16.mxu1 %v17281_v23  ;;  %v12965_v23 = vld [vmem:[#allocation10 + $0x8a0] sm:$0xff]  ;;  %v11269_v61 = vld [vmem:[#allocation10 + $0x5f0] sm:$0xff] }
 0xa26   : > { %12037 = vmatpush1.bf16.msra.mxu0 %v17142_v53  ;;  %v17073_v53 = vcombine.high %v11217_v29, %v11221_v6  ;;  %v13009_v29 = vld [vmem:[#allocation10 + $0xa00] sm:$0xff] }
 0xa27   : > { %12038 = vmatprep.subr.bf16.mxu0 %v17151_v31  ;;  %v11229_v31 = vld [vmem:[#allocation10 + $0x4b0] sm:$0xff]  ;;  %v13013_v6 = vld [vmem:[#allocation10 + $0xa20] sm:$0xff] }
 0xa28   : > { %12884 = vmatpush1.bf16.msra.mxu1 %v17280_v16  ;;  %v17333_v16 = vcombine.high %v12961_v43, %v12965_v23 }
 0xa29   : > { %12885 = vmatprep.subr.bf16.mxu1 %v17289_v62  ;;  %v17081_v62 = vcombine.high %v11225_v24, %v11229_v31 }
 0xa2a   : > { %12039 = vmatpush1.bf16.msra.mxu0 %v17150_v30  ;;  %v17332_v30 = vcombine.low %v12961_v43, %v12965_v23  ;;  %v11273_v43 = vld [vmem:[#allocation10 + $0x610] sm:$0xff] }
 0xa2b   : > { %12040 = vmatprep.subr.bf16.mxu0 %v17159_v60  ;;  %v17341_v60 = vcombine.high %v12969_v4, %v12973_v17  ;;  %v11277_v23 = vld [vmem:[#allocation10 + $0x630] sm:$0xff] }
 0xa2c   : > { %12886 = vmatpush1.bf16.msra.mxu1 %v17288_v2  ;;  %v17080_v2 = vcombine.low %v11225_v24, %v11229_v31  ;;  %v13017_v24 = vld [vmem:[#allocation10 + $0xa40] sm:$0xff] }
 0xa2d   : > { %12887 = vmatprep.subr.bf16.mxu1 %v17297_v57  ;;  %v17089_v57 = vcombine.high %v11233_v41, %v11237_v28  ;;  %v13021_v31 = vld [vmem:[#allocation10 + $0xa60] sm:$0xff] }
 0xa2e   : > { %12041 = vmatpush1.bf16.msra.mxu0 %v17158_v39  ;;  %v17340_v39 = vcombine.low %v12969_v4, %v12973_v17  ;;  %v11281_v4 = vld [vmem:[#allocation10 + $0x650] sm:$0xff] }
 0xa2f   : > { %12042 = vmatprep.subr.bf16.mxu0 %v17167_v27  ;;  %v17349_v27 = vcombine.high %v12977_v52, %v12981_v1  ;;  %v11285_v17 = vld [vmem:[#allocation10 + $0x670] sm:$0xff] }
 0xa30   : > { %12888 = vmatpush1.bf16.msra.mxu1 %v17296_v50  ;;  %v17088_v50 = vcombine.low %v11233_v41, %v11237_v28  ;;  %v13025_v41 = vld [vmem:[#allocation10 + $0xa80] sm:$0xff] }
 0xa31   : > { %12889 = vmatprep.subr.bf16.mxu1 %v17305_v8  ;;  %v17097_v8 = vcombine.high %v11241_v35, %v11245_v63  ;;  %v13029_v28 = vld [vmem:[#allocation10 + $0xaa0] sm:$0xff] }
 0xa32   : > { %12043 = vmatpush1.bf16.msra.mxu0 %v17166_v3  ;;  %v17348_v3 = vcombine.low %v12977_v52, %v12981_v1  ;;  %v11289_v52 = vld [vmem:[#allocation10 + $0x690] sm:$0xff] }
 0xa33   : > { %12044 = vmatprep.subr.bf16.mxu0 %v17175_v13  ;;  %v17357_v13 = vcombine.high %v12985_v46, %v12989_v47  ;;  %v11293_v1 = vld [vmem:[#allocation10 + $0x6b0] sm:$0xff] }
 0xa34   : > { %12890 = vmatpush1.bf16.msra.mxu1 %v17304_v20  ;;  %v17096_v20 = vcombine.low %v11241_v35, %v11245_v63  ;;  %v13033_v35 = vld [vmem:[#allocation10 + $0xac0] sm:$0xff] }
 0xa35   : > { %12891 = vmatprep.subr.bf16.mxu1 %v17313_v45  ;;  %v17105_v45 = vcombine.high %v11249_v25, %v11253_v42  ;;  %v13037_v63 = vld [vmem:[#allocation10 + $0xae0] sm:$0xff] }
 0xa36   : > { %12045 = vmatpush1.bf16.msra.mxu0 %v17174_v11  ;;  %v17356_v11 = vcombine.low %v12985_v46, %v12989_v47  ;;  %v11297_v46 = vld [vmem:[#allocation10 + $0x6d0] sm:$0xff] }
 0xa37   : > { %12046 = vmatprep.subr.bf16.mxu0 %v17183_v12  ;;  %v17365_v12 = vcombine.high %v12993_v7, %v12997_v55  ;;  %v11301_v47 = vld [vmem:[#allocation10 + $0x6f0] sm:$0xff] }
 0xa38   : > { %12892 = vmatpush1.bf16.msra.mxu1 %v17312_v49  ;;  %v17104_v49 = vcombine.low %v11249_v25, %v11253_v42  ;;  %v13041_v25 = vld [vmem:[#allocation10 + $0xb00] sm:$0xff] }
 0xa39   : > { %13713 = vmatprep.subr.bf16.mxu1 %v17317_v18  ;;  %v17113_v18 = vcombine.high %v11257_v9, %v11261_v21  ;;  %v13045_v42 = vld [vmem:[#allocation10 + $0xb20] sm:$0xff] }
 0xa3a   : > { %12047 = vmatpush1.bf16.msra.mxu0 %v17182_v37  ;;  %v17364_v37 = vcombine.low %v12993_v7, %v12997_v55  ;;  %v11305_v7 = vld [vmem:[#allocation10 + $0x710] sm:$0xff] }
 0xa3b   : > { %12894 = vmatmul.mubr.bf16.vlgmr.msra.gmra.mrb[104].mxu1 %v24059_v44  ;;  %12057 = vmatprep.subr.bf16.mxu0 %v17065_v40  ;;  %v17373_v40 = vcombine.high %v13001_v38, %v13005_v34  ;;  %v11309_v55 = vld [vmem:[#allocation10 + $0x730] sm:$0xff] }
 0xa3c   : > { %13714 = vmatpush1.bf16.msra.mxu1 %v17316_v58  ;;  %13745 = vmatprep.mubr.bf16.mxu1 %v24091_v56  ;;  %v17112_v58 = vcombine.low %v11257_v9, %v11261_v21  ;;  %v13049_v9 = vld [vmem:[#allocation10 + $0xb40] sm:$0xff] }
 0xa3d   : > { %12049 = vmatmul.mubr.bf16.vlgmr.msra.gmra.mrb[92].mxu0 %v24064_v59  ;;  %13715 = vmatprep.subr.bf16.mxu1 %v17325_v32  ;;  %v17121_v32 = vcombine.high %v11265_v48, %v11269_v61  ;;  %v13053_v21 = vld [vmem:[#allocation10 + $0xb60] sm:$0xff] }
 0xa3e   : > { %12058 = vmatpush1.bf16.msra.mxu0 %v17064_v0  ;;  %12089 = vmatprep.mubr.bf16.mxu0 %v24062_v26  ;;  %v17372_v0 = vcombine.low %v13001_v38, %v13005_v34  ;;  %v11313_v38 = vld [vmem:[#allocation10 + $0x750] sm:$0xff] }
 0xa3f   : > { %12059 = vmatprep.subr.bf16.mxu0 %v17073_v53  ;;  %v17381_v53 = vcombine.high %v13009_v29, %v13013_v6  ;;  %v11317_v34 = vld [vmem:[#allocation10 + $0x770] sm:$0xff] }
 0xa40   : > { %13716 = vmatpush1.bf16.msra.mxu1 %v17324_v54  ;;  %v17120_v54 = vcombine.low %v11265_v48, %v11269_v61  ;;  %v13057_v48 = vld [vmem:[#allocation10 + $0xb80] sm:$0xff] }
 0xa41   : > { %13717 = vmatprep.subr.bf16.mxu1 %v17333_v16  ;;  %v17129_v16 = vcombine.high %v11273_v43, %v11277_v23  ;;  %v13061_v61 = vld [vmem:[#allocation10 + $0xba0] sm:$0xff] }
 0xa42   : > { %12060 = vmatpush1.bf16.msra.mxu0 %v17072_v19  ;;  %v17380_v19 = vcombine.low %v13009_v29, %v13013_v6  ;;  %v11321_v29 = vld [vmem:[#allocation10 + $0x790] sm:$0xff] }
 0xa43   : > { %12061 = vmatprep.subr.bf16.mxu0 %v17081_v62  ;;  %v17389_v62 = vcombine.high %v13017_v24, %v13021_v31  ;;  %v11325_v6 = vld [vmem:[#allocation10 + $0x7b0] sm:$0xff] }
 0xa44   : > { %13718 = vmatpush1.bf16.msra.mxu1 %v17332_v30  ;;  %v17128_v30 = vcombine.low %v11273_v43, %v11277_v23  ;;  %v13065_v43 = vld [vmem:[#allocation10 + $0xbc0] sm:$0xff] }
 0xa45   : > { %13719 = vmatprep.subr.bf16.mxu1 %v17341_v60  ;;  %v17137_v60 = vcombine.high %v11281_v4, %v11285_v17  ;;  %v13069_v23 = vld [vmem:[#allocation10 + $0xbe0] sm:$0xff] }
 0xa46   : > { %12062 = vmatpush1.bf16.msra.mxu0 %v17080_v2  ;;  %v17388_v2 = vcombine.low %v13017_v24, %v13021_v31  ;;  %v11329_v24 = vld [vmem:[#allocation10 + $0x7d0] sm:$0xff] }
 0xa47   : > { %12063 = vmatprep.subr.bf16.mxu0 %v17089_v57  ;;  %v17397_v57 = vcombine.high %v13025_v41, %v13029_v28  ;;  %v11333_v31 = vld [vmem:[#allocation10 + $0x7f0] sm:$0xff] }
 0xa48   : > { %13720 = vmatpush1.bf16.msra.mxu1 %v17340_v39  ;;  %v17136_v39 = vcombine.low %v11281_v4, %v11285_v17  ;;  %v12947_v4 = vld [vmem:[#allocation10 + $0x810] sm:$0xff] }
 0xa49   : > { %13721 = vmatprep.subr.bf16.mxu1 %v17349_v27  ;;  %v17145_v27 = vcombine.high %v11289_v52, %v11293_v1  ;;  %v12951_v17 = vld [vmem:[#allocation10 + $0x830] sm:$0xff] }
 0xa4a   : > { %12064 = vmatpush1.bf16.msra.mxu0 %v17088_v50  ;;  %v17396_v50 = vcombine.low %v13025_v41, %v13029_v28  ;;  %v11210_v41 = vld [vmem:[#allocation10 + $0x418] sm:$0xff] }
 0xa4b   : > { %12065 = vmatprep.subr.bf16.mxu0 %v17097_v8  ;;  %v17405_v8 = vcombine.high %v13033_v35, %v13037_v63  ;;  %v11214_v28 = vld [vmem:[#allocation10 + $0x438] sm:$0xff] }
 0xa4c   : > { %13722 = vmatpush1.bf16.msra.mxu1 %v17348_v3  ;;  %v17144_v3 = vcombine.low %v11289_v52, %v11293_v1  ;;  %v12955_v52 = vld [vmem:[#allocation10 + $0x850] sm:$0xff] }
 0xa4d   : > { %13723 = vmatprep.subr.bf16.mxu1 %v17357_v13  ;;  %v17153_v13 = vcombine.high %v11297_v46, %v11301_v47  ;;  %v12959_v1 = vld [vmem:[#allocation10 + $0x870] sm:$0xff] }
 0xa4e   : > { %12066 = vmatpush1.bf16.msra.mxu0 %v17096_v20  ;;  %v17404_v20 = vcombine.low %v13033_v35, %v13037_v63  ;;  %v11218_v35 = vld [vmem:[#allocation10 + $0x458] sm:$0xff] }
 0xa4f   : > { %12067 = vmatprep.subr.bf16.mxu0 %v17105_v45  ;;  %v17413_v45 = vcombine.high %v13041_v25, %v13045_v42  ;;  %v11222_v63 = vld [vmem:[#allocation10 + $0x478] sm:$0xff] }
 0xa50   : > { %13724 = vmatpush1.bf16.msra.mxu1 %v17356_v11  ;;  %v17152_v11 = vcombine.low %v11297_v46, %v11301_v47  ;;  %v17066_v46 = vcombine.low %v11210_v41, %v11214_v28  ;;  %v12963_v47 = vld [vmem:[#allocation10 + $0x890] sm:$0xff] }
 0xa51   : > { %13725 = vmatprep.subr.bf16.mxu1 %v17365_v12  ;;  %v17161_v12 = vcombine.high %v11305_v7, %v11309_v55 }
 0xa52   : > { %12068 = vmatpush1.bf16.msra.mxu0 %v17104_v49  ;;  %v17412_v49 = vcombine.low %v13041_v25, %v13045_v42  ;;  %v17328_v25 = vcombine.low %v12955_v52, %v12959_v1  ;;  %v11226_v42 = vld [vmem:[#allocation10 + $0x498] sm:$0xff] }
 0xa53   : > { %12069 = vmatprep.subr.bf16.mxu0 %v17113_v18  ;;  %v17421_v18 = vcombine.high %v13049_v9, %v13053_v21 }
 0xa54   : > { %13726 = vmatpush1.bf16.msra.mxu1 %v17364_v37  ;;  %v17160_v37 = vcombine.low %v11305_v7, %v11309_v55  ;;  %v12971_v7 = vld [vmem:[#allocation10 + $0x8d0] sm:$0xff] }
 0xa55   : > { %13727 = vmatprep.subr.bf16.mxu1 %v17373_v40  ;;  %v17169_v40 = vcombine.high %v11313_v38, %v11317_v34  ;;  %v12975_v55 = vld [vmem:[#allocation10 + $0x8f0] sm:$0xff] }
 0xa56   : > { %12070 = vmatpush1.bf16.msra.mxu0 %v17112_v58  ;;  %v17420_v58 = vcombine.low %v13049_v9, %v13053_v21  ;;  %v11234_v9 = vld [vmem:[#allocation10 + $0x4d8] sm:$0xff] }
 0xa57   : > { %12071 = vmatprep.subr.bf16.mxu0 %v17121_v32  ;;  %v17429_v32 = vcombine.high %v13057_v48, %v13061_v61  ;;  %v11238_v21 = vld [vmem:[#allocation10 + $0x4f8] sm:$0xff] }
 0xa58   : > { %13728 = vmatpush1.bf16.msra.mxu1 %v17372_v0  ;;  %v17168_v0 = vcombine.low %v11313_v38, %v11317_v34  ;;  %v12979_v38 = vld [vmem:[#allocation10 + $0x910] sm:$0xff] }
 0xa59   : > { %13729 = vmatprep.subr.bf16.mxu1 %v17381_v53  ;;  %v17177_v53 = vcombine.high %v11321_v29, %v11325_v6  ;;  %v12983_v34 = vld [vmem:[#allocation10 + $0x930] sm:$0xff] }
 0xa5a   : > { %12072 = vmatpush1.bf16.msra.mxu0 %v17120_v54  ;;  %v17428_v54 = vcombine.low %v13057_v48, %v13061_v61  ;;  %v11246_v48 = vld [vmem:[#allocation10 + $0x538] sm:$0xff]  ;;  %v17353_v61 = vcombine.high %v12979_v38, %v12983_v34 }
 0xa5b   : > { %12073 = vmatprep.subr.bf16.mxu0 %v17129_v16  ;;  %v17437_v16 = vcombine.high %v13065_v43, %v13069_v23 }
 0xa5c   : > { %13730 = vmatpush1.bf16.msra.mxu1 %v17380_v19  ;;  %v17176_v19 = vcombine.low %v11321_v29, %v11325_v6  ;;  %v12991_v29 = vld [vmem:[#allocation10 + $0x970] sm:$0xff] }
 0xa5d   : > { %13731 = vmatprep.subr.bf16.mxu1 %v17389_v62  ;;  %v17185_v62 = vcombine.high %v11329_v24, %v11333_v31 }
 0xa5e   : > { %12074 = vmatpush1.bf16.msra.mxu0 %v17128_v30  ;;  %v17436_v30 = vcombine.low %v13065_v43, %v13069_v23  ;;  %v11254_v43 = vld [vmem:[#allocation10 + $0x578] sm:$0xff] }
 0xa5f   : > { %12075 = vmatprep.subr.bf16.mxu0 %v17137_v60  ;;  %v17321_v60 = vcombine.high %v12947_v4, %v12951_v17 }
 0xa60   : > { %13732 = vmatpush1.bf16.msra.mxu1 %v17388_v2  ;;  %v17184_v2 = vcombine.low %v11329_v24, %v11333_v31  ;;  %v12999_v24 = vld [vmem:[#allocation10 + $0x9b0] sm:$0xff] }
 0xa61   : > { %13733 = vmatprep.subr.bf16.mxu1 %v17397_v57  ;;  %v17067_v57 = vcombine.high %v11210_v41, %v11214_v28  ;;  %v13007_v41 = vld [vmem:[#allocation10 + $0x9f0] sm:$0xff] }
 0xa62   : > { %12076 = vmatpush1.bf16.msra.mxu0 %v17136_v39  ;;  %v17320_v39 = vcombine.low %v12947_v4, %v12951_v17  ;;  %v11262_v4 = vld [vmem:[#allocation10 + $0x5b8] sm:$0xff] }
 0xa63   : > { %12077 = vmatprep.subr.bf16.mxu0 %v17145_v27  ;;  %v24099_v27 = vpack.c.bf16 %v24072_v22, %v24072_v22 }
 0xa64   : > { %13734 = vmatpush1.bf16.msra.mxu1 %v17396_v50  ;;  %v17329_v50 = vcombine.high %v12955_v52, %v12959_v1  ;;  %v11270_v52 = vld [vmem:[#allocation10 + $0x5f8] sm:$0xff] }
 0xa65   : > { %13735 = vmatprep.subr.bf16.mxu1 %v17405_v8  ;;  %v12967_v8 = vld [vmem:[#allocation10 + $0x8b0] sm:$0xff] }
 0xa66   : > { %12078 = vmatpush1.bf16.msra.mxu0 %v17144_v3  ;;  %v17075_v3 = vcombine.high %v11218_v35, %v11222_v63  ;;  %v17337_v22 = vcombine.high %v12963_v47, %v12967_v8 }
 0xa67   : > { %12079 = vmatprep.subr.bf16.mxu0 %v17153_v13  ;;  %v11230_v13 = vld [vmem:[#allocation10 + $0x4b8] sm:$0xff] }
 0xa68   : > { %13736 = vmatpush1.bf16.msra.mxu1 %v17404_v20  ;;  %v17074_v20 = vcombine.low %v11218_v35, %v11222_v63  ;;  %v13015_v35 = vld [vmem:[#allocation10 + $0xa30] sm:$0xff] }
 0xa69   : > { %13737 = vmatprep.subr.bf16.mxu1 %v17413_v45  ;;  %v17083_v45 = vcombine.high %v11226_v42, %v11230_v13 }
 0xa6a   : > { %12080 = vmatpush1.bf16.msra.mxu0 %v17152_v11  ;;  %v17336_v11 = vcombine.low %v12963_v47, %v12967_v8  ;;  %v11278_v47 = vld [vmem:[#allocation10 + $0x638] sm:$0xff] }
 0xa6b   : > { %12081 = vmatprep.subr.bf16.mxu0 %v17161_v12  ;;  %v17345_v12 = vcombine.high %v12971_v7, %v12975_v55 }
 0xa6c   : > { %13738 = vmatpush1.bf16.msra.mxu1 %v17412_v49  ;;  %v17082_v49 = vcombine.low %v11226_v42, %v11230_v13  ;;  %v13023_v42 = vld [vmem:[#allocation10 + $0xa70] sm:$0xff] }
 0xa6d   : > { %13739 = vmatprep.subr.bf16.mxu1 %v17421_v18  ;;  %v17091_v18 = vcombine.high %v11234_v9, %v11238_v21 }
 0xa6e   : > { %12082 = vmatpush1.bf16.msra.mxu0 %v17160_v37  ;;  %v17344_v37 = vcombine.low %v12971_v7, %v12975_v55  ;;  %v11286_v7 = vld [vmem:[#allocation10 + $0x678] sm:$0xff] }
 0xa6f   : > { %12083 = vmatprep.subr.bf16.mxu0 %v17169_v40  ;;  %v17090_v40 = vcombine.low %v11234_v9, %v11238_v21  ;;  %v13031_v9 = vld [vmem:[#allocation10 + $0xab0] sm:$0xff] }
 0xa70   : > { %13740 = vmatpush1.bf16.msra.mxu1 %v17420_v58  ;;  %v12987_v58 = vld [vmem:[#allocation10 + $0x950] sm:$0xff] }
 0xa71   : > { %13741 = vmatprep.subr.bf16.mxu1 %v17429_v32  ;;  %v17352_v32 = vcombine.low %v12979_v38, %v12983_v34  ;;  %v17361_v23 = vcombine.high %v12987_v58, %v12991_v29  ;;  %v11294_v38 = vld [vmem:[#allocation10 + $0x6b8] sm:$0xff] }
 0xa72   : > { %12084 = vmatpush1.bf16.msra.mxu0 %v17168_v0  ;;  %v11250_v0 = vld [vmem:[#allocation10 + $0x558] sm:$0xff] }
 0xa73   : > { %12085 = vmatprep.subr.bf16.mxu0 %v17177_v53  ;;  %v17107_v31 = vcombine.high %v11250_v0, %v11254_v43 }
 0xa74   : > { %13742 = vmatpush1.bf16.msra.mxu1 %v17428_v54  ;;  %v12995_v54 = vld [vmem:[#allocation10 + $0x990] sm:$0xff] }
 0xa75   : > { %13743 = vmatprep.subr.bf16.mxu1 %v17437_v16  ;;  %v17360_v16 = vcombine.low %v12987_v58, %v12991_v29  ;;  %v17369_v17 = vcombine.high %v12995_v54, %v12999_v24  ;;  %v11302_v58 = vld [vmem:[#allocation10 + $0x6f8] sm:$0xff] }
 0xa76   : > { %12086 = vmatpush1.bf16.msra.mxu0 %v17176_v19  ;;  %v11258_v19 = vld [vmem:[#allocation10 + $0x598] sm:$0xff] }
 0xa77   : > { %12087 = vmatprep.subr.bf16.mxu0 %v17185_v62  ;;  %v17106_v62 = vcombine.low %v11250_v0, %v11254_v43  ;;  %v17115_v28 = vcombine.high %v11258_v19, %v11262_v4  ;;  %v13047_v0 = vld [vmem:[#allocation10 + $0xb30] sm:$0xff] }
 0xa78   : > { %13744 = vmatpush1.bf16.msra.mxu1 %v17436_v30  ;;  %v13003_v30 = vld [vmem:[#allocation10 + $0x9d0] sm:$0xff] }
 0xa79   : > { %13795 = vmatprep.subr.bf16.mxu1 %v17321_v60  ;;  %v17368_v60 = vcombine.low %v12995_v54, %v12999_v24  ;;  %v17377_v1 = vcombine.high %v13003_v30, %v13007_v41  ;;  %v11310_v54 = vld [vmem:[#allocation10 + $0x738] sm:$0xff] }
 0xa7a   : > { %12088 = vmatpush1.bf16.msra.mxu0 %v17184_v2  ;;  %v11266_v2 = vld [vmem:[#allocation10 + $0x5d8] sm:$0xff] }
 0xa7b   : > { %13746 = vmatmul.mubr.bf16.vlgmr.msra.gmra.mrb[108].mxu1 %v24099_v27  ;;  %12098 = vmatprep.subr.bf16.mxu0 %v17067_v57  ;;  %v17114_v57 = vcombine.low %v11258_v19, %v11262_v4  ;;  %v17123_v63 = vcombine.high %v11266_v2, %v11270_v52  ;;  %v13055_v19 = vld [vmem:[#allocation10 + $0xb70] sm:$0xff] }
 0xa7c   : > { %13796 = vmatpush1.bf16.msra.mxu1 %v17320_v39  ;;  %13827 = vmatprep.mubr.bf16.mxu1 %v24091_v56  ;;  %v13011_v39 = vld [vmem:[#allocation10 + $0xa10] sm:$0xff] }
 0xa7d   : > { %12090 = vmatmul.mubr.bf16.vlgmr.msra.gmra.mrb[96].mxu0 %v24064_v59  ;;  %13797 = vmatprep.subr.bf16.mxu1 %v17329_v50  ;;  %v17376_v50 = vcombine.low %v13003_v30, %v13007_v41  ;;  %v17385_v8 = vcombine.high %v13011_v39, %v13015_v35  ;;  %v11318_v30 = vld [vmem:[#allocation10 + $0x778] sm:$0xff] }
 0xa7e   : > { %12099 = vmatpush1.bf16.msra.mxu0 %v17066_v46  ;;  %12130 = vmatprep.mubr.bf16.mxu0 %v24062_v26  ;;  %v11242_v26 = vld [vmem:[#allocation10 + $0x518] sm:$0xff] }
 0xa7f   : > { %12100 = vmatprep.subr.bf16.mxu0 %v17075_v3  ;;  %v17099_v6 = vcombine.high %v11242_v26, %v11246_v48  ;;  %v17098_v53 = vcombine.low %v11242_v26, %v11246_v48  ;;  %v11274_v46 = vld [vmem:[#allocation10 + $0x618] sm:$0xff]  ;;  %v17122_v3 = vcombine.low %v11266_v2, %v11270_v52  ;;  %v13039_v26 = vld [vmem:[#allocation10 + $0xaf0] sm:$0xff] }
 0xa80   : > { %13798 = vmatpush1.bf16.msra.mxu1 %v17328_v25  ;;  %v13019_v25 = vld [vmem:[#allocation10 + $0xa50] sm:$0xff]  ;;  %v17131_v13 = vcombine.high %v11274_v46, %v11278_v47 }
 0xa81   : > { %13799 = vmatprep.subr.bf16.mxu1 %v17337_v22  ;;  %v17384_v22 = vcombine.low %v13011_v39, %v13015_v35  ;;  %v17393_v55 = vcombine.high %v13019_v25, %v13023_v42  ;;  %v13063_v2 = vld [vmem:[#allocation10 + $0xbb0] sm:$0xff]  ;;  %v11326_v39 = vld [vmem:[#allocation10 + $0x7b8] sm:$0xff] }
 0xa82   : > { %12101 = vmatpush1.bf16.msra.mxu0 %v17074_v20  ;;  %v11282_v20 = vld [vmem:[#allocation10 + $0x658] sm:$0xff] }
 0xa83   : > { %12102 = vmatprep.subr.bf16.mxu0 %v17083_v45  ;;  %v17130_v45 = vcombine.low %v11274_v46, %v11278_v47  ;;  %v17139_v21 = vcombine.high %v11282_v20, %v11286_v7  ;;  %v13071_v46 = vld [vmem:[#allocation10 + $0xbf0] sm:$0xff] }
 0xa84   : > { %13800 = vmatpush1.bf16.msra.mxu1 %v17336_v11  ;;  %v13027_v11 = vld [vmem:[#allocation10 + $0xa90] sm:$0xff] }
 0xa85   : > { %13801 = vmatprep.subr.bf16.mxu1 %v17345_v12  ;;  %v17392_v12 = vcombine.low %v13019_v25, %v13023_v42  ;;  %v17401_v34 = vcombine.high %v13027_v11, %v13031_v9  ;;  %v11334_v25 = vld [vmem:[#allocation10 + $0x7f8] sm:$0xff] }
 0xa86   : > { %12103 = vmatpush1.bf16.msra.mxu0 %v17082_v49  ;;  %v11290_v49 = vld [vmem:[#allocation10 + $0x698] sm:$0xff] }
 0xa87   : > { %12104 = vmatprep.subr.bf16.mxu0 %v17091_v18  ;;  %v17138_v18 = vcombine.low %v11282_v20, %v11286_v7  ;;  %v17147_v48 = vcombine.high %v11290_v49, %v11294_v38  ;;  %v13891_v20 = vld [vmem:[#allocation10 + $0xc20] sm:$0xff] }
 0xa88   : > { %13802 = vmatpush1.bf16.msra.mxu1 %v17344_v37  ;;  %v13035_v37 = vld [vmem:[#allocation10 + $0xad0] sm:$0xff] }
 0xa89   : > { %13803 = vmatprep.subr.bf16.mxu1 %v17353_v61  ;;  %v17400_v61 = vcombine.low %v13027_v11, %v13031_v9  ;;  %v17409_v29 = vcombine.high %v13035_v37, %v13039_v26  ;;  %v11082_v11 = vld [vmem:[#allocation10 + $0x28] sm:$0xff] }
 0xa8a   : > { %12105 = vmatpush1.bf16.msra.mxu0 %v17090_v40  ;;  %v11298_v40 = vld [vmem:[#allocation10 + $0x6d8] sm:$0xff] }
 0xa8b   : > { %12106 = vmatprep.subr.bf16.mxu0 %v17099_v6  ;;  %v17146_v6 = vcombine.low %v11290_v49, %v11294_v38  ;;  %v17155_v43 = vcombine.high %v11298_v40, %v11302_v58  ;;  %v13899_v49 = vld [vmem:[#allocation10 + $0xc60] sm:$0xff] }
 0xa8c   : > { %13804 = vmatpush1.bf16.msra.mxu1 %v17352_v32  ;;  %v13043_v32 = vld [vmem:[#allocation10 + $0xb10] sm:$0xff] }
 0xa8d   : > { %13805 = vmatprep.subr.bf16.mxu1 %v17361_v23  ;;  %v17408_v23 = vcombine.low %v13035_v37, %v13039_v26  ;;  %v17417_v24 = vcombine.high %v13043_v32, %v13047_v0  ;;  %v11090_v37 = vld [vmem:[#allocation10 + $0x68] sm:$0xff] }
 0xa8e   : > { %12107 = vmatpush1.bf16.msra.mxu0 %v17098_v53  ;;  %v11306_v53 = vld [vmem:[#allocation10 + $0x718] sm:$0xff] }
 0xa8f   : > { %12108 = vmatprep.subr.bf16.mxu0 %v17107_v31  ;;  %v17154_v31 = vcombine.low %v11298_v40, %v11302_v58  ;;  %v17163_v4 = vcombine.high %v11306_v53, %v11310_v54  ;;  %v13903_v40 = vld [vmem:[#allocation10 + $0xc80] sm:$0xff] }
 0xa90   : > { %13806 = vmatpush1.bf16.msra.mxu1 %v17360_v16  ;;  %v13051_v16 = vld [vmem:[#allocation10 + $0xb50] sm:$0xff]  ;;  %v13907_v58 = vld [vmem:[#allocation10 + $0xca0] sm:$0xff] }
 0xa91   : > { %13807 = vmatprep.subr.bf16.mxu1 %v17369_v17  ;;  %v17416_v17 = vcombine.low %v13043_v32, %v13047_v0  ;;  %v17425_v41 = vcombine.high %v13051_v16, %v13055_v19  ;;  %v11094_v32 = vld [vmem:[#allocation10 + $0x88] sm:$0xff] }
 0xa92   : > { %12109 = vmatpush1.bf16.msra.mxu0 %v17106_v62  ;;  %v11314_v62 = vld [vmem:[#allocation10 + $0x758] sm:$0xff]  ;;  %v11098_v0 = vld [vmem:[#allocation10 + $0xa8] sm:$0xff] }
 0xa93   : > { %12110 = vmatprep.subr.bf16.mxu0 %v17115_v28  ;;  %v17162_v28 = vcombine.low %v11306_v53, %v11310_v54  ;;  %v17171_v52 = vcombine.high %v11314_v62, %v11318_v30  ;;  %v13915_v53 = vld [vmem:[#allocation10 + $0xce0] sm:$0xff]  ;;  %v17207_v54 = vcombine.high %v11094_v32, %v11098_v0 }
 0xa94   : > { %13808 = vmatpush1.bf16.msra.mxu1 %v17368_v60  ;;  %v13059_v60 = vld [vmem:[#allocation10 + $0xb90] sm:$0xff] }
 0xa95   : > { %13809 = vmatprep.subr.bf16.mxu1 %v17377_v1  ;;  %v17424_v1 = vcombine.low %v13051_v16, %v13055_v19  ;;  %v17433_v35 = vcombine.high %v13059_v60, %v13063_v2  ;;  %v11106_v16 = vld [vmem:[#allocation10 + $0xe8] sm:$0xff] }
 0xa96   : > { %12111 = vmatpush1.bf16.msra.mxu0 %v17114_v57  ;;  %v11322_v57 = vld [vmem:[#allocation10 + $0x798] sm:$0xff] }
 0xa97   : > { %12112 = vmatprep.subr.bf16.mxu0 %v17123_v63  ;;  %v17170_v63 = vcombine.low %v11314_v62, %v11318_v30  ;;  %v17179_v47 = vcombine.high %v11322_v57, %v11326_v39 }
 0xa98   : > { %13810 = vmatpush1.bf16.msra.mxu1 %v17376_v50  ;;  %v13067_v50 = vld [vmem:[#allocation10 + $0xbd0] sm:$0xff] }
 0xa99   : > { %13811 = vmatprep.subr.bf16.mxu1 %v17385_v8  ;;  %v17432_v8 = vcombine.low %v13059_v60, %v13063_v2  ;;  %v17441_v42 = vcombine.high %v13067_v50, %v13071_v46 }
 0xa9a   : > { %12113 = vmatpush1.bf16.msra.mxu0 %v17122_v3  ;;  %v11330_v3 = vld [vmem:[#allocation10 + $0x7d8] sm:$0xff] }
 0xa9b   : > { %12114 = vmatprep.subr.bf16.mxu0 %v17131_v13  ;;  %v17178_v13 = vcombine.low %v11322_v57, %v11326_v39  ;;  %v17187_v7 = vcombine.high %v11330_v3, %v11334_v25 }
 0xa9c   : > { %13812 = vmatpush1.bf16.msra.mxu1 %v17384_v22  ;;  %v13887_v22 = vld [vmem:[#allocation10 + $0xc00] sm:$0xff] }
 0xa9d   : > { %13813 = vmatprep.subr.bf16.mxu1 %v17393_v55  ;;  %v17440_v55 = vcombine.low %v13067_v50, %v13071_v46  ;;  %v17445_v9 = vcombine.high %v13887_v22, %v13891_v20 }
 0xa9e   : > { %12115 = vmatpush1.bf16.msra.mxu0 %v17130_v45  ;;  %v11078_v45 = vld [vmem:[#allocation10 + $0x8] sm:$0xff] }
 0xa9f   : > { %12116 = vmatprep.subr.bf16.mxu0 %v17139_v21  ;;  %v17186_v21 = vcombine.low %v11330_v3, %v11334_v25  ;;  %v17191_v38 = vcombine.high %v11078_v45, %v11082_v11 }
 0xaa0   : > { %13814 = vmatpush1.bf16.msra.mxu1 %v17392_v12  ;;  %v13895_v12 = vld [vmem:[#allocation10 + $0xc40] sm:$0xff] }
 0xaa1   : > { %13815 = vmatprep.subr.bf16.mxu1 %v17401_v34  ;;  %v17444_v34 = vcombine.low %v13887_v22, %v13891_v20  ;;  %v17453_v26 = vcombine.high %v13895_v12, %v13899_v49 }
 0xaa2   : > { %12117 = vmatpush1.bf16.msra.mxu0 %v17138_v18  ;;  %v11086_v18 = vld [vmem:[#allocation10 + $0x48] sm:$0xff] }
 0xaa3   : > { %12118 = vmatprep.subr.bf16.mxu0 %v17147_v48  ;;  %v24107_v48 = vpack.c.bf16 %v24087_v15, %v24087_v15  ;;  %v17198_v15 = vcombine.low %v11086_v18, %v11090_v37 }
 0xaa4   : > { %13816 = vmatpush1.bf16.msra.mxu1 %v17400_v61  ;;  %v17190_v61 = vcombine.low %v11078_v45, %v11082_v11  ;;  %v13947_v45 = vld [vmem:[#allocation10 + $0xde0] sm:$0xff] }
 0xaa5   : > { %13817 = vmatprep.subr.bf16.mxu1 %v17409_v29  ;;  %v17199_v29 = vcombine.high %v11086_v18, %v11090_v37 }
 0xaa6   : > { %12119 = vmatpush1.bf16.msra.mxu0 %v17146_v6  ;;  %v17452_v6 = vcombine.low %v13895_v12, %v13899_v49 }
 0xaa7   : > { %12120 = vmatprep.subr.bf16.mxu0 %v17155_v43  ;;  %v17461_v43 = vcombine.high %v13903_v40, %v13907_v58 }
 0xaa8   : > { %13818 = vmatpush1.bf16.msra.mxu1 %v17408_v23  ;;  %v13911_v23 = vld [vmem:[#allocation10 + $0xcc0] sm:$0xff] }
 0xaa9   : > { %13819 = vmatprep.subr.bf16.mxu1 %v17417_v24  ;;  %v17460_v24 = vcombine.low %v13903_v40, %v13907_v58  ;;  %v17469_v19 = vcombine.high %v13911_v23, %v13915_v53  ;;  %v17468_v30 = vcombine.low %v13911_v23, %v13915_v53  ;;  %v11142_v23 = vld [vmem:[#allocation10 + $0x208] sm:$0xff] }
 0xaaa   : > { %12121 = vmatpush1.bf16.msra.mxu0 %v17154_v31  ;;  %v11102_v31 = vld [vmem:[#allocation10 + $0xc8] sm:$0xff] }
 0xaab   : > { %12122 = vmatprep.subr.bf16.mxu0 %v17163_v4  ;;  %v17206_v4 = vcombine.low %v11094_v32, %v11098_v0  ;;  %v17215_v62 = vcombine.high %v11102_v31, %v11106_v16  ;;  %v17214_v2 = vcombine.low %v11102_v31, %v11106_v16  ;;  %v13955_v32 = vld [vmem:[#allocation10 + $0xe20] sm:$0xff]  ;;  %v11146_v53 = vld [vmem:[#allocation10 + $0x228] sm:$0xff] }
 0xaac   : > { %13820 = vmatpush1.bf16.msra.mxu1 %v17416_v17  ;;  %v13919_v17 = vld [vmem:[#allocation10 + $0xd00] sm:$0xff] }
 0xaad   : > { %13821 = vmatprep.subr.bf16.mxu1 %v17425_v41  ;;  %v11110_v41 = vld [vmem:[#allocation10 + $0x108] sm:$0xff]  ;;  %v13959_v31 = vld [vmem:[#allocation10 + $0xe40] sm:$0xff] }
 0xaae   : > { %12123 = vmatpush1.bf16.msra.mxu0 %v17162_v28  ;;  %v11114_v28 = vld [vmem:[#allocation10 + $0x128] sm:$0xff]  ;;  %v13963_v16 = vld [vmem:[#allocation10 + $0xe60] sm:$0xff] }
 0xaaf   : > { %12124 = vmatprep.subr.bf16.mxu0 %v17171_v52  ;;  %v13927_v52 = vld [vmem:[#allocation10 + $0xd40] sm:$0xff]  ;;  %v17223_v57 = vcombine.high %v11110_v41, %v11114_v28  ;;  %v17222_v46 = vcombine.low %v11110_v41, %v11114_v28 }
 0xab0   : > { %13822 = vmatpush1.bf16.msra.mxu1 %v17424_v1  ;;  %v13931_v1 = vld [vmem:[#allocation10 + $0xd60] sm:$0xff] }
 0xab1   : > { %13823 = vmatprep.subr.bf16.mxu1 %v17433_v35  ;;  %v11118_v35 = vld [vmem:[#allocation10 + $0x148] sm:$0xff]  ;;  %v17485_v50 = vcombine.high %v13927_v52, %v13931_v1  ;;  %v17484_v25 = vcombine.low %v13927_v52, %v13931_v1  ;;  %v13967_v41 = vld [vmem:[#allocation10 + $0xe80] sm:$0xff] }
 0xab2   : > { %12125 = vmatpush1.bf16.msra.mxu0 %v17170_v63  ;;  %v11122_v63 = vld [vmem:[#allocation10 + $0x168] sm:$0xff]  ;;  %v13971_v28 = vld [vmem:[#allocation10 + $0xea0] sm:$0xff] }
 0xab3   : > { %12126 = vmatprep.subr.bf16.mxu0 %v17179_v47  ;;  %v13935_v47 = vld [vmem:[#allocation10 + $0xd80] sm:$0xff]  ;;  %v17231_v3 = vcombine.high %v11118_v35, %v11122_v63  ;;  %v11158_v52 = vld [vmem:[#allocation10 + $0x288] sm:$0xff] }
 0xab4   : > { %13824 = vmatpush1.bf16.msra.mxu1 %v17432_v8  ;;  %v13939_v8 = vld [vmem:[#allocation10 + $0xda0] sm:$0xff]  ;;  %v11162_v1 = vld [vmem:[#allocation10 + $0x2a8] sm:$0xff] }
 0xab5   : > { %13825 = vmatprep.subr.bf16.mxu1 %v17441_v42  ;;  %v11126_v42 = vld [vmem:[#allocation10 + $0x188] sm:$0xff]  ;;  %v17493_v22 = vcombine.high %v13935_v47, %v13939_v8  ;;  %v17492_v49 = vcombine.low %v13935_v47, %v13939_v8 }
 0xab6   : > { %12127 = vmatpush1.bf16.msra.mxu0 %v17178_v13  ;;  %v11130_v13 = vld [vmem:[#allocation10 + $0x1a8] sm:$0xff] }
 0xab7   : > { %12128 = vmatprep.subr.bf16.mxu0 %v17187_v7  ;;  %v17230_v7 = vcombine.low %v11118_v35, %v11122_v63  ;;  %v13975_v35 = vld [vmem:[#allocation10 + $0xec0] sm:$0xff]  ;;  %v11166_v47 = vld [vmem:[#allocation10 + $0x2c8] sm:$0xff] }
 0xab8   : > { %13826 = vmatpush1.bf16.msra.mxu1 %v17440_v55  ;;  %v13943_v55 = vld [vmem:[#allocation10 + $0xdc0] sm:$0xff]  ;;  %v11170_v8 = vld [vmem:[#allocation10 + $0x2e8] sm:$0xff] }
 0xab9   : > { %14655 = vmatprep.subr.bf16.mxu1 %v17445_v9  ;;  %v17239_v9 = vcombine.high %v11126_v42, %v11130_v13  ;;  %v13979_v63 = vld [vmem:[#allocation10 + $0xee0] sm:$0xff] }
 0xaba   : > { %12129 = vmatpush1.bf16.msra.mxu0 %v17186_v21 }
 0xabb   : > { %13828 = vmatmul.mubr.bf16.vlgmr.msra.gmra.mrb[112].mxu1 %v24099_v27  ;;  %12820 = vmatprep.subr.bf16.mxu0 %v17191_v38  ;;  %v11134_v38 = vld [vmem:[#allocation10 + $0x1c8] sm:$0xff] }
 0xabc   : > { %14656 = vmatpush1.bf16.msra.mxu1 %v17444_v34  ;;  %14687 = vmatprep.mubr.bf16.mxu1 %v24107_v48  ;;  %v11138_v34 = vld [vmem:[#allocation10 + $0x1e8] sm:$0xff] }
 0xabd   : > { %12131 = vmatmul.mubr.bf16.vlgmr.msra.gmra.mrb[100].mxu0 %v24064_v59  ;;  %14657 = vmatprep.subr.bf16.mxu1 %v17453_v26  ;;  %v13923_v59 = vld [vmem:[#allocation10 + $0xd20] sm:$0xff] }
 0xabe   : > { %12821 = vmatpush1.bf16.msra.mxu0 %v17190_v61  ;;  %12852 = vmatprep.mubr.bf16.mxu0 %v24057_v10  ;;  %v17477_v60 = vcombine.high %v13919_v17, %v13923_v59  ;;  %v17476_v39 = vcombine.low %v13919_v17, %v13923_v59  ;;  %v17501_v61 = vcombine.high %v13943_v55, %v13947_v45  ;;  %v11150_v17 = vld [vmem:[#allocation10 + $0x248] sm:$0xff] }
 0xabf   : > { %12822 = vmatprep.subr.bf16.mxu0 %v17199_v29  ;;  %v17238_v29 = vcombine.low %v11126_v42, %v11130_v13  ;;  %v11154_v59 = vld [vmem:[#allocation10 + $0x268] sm:$0xff]  ;;  %v13983_v42 = vld [vmem:[#allocation10 + $0xf00] sm:$0xff] }
 0xac0   : > { %14658 = vmatpush1.bf16.msra.mxu1 %v17452_v6  ;;  %v13951_v6 = vld [vmem:[#allocation10 + $0xe00] sm:$0xff] }
 0xac1   : > { %14659 = vmatprep.subr.bf16.mxu1 %v17461_v43  ;;  %v17247_v43 = vcombine.high %v11134_v38, %v11138_v34  ;;  %v13987_v13 = vld [vmem:[#allocation10 + $0xf20] sm:$0xff] }
 0xac2   : > { %12823 = vmatpush1.bf16.msra.mxu0 %v17198_v15  ;;  %v17500_v15 = vcombine.low %v13943_v55, %v13947_v45  ;;  %v11178_v55 = vld [vmem:[#allocation10 + $0x328] sm:$0xff]  ;;  %v17541_v45 = vcombine.high %v13983_v42, %v13987_v13 }
 0xac3   : > { %12824 = vmatprep.subr.bf16.mxu0 %v17207_v54  ;;  %v17509_v54 = vcombine.high %v13951_v6, %v13955_v32 }
 0xac4   : > { %14660 = vmatpush1.bf16.msra.mxu1 %v17460_v24  ;;  %v17246_v24 = vcombine.low %v11134_v38, %v11138_v34  ;;  %v11182_v38 = vld [vmem:[#allocation10 + $0x348] sm:$0xff] }
 0xac5   : > { %14661 = vmatprep.subr.bf16.mxu1 %v17469_v19  ;;  %v17255_v19 = vcombine.high %v11142_v23, %v11146_v53  ;;  %v11186_v34 = vld [vmem:[#allocation10 + $0x368] sm:$0xff] }
 0xac6   : > { %12825 = vmatpush1.bf16.msra.mxu0 %v17206_v4  ;;  %v17508_v4 = vcombine.low %v13951_v6, %v13955_v32  ;;  %v11190_v32 = vld [vmem:[#allocation10 + $0x388] sm:$0xff] }
 0xac7   : > { %12826 = vmatprep.subr.bf16.mxu0 %v17215_v62  ;;  %v17517_v62 = vcombine.high %v13959_v31, %v13963_v16 }
 0xac8   : > { %14662 = vmatpush1.bf16.msra.mxu1 %v17468_v30  ;;  %v17254_v30 = vcombine.low %v11142_v23, %v11146_v53  ;;  %v14007_v23 = vld [vmem:[#allocation10 + $0xfc0] sm:$0xff] }
 0xac9   : > { %14663 = vmatprep.subr.bf16.mxu1 %v17477_v60  ;;  %v17263_v60 = vcombine.high %v11150_v17, %v11154_v59  ;;  %v14011_v53 = vld [vmem:[#allocation10 + $0xfe0] sm:$0xff] }
 0xaca   : > { %12827 = vmatpush1.bf16.msra.mxu0 %v17214_v2  ;;  %v17516_v2 = vcombine.low %v13959_v31, %v13963_v16  ;;  %v11198_v31 = vld [vmem:[#allocation10 + $0x3c8] sm:$0xff] }
 0xacb   : > { %12828 = vmatprep.subr.bf16.mxu0 %v17223_v57  ;;  %v17525_v57 = vcombine.high %v13967_v41, %v13971_v28  ;;  %v11202_v16 = vld [vmem:[#allocation10 + $0x3e8] sm:$0xff] }
 0xacc   : > { %14664 = vmatpush1.bf16.msra.mxu1 %v17476_v39  ;;  %v17262_v39 = vcombine.low %v11150_v17, %v11154_v59  ;;  %v13889_v17 = vld [vmem:[#allocation10 + $0xc10] sm:$0xff] }
 0xacd   : > { %14665 = vmatprep.subr.bf16.mxu1 %v17485_v50  ;;  %v17271_v50 = vcombine.high %v11158_v52, %v11162_v1  ;;  %v13893_v59 = vld [vmem:[#allocation10 + $0xc30] sm:$0xff] }
 0xace   : > { %12829 = vmatpush1.bf16.msra.mxu0 %v17222_v46  ;;  %v12813_v20 = vpop.f32.mrb[100].mxu1  ;;  %v17524_v46 = vcombine.low %v13967_v41, %v13971_v28  ;;  %v11080_v41 = vld [vmem:[#allocation10 + $0x18] sm:$0xff] }
 0xacf   : > { %v12815_v11 = vpop.f32.mrb[101].mxu1  ;;  %12830 = vmatprep.subr.bf16.mxu0 %v17231_v3  ;;  %v17533_v3 = vcombine.high %v13975_v35, %v13979_v63  ;;  %v11084_v28 = vld [vmem:[#allocation10 + $0x38] sm:$0xff] }
 0xad0   : > { %14666 = vmatpush1.bf16.msra.mxu1 %v17484_v25  ;;  %v12009_v21 = vpop.f32.mrb[88].mxu0  ;;  %v12817_v12 = vpop.f32.mrb[102].mxu1  ;;  %v17270_v25 = vcombine.low %v11158_v52, %v11162_v1  ;;  %v13897_v52 = vld [vmem:[#allocation10 + $0xc50] sm:$0xff] }
 0xad1   : > { %v24113_v18 = vadd.f32 %v12813_v20, %v12009_v21  ;;  %v12011_v37 = vpop.f32.mrb[89].mxu0  ;;  %v12818_v26 = vpop.f32.mrb[103].mxu1  ;;  %14667 = vmatprep.subr.bf16.mxu1 %v17493_v22  ;;  %v17279_v22 = vcombine.high %v11166_v47, %v11170_v8  ;;  %v17532_v20 = vcombine.low %v13975_v35, %v13979_v63  ;;  %v13995_v21 = vld [vmem:[#allocation10 + $0xf60] sm:$0xff]  ;;  %v13901_v1 = vld [vmem:[#allocation10 + $0xc70] sm:$0xff]  ;;  %v11088_v35 = vld [vmem:[#allocation10 + $0x58] sm:$0xff] }
 0xad2   : > { %v24115_v40 = vadd.f32 %v12815_v11, %v12011_v37  ;;  %12831 = vmatpush1.bf16.msra.mxu0 %v17230_v7  ;;  %v12013_v58 = vpop.f32.mrb[90].mxu0  ;;  %v11174_v7 = vld [vmem:[#allocation10 + $0x308] sm:$0xff]  ;;  %v17278_v11 = vcombine.low %v11166_v47, %v11170_v8  ;;  %v11092_v63 = vld [vmem:[#allocation10 + $0x78] sm:$0xff]  ;;  %v17194_v47 = vcombine.low %v11080_v41, %v11084_v28  ;;  %v13905_v8 = vld [vmem:[#allocation10 + $0xc90] sm:$0xff] }
 0xad3   : > { %v12014_v0 = vpop.f32.mrb[91].mxu0  ;;  %12832 = vmatprep.subr.bf16.mxu0 %v17239_v9  ;;  %v13991_v9 = vld [vmem:[#allocation10 + $0xf40] sm:$0xff]  ;;  %v17287_v12 = vcombine.high %v11174_v7, %v11178_v55  ;;  %v17286_v26 = vcombine.low %v11174_v7, %v11178_v55  ;;  %v13913_v7 = vld [vmem:[#allocation10 + $0xcd0] sm:$0xff] }
 0xad4   : > { %14668 = vmatpush1.bf16.msra.mxu1 %v17492_v49  ;;  %v17540_v49 = vcombine.low %v13983_v42, %v13987_v13  ;;  %v17549_v37 = vcombine.high %v13991_v9, %v13995_v21  ;;  %v14003_v58 = vld [vmem:[#allocation10 + $0xfa0] sm:$0xff]  ;;  %v17548_v6 = vcombine.low %v13991_v9, %v13995_v21  ;;  %v11194_v0 = vld [vmem:[#allocation10 + $0x3a8] sm:$0xff]  ;;  %v17456_v42 = vcombine.low %v13897_v52, %v13901_v1  ;;  %v11096_v13 = vld [vmem:[#allocation10 + $0x98] sm:$0xff] }
 0xad5   : > { %14669 = vmatprep.subr.bf16.mxu1 %v17501_v61  ;;  %v13999_v61 = vld [vmem:[#allocation10 + $0xf80] sm:$0xff]  ;;  %v13917_v55 = vld [vmem:[#allocation10 + $0xcf0] sm:$0xff]  ;;  %v11104_v9 = vld [vmem:[#allocation10 + $0xd8] sm:$0xff] }
 0xad6   : > { %12833 = vmatpush1.bf16.msra.mxu0 %v17238_v29  ;;  %v17295_v29 = vcombine.high %v11182_v38, %v11186_v34  ;;  %v11108_v21 = vld [vmem:[#allocation10 + $0xf8] sm:$0xff] }
 0xad7   : > { %12834 = vmatprep.subr.bf16.mxu0 %v17247_v43  ;;  %v17557_v43 = vcombine.high %v13999_v61, %v14003_v58 }
 0xad8   : > { %14670 = vmatpush1.bf16.msra.mxu1 %v17500_v15  ;;  %v17294_v15 = vcombine.low %v11182_v38, %v11186_v34  ;;  %v13921_v38 = vld [vmem:[#allocation10 + $0xd10] sm:$0xff] }
 0xad9   : > { %14671 = vmatprep.subr.bf16.mxu1 %v17509_v54  ;;  %v17303_v54 = vcombine.high %v11190_v32, %v11194_v0  ;;  %v13925_v34 = vld [vmem:[#allocation10 + $0xd30] sm:$0xff] }
 0xada   : > { %12835 = vmatpush1.bf16.msra.mxu0 %v17246_v24  ;;  %v17556_v24 = vcombine.low %v13999_v61, %v14003_v58  ;;  %v11116_v61 = vld [vmem:[#allocation10 + $0x138] sm:$0xff]  ;;  %v17481_v58 = vcombine.high %v13921_v38, %v13925_v34 }
 0xadb   : > { %12836 = vmatprep.subr.bf16.mxu0 %v17255_v19  ;;  %v17565_v19 = vcombine.high %v14007_v23, %v14011_v53 }
 0xadc   : > { %14672 = vmatpush1.bf16.msra.mxu1 %v17508_v4  ;;  %v17302_v4 = vcombine.low %v11190_v32, %v11194_v0  ;;  %v13933_v32 = vld [vmem:[#allocation10 + $0xd70] sm:$0xff] }
 0xadd   : > { %14673 = vmatprep.subr.bf16.mxu1 %v17517_v62  ;;  %v17311_v62 = vcombine.high %v11198_v31, %v11202_v16 }
 0xade   : > { %12837 = vmatpush1.bf16.msra.mxu0 %v17254_v30  ;;  %v17564_v30 = vcombine.low %v14007_v23, %v14011_v53  ;;  %v11124_v23 = vld [vmem:[#allocation10 + $0x178] sm:$0xff] }
 0xadf   : > { %12838 = vmatprep.subr.bf16.mxu0 %v17263_v60  ;;  %v17449_v60 = vcombine.high %v13889_v17, %v13893_v59 }
 0xae0   : > { %14674 = vmatpush1.bf16.msra.mxu1 %v17516_v2  ;;  %v17310_v2 = vcombine.low %v11198_v31, %v11202_v16  ;;  %v13941_v31 = vld [vmem:[#allocation10 + $0xdb0] sm:$0xff] }
 0xae1   : > { %14675 = vmatprep.subr.bf16.mxu1 %v17525_v57  ;;  %v17195_v57 = vcombine.high %v11080_v41, %v11084_v28  ;;  %v13945_v41 = vld [vmem:[#allocation10 + $0xdd0] sm:$0xff] }
 0xae2   : > { %12839 = vmatpush1.bf16.msra.mxu0 %v17262_v39  ;;  %v17448_v39 = vcombine.low %v13889_v17, %v13893_v59  ;;  %v11132_v17 = vld [vmem:[#allocation10 + $0x1b8] sm:$0xff]  ;;  %v13949_v28 = vld [vmem:[#allocation10 + $0xdf0] sm:$0xff] }
 0xae3   : > { %12840 = vmatprep.subr.bf16.mxu0 %v17271_v50  ;;  %v24119_v50 = vpack.c.bf16 %v24084_v51, %v24084_v51 }
 0xae4   : > { %14676 = vmatpush1.bf16.msra.mxu1 %v17524_v46  ;;  %v17457_v46 = vcombine.high %v13897_v52, %v13901_v1 }
 0xae5   : > { %14677 = vmatprep.subr.bf16.mxu1 %v17533_v3  ;;  %v13909_v3 = vld [vmem:[#allocation10 + $0xcb0] sm:$0xff] }
 0xae6   : > { %12841 = vmatpush1.bf16.msra.mxu0 %v17270_v25  ;;  %v17203_v25 = vcombine.high %v11088_v35, %v11092_v63  ;;  %v17465_v51 = vcombine.high %v13905_v8, %v13909_v3 }
 0xae7   : > { %12842 = vmatprep.subr.bf16.mxu0 %v17279_v22  ;;  %v11100_v22 = vld [vmem:[#allocation10 + $0xb8] sm:$0xff] }
 0xae8   : > { %14678 = vmatpush1.bf16.msra.mxu1 %v17532_v20  ;;  %v17202_v20 = vcombine.low %v11088_v35, %v11092_v63  ;;  %v11140_v35 = vld [vmem:[#allocation10 + $0x1f8] sm:$0xff] }
 0xae9   : > { %14679 = vmatprep.subr.bf16.mxu1 %v17541_v45  ;;  %v17211_v45 = vcombine.high %v11096_v13, %v11100_v22 }
 0xaea   : > { %12843 = vmatpush1.bf16.msra.mxu0 %v17278_v11  ;;  %v17464_v11 = vcombine.low %v13905_v8, %v13909_v3 }
 0xaeb   : > { %12844 = vmatprep.subr.bf16.mxu0 %v17287_v12  ;;  %v17473_v12 = vcombine.high %v13913_v7, %v13917_v55 }
 0xaec   : > { %14680 = vmatpush1.bf16.msra.mxu1 %v17540_v49  ;;  %v17210_v49 = vcombine.low %v11096_v13, %v11100_v22 }
 0xaed   : > { %14681 = vmatprep.subr.bf16.mxu1 %v17549_v37  ;;  %v17219_v37 = vcombine.high %v11104_v9, %v11108_v21 }
 0xaee   : > { %12845 = vmatpush1.bf16.msra.mxu0 %v17286_v26  ;;  %v17472_v26 = vcombine.low %v13913_v7, %v13917_v55  ;;  %v11148_v7 = vld [vmem:[#allocation10 + $0x238] sm:$0xff] }
 0xaef   : > { %12846 = vmatprep.subr.bf16.mxu0 %v17295_v29  ;;  %v17218_v29 = vcombine.low %v11104_v9, %v11108_v21  ;;  %v13965_v9 = vld [vmem:[#allocation10 + $0xe70] sm:$0xff] }
 0xaf0   : > { %14682 = vmatpush1.bf16.msra.mxu1 %v17548_v6  ;;  %v13929_v6 = vld [vmem:[#allocation10 + $0xd50] sm:$0xff] }
 0xaf1   : > { %14683 = vmatprep.subr.bf16.mxu1 %v17557_v43  ;;  %v17480_v43 = vcombine.low %v13921_v38, %v13925_v34  ;;  %v17489_v53 = vcombine.high %v13929_v6, %v13933_v32  ;;  %v11156_v38 = vld [vmem:[#allocation10 + $0x278] sm:$0xff] }
 0xaf2   : > { %12847 = vmatpush1.bf16.msra.mxu0 %v17294_v15  ;;  %v11120_v15 = vld [vmem:[#allocation10 + $0x158] sm:$0xff] }
 0xaf3   : > { %12848 = vmatprep.subr.bf16.mxu0 %v17303_v54  ;;  %v17235_v16 = vcombine.high %v11120_v15, %v11124_v23 }
 0xaf4   : > { %14684 = vmatpush1.bf16.msra.mxu1 %v17556_v24  ;;  %v13937_v24 = vld [vmem:[#allocation10 + $0xd90] sm:$0xff] }
 0xaf5   : > { %14685 = vmatprep.subr.bf16.mxu1 %v17565_v19  ;;  %v17488_v19 = vcombine.low %v13929_v6, %v13933_v32  ;;  %v17497_v59 = vcombine.high %v13937_v24, %v13941_v31  ;;  %v11164_v6 = vld [vmem:[#allocation10 + $0x2b8] sm:$0xff] }
 0xaf6   : > { %12849 = vmatpush1.bf16.msra.mxu0 %v17302_v4  ;;  %v11128_v4 = vld [vmem:[#allocation10 + $0x198] sm:$0xff] }
 0xaf7   : > { %12850 = vmatprep.subr.bf16.mxu0 %v17311_v62  ;;  %v17242_v3 = vcombine.low %v11128_v4, %v11132_v17 }
 0xaf8   : > { %14686 = vmatpush1.bf16.msra.mxu1 %v17564_v30  ;;  %v17234_v30 = vcombine.low %v11120_v15, %v11124_v23  ;;  %v13981_v15 = vld [vmem:[#allocation10 + $0xef0] sm:$0xff] }
 0xaf9   : > { %14737 = vmatprep.subr.bf16.mxu1 %v17449_v60 }
 0xafa   : > { %12851 = vmatpush1.bf16.msra.mxu0 %v17310_v2  ;;  %v17243_v2 = vcombine.high %v11128_v4, %v11132_v17  ;;  %v13989_v4 = vld [vmem:[#allocation10 + $0xf30] sm:$0xff] }
 0xafb   : > { %14688 = vmatmul.mubr.bf16.vlgmr.msra.gmra.mrb[116].mxu1 %v24119_v50  ;;  %12902 = vmatprep.subr.bf16.mxu0 %v17195_v57  ;;  %v17496_v57 = vcombine.low %v13937_v24, %v13941_v31  ;;  %v11172_v24 = vld [vmem:[#allocation10 + $0x2f8] sm:$0xff] }
 0xafc   : > { %14738 = vmatpush1.bf16.msra.mxu1 %v17448_v39  ;;  %14769 = vmatprep.mubr.bf16.mxu1 %v24107_v48  ;;  %v11136_v39 = vld [vmem:[#allocation10 + $0x1d8] sm:$0xff] }
 0xafd   : > { %12853 = vmatmul.mubr.bf16.vlgmr.msra.gmra.mrb[104].mxu0 %v24059_v44  ;;  %14739 = vmatprep.subr.bf16.mxu1 %v17457_v46  ;;  %v17251_v22 = vcombine.high %v11136_v39, %v11140_v35 }
 0xafe   : > { %12903 = vmatpush1.bf16.msra.mxu0 %v17194_v47  ;;  %12934 = vmatprep.mubr.bf16.mxu0 %v24057_v10  ;;  %v11112_v10 = vld [vmem:[#allocation10 + $0x118] sm:$0xff]  ;;  %v17505_v47 = vcombine.high %v13945_v41, %v13949_v28 }
 0xaff   : > { %12904 = vmatprep.subr.bf16.mxu0 %v17203_v25  ;;  %v17227_v0 = vcombine.high %v11112_v10, %v11116_v61  ;;  %v17226_v54 = vcombine.low %v11112_v10, %v11116_v61  ;;  %v13953_v25 = vld [vmem:[#allocation10 + $0xe10] sm:$0xff] }
 0xb00   : > { %14740 = vmatpush1.bf16.msra.mxu1 %v17456_v42  ;;  %v13957_v42 = vld [vmem:[#allocation10 + $0xe30] sm:$0xff] }
 0xb01   : > { %14741 = vmatprep.subr.bf16.mxu1 %v17465_v51  ;;  %v17504_v51 = vcombine.low %v13945_v41, %v13949_v28  ;;  %v17513_v55 = vcombine.high %v13953_v25, %v13957_v42  ;;  %v13973_v10 = vld [vmem:[#allocation10 + $0xeb0] sm:$0xff]  ;;  %v11180_v41 = vld [vmem:[#allocation10 + $0x338] sm:$0xff] }
 0xb02   : > { %12905 = vmatpush1.bf16.msra.mxu0 %v17202_v20  ;;  %v11144_v20 = vld [vmem:[#allocation10 + $0x218] sm:$0xff] }
 0xb03   : > { %12906 = vmatprep.subr.bf16.mxu0 %v17211_v45  ;;  %v17250_v45 = vcombine.low %v11136_v39, %v11140_v35  ;;  %v17259_v21 = vcombine.high %v11144_v20, %v11148_v7 }
 0xb04   : > { %14742 = vmatpush1.bf16.msra.mxu1 %v17464_v11  ;;  %v13961_v11 = vld [vmem:[#allocation10 + $0xe50] sm:$0xff] }
 0xb05   : > { %14743 = vmatprep.subr.bf16.mxu1 %v17473_v12  ;;  %v17512_v12 = vcombine.low %v13953_v25, %v13957_v42  ;;  %v17521_v34 = vcombine.high %v13961_v11, %v13965_v9  ;;  %v14001_v25 = vld [vmem:[#allocation10 + $0xf90] sm:$0xff] }
 0xb06   : > { %12907 = vmatpush1.bf16.msra.mxu0 %v17210_v49  ;;  %v11152_v49 = vld [vmem:[#allocation10 + $0x258] sm:$0xff]  ;;  %v14005_v42 = vld [vmem:[#allocation10 + $0xfb0] sm:$0xff] }
 0xb07   : > { %12908 = vmatprep.subr.bf16.mxu0 %v17219_v37  ;;  %v17258_v37 = vcombine.low %v11144_v20, %v11148_v7  ;;  %v17267_v61 = vcombine.high %v11152_v49, %v11156_v38  ;;  %v11196_v20 = vld [vmem:[#allocation10 + $0x3b8] sm:$0xff]  ;;  %v17561_v7 = vcombine.high %v14001_v25, %v14005_v42 }
 0xb08   : > { %14744 = vmatpush1.bf16.msra.mxu1 %v17472_v26  ;;  %v13969_v26 = vld [vmem:[#allocation10 + $0xe90] sm:$0xff] }
 0xb09   : > { %14745 = vmatprep.subr.bf16.mxu1 %v17481_v58  ;;  %v17520_v58 = vcombine.low %v13961_v11, %v13965_v9  ;;  %v17529_v32 = vcombine.high %v13969_v26, %v13973_v10  ;;  %v14013_v11 = vld [vmem:[#allocation10 + $0xff0] sm:$0xff] }
 0xb0a   : > { %12909 = vmatpush1.bf16.msra.mxu0 %v17218_v29  ;;  %v11160_v29 = vld [vmem:[#allocation10 + $0x298] sm:$0xff] }
 0xb0b   : > { %12910 = vmatprep.subr.bf16.mxu0 %v17227_v0  ;;  %v17266_v0 = vcombine.low %v11152_v49, %v11156_v38  ;;  %v17275_v23 = vcombine.high %v11160_v29, %v11164_v6  ;;  %v11204_v49 = vld [vmem:[#allocation10 + $0x3f8] sm:$0xff] }
 0xb0c   : > { %14746 = vmatpush1.bf16.msra.mxu1 %v17480_v43  ;;  %v13977_v43 = vld [vmem:[#allocation10 + $0xed0] sm:$0xff] }
 0xb0d   : > { %14747 = vmatprep.subr.bf16.mxu1 %v17489_v53  ;;  %v17528_v53 = vcombine.low %v13969_v26, %v13973_v10  ;;  %v17537_v31 = vcombine.high %v13977_v43, %v13981_v15  ;;  %v12946_v10 = vld [vmem:[#allocation10 + $0x808] sm:$0xff] }
 0xb0e   : > { %v24125_v62 = vpop.f32.mrb[104].mxu1  ;;  %12911 = vmatpush1.bf16.msra.mxu0 %v17226_v54  ;;  %v11168_v54 = vld [vmem:[#allocation10 + $0x2d8] sm:$0xff] }
 0xb0f   : > { %v24127_v60 = vpop.f32.mrb[105].mxu1  ;;  %12912 = vmatprep.subr.bf16.mxu0 %v17235_v16  ;;  %v17274_v16 = vcombine.low %v11160_v29, %v11164_v6  ;;  %v17283_v17 = vcombine.high %v11168_v54, %v11172_v24 }
 0xb10   : > { %v24129_v52 = vpop.f32.mrb[92].mxu0  ;;  %v12899_v1 = vpop.f32.mrb[106].mxu1  ;;  %14748 = vmatpush1.bf16.msra.mxu1 %v17488_v19  ;;  %v13985_v19 = vld [vmem:[#allocation10 + $0xf10] sm:$0xff] }
 0xb11   : > { %v24131_v63 = vpop.f32.mrb[93].mxu0  ;;  %v12900_v46 = vpop.f32.mrb[107].mxu1  ;;  %14749 = vmatprep.subr.bf16.mxu1 %v17497_v59  ;;  %v17536_v59 = vcombine.low %v13977_v43, %v13981_v15  ;;  %v17545_v28 = vcombine.high %v13985_v19, %v13989_v4  ;;  %v13993_v1 = vld [vmem:[#allocation10 + $0xf50] sm:$0xff]  ;;  %v17544_v35 = vcombine.low %v13985_v19, %v13989_v4  ;;  %v19616_v15 = vld [vmem:[#allocation13 + $0x14] ss:$8 sps:$4 sm:$0xff]  }
 0xb12   : > { %v12054_v8 = vpop.f32.mrb[94].mxu0  ;;  %12913 = vmatpush1.bf16.msra.mxu0 %v17234_v30  ;;  %v11176_v30 = vld [vmem:[#allocation10 + $0x318] sm:$0xff]  ;;  %v19611_v43 = vld [vmem:[#allocation13] ss:$8 sps:$4 sm:$0xff]  }
 0xb13   : > { %v12055_v13 = vpop.f32.mrb[95].mxu0  ;;  %12914 = vmatprep.subr.bf16.mxu0 %v17243_v2  ;;  %v17282_v2 = vcombine.low %v11168_v54, %v11172_v24  ;;  %v17291_v39 = vcombine.high %v11176_v30, %v11180_v41  ;;  %v11184_v46 = vld [vmem:[#allocation10 + $0x358] sm:$0xff]  ;;  %v12962_v54 = vld [vmem:[#allocation10 + $0x888] sm:$0xff] }
 0xb14   : > { %14750 = vmatpush1.bf16.msra.mxu1 %v17496_v57  ;;  %v13997_v57 = vld [vmem:[#allocation10 + $0xf70] sm:$0xff]  ;;  %v12966_v24 = vld [vmem:[#allocation10 + $0x8a8] sm:$0xff] }
 0xb15   : > { %14751 = vmatprep.subr.bf16.mxu1 %v17505_v47  ;;  %v11188_v47 = vld [vmem:[#allocation10 + $0x378] sm:$0xff]  ;;  %v17553_v8 = vcombine.high %v13993_v1, %v13997_v57  ;;  %v17335_v4 = vcombine.high %v12962_v54, %v12966_v24 }
 0xb16   : > { %12915 = vmatpush1.bf16.msra.mxu0 %v17242_v3  ;;  %v17290_v3 = vcombine.low %v11176_v30, %v11180_v41  ;;  %v17299_v13 = vcombine.high %v11184_v46, %v11188_v47  ;;  %v19617_v30 = vld [vmem:[#allocation13 + $0x20] ss:$8 sps:$4 sm:$0xff]   ;;  %v19622_v41 = vld [vmem:[#allocation13 + $0x34] ss:$8 sps:$4 sm:$0xff]  }
 0xb17   : > { %12916 = vmatprep.subr.bf16.mxu0 %v17251_v22  ;;  %v17552_v22 = vcombine.low %v13993_v1, %v13997_v57  ;;  %v12978_v1 = vld [vmem:[#allocation10 + $0x908] sm:$0xff]  ;;  %v19620_v57 = vld [vmem:[#allocation13 + $0x30] ss:$8 sps:$4 sm:$0xff]  }
 0xb18   : > { %14752 = vmatpush1.bf16.msra.mxu1 %v17504_v51  ;;  %v11192_v51 = vld [vmem:[#allocation10 + $0x398] sm:$0xff] }
 0xb19   : > { %14753 = vmatprep.subr.bf16.mxu1 %v17513_v55  ;;  %v17298_v55 = vcombine.low %v11184_v46, %v11188_v47  ;;  %v17307_v9 = vcombine.high %v11192_v51, %v11196_v20  ;;  %v12986_v47 = vld [vmem:[#allocation10 + $0x948] sm:$0xff] }
 0xb1a   : > { %12917 = vmatpush1.bf16.msra.mxu0 %v17250_v45  ;;  %v14009_v45 = vld [vmem:[#allocation10 + $0xfd0] sm:$0xff] }
 0xb1b   : > { %12918 = vmatprep.subr.bf16.mxu0 %v17259_v21  ;;  %v17560_v21 = vcombine.low %v14001_v25, %v14005_v42  ;;  %v17569_v38 = vcombine.high %v14009_v45, %v14013_v11  ;;  %v17568_v26 = vcombine.low %v14009_v45, %v14013_v11  ;;  %v19628_v25 = vld [vmem:[#allocation13 + $0x54] ss:$8 sps:$4 sm:$0xff]  }
 0xb1c   : > { %14754 = vmatpush1.bf16.msra.mxu1 %v17512_v12  ;;  %v11200_v12 = vld [vmem:[#allocation10 + $0x3d8] sm:$0xff] }
 0xb1d   : > { %14755 = vmatprep.subr.bf16.mxu1 %v17521_v34  ;;  %v17306_v34 = vcombine.low %v11192_v51, %v11196_v20  ;;  %v17314_v29 = vcombine.low %v11200_v12, %v11204_v49  ;;  %v12998_v51 = vld [vmem:[#allocation10 + $0x9a8] sm:$0xff]  ;;  %v19626_v20 = vld [vmem:[#allocation13 + $0x50] ss:$8 sps:$4 sm:$0xff]  }
 0xb1e   : > { %12919 = vmatpush1.bf16.msra.mxu0 %v17258_v37  ;;  %v17315_v37 = vcombine.high %v11200_v12, %v11204_v49 }
 0xb1f   : > { %12920 = vmatprep.subr.bf16.mxu0 %v17267_v61  ;;  %v12950_v61 = vld [vmem:[#allocation10 + $0x828] sm:$0xff] }
 0xb20   : > { %14756 = vmatpush1.bf16.msra.mxu1 %v17520_v58  ;;  %v19613_v58 = vld [vmem:[#allocation13 + $0x4] ss:$8 sps:$4 sm:$0xff]   ;;  %v17319_v6 = vcombine.high %v12946_v10, %v12950_v61 }
 0xb21   : > { %14757 = vmatprep.subr.bf16.mxu1 %v17529_v32  ;;  %v12954_v32 = vld [vmem:[#allocation10 + $0x848] sm:$0xff] }
 0xb22   : > { %12921 = vmatpush1.bf16.msra.mxu0 %v17266_v0  ;;  %v12958_v0 = vld [vmem:[#allocation10 + $0x868] sm:$0xff] }
 0xb23   : > { %12922 = vmatprep.subr.bf16.mxu0 %v17275_v23  ;;  %v17318_v23 = vcombine.low %v12946_v10, %v12950_v61  ;;  %v17326_v19 = vcombine.low %v12954_v32, %v12958_v0 }
 0xb24   : > { %14758 = vmatpush1.bf16.msra.mxu1 %v17528_v53  ;;  %v17327_v53 = vcombine.high %v12954_v32, %v12958_v0 }
 0xb25   : > { %14759 = vmatprep.subr.bf16.mxu1 %v17537_v31  ;;  %v19614_v31 = vld [vmem:[#allocation13 + $0x10] ss:$8 sps:$4 sm:$0xff]  }
 0xb26   : > { %12923 = vmatpush1.bf16.msra.mxu0 %v17274_v16  ;;  %v19619_v16 = vld [vmem:[#allocation13 + $0x24] ss:$8 sps:$4 sm:$0xff]  }
 0xb27   : > { %12924 = vmatprep.subr.bf16.mxu0 %v17283_v17  ;;  %v12970_v17 = vld [vmem:[#allocation10 + $0x8c8] sm:$0xff] }
 0xb28   : > { %14760 = vmatpush1.bf16.msra.mxu1 %v17536_v59  ;;  %v12974_v59 = vld [vmem:[#allocation10 + $0x8e8] sm:$0xff] }
 0xb29   : > { %14761 = vmatprep.subr.bf16.mxu1 %v17545_v28  ;;  %v17334_v28 = vcombine.low %v12962_v54, %v12966_v24  ;;  %v13018_v24 = vld [vmem:[#allocation10 + $0xa48] sm:$0xff] }
 0xb2a   : > { %12925 = vmatpush1.bf16.msra.mxu0 %v17282_v2  ;;  %v17343_v2 = vcombine.high %v12970_v17, %v12974_v59 }
 0xb2b   : > { %12926 = vmatprep.subr.bf16.mxu0 %v17291_v39  ;;  %v19625_v39 = vld [vmem:[#allocation13 + $0x44] ss:$8 sps:$4 sm:$0xff]  }
 0xb2c   : > { %14762 = vmatpush1.bf16.msra.mxu1 %v17544_v35  ;;  %v17342_v35 = vcombine.low %v12970_v17, %v12974_v59  ;;  %v13026_v17 = vld [vmem:[#allocation10 + $0xa88] sm:$0xff] }
 0xb2d   : > { %14763 = vmatprep.subr.bf16.mxu1 %v17553_v8  ;;  %v12990_v8 = vld [vmem:[#allocation10 + $0x968] sm:$0xff] }
 0xb2e   : > { %12927 = vmatpush1.bf16.msra.mxu0 %v17290_v3  ;;  %v19623_v3 = vld [vmem:[#allocation13 + $0x40] ss:$8 sps:$4 sm:$0xff]   ;;  %v17358_v45 = vcombine.low %v12986_v47, %v12990_v8 }
 0xb2f   : > { %12928 = vmatprep.subr.bf16.mxu0 %v17299_v13  ;;  %v17359_v13 = vcombine.high %v12986_v47, %v12990_v8  ;;  %v13030_v59 = vld [vmem:[#allocation10 + $0xaa8] sm:$0xff] }
 0xb30   : > { %14764 = vmatpush1.bf16.msra.mxu1 %v17552_v22  ;;  %v12994_v22 = vld [vmem:[#allocation10 + $0x988] sm:$0xff] }
 0xb31   : > { %14765 = vmatprep.subr.bf16.mxu1 %v17561_v7  ;;  %v19631_v7 = vld [vmem:[#allocation13 + $0x64] ss:$8 sps:$4 sm:$0xff]  }
 0xb32   : > { %12929 = vmatpush1.bf16.msra.mxu0 %v17298_v55  ;;  %v13042_v47 = vld [vmem:[#allocation10 + $0xb08] sm:$0xff] }
 0xb33   : > { %12930 = vmatprep.subr.bf16.mxu0 %v17307_v9  ;;  %v13046_v8 = vld [vmem:[#allocation10 + $0xb28] sm:$0xff] }
 0xb34   : > { %14766 = vmatpush1.bf16.msra.mxu1 %v17560_v21  ;;  %v17367_v21 = vcombine.high %v12994_v22, %v12998_v51 }
 0xb35   : > { %14767 = vmatprep.subr.bf16.mxu1 %v17569_v38 }
 0xb36   : > { %12931 = vmatpush1.bf16.msra.mxu0 %v17306_v34  ;;  %v13002_v34 = vld [vmem:[#allocation10 + $0x9c8] sm:$0xff] }
 0xb37   : > { %12932 = vmatprep.subr.bf16.mxu0 %v17315_v37  ;;  %v13006_v37 = vld [vmem:[#allocation10 + $0x9e8] sm:$0xff] }
 0xb38   : > { %14768 = vmatpush1.bf16.msra.mxu1 %v17568_v26  ;;  %v19629_v26 = vld [vmem:[#allocation13 + $0x60] ss:$8 sps:$4 sm:$0xff]   ;;  %v17375_v0 = vcombine.high %v13002_v34, %v13006_v37 }
 0xb39   : > { %15673 = vmatprep.subr.bf16.mxu1 %v19613_v58 }
 0xb3a   : > { %12933 = vmatpush1.bf16.msra.mxu0 %v17314_v29 }
 0xb3b   : > { %14770 = vmatmul.mubr.bf16.vlgmr.msra.gmra.mrb[120].mxu1 %v24119_v50  ;;  %13754 = vmatprep.subr.bf16.mxu0 %v17319_v6 }
 0xb3c   : > { %15674 = vmatpush1.bf16.msra.mxu1 %v19611_v43  ;;  %v13010_v43 = vld [vmem:[#allocation10 + $0xa08] sm:$0xff] }
 0xb3d   : > { %12935 = vmatmul.mubr.bf16.vlgmr.msra.gmra.mrb[108].mxu0 %v24059_v44  ;;  %15675 = vmatprep.subr.bf16.mxu1 %v19616_v15  ;;  %v12982_v44 = vld [vmem:[#allocation10 + $0x928] sm:$0xff] }
 0xb3e   : > { %13755 = vmatpush1.bf16.msra.mxu0 %v17318_v23  ;;  %13786 = vmatprep.mubr.bf16.mxu0 %v24091_v56  ;;  %v17351_v46 = vcombine.high %v12978_v1, %v12982_v44  ;;  %v17350_v42 = vcombine.low %v12978_v1, %v12982_v44  ;;  %v13014_v15 = vld [vmem:[#allocation10 + $0xa28] sm:$0xff]  ;;  %v19632_v23 = vld [vmem:[#allocation13 + $0x70] ss:$8 sps:$4 sm:$0xff]  }
 0xb3f   : > { %13756 = vmatprep.subr.bf16.mxu0 %v17327_v53  ;;  %v17374_v53 = vcombine.low %v13002_v34, %v13006_v37  ;;  %v17383_v54 = vcombine.high %v13010_v43, %v13014_v15  ;;  %v13034_v1 = vld [vmem:[#allocation10 + $0xac8] sm:$0xff] }
 0xb40   : > { %15676 = vmatpush1.bf16.msra.mxu1 %v19614_v31  ;;  %v13022_v31 = vld [vmem:[#allocation10 + $0xa68] sm:$0xff] }
 0xb41   : > { %15677 = vmatprep.subr.bf16.mxu1 %v19619_v16  ;;  %v19640_v16 = vld [vmem:[#allocation13 + $0x94] ss:$8 sps:$4 sm:$0xff]   ;;  %v13038_v44 = vld [vmem:[#allocation10 + $0xae8] sm:$0xff] }
 0xb42   : > { %13757 = vmatpush1.bf16.msra.mxu0 %v17326_v19  ;;  %v17382_v19 = vcombine.low %v13010_v43, %v13014_v15  ;;  %v19656_v43 = vld [vmem:[#allocation13 + $0xf0] ss:$8 sps:$4 sm:$0xff]  }
 0xb43   : > { %13758 = vmatprep.subr.bf16.mxu0 %v17335_v4  ;;  %v17391_v4 = vcombine.high %v13018_v24, %v13022_v31 }
 0xb44   : > { %15678 = vmatpush1.bf16.msra.mxu1 %v19617_v30  ;;  %v19638_v30 = vld [vmem:[#allocation13 + $0x90] ss:$8 sps:$4 sm:$0xff]  }
 0xb45   : > { %15679 = vmatprep.subr.bf16.mxu1 %v19622_v41  ;;  %v19643_v41 = vld [vmem:[#allocation13 + $0xa4] ss:$8 sps:$4 sm:$0xff]  }
 0xb46   : > { %13759 = vmatpush1.bf16.msra.mxu0 %v17334_v28  ;;  %v17390_v28 = vcombine.low %v13018_v24, %v13022_v31  ;;  %v12964_v31 = vld [vmem:[#allocation10 + $0x898] sm:$0xff] }
 0xb47   : > { %13760 = vmatprep.subr.bf16.mxu0 %v17343_v2  ;;  %v17399_v2 = vcombine.high %v13026_v17, %v13030_v59 }
 0xb48   : > { %15680 = vmatpush1.bf16.msra.mxu1 %v19620_v57  ;;  %v19641_v57 = vld [vmem:[#allocation13 + $0xa0] ss:$8 sps:$4 sm:$0xff]  }
 0xb49   : > { %15681 = vmatprep.subr.bf16.mxu1 %v19625_v39  ;;  %v19646_v39 = vld [vmem:[#allocation13 + $0xb4] ss:$8 sps:$4 sm:$0xff]  }
 0xb4a   : > { %13761 = vmatpush1.bf16.msra.mxu0 %v17342_v35  ;;  %v17398_v35 = vcombine.low %v13026_v17, %v13030_v59  ;;  %v12976_v17 = vld [vmem:[#allocation10 + $0x8f8] sm:$0xff] }
 0xb4b   : > { %13762 = vmatprep.subr.bf16.mxu0 %v17351_v46  ;;  %v17407_v46 = vcombine.high %v13034_v1, %v13038_v44 }
 0xb4c   : > { %15682 = vmatpush1.bf16.msra.mxu1 %v19623_v3  ;;  %v19644_v3 = vld [vmem:[#allocation13 + $0xb0] ss:$8 sps:$4 sm:$0xff]  }
 0xb4d   : > { %15683 = vmatprep.subr.bf16.mxu1 %v19628_v25  ;;  %v19649_v25 = vld [vmem:[#allocation13 + $0xc4] ss:$8 sps:$4 sm:$0xff]  }
 0xb4e   : > { %v13747_v55 = vpop.f32.mrb[108].mxu1  ;;  %13763 = vmatpush1.bf16.msra.mxu0 %v17350_v42  ;;  %v17406_v42 = vcombine.low %v13034_v1, %v13038_v44  ;;  %v12988_v44 = vld [vmem:[#allocation10 + $0x958] sm:$0xff] }
 0xb4f   : > { %v24137_v11 = vadd.f32 %v13747_v55, %v24113_v18  ;;  %v13749_v9 = vpop.f32.mrb[109].mxu1  ;;  %13764 = vmatprep.subr.bf16.mxu0 %v17359_v13  ;;  %v19634_v18 = vld [vmem:[#allocation13 + $0x74] ss:$8 sps:$4 sm:$0xff]   ;;  %v17415_v13 = vcombine.high %v13042_v47, %v13046_v8  ;;  %v17414_v55 = vcombine.low %v13042_v47, %v13046_v8 }
 0xb50   : > { %v24140_v12 = vadd.f32 %v13749_v9, %v24115_v40  ;;  %v12091_v49 = vpop.f32.mrb[96].mxu0  ;;  %v13751_v38 = vpop.f32.mrb[110].mxu1  ;;  %15684 = vmatpush1.bf16.msra.mxu1 %v19626_v20  ;;  %v17366_v40 = vcombine.low %v12994_v22, %v12998_v51  ;;  %v13050_v22 = vld [vmem:[#allocation10 + $0xb48] sm:$0xff] }
 0xb51   : > { %v24143_v10 = vadd.f32 %v24125_v62, %v12091_v49  ;;  %v12093_v61 = vpop.f32.mrb[97].mxu0  ;;  %v13752_v58 = vpop.f32.mrb[111].mxu1  ;;  %15685 = vmatprep.subr.bf16.mxu1 %v19631_v7  ;;  %v19637_v62 = vld [vmem:[#allocation13 + $0x84] ss:$8 sps:$4 sm:$0xff]   ;;  %v19647_v20 = vld [vmem:[#allocation13 + $0xc0] ss:$8 sps:$4 sm:$0xff]  }
 0xb52   : > { %v24146_v29 = vadd.f32 %v24127_v60, %v12093_v61  ;;  %v12095_v6 = vpop.f32.mrb[98].mxu0  ;;  %13765 = vmatpush1.bf16.msra.mxu0 %v17358_v45  ;;  %v19635_v60 = vld [vmem:[#allocation13 + $0x80] ss:$8 sps:$4 sm:$0xff]   ;;  %v19652_v7 = vld [vmem:[#allocation13 + $0xd4] ss:$8 sps:$4 sm:$0xff]  }
 0xb53   : > { %v12096_v32 = vpop.f32.mrb[99].mxu0  ;;  %13766 = vmatprep.subr.bf16.mxu0 %v17367_v21  ;;  %v13054_v51 = vld [vmem:[#allocation10 + $0xb68] sm:$0xff]  ;;  %v19650_v49 = vld [vmem:[#allocation13 + $0xd0] ss:$8 sps:$4 sm:$0xff]  }
 0xb54   : > { %15686 = vmatpush1.bf16.msra.mxu1 %v19629_v26  ;;  %v17423_v45 = vcombine.high %v13050_v22, %v13054_v51  ;;  %v13058_v9 = vld [vmem:[#allocation10 + $0xb88] sm:$0xff]  ;;  %v17422_v34 = vcombine.low %v13050_v22, %v13054_v51  ;;  %v12948_v32 = vld [vmem:[#allocation10 + $0x818] sm:$0xff] }
 0xb55   : > { %15687 = vmatprep.subr.bf16.mxu1 %v19634_v18  ;;  %v13062_v21 = vld [vmem:[#allocation10 + $0xba8] sm:$0xff]  ;;  %v19658_v18 = vld [vmem:[#allocation13 + $0xf4] ss:$8 sps:$4 sm:$0xff]  }
 0xb56   : > { %13767 = vmatpush1.bf16.msra.mxu0 %v17366_v40  ;;  %v19655_v38 = vld [vmem:[#allocation13 + $0xe4] ss:$8 sps:$4 sm:$0xff]   ;;  %v17431_v37 = vcombine.high %v13058_v9, %v13062_v21  ;;  %v19653_v58 = vld [vmem:[#allocation13 + $0xe0] ss:$8 sps:$4 sm:$0xff]   ;;  %v17430_v6 = vcombine.low %v13058_v9, %v13062_v21 }
 0xb57   : > { %13768 = vmatprep.subr.bf16.mxu0 %v17375_v0  ;;  %v13066_v26 = vld [vmem:[#allocation10 + $0xbc8] sm:$0xff]  ;;  %v12952_v0 = vld [vmem:[#allocation10 + $0x838] sm:$0xff] }
 0xb58   : > { %15688 = vmatpush1.bf16.msra.mxu1 %v19632_v23  ;;  %v13070_v61 = vld [vmem:[#allocation10 + $0xbe8] sm:$0xff]  ;;  %v17323_v23 = vcombine.high %v12948_v32, %v12952_v0 }
 0xb59   : > { %15689 = vmatprep.subr.bf16.mxu1 %v19637_v62  ;;  %v17439_v40 = vcombine.high %v13066_v26, %v13070_v61  ;;  %v17438_v15 = vcombine.low %v13066_v26, %v13070_v61  ;;  %v12956_v62 = vld [vmem:[#allocation10 + $0x858] sm:$0xff] }
 0xb5a   : > { %13769 = vmatpush1.bf16.msra.mxu0 %v17374_v53  ;;  %v12960_v53 = vld [vmem:[#allocation10 + $0x878] sm:$0xff] }
 0xb5b   : > { %13770 = vmatprep.subr.bf16.mxu0 %v17383_v54  ;;  %v17322_v54 = vcombine.low %v12948_v32, %v12952_v0  ;;  %v17331_v24 = vcombine.high %v12956_v62, %v12960_v53  ;;  %v13020_v26 = vld [vmem:[#allocation10 + $0xa58] sm:$0xff] }
 0xb5c   : > { %15690 = vmatpush1.bf16.msra.mxu1 %v19635_v60  ;;  %v12968_v60 = vld [vmem:[#allocation10 + $0x8b8] sm:$0xff] }
 0xb5d   : > { %15691 = vmatprep.subr.bf16.mxu1 %v19640_v16  ;;  %v17330_v16 = vcombine.low %v12956_v62, %v12960_v53  ;;  %v17338_v59 = vcombine.low %v12964_v31, %v12968_v60  ;;  %v13024_v61 = vld [vmem:[#allocation10 + $0xa78] sm:$0xff] }
 0xb5e   : > { %13771 = vmatpush1.bf16.msra.mxu0 %v17382_v19  ;;  %v17339_v19 = vcombine.high %v12964_v31, %v12968_v60  ;;  %v17394_v32 = vcombine.low %v13020_v26, %v13024_v61  ;;  %v13044_v53 = vld [vmem:[#allocation10 + $0xb18] sm:$0xff] }
 0xb5f   : > { %13772 = vmatprep.subr.bf16.mxu0 %v17391_v4  ;;  %v12972_v4 = vld [vmem:[#allocation10 + $0x8d8] sm:$0xff] }
 0xb60   : > { %15692 = vmatpush1.bf16.msra.mxu1 %v19638_v30  ;;  %v17347_v30 = vcombine.high %v12972_v4, %v12976_v17  ;;  %v13052_v60 = vld [vmem:[#allocation10 + $0xb58] sm:$0xff] }
 0xb61   : > { %15693 = vmatprep.subr.bf16.mxu1 %v19643_v41  ;;  %v12980_v41 = vld [vmem:[#allocation10 + $0x918] sm:$0xff] }
 0xb62   : > { %13773 = vmatpush1.bf16.msra.mxu0 %v17390_v28  ;;  %v12984_v28 = vld [vmem:[#allocation10 + $0x938] sm:$0xff] }
 0xb63   : > { %13774 = vmatprep.subr.bf16.mxu0 %v17399_v2  ;;  %v17346_v2 = vcombine.low %v12972_v4, %v12976_v17  ;;  %v17355_v1 = vcombine.high %v12980_v41, %v12984_v28  ;;  %v13060_v17 = vld [vmem:[#allocation10 + $0xb98] sm:$0xff] }
 0xb64   : > { %15694 = vmatpush1.bf16.msra.mxu1 %v19641_v57  ;;  %v12992_v57 = vld [vmem:[#allocation10 + $0x978] sm:$0xff] }
 0xb65   : > { %15695 = vmatprep.subr.bf16.mxu1 %v19646_v39  ;;  %v17354_v39 = vcombine.low %v12980_v41, %v12984_v28  ;;  %v17362_v8 = vcombine.low %v12988_v44, %v12992_v57  ;;  %v13068_v28 = vld [vmem:[#allocation10 + $0xbd8] sm:$0xff] }
 0xb66   : > { %13775 = vmatpush1.bf16.msra.mxu0 %v17398_v35  ;;  %v12996_v35 = vld [vmem:[#allocation10 + $0x998] sm:$0xff] }
 0xb67   : > { %13776 = vmatprep.subr.bf16.mxu0 %v17407_v46  ;;  %v13000_v46 = vld [vmem:[#allocation10 + $0x9b8] sm:$0xff] }
 0xb68   : > { %15696 = vmatpush1.bf16.msra.mxu1 %v19644_v3  ;;  %v17370_v21 = vcombine.low %v12996_v35, %v13000_v46 }
 0xb69   : > { %15697 = vmatprep.subr.bf16.mxu1 %v19649_v25 }
 0xb6a   : > { %13777 = vmatpush1.bf16.msra.mxu0 %v17406_v42  ;;  %v17371_v42 = vcombine.high %v12996_v35, %v13000_v46  ;;  %v13896_v46 = vld [vmem:[#allocation10 + $0xc48] sm:$0xff] }
 0xb6b   : > { %13778 = vmatprep.subr.bf16.mxu0 %v17415_v13 }
 0xb6c   : > { %15698 = vmatpush1.bf16.msra.mxu1 %v19647_v20  ;;  %v13004_v20 = vld [vmem:[#allocation10 + $0x9d8] sm:$0xff] }
 0xb6d   : > { %15699 = vmatprep.subr.bf16.mxu1 %v19652_v7  ;;  %v13008_v7 = vld [vmem:[#allocation10 + $0x9f8] sm:$0xff] }
 0xb6e   : > { %13779 = vmatpush1.bf16.msra.mxu0 %v17414_v55 }
 0xb6f   : > { %13780 = vmatprep.subr.bf16.mxu0 %v17423_v45 }
 0xb70   : > { %15700 = vmatpush1.bf16.msra.mxu1 %v19650_v49 }
 0xb71   : > { %15701 = vmatprep.subr.bf16.mxu1 %v19655_v38  ;;  %v13012_v38 = vld [vmem:[#allocation10 + $0xa18] sm:$0xff] }
 0xb72   : > { %13781 = vmatpush1.bf16.msra.mxu0 %v17422_v34  ;;  %v13016_v34 = vld [vmem:[#allocation10 + $0xa38] sm:$0xff] }
 0xb73   : > { %13782 = vmatprep.subr.bf16.mxu0 %v17431_v37  ;;  %v17378_v37 = vcombine.low %v13004_v20, %v13008_v7 }
 0xb74   : > { %15702 = vmatpush1.bf16.msra.mxu1 %v19653_v58  ;;  %v17386_v58 = vcombine.low %v13012_v38, %v13016_v34 }
 0xb75   : > { %15703 = vmatprep.subr.bf16.mxu1 %v19658_v18  ;;  %v17395_v18 = vcombine.high %v13020_v26, %v13024_v61  ;;  %v24162_v61 = vld [vmem:[#allocation11] sm:$0xff] }
 0xb76   : > { %13783 = vmatpush1.bf16.msra.mxu0 %v17430_v6  ;;  %v13028_v6 = vld [vmem:[#allocation10 + $0xa98] sm:$0xff] }
 0xb77   : > { %13784 = vmatprep.subr.bf16.mxu0 %v17439_v40  ;;  %v13032_v40 = vld [vmem:[#allocation10 + $0xab8] sm:$0xff] }
 0xb78   : > { %15704 = vmatpush1.bf16.msra.mxu1 %v19656_v43  ;;  %v17403_v0 = vcombine.high %v13028_v6, %v13032_v40  ;;  %v13036_v43 = vld [vmem:[#allocation10 + $0xad8] sm:$0xff] }
 0xb7a   : > { %13785 = vmatpush1.bf16.msra.mxu0 %v17438_v15  ;;  %v13040_v15 = vld [vmem:[#allocation10 + $0xaf8] sm:$0xff] }
 0xb7b   : > { %13836 = vmatprep.subr.bf16.mxu0 %v17323_v23  ;;  %v17402_v23 = vcombine.low %v13028_v6, %v13032_v40  ;;  %v17411_v62 = vcombine.high %v13036_v43, %v13040_v15  ;;  %v13940_v6 = vld [vmem:[#allocation10 + $0xda8] sm:$0xff]  ;;  %v14832_v40 = vrot.slane %v24162_v61, %v24992_v36 }
 0xb7d   : > { %13787 = vmatmul.mubr.bf16.vlgmr.msra.gmra.mrb[112].mxu0 %v24099_v27 }
 0xb7e   : > { %13837 = vmatpush1.bf16.msra.mxu0 %v17322_v54  ;;  %13868 = vmatprep.mubr.bf16.mxu0 %v24091_v56  ;;  %v17363_v56 = vcombine.high %v12988_v44, %v12992_v57  ;;  %v13048_v54 = vld [vmem:[#allocation10 + $0xb38] sm:$0xff]  ;;  %v13888_v57 = vld [vmem:[#allocation10 + $0xc08] sm:$0xff] }
 0xb7f   : > { %13838 = vmatprep.subr.bf16.mxu0 %v17331_v24  ;;  %v17410_v24 = vcombine.low %v13036_v43, %v13040_v15  ;;  %v17419_v31 = vcombine.high %v13044_v53, %v13048_v54 }
 0xb82   : > { %13839 = vmatpush1.bf16.msra.mxu0 %v17330_v16  ;;  %v13056_v16 = vld [vmem:[#allocation10 + $0xb78] sm:$0xff] }
 0xb83   : > { %13840 = vmatprep.subr.bf16.mxu0 %v17339_v19  ;;  %v17418_v19 = vcombine.low %v13044_v53, %v13048_v54  ;;  %v17427_v4 = vcombine.high %v13052_v60, %v13056_v16 }
 0xb86   : > { %13841 = vmatpush1.bf16.msra.mxu0 %v17338_v59  ;;  %v13064_v59 = vld [vmem:[#allocation10 + $0xbb8] sm:$0xff] }
 0xb87   : > { %13842 = vmatprep.subr.bf16.mxu0 %v17347_v30  ;;  %v17426_v30 = vcombine.low %v13052_v60, %v13056_v16  ;;  %v17435_v41 = vcombine.high %v13060_v17, %v13064_v59  ;;  %v13948_v60 = vld [vmem:[#allocation10 + $0xde8] sm:$0xff] }
 0xb8a   : > { %13843 = vmatpush1.bf16.msra.mxu0 %v17346_v2  ;;  %v13072_v2 = vld [vmem:[#allocation10 + $0xbf8] sm:$0xff] }
 0xb8b   : > { %13844 = vmatprep.subr.bf16.mxu0 %v17355_v1  ;;  %v17434_v1 = vcombine.low %v13060_v17, %v13064_v59  ;;  %v17443_v44 = vcombine.high %v13068_v28, %v13072_v2 }
 0xb8e   : > { %v13829_v47 = vpop.f32.mrb[112].mxu1  ;;  %13845 = vmatpush1.bf16.msra.mxu0 %v17354_v39  ;;  %v13892_v39 = vld [vmem:[#allocation10 + $0xc28] sm:$0xff] }
 0xb8f   : > { %v24151_v3 = vadd.f32 %v13829_v47, %v24143_v10  ;;  %v13831_v25 = vpop.f32.mrb[113].mxu1  ;;  %13846 = vmatprep.subr.bf16.mxu0 %v17363_v56  ;;  %v17379_v10 = vcombine.high %v13004_v20, %v13008_v7  ;;  %v17442_v56 = vcombine.low %v13068_v28, %v13072_v2  ;;  %v17447_v35 = vcombine.high %v13888_v57, %v13892_v39  ;;  %v13900_v47 = vld [vmem:[#allocation10 + $0xc68] sm:$0xff] }
 0xb90   : > { %v24154_v13 = vadd.f32 %v13831_v25, %v24146_v29  ;;  %v24156_v22 = vpop.f32.mrb[100].mxu0  ;;  %v13833_v51 = vpop.f32.mrb[114].mxu1  ;;  %v17387_v29 = vcombine.high %v13012_v38, %v13016_v34  ;;  %v17455_v25 = vcombine.high %v13896_v46, %v13900_v47  ;;  %v17454_v20 = vcombine.low %v13896_v46, %v13900_v47  ;;  %v13924_v38 = vld [vmem:[#allocation10 + $0xd28] sm:$0xff] }
 0xb91   : > { %v24158_v55 = vpop.f32.mrb[101].mxu0  ;;  %v13834_v45 = vpop.f32.mrb[115].mxu1  ;;  %v13908_v51 = vld [vmem:[#allocation10 + $0xca8] sm:$0xff] }
 0xb92   : > { %v12136_v9 = vpop.f32.mrb[102].mxu0  ;;  %13847 = vmatpush1.bf16.msra.mxu0 %v17362_v8  ;;  %v17446_v8 = vcombine.low %v13888_v57, %v13892_v39  ;;  %v13912_v45 = vld [vmem:[#allocation10 + $0xcc8] sm:$0xff] }
 0xb93   : > { %v12137_v49 = vpop.f32.mrb[103].mxu0  ;;  %13848 = vmatprep.subr.bf16.mxu0 %v17371_v42  ;;  %v13904_v42 = vld [vmem:[#allocation10 + $0xc88] sm:$0xff] }
 0xb94   : > { %v17463_v7 = vcombine.high %v13904_v42, %v13908_v51  ;;  %v13916_v9 = vld [vmem:[#allocation10 + $0xce8] sm:$0xff] }
 0xb95   : > { %v17471_v49 = vcombine.high %v13912_v45, %v13916_v9  ;;  %v17470_v34 = vcombine.low %v13912_v45, %v13916_v9  ;;  %v13956_v57 = vld [vmem:[#allocation10 + $0xe28] sm:$0xff] }
 0xb96   : > { %13849 = vmatpush1.bf16.msra.mxu0 %v17370_v21  ;;  %v17462_v21 = vcombine.low %v13904_v42, %v13908_v51  ;;  %v13960_v46 = vld [vmem:[#allocation10 + $0xe48] sm:$0xff] }
 0xb97   : > { %13850 = vmatprep.subr.bf16.mxu0 %v17379_v10  ;;  %v13920_v10 = vld [vmem:[#allocation10 + $0xd08] sm:$0xff] }
 0xb98   : > { %v17478_v26 = vcombine.low %v13920_v10, %v13924_v38  ;;  %v13972_v42 = vld [vmem:[#allocation10 + $0xea8] sm:$0xff] }
 0xb99   : > { %v13980_v45 = vld [vmem:[#allocation10 + $0xee8] sm:$0xff] }
 0xb9a   : > { %13851 = vmatpush1.bf16.msra.mxu0 %v17378_v37  ;;  %v17479_v37 = vcombine.high %v13920_v10, %v13924_v38  ;;  %v13988_v10 = vld [vmem:[#allocation10 + $0xf28] sm:$0xff] }
 0xb9b   : > { %13852 = vmatprep.subr.bf16.mxu0 %v17387_v29  ;;  %v13928_v29 = vld [vmem:[#allocation10 + $0xd48] sm:$0xff] }
 0xb9e   : > { %13853 = vmatpush1.bf16.msra.mxu0 %v17386_v58 }
 0xb9f   : > { %13854 = vmatprep.subr.bf16.mxu0 %v17395_v18  ;;  %v13936_v18 = vld [vmem:[#allocation10 + $0xd88] sm:$0xff] }
 0xba2   : > { %13855 = vmatpush1.bf16.msra.mxu0 %v17394_v32 }
 0xba3   : > { %13856 = vmatprep.subr.bf16.mxu0 %v17403_v0  ;;  %v14836_v0 = vrot.slane %v24162_v61, %v24993_v33 }
 0xba6   : > { %13857 = vmatpush1.bf16.msra.mxu0 %v17402_v23 }
 0xba7   : > { %13858 = vmatprep.subr.bf16.mxu0 %v17411_v62  ;;  %v17495_v62 = vcombine.high %v13936_v18, %v13940_v6 }
 0xbaa   : > { %13859 = vmatpush1.bf16.msra.mxu0 %v17410_v24 }
 0xbab   : > { %13860 = vmatprep.subr.bf16.mxu0 %v17419_v31  ;;  %v13944_v31 = vld [vmem:[#allocation10 + $0xdc8] sm:$0xff] }
 0xbae   : > { %13861 = vmatpush1.bf16.msra.mxu0 %v17418_v19 }
 0xbaf   : > { %13862 = vmatprep.subr.bf16.mxu0 %v17427_v4 }
 0xbb2   : > { %13863 = vmatpush1.bf16.msra.mxu0 %v17426_v30 }
 0xbb3   : > { %13864 = vmatprep.subr.bf16.mxu0 %v17435_v41  ;;  %v17494_v41 = vcombine.low %v13936_v18, %v13940_v6  ;;  %v14004_v18 = vld [vmem:[#allocation10 + $0xfa8] sm:$0xff] }
 0xbb6   : > { %13865 = vmatpush1.bf16.msra.mxu0 %v17434_v1 }
 0xbb7   : > { %13866 = vmatprep.subr.bf16.mxu0 %v17443_v44  ;;  %v13952_v44 = vld [vmem:[#allocation10 + $0xe08] sm:$0xff] }
 0xbb8   : > { %v17510_v47 = vcombine.low %v13952_v44, %v13956_v57 }
 0xbba   : > { %13867 = vmatpush1.bf16.msra.mxu0 %v17442_v56 }
 0xbbb   : > { %14696 = vmatprep.subr.bf16.mxu0 %v17447_v35  ;;  %v17511_v35 = vcombine.high %v13952_v44, %v13956_v57  ;;  %v13926_v44 = vld [vmem:[#allocation10 + $0xd38] sm:$0xff] }
 0xbbd   : > { %13869 = vmatmul.mubr.bf16.vlgmr.msra.gmra.mrb[116].mxu0 %v24099_v27  ;;  %v13932_v27 = vld [vmem:[#allocation10 + $0xd68] sm:$0xff] }
 0xbbe   : > { %14697 = vmatpush1.bf16.msra.mxu0 %v17446_v8  ;;  %14728 = vmatprep.mubr.bf16.mxu0 %v24107_v48  ;;  %v17487_v58 = vcombine.high %v13928_v29, %v13932_v27  ;;  %v17486_v43 = vcombine.low %v13928_v29, %v13932_v27  ;;  %v13996_v29 = vld [vmem:[#allocation10 + $0xf68] sm:$0xff] }
 0xbbf   : > { %14698 = vmatprep.subr.bf16.mxu0 %v17455_v25  ;;  %v13968_v25 = vld [vmem:[#allocation10 + $0xe88] sm:$0xff] }
 0xbc0   : > { %v17526_v9 = vcombine.low %v13968_v25, %v13972_v42 }
 0xbc2   : > { %14699 = vmatpush1.bf16.msra.mxu0 %v17454_v20  ;;  %v17527_v20 = vcombine.high %v13968_v25, %v13972_v42 }
 0xbc3   : > { %14700 = vmatprep.subr.bf16.mxu0 %v17463_v7  ;;  %v13976_v7 = vld [vmem:[#allocation10 + $0xec8] sm:$0xff] }
 0xbc4   : > { %v17534_v38 = vcombine.low %v13976_v7, %v13980_v45 }
 0xbc6   : > { %14701 = vmatpush1.bf16.msra.mxu0 %v17462_v21  ;;  %v17535_v21 = vcombine.high %v13976_v7, %v13980_v45 }
 0xbc7   : > { %14702 = vmatprep.subr.bf16.mxu0 %v17471_v49  ;;  %v13984_v49 = vld [vmem:[#allocation10 + $0xf08] sm:$0xff] }
 0xbc8   : > { %v17542_v27 = vcombine.low %v13984_v49, %v13988_v10 }
 0xbca   : > { %14703 = vmatpush1.bf16.msra.mxu0 %v17470_v34  ;;  %v17543_v34 = vcombine.high %v13984_v49, %v13988_v10 }
 0xbcb   : > { %14704 = vmatprep.subr.bf16.mxu0 %v17479_v37  ;;  %v13992_v37 = vld [vmem:[#allocation10 + $0xf48] sm:$0xff] }
 0xbcc   : > { %v17550_v6 = vcombine.low %v13992_v37, %v13996_v29 }
 0xbce   : > { %v14689_v32 = vpop.f32.mrb[116].mxu1  ;;  %14705 = vmatpush1.bf16.msra.mxu0 %v17478_v26  ;;  %v17551_v26 = vcombine.high %v13992_v37, %v13996_v29 }
 0xbcf   : > { %v14819_v15 = vadd.f32 %v14689_v32, %v24137_v11  ;;  %v14691_v23 = vpop.f32.mrb[117].mxu1  ;;  %14706 = vmatprep.subr.bf16.mxu0 %v17487_v58  ;;  %v14000_v58 = vld [vmem:[#allocation10 + $0xf88] sm:$0xff] }
 0xbd0   : > { %v14820_v53 = vadd.f32 %v14691_v23, %v24140_v12  ;;  %v12854_v54 = vpop.f32.mrb[104].mxu0  ;;  %v14693_v24 = vpop.f32.mrb[118].mxu1  ;;  %v17503_v12 = vcombine.high %v13944_v31, %v13948_v60  ;;  %v14008_v32 = vld [vmem:[#allocation10 + $0xfc8] sm:$0xff]  ;;  %v13890_v23 = vld [vmem:[#allocation10 + $0xc18] sm:$0xff] }
 0xbd1   : > { %v14869_v16 = vadd.f32 %v14832_v40, %v14819_v15  ;;  %v24171_v19 = vadd.f32 %v12854_v54, %v24129_v52  ;;  %v12856_v4 = vpop.f32.mrb[105].mxu0  ;;  %v14694_v17 = vpop.f32.mrb[119].mxu1  ;;  %v17502_v52 = vcombine.low %v13944_v31, %v13948_v60  ;;  %v17559_v40 = vcombine.high %v14000_v58, %v14004_v18  ;;  %v13898_v24 = vld [vmem:[#allocation10 + $0xc58] sm:$0xff] }
 0xbd2   : > { %v14870_v59 = vadd.f32 %v14836_v0, %v14820_v53  ;;  %v24174_v30 = vadd.f32 %v12856_v4, %v24131_v63  ;;  %v12858_v11 = vpop.f32.mrb[106].mxu0  ;;  %14707 = vmatpush1.bf16.msra.mxu0 %v17486_v43  ;;  %v13964_v63 = vld [vmem:[#allocation10 + $0xe68] sm:$0xff]  ;;  %v17558_v43 = vcombine.low %v14000_v58, %v14004_v18  ;;  %v13902_v31 = vld [vmem:[#allocation10 + $0xc78] sm:$0xff] }
 0xbd3   : > { %v14877_v28 = vmax.f32 %v14869_v16, 0.0  ;;  %v12859_v2 = vpop.f32.mrb[107].mxu0  ;;  %14708 = vmatprep.subr.bf16.mxu0 %v17495_v62  ;;  %v17519_v8 = vcombine.high %v13960_v46, %v13964_v63  ;;  %v17518_v51 = vcombine.low %v13960_v46, %v13964_v63  ;;  %v14012_v0 = vld [vmem:[#allocation10 + $0xfe8] sm:$0xff]  ;;  %v13894_v62 = vld [vmem:[#allocation10 + $0xc38] sm:$0xff]  ;;  %v17459_v16 = vcombine.high %v13898_v24, %v13902_v31 }
 0xbd4   : > { %v14878_v1 = vmax.f32 %v14870_v59, 0.0  ;;  %v17567_v15 = vcombine.high %v14008_v32, %v14012_v0  ;;  %v17566_v53 = vcombine.low %v14008_v32, %v14012_v0  ;;  %v17451_v54 = vcombine.high %v13890_v23, %v13894_v62  ;;  %v13906_v4 = vld [vmem:[#allocation10 + $0xc98] sm:$0xff] }
 0xbd5   : > { %v14885_v56 = vpack.c.bf16 %v14877_v28, %v14877_v28  ;;  %v17450_v60 = vcombine.low %v13890_v23, %v13894_v62  ;;  %v13910_v17 = vld [vmem:[#allocation10 + $0xcb8] sm:$0xff]  ;;  %v17458_v59 = vcombine.low %v13898_v24, %v13902_v31  ;;  %v19665_v23 = vld [vmem:[#allocation13 + $0x120] ss:$8 sps:$4 sm:$0xff]  }
 0xbd6   : > { %v14886_v39 = vpack.c.bf16 %v14878_v1, %v14878_v1  ;;  %14709 = vmatpush1.bf16.msra.mxu0 %v17494_v41  ;;  %v17467_v11 = vcombine.high %v13906_v4, %v13910_v17  ;;  %v13914_v41 = vld [vmem:[#allocation10 + $0xcd8] sm:$0xff]  ;;  %v17466_v2 = vcombine.low %v13906_v4, %v13910_v17  ;;  %v19673_v4 = vld [vmem:[#allocation13 + $0x144] ss:$8 sps:$4 sm:$0xff]  }
 0xbd7   : > { %14710 = vmatprep.subr.bf16.mxu0 %v17503_v12  ;;  %v13918_v28 = vld [vmem:[#allocation10 + $0xcf8] sm:$0xff] }
 0xbd8   : > { %15705 = vmatprep.mubr.bf16.mxu1 %v14886_v39  ;;  %v17475_v12 = vcombine.high %v13914_v41, %v13918_v28  ;;  %v13922_v1 = vld [vmem:[#allocation10 + $0xd18] sm:$0xff]  ;;  %v17474_v57 = vcombine.low %v13914_v41, %v13918_v28  ;;  %v19671_v41 = vld [vmem:[#allocation13 + $0x140] ss:$8 sps:$4 sm:$0xff]  }
 0xbd9   : > { %15706 = vmatmul.mubr.bf16.vlgmr.msra.gmra.mrb[124].mxu1 %v14885_v56  ;;  %v17483_v39 = vcombine.high %v13922_v1, %v13926_v44  ;;  %v13934_v56 = vld [vmem:[#allocation10 + $0xd78] sm:$0xff] }
 0xbda   : > { %14711 = vmatpush1.bf16.msra.mxu0 %v17502_v52  ;;  %v13930_v52 = vld [vmem:[#allocation10 + $0xd58] sm:$0xff] }
 0xbdb   : > { %14712 = vmatprep.subr.bf16.mxu0 %v17511_v35  ;;  %v17482_v35 = vcombine.low %v13922_v1, %v13926_v44  ;;  %v13938_v46 = vld [vmem:[#allocation10 + $0xd98] sm:$0xff] }
 0xbdc   : > { %v13942_v63 = vld [vmem:[#allocation10 + $0xdb8] sm:$0xff] }
 0xbdd   : > { %v17498_v37 = vcombine.low %v13938_v46, %v13942_v63  ;;  %v13954_v58 = vld [vmem:[#allocation10 + $0xe18] sm:$0xff] }
 0xbde   : > { %14713 = vmatpush1.bf16.msra.mxu0 %v17510_v47  ;;  %v13958_v18 = vld [vmem:[#allocation10 + $0xe38] sm:$0xff] }
 0xbdf   : > { %14714 = vmatprep.subr.bf16.mxu0 %v17519_v8  ;;  %v17490_v8 = vcombine.low %v13930_v52, %v13934_v56  ;;  %v17515_v32 = vcombine.high %v13954_v58, %v13958_v18  ;;  %v13962_v0 = vld [vmem:[#allocation10 + $0xe58] sm:$0xff] }
 0xbe0   : > { %v13974_v24 = vld [vmem:[#allocation10 + $0xeb8] sm:$0xff] }
 0xbe1   : > { %v13978_v17 = vld [vmem:[#allocation10 + $0xed8] sm:$0xff] }
 0xbe2   : > { %14715 = vmatpush1.bf16.msra.mxu0 %v17518_v51  ;;  %v17499_v51 = vcombine.high %v13938_v46, %v13942_v63  ;;  %v13990_v1 = vld [vmem:[#allocation10 + $0xf38] sm:$0xff]  ;;  %v19677_v46 = vld [vmem:[#allocation13 + $0x160] ss:$8 sps:$4 sm:$0xff]  }
 0xbe3   : > { %14716 = vmatprep.subr.bf16.mxu0 %v17527_v20 }
 0xbe6   : > { %14717 = vmatpush1.bf16.msra.mxu0 %v17526_v9  ;;  %v13946_v9 = vld [vmem:[#allocation10 + $0xdd8] sm:$0xff] }
 0xbe7   : > { %14718 = vmatprep.subr.bf16.mxu0 %v17535_v21  ;;  %v13950_v21 = vld [vmem:[#allocation10 + $0xdf8] sm:$0xff] }
 0xbea   : > { %14719 = vmatpush1.bf16.msra.mxu0 %v17534_v38 }
 0xbeb   : > { %14720 = vmatprep.subr.bf16.mxu0 %v17543_v34 }
 0xbee   : > { %14721 = vmatpush1.bf16.msra.mxu0 %v17542_v27  ;;  %v17507_v27 = vcombine.high %v13946_v9, %v13950_v21 }
 0xbef   : > { %14722 = vmatprep.subr.bf16.mxu0 %v17551_v26  ;;  %v19661_v26 = vld [vmem:[#allocation13 + $0x104] ss:$8 sps:$4 sm:$0xff]  }
 0xbf0   : > { %15714 = vmatprep.subr.bf16.mxu1 %v19661_v26  ;;  %v19691_v26 = vld [vmem:[#allocation13 + $0x1a4] ss:$8 sps:$4 sm:$0xff]  }
 0xbf2   : > { %14723 = vmatpush1.bf16.msra.mxu0 %v17550_v6  ;;  %v19664_v6 = vld [vmem:[#allocation13 + $0x114] ss:$8 sps:$4 sm:$0xff]  }
 0xbf3   : > { %14724 = vmatprep.subr.bf16.mxu0 %v17559_v40  ;;  %v19662_v40 = vld [vmem:[#allocation13 + $0x110] ss:$8 sps:$4 sm:$0xff]  }
 0xbf6   : > { %14725 = vmatpush1.bf16.msra.mxu0 %v17558_v43  ;;  %v13966_v43 = vld [vmem:[#allocation10 + $0xe78] sm:$0xff] }
 0xbf7   : > { %14726 = vmatprep.subr.bf16.mxu0 %v17567_v15  ;;  %v17514_v15 = vcombine.low %v13954_v58, %v13958_v18  ;;  %v17523_v62 = vcombine.high %v13962_v0, %v13966_v43  ;;  %v17522_v31 = vcombine.low %v13962_v0, %v13966_v43  ;;  %v19689_v58 = vld [vmem:[#allocation13 + $0x1a0] ss:$8 sps:$4 sm:$0xff]   ;;  %v19694_v18 = vld [vmem:[#allocation13 + $0x1b4] ss:$8 sps:$4 sm:$0xff]   ;;  %v19703_v43 = vld [vmem:[#allocation13 + $0x1e4] ss:$8 sps:$4 sm:$0xff]  }
 0xbfa   : > { %14727 = vmatpush1.bf16.msra.mxu0 %v17566_v53  ;;  %v19670_v53 = vld [vmem:[#allocation13 + $0x134] ss:$8 sps:$4 sm:$0xff]  }
 0xbfb   : > { %14778 = vmatprep.subr.bf16.mxu0 %v17451_v54  ;;  %v13970_v54 = vld [vmem:[#allocation10 + $0xe98] sm:$0xff] }
 0xbfd   : > { %14729 = vmatmul.mubr.bf16.vlgmr.msra.gmra.mrb[120].mxu0 %v24119_v50 }
 0xbfe   : > { %14779 = vmatpush1.bf16.msra.mxu0 %v17450_v60  ;;  %14810 = vmatprep.mubr.bf16.mxu0 %v24107_v48  ;;  %v17491_v48 = vcombine.high %v13930_v52, %v13934_v56  ;;  %v19668_v60 = vld [vmem:[#allocation13 + $0x130] ss:$8 sps:$4 sm:$0xff]   ;;  %v19679_v52 = vld [vmem:[#allocation13 + $0x164] ss:$8 sps:$4 sm:$0xff]  }
 0xbff   : > { %14780 = vmatprep.subr.bf16.mxu0 %v17459_v16  ;;  %v17531_v16 = vcombine.high %v13970_v54, %v13974_v24  ;;  %v13994_v56 = vld [vmem:[#allocation10 + $0xf58] sm:$0xff] }
 0xc02   : > { %14781 = vmatpush1.bf16.msra.mxu0 %v17458_v59  ;;  %v13982_v59 = vld [vmem:[#allocation10 + $0xef8] sm:$0xff] }
 0xc03   : > { %14782 = vmatprep.subr.bf16.mxu0 %v17467_v11  ;;  %v17530_v11 = vcombine.low %v13970_v54, %v13974_v24  ;;  %v17539_v28 = vcombine.high %v13978_v17, %v13982_v59  ;;  %v17538_v44 = vcombine.low %v13978_v17, %v13982_v59  ;;  %v19706_v24 = vld [vmem:[#allocation13 + $0x1f4] ss:$8 sps:$4 sm:$0xff]  }
 0xc06   : > { %14783 = vmatpush1.bf16.msra.mxu0 %v17466_v2  ;;  %v19676_v2 = vld [vmem:[#allocation13 + $0x154] ss:$8 sps:$4 sm:$0xff]  }
 0xc07   : > { %14784 = vmatprep.subr.bf16.mxu0 %v17475_v12  ;;  %v13986_v12 = vld [vmem:[#allocation10 + $0xf18] sm:$0xff] }
 0xc0a   : > { %14785 = vmatpush1.bf16.msra.mxu0 %v17474_v57  ;;  %v19674_v57 = vld [vmem:[#allocation13 + $0x150] ss:$8 sps:$4 sm:$0xff]  }
 0xc0b   : > { %14786 = vmatprep.subr.bf16.mxu0 %v17483_v39  ;;  %v17547_v39 = vcombine.high %v13986_v12, %v13990_v1 }
 0xc0e   : > { %v14771_v47 = vpop.f32.mrb[120].mxu1  ;;  %14787 = vmatpush1.bf16.msra.mxu0 %v17482_v35  ;;  %v13998_v35 = vld [vmem:[#allocation10 + $0xf78] sm:$0xff] }
 0xc0f   : > { %v24179_v25 = vadd.f32 %v14771_v47, %v24151_v3  ;;  %v14773_v42 = vpop.f32.mrb[121].mxu1  ;;  %14788 = vmatprep.subr.bf16.mxu0 %v17491_v48  ;;  %v17546_v48 = vcombine.low %v13986_v12, %v13990_v1  ;;  %v17555_v63 = vcombine.high %v13994_v56, %v13998_v35  ;;  %v19682_v47 = vld [vmem:[#allocation13 + $0x174] ss:$8 sps:$4 sm:$0xff]   ;;  %v14844_v1 = vrot.slane %v24162_v61, %v24991_v14  ;;  %v19803_v14 = vld [vmem:[#allocation16 + $0x40] sm:$0xff]  }
 0xc10   : > { %v24182_v20 = vadd.f32 %v14773_v42, %v24154_v13  ;;  %v12936_v7 = vpop.f32.mrb[108].mxu0  ;;  %v14775_v45 = vpop.f32.mrb[122].mxu1  ;;  %v19659_v13 = vld [vmem:[#allocation13 + $0x100] ss:$8 sps:$4 sm:$0xff]   ;;  %v14006_v42 = vld [vmem:[#allocation10 + $0xfb8] sm:$0xff] }
 0xc11   : > { %v24185_v49 = vadd.f32 %v12936_v7, %v24156_v22  ;;  %v12938_v10 = vpop.f32.mrb[109].mxu0  ;;  %v14776_v38 = vpop.f32.mrb[123].mxu1  ;;  %v17506_v22 = vcombine.low %v13946_v9, %v13950_v21  ;;  %15715 = vmatpush1.bf16.msra.mxu1 %v19659_v13  ;;  %v19680_v7 = vld [vmem:[#allocation13 + $0x170] ss:$8 sps:$4 sm:$0xff]   ;;  %v19685_v9 = vld [vmem:[#allocation13 + $0x184] ss:$8 sps:$4 sm:$0xff]  }
 0xc12   : > { %v24188_v34 = vadd.f32 %v12938_v10, %v24158_v55  ;;  %v12940_v3 = vpop.f32.mrb[110].mxu0  ;;  %14789 = vmatpush1.bf16.msra.mxu0 %v17490_v8  ;;  %15716 = vmatprep.subr.bf16.mxu1 %v19664_v6  ;;  %v19667_v55 = vld [vmem:[#allocation13 + $0x124] ss:$8 sps:$4 sm:$0xff]   ;;  %v14002_v8 = vld [vmem:[#allocation10 + $0xf98] sm:$0xff] }
 0xc13   : > { %v12941_v29 = vpop.f32.mrb[111].mxu0  ;;  %14790 = vmatprep.subr.bf16.mxu0 %v17499_v51  ;;  %v17554_v51 = vcombine.low %v13994_v56, %v13998_v35  ;;  %v17563_v45 = vcombine.high %v14002_v8, %v14006_v42  ;;  %v14010_v21 = vld [vmem:[#allocation10 + $0xfd8] sm:$0xff]  ;;  %v17562_v38 = vcombine.low %v14002_v8, %v14006_v42  ;;  %v19683_v3 = vld [vmem:[#allocation13 + $0x180] ss:$8 sps:$4 sm:$0xff]  }
 0xc14   : > { %v14014_v10 = vld [vmem:[#allocation10 + $0xff8] sm:$0xff]  ;;  %v19707_v8 = vld [vmem:[#allocation13 + $0x200] ss:$8 sps:$4 sm:$0xff]  }
 0xc15   : > { %15717 = vmatpush1.bf16.msra.mxu1 %v19662_v40  ;;  %v19688_v29 = vld [vmem:[#allocation13 + $0x194] ss:$8 sps:$4 sm:$0xff]   ;;  %v19686_v13 = vld [vmem:[#allocation13 + $0x190] ss:$8 sps:$4 sm:$0xff]   ;;  %v19695_v40 = vld [vmem:[#allocation13 + $0x1c0] ss:$8 sps:$4 sm:$0xff]  }
 0xc16   : > { %14791 = vmatpush1.bf16.msra.mxu0 %v17498_v37  ;;  %15718 = vmatprep.subr.bf16.mxu1 %v19667_v55  ;;  %v17571_v37 = vcombine.high %v14010_v21, %v14014_v10  ;;  %v19692_v6 = vld [vmem:[#allocation13 + $0x1b0] ss:$8 sps:$4 sm:$0xff]  }
 0xc17   : > { %14792 = vmatprep.subr.bf16.mxu0 %v17507_v27  ;;  %v17570_v27 = vcombine.low %v14010_v21, %v14014_v10  ;;  %v19698_v55 = vld [vmem:[#allocation13 + $0x1d0] ss:$8 sps:$4 sm:$0xff]  }
 0xc18   : > { %v19806_v21 = vld [vmem:[#allocation16 + $0x8] sm:$0xff]   ;;  %v19807_v10 = vld [vmem:[#allocation16 + $0x50] sm:$0xff]  }
 0xc19   : > { %15719 = vmatpush1.bf16.msra.mxu1 %v19665_v23 }
 0xc1a   : > { %14793 = vmatpush1.bf16.msra.mxu0 %v17506_v22  ;;  %15720 = vmatprep.subr.bf16.mxu1 %v19670_v53  ;;  %v19697_v22 = vld [vmem:[#allocation13 + $0x1c4] ss:$8 sps:$4 sm:$0xff]  }
 0xc1b   : > { %14794 = vmatprep.subr.bf16.mxu0 %v17515_v32  ;;  %v19700_v32 = vld [vmem:[#allocation13 + $0x1d4] ss:$8 sps:$4 sm:$0xff]  }
 0xc1d   : > { %15721 = vmatpush1.bf16.msra.mxu1 %v19668_v60  ;;  %v19709_v60 = vld [vmem:[#allocation13 + $0x204] ss:$8 sps:$4 sm:$0xff]  }
 0xc1e   : > { %14795 = vmatpush1.bf16.msra.mxu0 %v17514_v15  ;;  %15722 = vmatprep.subr.bf16.mxu1 %v19673_v4 }
 0xc1f   : > { %14796 = vmatprep.subr.bf16.mxu0 %v17523_v62  ;;  %v19701_v62 = vld [vmem:[#allocation13 + $0x1e0] ss:$8 sps:$4 sm:$0xff]  }
 0xc21   : > { %15723 = vmatpush1.bf16.msra.mxu1 %v19671_v41 }
 0xc22   : > { %14797 = vmatpush1.bf16.msra.mxu0 %v17522_v31  ;;  %15724 = vmatprep.subr.bf16.mxu1 %v19676_v2  ;;  %v19704_v31 = vld [vmem:[#allocation13 + $0x1f0] ss:$8 sps:$4 sm:$0xff]   ;;  %v14840_v2 = vrot.slane %v24162_v61, %v24990_v5  ;;  %v19712_v5 = vld [vmem:[#allocation13 + $0x214] ss:$8 sps:$4 sm:$0xff]  }
 0xc23   : > { %14798 = vmatprep.subr.bf16.mxu0 %v17531_v16 }
 0xc25   : > { %15725 = vmatpush1.bf16.msra.mxu1 %v19674_v57 }
 0xc26   : > { %14799 = vmatpush1.bf16.msra.mxu0 %v17530_v11  ;;  %15726 = vmatprep.subr.bf16.mxu1 %v19679_v52  ;;  %v24994_v11 = vld [vmem:[#allocation32_spill] sm:$0xff] }
 0xc27   : > { %14800 = vmatprep.subr.bf16.mxu0 %v17539_v28  ;;  %v24995_v41 = vsub.s32 5, %v24994_v11 }
 0xc29   : > { %15727 = vmatpush1.bf16.msra.mxu1 %v19677_v46  ;;  %v14852_v28 = vrot.slane %v24162_v61, %v24995_v41  ;;  %v19746_v41 = vld [vmem:[#allocation13 + $0x2d0] ss:$8 sps:$4 sm:$0xff]  }
 0xc2a   : > { %14801 = vmatpush1.bf16.msra.mxu0 %v17538_v44  ;;  %15728 = vmatprep.subr.bf16.mxu1 %v19682_v47 }
 0xc2b   : > { %14802 = vmatprep.subr.bf16.mxu0 %v17547_v39  ;;  %v14874_v57 = vadd.f32 %v14852_v28, %v24182_v20  ;;  %v19710_v20 = vld [vmem:[#allocation13 + $0x210] ss:$8 sps:$4 sm:$0xff]   ;;  %v14859_v28 = vsub.s32 7, %v24994_v11 }
 0xc2d   : > { %15729 = vmatpush1.bf16.msra.mxu1 %v19680_v7  ;;  %v14882_v46 = vmax.f32 %v14874_v57, 0.0  ;;  %v19804_v7 = vld [vmem:[#allocation16] sm:$0xff]  }
 0xc2e   : > { %14803 = vmatpush1.bf16.msra.mxu0 %v17546_v48  ;;  %15730 = vmatprep.subr.bf16.mxu1 %v19685_v9  ;;  %v19715_v9 = vld [vmem:[#allocation13 + $0x224] ss:$8 sps:$4 sm:$0xff]   ;;  %v19749_v57 = vld [vmem:[#allocation13 + $0x2e0] ss:$8 sps:$4 sm:$0xff]  }
 0xc2f   : > { %14804 = vmatprep.subr.bf16.mxu0 %v17555_v63 }
 0xc31   : > { %15731 = vmatpush1.bf16.msra.mxu1 %v19683_v3  ;;  %v19718_v3 = vld [vmem:[#allocation13 + $0x234] ss:$8 sps:$4 sm:$0xff]  }
 0xc32   : > { %14805 = vmatpush1.bf16.msra.mxu0 %v17554_v51  ;;  %15732 = vmatprep.subr.bf16.mxu1 %v19688_v29  ;;  %v14890_v51 = vpack.c.bf16 %v14882_v46, %v14882_v46  ;;  %v19809_v29 = vld [vmem:[#allocation16 + $0x58] sm:$0xff]  }
 0xc33   : > { %14806 = vmatprep.subr.bf16.mxu0 %v17563_v45  ;;  %v19805_v45 = vld [vmem:[#allocation16 + $0x48] sm:$0xff]  }
 0xc35   : > { %15733 = vmatpush1.bf16.msra.mxu1 %v19686_v13  ;;  %v19721_v13 = vld [vmem:[#allocation13 + $0x244] ss:$8 sps:$4 sm:$0xff]  }
 0xc36   : > { %14807 = vmatpush1.bf16.msra.mxu0 %v17562_v38  ;;  %15734 = vmatprep.subr.bf16.mxu1 %v19691_v26  ;;  %v19713_v38 = vld [vmem:[#allocation13 + $0x220] ss:$8 sps:$4 sm:$0xff]  }
 0xc37   : > { %14808 = vmatprep.subr.bf16.mxu0 %v17571_v37  ;;  %v19808_v37 = vld [vmem:[#allocation16 + $0x10] sm:$0xff]   ;;  %v19810_v26 = vld [vmem:[#allocation16 + $0x18] sm:$0xff]  }
 0xc39   : > { %15735 = vmatpush1.bf16.msra.mxu1 %v19689_v58  ;;  %v19811_v58 = vld [vmem:[#allocation16 + $0x60] sm:$0xff]  }
 0xc3a   : > { %14809 = vmatpush1.bf16.msra.mxu0 %v17570_v27  ;;  %15736 = vmatprep.subr.bf16.mxu1 %v19694_v18  ;;  %v19716_v27 = vld [vmem:[#allocation13 + $0x230] ss:$8 sps:$4 sm:$0xff]   ;;  %v19719_v18 = vld [vmem:[#allocation13 + $0x240] ss:$8 sps:$4 sm:$0xff]  }
 0xc3b   : > { %17721 = vmatprep.subr.bf16.mxu0 %v19803_v14 }
 0xc3d   : > { %14811 = vmatmul.mubr.bf16.vlgmr.msra.gmra.mrb[124].mxu0 %v24119_v50  ;;  %15737 = vmatpush1.bf16.msra.mxu1 %v19692_v6  ;;  %v19724_v6 = vld [vmem:[#allocation13 + $0x254] ss:$8 sps:$4 sm:$0xff]  }
 0xc3e   : > { %15738 = vmatprep.subr.bf16.mxu1 %v19697_v22  ;;  %17722 = vmatpush3.bf16.msra.mxu0 %v19804_v7  ;;  %v19812_v22 = vld [vmem:[#allocation16 + $0x20] sm:$0xff]   ;;  %v19758_v7 = vld [vmem:[#allocation13 + $0x310] ss:$8 sps:$4 sm:$0xff]  }
 0xc3f   : > { %17723 = vmatprep.subr.bf16.mxu0 %v19805_v45  ;;  %v19761_v45 = vld [vmem:[#allocation13 + $0x320] ss:$8 sps:$4 sm:$0xff]  }
 0xc41   : > { %15739 = vmatpush1.bf16.msra.mxu1 %v19695_v40  ;;  %v19813_v40 = vld [vmem:[#allocation16 + $0x68] sm:$0xff]  }
 0xc42   : > { %15740 = vmatprep.subr.bf16.mxu1 %v19700_v32  ;;  %17724 = vmatpush3.bf16.msra.mxu0 %v19806_v21  ;;  %v19722_v32 = vld [vmem:[#allocation13 + $0x250] ss:$8 sps:$4 sm:$0xff]   ;;  %v19769_v21 = vld [vmem:[#allocation13 + $0x344] ss:$8 sps:$4 sm:$0xff]  }
 0xc43   : > { %17725 = vmatprep.subr.bf16.mxu0 %v19807_v10  ;;  %v19767_v10 = vld [vmem:[#allocation13 + $0x340] ss:$8 sps:$4 sm:$0xff]  }
 0xc45   : > { %15741 = vmatpush1.bf16.msra.mxu1 %v19698_v55  ;;  %v19727_v55 = vld [vmem:[#allocation13 + $0x264] ss:$8 sps:$4 sm:$0xff]  }
 0xc46   : > { %15742 = vmatprep.subr.bf16.mxu1 %v19703_v43  ;;  %17726 = vmatpush3.bf16.msra.mxu0 %v19808_v37  ;;  %v19725_v43 = vld [vmem:[#allocation13 + $0x260] ss:$8 sps:$4 sm:$0xff]   ;;  %v19775_v37 = vld [vmem:[#allocation13 + $0x364] ss:$8 sps:$4 sm:$0xff]  }
 0xc47   : > { %17727 = vmatprep.subr.bf16.mxu0 %v19809_v29  ;;  %v19773_v29 = vld [vmem:[#allocation13 + $0x360] ss:$8 sps:$4 sm:$0xff]  }
 0xc49   : > { %15743 = vmatpush1.bf16.msra.mxu1 %v19701_v62  ;;  %v19733_v62 = vld [vmem:[#allocation13 + $0x284] ss:$8 sps:$4 sm:$0xff]  }
 0xc4a   : > { %15744 = vmatprep.subr.bf16.mxu1 %v19706_v24  ;;  %17728 = vmatpush3.bf16.msra.mxu0 %v19810_v26  ;;  %v19739_v24 = vld [vmem:[#allocation13 + $0x2a4] ss:$8 sps:$4 sm:$0xff]  }
 0xc4b   : > { %17729 = vmatprep.subr.bf16.mxu0 %v19811_v58  ;;  %v19781_v26 = vld [vmem:[#allocation13 + $0x384] ss:$8 sps:$4 sm:$0xff]   ;;  %v19779_v58 = vld [vmem:[#allocation13 + $0x380] ss:$8 sps:$4 sm:$0xff]  }
 0xc4d   : > { %15745 = vmatpush1.bf16.msra.mxu1 %v19704_v31  ;;  %v19737_v31 = vld [vmem:[#allocation13 + $0x2a0] ss:$8 sps:$4 sm:$0xff]  }
 0xc4e   : > { %15755 = vmatprep.subr.bf16.mxu1 %v19709_v60  ;;  %17730 = vmatpush3.bf16.msra.mxu0 %v19812_v22  ;;  %v19742_v60 = vld [vmem:[#allocation13 + $0x2b4] ss:$8 sps:$4 sm:$0xff]   ;;  %v19787_v22 = vld [vmem:[#allocation13 + $0x3a4] ss:$8 sps:$4 sm:$0xff]  }
 0xc4f   : > { %17731 = vmatprep.subr.bf16.mxu0 %v19813_v40  ;;  %v19785_v40 = vld [vmem:[#allocation13 + $0x3a0] ss:$8 sps:$4 sm:$0xff]  }
 0xc50   : > { %v13788_v0 = vpop.f32.mrb[112].mxu0 }
 0xc51   : > { %v13879_v15 = vadd.f32 %v13788_v0, %v24171_v19  ;;  %v13790_v23 = vpop.f32.mrb[113].mxu0  ;;  %v19814_v0 = vld [vmem:[#allocation16 + $0x28] sm:$0xff]  }
 0xc52   : > { %v13880_v50 = vadd.f32 %v13790_v23, %v24174_v30  ;;  %v13792_v53 = vpop.f32.mrb[114].mxu0  ;;  %17732 = vmatpush3.bf16.msra.mxu0 %v19814_v0  ;;  %v19728_v23 = vld [vmem:[#allocation13 + $0x270] ss:$8 sps:$4 sm:$0xff]   ;;  %v19793_v0 = vld [vmem:[#allocation13 + $0x3c4] ss:$8 sps:$4 sm:$0xff]  }
 0xc53   : > { %v13793_v54 = vpop.f32.mrb[115].mxu0  ;;  %v19736_v53 = vld [vmem:[#allocation13 + $0x294] ss:$8 sps:$4 sm:$0xff]  }
 0xc54   : > { %v19734_v54 = vld [vmem:[#allocation13 + $0x290] ss:$8 sps:$4 sm:$0xff]  }
 0xc90   : > { %v13870_v16 = vpop.f32.mrb[116].mxu0 }
 0xc91   : > { %v24194_v4 = vadd.f32 %v13870_v16, %v24185_v49  ;;  %v13872_v17 = vpop.f32.mrb[117].mxu0  ;;  %v19740_v16 = vld [vmem:[#allocation13 + $0x2b0] ss:$8 sps:$4 sm:$0xff]  }
 0xc92   : > { %v24197_v19 = vadd.f32 %v13872_v17, %v24188_v34  ;;  %v13874_v59 = vpop.f32.mrb[118].mxu0  ;;  %v19745_v17 = vld [vmem:[#allocation13 + $0x2c4] ss:$8 sps:$4 sm:$0xff]  }
 0xc93   : > { %v13875_v30 = vpop.f32.mrb[119].mxu0  ;;  %v19743_v59 = vld [vmem:[#allocation13 + $0x2c0] ss:$8 sps:$4 sm:$0xff]  }
 0xc94   : > { %v19748_v30 = vld [vmem:[#allocation13 + $0x2d4] ss:$8 sps:$4 sm:$0xff]  }
 0xcd0   : > { %v14730_v12 = vpop.f32.mrb[120].mxu0 }
 0xcd1   : > { %v14821_v44 = vadd.f32 %v14730_v12, %v13879_v15  ;;  %v14732_v49 = vpop.f32.mrb[121].mxu0  ;;  %v19730_v15 = vld [vmem:[#allocation13 + $0x274] ss:$8 sps:$4 sm:$0xff]  }
 0xcd2   : > { %v14822_v39 = vadd.f32 %v14732_v49, %v13880_v50  ;;  %v14734_v34 = vpop.f32.mrb[122].mxu0  ;;  %v19731_v50 = vld [vmem:[#allocation13 + $0x280] ss:$8 sps:$4 sm:$0xff]   ;;  %v14860_v49 = vrot.slane %v24162_v61, %v14859_v28 }
 0xcd3   : > { %v14871_v52 = vadd.f32 %v14840_v2, %v14821_v44  ;;  %v14735_v56 = vpop.f32.mrb[123].mxu0  ;;  %v24996_v2 = vsub.s32 4, %v24994_v11 }
 0xcd4   : > { %v14872_v35 = vadd.f32 %v14844_v1, %v14822_v39  ;;  %v19751_v1 = vld [vmem:[#allocation13 + $0x2e4] ss:$8 sps:$4 sm:$0xff]   ;;  %v19754_v56 = vld [vmem:[#allocation13 + $0x2f4] ss:$8 sps:$4 sm:$0xff]  }
 0xcd5   : > { %v14879_v48 = vmax.f32 %v14871_v52, 0.0  ;;  %v14848_v12 = vrot.slane %v24162_v61, %v24996_v2 }
 0xcd6   : > { %v14880_v63 = vmax.f32 %v14872_v35, 0.0 }
 0xcd7   : > { %v14887_v42 = vpack.c.bf16 %v14879_v48, %v14879_v48  ;;  %v14873_v39 = vadd.f32 %v14848_v12, %v24179_v25  ;;  %v19755_v25 = vld [vmem:[#allocation13 + $0x300] ss:$8 sps:$4 sm:$0xff]  }
 0xcd8   : > { %v14888_v47 = vpack.c.bf16 %v14880_v63, %v14880_v63 }
 0xcda   : > { %15746 = vmatprep.mubr.bf16.mxu1 %v14888_v47  ;;  %v19752_v47 = vld [vmem:[#allocation13 + $0x2f0] ss:$8 sps:$4 sm:$0xff]  }
 0xcdb   : > { %15747 = vmatmul.mubr.bf16.vlgmr.msra.gmra.mrb[124].mxu1 %v14887_v42  ;;  %v19757_v42 = vld [vmem:[#allocation13 + $0x304] ss:$8 sps:$4 sm:$0xff]  }
 0xcdc   : > { %15756 = vmatpush1.bf16.msra.mxu1 %v19707_v8  ;;  %15787 = vmatprep.mubr.bf16.mxu1 %v14890_v51  ;;  %v14881_v8 = vmax.f32 %v14873_v39, 0.0 }
 0xcdd   : > { %15757 = vmatprep.subr.bf16.mxu1 %v19712_v5 }
 0xcde   : > { %v14889_v14 = vpack.c.bf16 %v14881_v8, %v14881_v8 }
 0xce0   : > { %15758 = vmatpush1.bf16.msra.mxu1 %v19710_v20  ;;  %v19766_v20 = vld [vmem:[#allocation13 + $0x334] ss:$8 sps:$4 sm:$0xff]  }
 0xce1   : > { %15759 = vmatprep.subr.bf16.mxu1 %v19715_v9  ;;  %v19764_v9 = vld [vmem:[#allocation13 + $0x330] ss:$8 sps:$4 sm:$0xff]  }
 0xce4   : > { %15760 = vmatpush1.bf16.msra.mxu1 %v19713_v38  ;;  %v19772_v38 = vld [vmem:[#allocation13 + $0x354] ss:$8 sps:$4 sm:$0xff]  }
 0xce5   : > { %15761 = vmatprep.subr.bf16.mxu1 %v19718_v3  ;;  %v19770_v3 = vld [vmem:[#allocation13 + $0x350] ss:$8 sps:$4 sm:$0xff]  }
 0xce8   : > { %15762 = vmatpush1.bf16.msra.mxu1 %v19716_v27  ;;  %v19778_v27 = vld [vmem:[#allocation13 + $0x374] ss:$8 sps:$4 sm:$0xff]  }
 0xce9   : > { %15763 = vmatprep.subr.bf16.mxu1 %v19721_v13  ;;  %v19776_v13 = vld [vmem:[#allocation13 + $0x370] ss:$8 sps:$4 sm:$0xff]  }
 0xcec   : > { %15764 = vmatpush1.bf16.msra.mxu1 %v19719_v18  ;;  %v19784_v18 = vld [vmem:[#allocation13 + $0x394] ss:$8 sps:$4 sm:$0xff]  }
 0xced   : > { %15765 = vmatprep.subr.bf16.mxu1 %v19724_v6  ;;  %v19782_v6 = vld [vmem:[#allocation13 + $0x390] ss:$8 sps:$4 sm:$0xff]  }
 0xcf0   : > { %15766 = vmatpush1.bf16.msra.mxu1 %v19722_v32  ;;  %v19790_v32 = vld [vmem:[#allocation13 + $0x3b4] ss:$8 sps:$4 sm:$0xff]  }
 0xcf1   : > { %15767 = vmatprep.subr.bf16.mxu1 %v19727_v55  ;;  %v19788_v55 = vld [vmem:[#allocation13 + $0x3b0] ss:$8 sps:$4 sm:$0xff]  }
 0xcf4   : > { %15768 = vmatpush1.bf16.msra.mxu1 %v19725_v43  ;;  %v19791_v43 = vld [vmem:[#allocation13 + $0x3c0] ss:$8 sps:$4 sm:$0xff]  }
 0xcf5   : > { %15769 = vmatprep.subr.bf16.mxu1 %v19730_v15  ;;  %v14855_v15 = vsub.s32 6, %v24994_v11 }
 0xcf8   : > { %15770 = vmatpush1.bf16.msra.mxu1 %v19728_v23  ;;  %v19796_v23 = vld [vmem:[#allocation13 + $0x3d4] ss:$8 sps:$4 sm:$0xff]  }
 0xcf9   : > { %15771 = vmatprep.subr.bf16.mxu1 %v19733_v62  ;;  %v19794_v62 = vld [vmem:[#allocation13 + $0x3d0] ss:$8 sps:$4 sm:$0xff]  }
 0xcfc   : > { %15772 = vmatpush1.bf16.msra.mxu1 %v19731_v50  ;;  %v14856_v50 = vrot.slane %v24162_v61, %v14855_v15  ;;  %v19817_v61 = vld [vmem:[#allocation16 + $0x78] sm:$0xff]  }
 0xcfd   : > { %15773 = vmatprep.subr.bf16.mxu1 %v19736_v53  ;;  %v19799_v53 = vld [vmem:[#allocation13 + $0x3e4] ss:$8 sps:$4 sm:$0xff]  }
 0xd00   : > { %15774 = vmatpush1.bf16.msra.mxu1 %v19734_v54  ;;  %v19797_v54 = vld [vmem:[#allocation13 + $0x3e0] ss:$8 sps:$4 sm:$0xff]  }
 0xd01   : > { %15775 = vmatprep.subr.bf16.mxu1 %v19739_v24 }
 0xd04   : > { %15776 = vmatpush1.bf16.msra.mxu1 %v19737_v31  ;;  %v19802_v31 = vld [vmem:[#allocation13 + $0x3f4] ss:$8 sps:$4 sm:$0xff]  }
 0xd05   : > { %15777 = vmatprep.subr.bf16.mxu1 %v19742_v60  ;;  %v19800_v60 = vld [vmem:[#allocation13 + $0x3f0] ss:$8 sps:$4 sm:$0xff]  }
 0xd08   : > { %15778 = vmatpush1.bf16.msra.mxu1 %v19740_v16 }
 0xd09   : > { %15779 = vmatprep.subr.bf16.mxu1 %v19745_v17  ;;  %v19815_v17 = vld [vmem:[#allocation16 + $0x70] sm:$0xff]  }
 0xd0a   : > { %17733 = vmatprep.subr.bf16.mxu0 %v19815_v17 }
 0xd0c   : > { %15780 = vmatpush1.bf16.msra.mxu1 %v19743_v59  ;;  %v19816_v59 = vld [vmem:[#allocation16 + $0x30] sm:$0xff]  }
 0xd0d   : > { %15781 = vmatprep.subr.bf16.mxu1 %v19748_v30  ;;  %17734 = vmatpush3.bf16.msra.mxu0 %v19816_v59  ;;  %v19818_v30 = vld [vmem:[#allocation16 + $0x38] sm:$0xff]  }
 0xd0e   : > { %17735 = vmatprep.subr.bf16.mxu0 %v19817_v61 }
 0xd10   : > { %15782 = vmatpush1.bf16.msra.mxu1 %v19746_v41  ;;  %v14812_v44 = vpop.f32.mrb[124].mxu0  ;;  %v15021_v41 = vld [vmem:[#allocation14] sm:$0x3] }
 0xd11   : > { %v24214_v34 = vadd.f32 %v14812_v44, %v24194_v4  ;;  %v14814_v52 = vpop.f32.mrb[125].mxu0  ;;  %15783 = vmatprep.subr.bf16.mxu1 %v19751_v1  ;;  %v19760_v4 = vld [vmem:[#allocation13 + $0x314] ss:$8 sps:$4 sm:$0xff]   ;;  %17736 = vmatpush3.bf16.msra.mxu0 %v19818_v30  ;;  %v15026_v28 = vrot.slane %v15021_v41, %v24992_v36  ;;  %v15030_v2 = vrot.slane %v15021_v41, %v24993_v33  ;;  %v17700_v36 = vld [vmem:[#allocation17] ss:$0 sm:$0xff] }
 0xd12   : > { %v14826_v35 = vadd.f32 %v14814_v52, %v24197_v19  ;;  %v14816_v48 = vpop.f32.mrb[126].mxu0  ;;  %v19763_v19 = vld [vmem:[#allocation13 + $0x324] ss:$8 sps:$4 sm:$0xff]  }
 0xd13   : > { %v14817_v46 = vpop.f32.mrb[127].mxu0  ;;  %v14875_v24 = vadd.f32 %v14856_v50, %v24214_v34 }
 0xd14   : > { %v14876_v63 = vadd.f32 %v14860_v49, %v14826_v35  ;;  %15784 = vmatpush1.bf16.msra.mxu1 %v19749_v57 }
 0xd15   : > { %15785 = vmatprep.subr.bf16.mxu1 %v19754_v56  ;;  %v14883_v16 = vmax.f32 %v14875_v24, 0.0 }
 0xd16   : > { %v14884_v5 = vmax.f32 %v14876_v63, 0.0 }
 0xd17   : > { %v14891_v11 = vpack.c.bf16 %v14883_v16, %v14883_v16 }
 0xd18   : > { %v14892_v51 = vpack.c.bf16 %v14884_v5, %v14884_v5  ;;  %15786 = vmatpush1.bf16.msra.mxu1 %v19752_v47 }
 0xd19   : > { %15796 = vmatprep.subr.bf16.mxu1 %v19757_v42 }
 0xd1b   : > { %15788 = vmatmul.mubr.bf16.vlgmr.msra.gmra.mrb[124].mxu1 %v14889_v14 }
 0xd1c   : > { %15797 = vmatpush1.bf16.msra.mxu1 %v19755_v25  ;;  %15828 = vmatprep.mubr.bf16.mxu1 %v14892_v51 }
 0xd1d   : > { %15798 = vmatprep.subr.bf16.mxu1 %v19760_v4 }
 0xd20   : > { %15799 = vmatpush1.bf16.msra.mxu1 %v19758_v7 }
 0xd21   : > { %15800 = vmatprep.subr.bf16.mxu1 %v19763_v19 }
 0xd24   : > { %15801 = vmatpush1.bf16.msra.mxu1 %v19761_v45 }
 0xd25   : > { %15802 = vmatprep.subr.bf16.mxu1 %v19766_v20 }
 0xd28   : > { %15803 = vmatpush1.bf16.msra.mxu1 %v19764_v9 }
 0xd29   : > { %15804 = vmatprep.subr.bf16.mxu1 %v19769_v21 }
 0xd2c   : > { %15805 = vmatpush1.bf16.msra.mxu1 %v19767_v10 }
 0xd2d   : > { %15806 = vmatprep.subr.bf16.mxu1 %v19772_v38 }
 0xd30   : > { %15807 = vmatpush1.bf16.msra.mxu1 %v19770_v3 }
 0xd31   : > { %15808 = vmatprep.subr.bf16.mxu1 %v19775_v37 }
 0xd34   : > { %15809 = vmatpush1.bf16.msra.mxu1 %v19773_v29 }
 0xd35   : > { %15810 = vmatprep.subr.bf16.mxu1 %v19778_v27 }
 0xd38   : > { %15811 = vmatpush1.bf16.msra.mxu1 %v19776_v13 }
 0xd39   : > { %15812 = vmatprep.subr.bf16.mxu1 %v19781_v26 }
 0xd3c   : > { %15813 = vmatpush1.bf16.msra.mxu1 %v19779_v58 }
 0xd3d   : > { %15814 = vmatprep.subr.bf16.mxu1 %v19784_v18 }
 0xd40   : > { %15815 = vmatpush1.bf16.msra.mxu1 %v19782_v6 }
 0xd41   : > { %15816 = vmatprep.subr.bf16.mxu1 %v19787_v22 }
 0xd44   : > { %15817 = vmatpush1.bf16.msra.mxu1 %v19785_v40 }
 0xd45   : > { %15818 = vmatprep.subr.bf16.mxu1 %v19790_v32 }
 0xd48   : > { %15819 = vmatpush1.bf16.msra.mxu1 %v19788_v55 }
 0xd49   : > { %15820 = vmatprep.subr.bf16.mxu1 %v19793_v0 }
 0xd4c   : > { %15821 = vmatpush1.bf16.msra.mxu1 %v19791_v43 }
 0xd4d   : > { %15822 = vmatprep.subr.bf16.mxu1 %v19796_v23 }
 0xd50   : > { %15823 = vmatpush1.bf16.msra.mxu1 %v19794_v62 }
 0xd51   : > { %15824 = vmatprep.subr.bf16.mxu1 %v19799_v53 }
 0xd54   : > { %15825 = vmatpush1.bf16.msra.mxu1 %v19797_v54 }
 0xd55   : > { %15826 = vmatprep.subr.bf16.mxu1 %v19802_v31 }
 0xd58   : > { %15827 = vmatpush1.bf16.msra.mxu1 %v19800_v60 }
 0xd5b   : > { %15829 = vmatmul.mubr.bf16.vlgmr.msra.gmra.mrb[124].mxu1 %v14891_v11 }
 0xe2e   : > { %v15830_v12 = vpop.f32.mrb[124].mxu1 }
 0xe2f   : > { %v17759_v1 = vadd.f32 %v15830_v12, %v15026_v28  ;;  %v15832_v44 = vpop.f32.mrb[125].mxu1 }
 0xe30   : > { %v17760_v49 = vadd.f32 %v15832_v44, %v15030_v2  ;;  %v15834_v57 = vpop.f32.mrb[126].mxu1 }
 0xe31   : > { %v15837_v39 = vmax.f32 %v17759_v1, 0.0  ;;  %v15835_v34 = vpop.f32.mrb[127].mxu1 }
 0xe32   : > { %v15838_v52 = vmax.f32 %v17760_v49, 0.0 }
 0xe33   : > { %v15839_v35 = vpack.c.bf16 %v15837_v39, %v15837_v39 }
 0xe34   : > { %v15840_v56 = vpack.c.bf16 %v15838_v52, %v15838_v52 }
 0xe36   : > { %16008 = vmatprep.mubr.bf16.mxu0 %v15840_v56 }
 0xe37   : > { %16009 = vmatmul.mubr.bf16.vlgmr.msra.gmra.mrb[128].mxu0 %v15839_v35 }
 0xf0a   : > { %v17737_v48 = vpop.f32.mrb[128].mxu0 }
 0xf0b   : > { %v17738_v46 = vpop.f32.mrb[129].mxu0 }
 0xf0c   : > { %v17739_v33 = vadd.f32 %v17738_v46, %v17737_v48  ;;  %v17740_v63 = vpop.f32.mrb[130].mxu0 }
 0xf0d   : > { %v17741_v47 = vpop.f32.mrb[131].mxu0 }
 0xf0e   : > { %v16011_v8 = vadd.f32 %v17739_v33, %v17700_v36 }
 0xf10   : > { %16016 = vst [vmem:[%s515_s12] sm:$0xff] %v16011_v8 }
 0xf11   : > { %20315 = shalt.err (!%p20312_p10)
}
 0xf12   : > { %s20316_s29 = scalar_lea.hbm %s24227_s25, 128  ;;  %s20320_s17 = scalar_lea.hbm %s24280_s11, 256 }
 0xf13   : > { %p20317_p2 = scmp.ne.s32.totalorder %s24227_s25, %s20316_s29  ;;  %p20321_p7 = scmp.lt.u32.totalorder %s24227_s25, %s24280_s11 }
 0xf14   : > { %p20322_p8 = scmp.lt.u32.totalorder %s20320_s17, %s20316_s29  ;;  %p20324_p13 = scmp.lt.u32.totalorder %s20316_s29, %s24227_s25 }
 0xf15   : > { %p20318_p3 = pnand %p20317_p2, %p24997_p1 }
 0xf16   : > { %p20323_p11 = por %p20322_p8, %p20321_p7 }
 0xf17   : > { %p20319_p4 = pneg %p20318_p3 }
 0xf18   : > { %p20325_p0 = por %p20324_p13, %p20323_p11 }
 0xf1a   : > { %p20326_p6 = pnand %p20325_p0, %p20319_p4 }
 0xf1c   : > { %20329 = shalt.err (!%p20326_p6)
}
 0xf1d   : > { %18666 = dma.vmem_to_hbm [thread:$0]  (%p24997_p1), %s24229_s23, 128, %s24227_s25, %s16018_s30  }
 0xf1e PF: > { %s24998_s24 = sld [smem:[#allocation27_spill]]  ;;  %s24999_s14 = sld [smem:[#allocation31_spill]] }
 0xf1f   : > { %p18723_p5 = scmp.ge.s32.totalorder %s20388_s20, 2 }
 0xf24   : > { %s16043_s12 = sand.u32 1, %s24998_s24   ;;  %p25000_p9 = scmp.ne.s32.totalorder %s24999_s14, 0 }
 0xf25   : > { %s16044_s26 = scalar_lea.sflag [#allocation4], %s16043_s12 }
 0xf26   : > { %p18700_p12 = pnand %p18723_p5, %p25000_p9 }
 0xf28   : > { %20371 = dma.done.wait (!%p18700_p12), %s16044_s26, 128  }
 0xf29   : > { %20373 = vsyncadd (!%p18700_p12), %s16044_s26, 4294967168  ;;  %s25001_s20 = sld [smem:[#allocation29_spill]]  ;;  %s25002_s2 = sld [smem:[#allocation28_spill]] }
 0xf2a   : > { %s25003_s19 = sld [smem:[#allocation30_spill]]  ;;  %s25004_s17 = smov %s20380_s18 }
 0xf2f   : > { %p27_p10 = scmp.ge.s32.totalorder %s25001_s20, 4   ;;  %s25005_s18 = smov %s25002_s2 }
 0xf31   :  { %29 = sbr.rel (!%p27_p10) target bundleno = 12 (0xc), region = 155 }
 0xf38   :  { %16049 = vsyncpa [#allocation3], 1 }
 0xf39   :  { %16051 = vsyncpa [#allocation3 + $0x1], 1 }
 0xf3a   :  { %16052 = vsyncpa [#allocation6], 1 }
 0xf3b   :  { %16053 = vsyncpa [#allocation9], 1 }
 0xf3c   :  { %16054 = vsyncpa [#allocation12], 1 }
 0xf3d   :  { %16055 = vsyncpa [#allocation15], 1 }
 0xf3e   :  { %16056 = vsyncpa [#allocation18], 1 }
 0xf3f   :  { %16057 = vsyncpa [#allocation4], 1 }
 0xf40   :  { %16059 = vsyncpa [#allocation4 + $0x1], 1 }

</bundles_post_ra>
